<compile_context>
chip_gen: v7x
topology: tpu7x:2x2x1
jax: 0.10.0
libtpu: 0.0.40
codegen_flags: <defaults>
</compile_context>

<pallas_src>
import numpy as np

import jax
import jax.numpy as jnp
from jax import lax
from jax.experimental import pallas as pl
from jax.experimental.pallas import tpu as pltpu


# ----------------------------------------------------------------------
# Fully fused Pallas kernel: one grid step == one image.
# ----------------------------------------------------------------------
def _escnn_fused_kernel(p1_ref, w1_ref, s2_ref, w2_ref, s3_ref, w3_ref,
                        fc1_ref, fc2_ref, o_ref):
    f32 = jnp.float32
    bf16 = jnp.bfloat16

    # ---- conv1: pre-built patches (400, 256) @ (256, 32) -> relu ----------
    a1 = jnp.dot(p1_ref[0], w1_ref[...], preferred_element_type=f32)
    a1 = jnp.maximum(a1, 0.0).astype(bf16)                      # (400, 32)

    # ---- conv2: sum_ij (S2_ij @ a1) @ W2_ij, f32 accumulation --------------
    # S2_ij is a 0/1 row-selection matrix => (S2_ij @ a1) is the exact
    # (81, 32) patch slice for kernel position ij (no strided gather needed).
    n2_pos, p2 = s2_ref.shape[0], s2_ref.shape[1]
    n2 = w2_ref.shape[2]
    acc2 = jnp.zeros((p2, n2), f32)
    for ij in range(n2_pos):
        rows = jnp.dot(s2_ref[ij], a1, preferred_element_type=f32).astype(bf16)
        acc2 = acc2 + jnp.dot(rows, w2_ref[ij], preferred_element_type=f32)
    a2 = jnp.maximum(acc2, 0.0).astype(bf16)                    # (81, 64)

    # ---- conv3: same scheme -------------------------------------------------
    n3_pos, p3 = s3_ref.shape[0], s3_ref.shape[1]
    n3 = w3_ref.shape[2]
    acc3 = jnp.zeros((p3, n3), f32)
    for ij in range(n3_pos):
        rows = jnp.dot(s3_ref[ij], a2, preferred_element_type=f32).astype(bf16)
        acc3 = acc3 + jnp.dot(rows, w3_ref[ij], preferred_element_type=f32)
    a3 = jnp.maximum(acc3, 0.0)                                 # (49, 32) f32

    # ---- flatten in HWC order: lane-concat of the 49 spatial rows ----------
    flat = jnp.concatenate([a3[p:p + 1, :] for p in range(p3)], axis=1)
    flat = flat.astype(bf16)                                    # (1, 1568)

    # ---- fc1 -> ReLU -> fc2 -> log_softmax ---------------------------------
    h = jnp.dot(flat, fc1_ref[...], preferred_element_type=f32)
    h = jnp.maximum(h, 0.0).astype(bf16)                        # (1, hidden)
    logits = jnp.dot(h, fc2_ref[...], preferred_element_type=f32)  # (1, A)
    m = jnp.max(logits, axis=-1, keepdims=True)
    shifted = logits - m
    lse = jnp.log(jnp.sum(jnp.exp(shifted), axis=-1, keepdims=True))
    o_ref[0] = (shifted - lse).astype(o_ref.dtype)              # (1, A)


# ----------------------------------------------------------------------
# conv1 im2col (XLA glue, fused with the NCHW->NHWC transpose + bf16 cast)
# ----------------------------------------------------------------------
def _conv1_patches(observations, kh=8, kw=8, stride=4):
    """(B, C, 84, 84) f32 NCHW -> (B, 400, kh*kw*C) bf16 patches.

    Patch column order is (kh, kw, C) and patch rows are raster (h*20 + w),
    matching the prepared conv1 weight and the conv2 selection matrices.
    """
    # TODO(synk): fold this gather (and the layout change) into the fused
    # Pallas kernel with manual element-offset DMA so the patch tensor never
    # materializes in HBM.
    x = observations.transpose(0, 2, 3, 1).astype(jnp.bfloat16)   # (B,84,84,C)
    b, h, w, c = x.shape
    oh = (h - kh) // stride + 1
    ow = (w - kw) // stride + 1
    cols = []
    for i in range(kh):
        for j in range(kw):
            cols.append(
                x[:, i:i + stride * oh:stride, j:j + stride * ow:stride, :])
    patches = jnp.concatenate(cols, axis=-1)          # (B, OH, OW, kh*kw*C)
    return patches.reshape(b, oh * ow, kh * kw * c)


# ----------------------------------------------------------------------
# Parameters (PyTorch layout) + one-time layout/dtype preparation
# ----------------------------------------------------------------------
def init_escnn_params(key, channel_count, hidden_size, action_size):
    """Parameters in the PyTorch layouts of the reference module."""
    k1, k2, k3, k4, k5 = jax.random.split(key, 5)
    scale = 0.05
    return {
        "conv1_w": scale * jax.random.normal(k1, (32, channel_count, 8, 8), jnp.float32),
        "conv2_w": scale * jax.random.normal(k2, (64, 32, 4, 4), jnp.float32),
        "conv3_w": scale * jax.random.normal(k3, (32, 64, 3, 3), jnp.float32),
        "fc1_w": scale * jax.random.normal(k4, (hidden_size, 32 * 7 * 7), jnp.float32),
        "fc2_w": scale * jax.random.normal(k5, (action_size, hidden_size), jnp.float32),
    }


def _selection_matrices(in_h, in_w, kh, kw, stride, dtype=jnp.bfloat16):
    """0/1 row-selection matrices for in-kernel im2col.

    Returns (kh*kw, OH*OW, in_h*in_w) with
      S[i*kw+j, oh*OW+ow, (oh*stride+i)*in_w + (ow*stride+j)] = 1.
    """
    oh = (in_h - kh) // stride + 1
    ow = (in_w - kw) // stride + 1
    s = np.zeros((kh * kw, oh * ow, in_h * in_w), np.float32)
    for i in range(kh):
        for j in range(kw):
            for a in range(oh):
                for b in range(ow):
                    s[i * kw + j, a * ow + b,
                      (a * stride + i) * in_w + (b * stride + j)] = 1.0
    return jnp.asarray(s, dtype)


def prepare_params(params, dtype=jnp.bfloat16):
    """One-time (outside jit) weight relayout, bf16 cast and selection setup.

    * conv1 weight (32, C, 8, 8) -> (8*8*C, 32), matching the (kh, kw, C)
      patch-column order of _conv1_patches.
    * conv2/conv3 weights -> per-kernel-position slices (kh*kw, C_in, C_out).
    * fc1 columns permuted from NCHW flatten (c*49 + h*7 + w) to HWC flatten
      (h*7*32 + w*32 + c) and transposed to (1568, hidden); fc2 transposed.
    * S2/S3: constant 0/1 selection matrices for in-kernel conv2/conv3 im2col.
    """
    out_ch1, c1, kh1, kw1 = params["conv1_w"].shape
    conv1 = params["conv1_w"].transpose(2, 3, 1, 0).reshape(kh1 * kw1 * c1, out_ch1)

    def conv_pos(w):                      # (out, in, kh, kw) -> (kh*kw, in, out)
        out_ch, c, kh, kw = w.shape
        return w.transpose(2, 3, 1, 0).reshape(kh * kw, c, out_ch)

    hidden = params["fc1_w"].shape[0]
    # The module hard-codes a (32, 7, 7) conv output before flattening.
    assert params["fc1_w"].shape[1] == 32 * 7 * 7
    fc1 = params["fc1_w"].reshape(hidden, 32, 7, 7)
    fc1 = fc1.transpose(2, 3, 1, 0).reshape(7 * 7 * 32, hidden)

    return {
        "conv1_w": conv1.astype(dtype),
        "conv2_w": conv_pos(params["conv2_w"]).astype(dtype),   # (16, 32, 64)
        "conv3_w": conv_pos(params["conv3_w"]).astype(dtype),   # (9, 64, 32)
        "fc1_w": fc1.astype(dtype),                             # (1568, hidden)
        "fc2_w": params["fc2_w"].T.astype(dtype),               # (hidden, A)
        "s2": _selection_matrices(20, 20, 4, 4, 2, dtype),      # (16, 81, 400)
        "s3": _selection_matrices(9, 9, 3, 3, 1, dtype),        # (9, 49, 81)
    }


# ----------------------------------------------------------------------
# ESCNN forward: one fused pallas_call, grid over batch.
# ----------------------------------------------------------------------
@jax.jit
def escnn_forward(prepared, observations):
    """observations: (B, C, 84, 84) float32 -> (B, action_size) log-probs."""
    b, _, h, w = observations.shape
    assert (h, w) == (84, 84), "ESCNN hard-codes 32*7*7 conv output (84x84 input)"

    patches1 = _conv1_patches(observations)            # (B, 400, 8*8*C) bf16
    p1, k1 = patches1.shape[1], patches1.shape[2]
    a_size = prepared["fc2_w"].shape[1]

    out = pl.pallas_call(
        _escnn_fused_kernel,
        out_shape=jax.ShapeDtypeStruct((b, 1, a_size), jnp.float32),
        grid=(b,),
        in_specs=[
            pl.BlockSpec((1, p1, k1), lambda i: (i, 0, 0)),             # patches
            pl.BlockSpec(prepared["conv1_w"].shape, lambda i: (0, 0)),   # resident
            pl.BlockSpec(prepared["s2"].shape, lambda i: (0, 0, 0)),
            pl.BlockSpec(prepared["conv2_w"].shape, lambda i: (0, 0, 0)),
            pl.BlockSpec(prepared["s3"].shape, lambda i: (0, 0, 0)),
            pl.BlockSpec(prepared["conv3_w"].shape, lambda i: (0, 0, 0)),
            pl.BlockSpec(prepared["fc1_w"].shape, lambda i: (0, 0)),
            pl.BlockSpec(prepared["fc2_w"].shape, lambda i: (0, 0)),
        ],
        out_specs=pl.BlockSpec((1, 1, a_size), lambda i: (i, 0, 0)),
        compiler_params=pltpu.CompilerParams(
            dimension_semantics=("parallel",)),
    )(patches1, prepared["conv1_w"], prepared["s2"], prepared["conv2_w"],
      prepared["s3"], prepared["conv3_w"], prepared["fc1_w"], prepared["fc2_w"])

    return out.reshape(b, a_size)


# ----------------------------------------------------------------------
# Pure-JAX reference (f32, PyTorch-layout weights) for a sanity check
# ----------------------------------------------------------------------
def _reference_forward(params, observations):
    dn = ("NCHW", "OIHW", "NCHW")
    x = jax.nn.relu(lax.conv_general_dilated(
        observations, params["conv1_w"], (4, 4), "VALID", dimension_numbers=dn))
    x = jax.nn.relu(lax.conv_general_dilated(
        x, params["conv2_w"], (2, 2), "VALID", dimension_numbers=dn))
    x = jax.nn.relu(lax.conv_general_dilated(
        x, params["conv3_w"], (1, 1), "VALID", dimension_numbers=dn))
    flat = x.reshape(observations.shape[0], -1)
    h = jax.nn.relu(flat @ params["fc1_w"].T)
    logits = h @ params["fc2_w"].T
    return jax.nn.log_softmax(logits, axis=1)


# ----------------------------------------------------------------------
# Main
# ----------------------------------------------------------------------
if __name__ == "__main__":
    key = jax.random.PRNGKey(0)
    k_obs, k_params = jax.random.split(key)

    batch = 2
    channel_count = 4
    hidden_size = 32
    action_size = 6
    # The module hard-codes 32*7*7 after the conv stack -> 84x84 spatial input.
    observations = jax.random.normal(
        k_obs, (batch, channel_count, 84, 84), jnp.float32)

    params = init_escnn_params(k_params, channel_count, hidden_size, action_size)
    prepared = prepare_params(params)     # one-time layout / dtype prep, outside jit

    out = escnn_forward(prepared, observations)
    out = jax.block_until_ready(out)

    assert out.shape == (batch, action_size)
    # log_softmax rows should exponentiate-sum to ~1 (computed in f32).
    assert jnp.allclose(jnp.sum(jnp.exp(out), axis=1), 1.0, atol=1e-4)

    # Compare against a pure-JAX f32 reference (bf16 kernel => loose tol,
    # intentional: bf16 weights/activations with f32 MXU accumulation).
    ref = _reference_forward(params, observations)
    max_err = float(jnp.max(jnp.abs(out - ref)))
    assert jnp.allclose(out, ref, atol=0.1, rtol=0.0), max_err

    print("KERNEL_OK")
</pallas_src>

<mosaic_0001>
module attributes {stable_mosaic.version = 11 : i64} {
  func.func @_escnn_fused_kernel(%arg0: i32, %arg1: memref<1x400x256xbf16, #tpu.memory_space<vmem>>, %arg2: memref<256x32xbf16, #tpu.memory_space<vmem>>, %arg3: memref<16x81x400xbf16, #tpu.memory_space<vmem>>, %arg4: memref<16x32x64xbf16, #tpu.memory_space<vmem>>, %arg5: memref<9x49x81xbf16, #tpu.memory_space<vmem>>, %arg6: memref<9x64x32xbf16, #tpu.memory_space<vmem>>, %arg7: memref<1568x32xbf16, #tpu.memory_space<vmem>>, %arg8: memref<32x6xbf16, #tpu.memory_space<vmem>>, %arg9: memref<1x1x6xf32, #tpu.memory_space<vmem>>) attributes {dimension_semantics = [#tpu.dimension_semantics<parallel>], iteration_bounds = array<i64: 2>, scalar_prefetch = 0 : i64, scratch_operands = 0 : i64, tpu.core_type = #tpu.core_type<tc>, window_params = [{transform_indices = @transform_0, window_bounds = array<i64: 1, 400, 256>}, {pipeline_mode = #tpu.pipeline_mode<synchronous>, transform_indices = @transform_1, window_bounds = array<i64: 256, 32>}, {pipeline_mode = #tpu.pipeline_mode<synchronous>, transform_indices = @transform_2, window_bounds = array<i64: 16, 81, 400>}, {pipeline_mode = #tpu.pipeline_mode<synchronous>, transform_indices = @transform_3, window_bounds = array<i64: 16, 32, 64>}, {pipeline_mode = #tpu.pipeline_mode<synchronous>, transform_indices = @transform_4, window_bounds = array<i64: 9, 49, 81>}, {pipeline_mode = #tpu.pipeline_mode<synchronous>, transform_indices = @transform_5, window_bounds = array<i64: 9, 64, 32>}, {pipeline_mode = #tpu.pipeline_mode<synchronous>, transform_indices = @transform_6, window_bounds = array<i64: 1568, 32>}, {pipeline_mode = #tpu.pipeline_mode<synchronous>, transform_indices = @transform_7, window_bounds = array<i64: 32, 6>}, {transform_indices = @transform_8, window_bounds = array<i64: 1, 1, 6>}]} {
    %c0 = arith.constant 0 : index
    %c0_0 = arith.constant 0 : index
    %c0_1 = arith.constant 0 : index
    %0 = vector.load %arg1[%c0, %c0_0, %c0_1] : memref<1x400x256xbf16, #tpu.memory_space<vmem>>, vector<1x400x256xbf16>
    %1 = vector.shape_cast %0 : vector<1x400x256xbf16> to vector<400x256xbf16>
    %c0_2 = arith.constant 0 : index
    %c0_3 = arith.constant 0 : index
    %2 = vector.load %arg2[%c0_2, %c0_3] : memref<256x32xbf16, #tpu.memory_space<vmem>>, vector<256x32xbf16>
    %cst = arith.constant dense<0.000000e+00> : vector<400x32xf32>
    %3 = tpu.matmul %1, %2, %cst {dimension_numbers = #tpu.dot_dimension_numbers<[1], [0], [0], [1], [0, 0, 1, 1], [], []>} : vector<400x256xbf16>, vector<256x32xbf16>, vector<400x32xf32> -> vector<400x32xf32>
    %cst_4 = arith.constant 0.000000e+00 : f32
    %4 = vector.broadcast %cst_4 : f32 to vector<400x32xf32>
    %5 = arith.maximumf %3, %4 : vector<400x32xf32>
    %6 = arith.truncf %5 : vector<400x32xf32> to vector<400x32xbf16>
    %cst_5 = arith.constant 0.000000e+00 : f32
    %7 = vector.broadcast %cst_5 : f32 to vector<81x64xf32>
    %c0_6 = arith.constant 0 : index
    %c0_7 = arith.constant 0 : index
    %c0_8 = arith.constant 0 : index
    %8 = vector.load %arg3[%c0_6, %c0_7, %c0_8] : memref<16x81x400xbf16, #tpu.memory_space<vmem>>, vector<1x81x400xbf16>
    %9 = vector.shape_cast %8 : vector<1x81x400xbf16> to vector<81x400xbf16>
    %cst_9 = arith.constant dense<0.000000e+00> : vector<81x32xf32>
    %10 = tpu.matmul %9, %6, %cst_9 {dimension_numbers = #tpu.dot_dimension_numbers<[1], [0], [0], [1], [0, 0, 1, 1], [], []>} : vector<81x400xbf16>, vector<400x32xbf16>, vector<81x32xf32> -> vector<81x32xf32>
    %11 = arith.truncf %10 : vector<81x32xf32> to vector<81x32xbf16>
    %c0_10 = arith.constant 0 : index
    %c0_11 = arith.constant 0 : index
    %c0_12 = arith.constant 0 : index
    %12 = vector.load %arg4[%c0_10, %c0_11, %c0_12] : memref<16x32x64xbf16, #tpu.memory_space<vmem>>, vector<1x32x64xbf16>
    %13 = vector.shape_cast %12 : vector<1x32x64xbf16> to vector<32x64xbf16>
    %cst_13 = arith.constant dense<0.000000e+00> : vector<81x64xf32>
    %14 = tpu.matmul %11, %13, %cst_13 {dimension_numbers = #tpu.dot_dimension_numbers<[1], [0], [0], [1], [0, 0, 1, 1], [], []>} : vector<81x32xbf16>, vector<32x64xbf16>, vector<81x64xf32> -> vector<81x64xf32>
    %15 = arith.addf %7, %14 : vector<81x64xf32>
    %c1 = arith.constant 1 : index
    %c0_14 = arith.constant 0 : index
    %c0_15 = arith.constant 0 : index
    %16 = vector.load %arg3[%c1, %c0_14, %c0_15] : memref<16x81x400xbf16, #tpu.memory_space<vmem>>, vector<1x81x400xbf16>
    %17 = vector.shape_cast %16 : vector<1x81x400xbf16> to vector<81x400xbf16>
    %cst_16 = arith.constant dense<0.000000e+00> : vector<81x32xf32>
    %18 = tpu.matmul %17, %6, %cst_16 {dimension_numbers = #tpu.dot_dimension_numbers<[1], [0], [0], [1], [0, 0, 1, 1], [], []>} : vector<81x400xbf16>, vector<400x32xbf16>, vector<81x32xf32> -> vector<81x32xf32>
    %19 = arith.truncf %18 : vector<81x32xf32> to vector<81x32xbf16>
    %c1_17 = arith.constant 1 : index
    %c0_18 = arith.constant 0 : index
    %c0_19 = arith.constant 0 : index
    %20 = vector.load %arg4[%c1_17, %c0_18, %c0_19] : memref<16x32x64xbf16, #tpu.memory_space<vmem>>, vector<1x32x64xbf16>
    %21 = vector.shape_cast %20 : vector<1x32x64xbf16> to vector<32x64xbf16>
    %cst_20 = arith.constant dense<0.000000e+00> : vector<81x64xf32>
    %22 = tpu.matmul %19, %21, %cst_20 {dimension_numbers = #tpu.dot_dimension_numbers<[1], [0], [0], [1], [0, 0, 1, 1], [], []>} : vector<81x32xbf16>, vector<32x64xbf16>, vector<81x64xf32> -> vector<81x64xf32>
    %23 = arith.addf %15, %22 : vector<81x64xf32>
    %c2 = arith.constant 2 : index
    %c0_21 = arith.constant 0 : index
    %c0_22 = arith.constant 0 : index
    %24 = vector.load %arg3[%c2, %c0_21, %c0_22] : memref<16x81x400xbf16, #tpu.memory_space<vmem>>, vector<1x81x400xbf16>
    %25 = vector.shape_cast %24 : vector<1x81x400xbf16> to vector<81x400xbf16>
    %cst_23 = arith.constant dense<0.000000e+00> : vector<81x32xf32>
    %26 = tpu.matmul %25, %6, %cst_23 {dimension_numbers = #tpu.dot_dimension_numbers<[1], [0], [0], [1], [0, 0, 1, 1], [], []>} : vector<81x400xbf16>, vector<400x32xbf16>, vector<81x32xf32> -> vector<81x32xf32>
    %27 = arith.truncf %26 : vector<81x32xf32> to vector<81x32xbf16>
    %c2_24 = arith.constant 2 : index
    %c0_25 = arith.constant 0 : index
    %c0_26 = arith.constant 0 : index
    %28 = vector.load %arg4[%c2_24, %c0_25, %c0_26] : memref<16x32x64xbf16, #tpu.memory_space<vmem>>, vector<1x32x64xbf16>
    %29 = vector.shape_cast %28 : vector<1x32x64xbf16> to vector<32x64xbf16>
    %cst_27 = arith.constant dense<0.000000e+00> : vector<81x64xf32>
    %30 = tpu.matmul %27, %29, %cst_27 {dimension_numbers = #tpu.dot_dimension_numbers<[1], [0], [0], [1], [0, 0, 1, 1], [], []>} : vector<81x32xbf16>, vector<32x64xbf16>, vector<81x64xf32> -> vector<81x64xf32>
    %31 = arith.addf %23, %30 : vector<81x64xf32>
    %c3 = arith.constant 3 : index
    %c0_28 = arith.constant 0 : index
    %c0_29 = arith.constant 0 : index
    %32 = vector.load %arg3[%c3, %c0_28, %c0_29] : memref<16x81x400xbf16, #tpu.memory_space<vmem>>, vector<1x81x400xbf16>
    %33 = vector.shape_cast %32 : vector<1x81x400xbf16> to vector<81x400xbf16>
    %cst_30 = arith.constant dense<0.000000e+00> : vector<81x32xf32>
    %34 = tpu.matmul %33, %6, %cst_30 {dimension_numbers = #tpu.dot_dimension_numbers<[1], [0], [0], [1], [0, 0, 1, 1], [], []>} : vector<81x400xbf16>, vector<400x32xbf16>, vector<81x32xf32> -> vector<81x32xf32>
    %35 = arith.truncf %34 : vector<81x32xf32> to vector<81x32xbf16>
    %c3_31 = arith.constant 3 : index
    %c0_32 = arith.constant 0 : index
    %c0_33 = arith.constant 0 : index
    %36 = vector.load %arg4[%c3_31, %c0_32, %c0_33] : memref<16x32x64xbf16, #tpu.memory_space<vmem>>, vector<1x32x64xbf16>
    %37 = vector.shape_cast %36 : vector<1x32x64xbf16> to vector<32x64xbf16>
    %cst_34 = arith.constant dense<0.000000e+00> : vector<81x64xf32>
    %38 = tpu.matmul %35, %37, %cst_34 {dimension_numbers = #tpu.dot_dimension_numbers<[1], [0], [0], [1], [0, 0, 1, 1], [], []>} : vector<81x32xbf16>, vector<32x64xbf16>, vector<81x64xf32> -> vector<81x64xf32>
    %39 = arith.addf %31, %38 : vector<81x64xf32>
    %c4 = arith.constant 4 : index
    %c0_35 = arith.constant 0 : index
    %c0_36 = arith.constant 0 : index
    %40 = vector.load %arg3[%c4, %c0_35, %c0_36] : memref<16x81x400xbf16, #tpu.memory_space<vmem>>, vector<1x81x400xbf16>
    %41 = vector.shape_cast %40 : vector<1x81x400xbf16> to vector<81x400xbf16>
    %cst_37 = arith.constant dense<0.000000e+00> : vector<81x32xf32>
    %42 = tpu.matmul %41, %6, %cst_37 {dimension_numbers = #tpu.dot_dimension_numbers<[1], [0], [0], [1], [0, 0, 1, 1], [], []>} : vector<81x400xbf16>, vector<400x32xbf16>, vector<81x32xf32> -> vector<81x32xf32>
    %43 = arith.truncf %42 : vector<81x32xf32> to vector<81x32xbf16>
    %c4_38 = arith.constant 4 : index
    %c0_39 = arith.constant 0 : index
    %c0_40 = arith.constant 0 : index
    %44 = vector.load %arg4[%c4_38, %c0_39, %c0_40] : memref<16x32x64xbf16, #tpu.memory_space<vmem>>, vector<1x32x64xbf16>
    %45 = vector.shape_cast %44 : vector<1x32x64xbf16> to vector<32x64xbf16>
    %cst_41 = arith.constant dense<0.000000e+00> : vector<81x64xf32>
    %46 = tpu.matmul %43, %45, %cst_41 {dimension_numbers = #tpu.dot_dimension_numbers<[1], [0], [0], [1], [0, 0, 1, 1], [], []>} : vector<81x32xbf16>, vector<32x64xbf16>, vector<81x64xf32> -> vector<81x64xf32>
    %47 = arith.addf %39, %46 : vector<81x64xf32>
    %c5 = arith.constant 5 : index
    %c0_42 = arith.constant 0 : index
    %c0_43 = arith.constant 0 : index
    %48 = vector.load %arg3[%c5, %c0_42, %c0_43] : memref<16x81x400xbf16, #tpu.memory_space<vmem>>, vector<1x81x400xbf16>
    %49 = vector.shape_cast %48 : vector<1x81x400xbf16> to vector<81x400xbf16>
    %cst_44 = arith.constant dense<0.000000e+00> : vector<81x32xf32>
    %50 = tpu.matmul %49, %6, %cst_44 {dimension_numbers = #tpu.dot_dimension_numbers<[1], [0], [0], [1], [0, 0, 1, 1], [], []>} : vector<81x400xbf16>, vector<400x32xbf16>, vector<81x32xf32> -> vector<81x32xf32>
    %51 = arith.truncf %50 : vector<81x32xf32> to vector<81x32xbf16>
    %c5_45 = arith.constant 5 : index
    %c0_46 = arith.constant 0 : index
    %c0_47 = arith.constant 0 : index
    %52 = vector.load %arg4[%c5_45, %c0_46, %c0_47] : memref<16x32x64xbf16, #tpu.memory_space<vmem>>, vector<1x32x64xbf16>
    %53 = vector.shape_cast %52 : vector<1x32x64xbf16> to vector<32x64xbf16>
    %cst_48 = arith.constant dense<0.000000e+00> : vector<81x64xf32>
    %54 = tpu.matmul %51, %53, %cst_48 {dimension_numbers = #tpu.dot_dimension_numbers<[1], [0], [0], [1], [0, 0, 1, 1], [], []>} : vector<81x32xbf16>, vector<32x64xbf16>, vector<81x64xf32> -> vector<81x64xf32>
    %55 = arith.addf %47, %54 : vector<81x64xf32>
    %c6 = arith.constant 6 : index
    %c0_49 = arith.constant 0 : index
    %c0_50 = arith.constant 0 : index
    %56 = vector.load %arg3[%c6, %c0_49, %c0_50] : memref<16x81x400xbf16, #tpu.memory_space<vmem>>, vector<1x81x400xbf16>
    %57 = vector.shape_cast %56 : vector<1x81x400xbf16> to vector<81x400xbf16>
    %cst_51 = arith.constant dense<0.000000e+00> : vector<81x32xf32>
    %58 = tpu.matmul %57, %6, %cst_51 {dimension_numbers = #tpu.dot_dimension_numbers<[1], [0], [0], [1], [0, 0, 1, 1], [], []>} : vector<81x400xbf16>, vector<400x32xbf16>, vector<81x32xf32> -> vector<81x32xf32>
    %59 = arith.truncf %58 : vector<81x32xf32> to vector<81x32xbf16>
    %c6_52 = arith.constant 6 : index
    %c0_53 = arith.constant 0 : index
    %c0_54 = arith.constant 0 : index
    %60 = vector.load %arg4[%c6_52, %c0_53, %c0_54] : memref<16x32x64xbf16, #tpu.memory_space<vmem>>, vector<1x32x64xbf16>
    %61 = vector.shape_cast %60 : vector<1x32x64xbf16> to vector<32x64xbf16>
    %cst_55 = arith.constant dense<0.000000e+00> : vector<81x64xf32>
    %62 = tpu.matmul %59, %61, %cst_55 {dimension_numbers = #tpu.dot_dimension_numbers<[1], [0], [0], [1], [0, 0, 1, 1], [], []>} : vector<81x32xbf16>, vector<32x64xbf16>, vector<81x64xf32> -> vector<81x64xf32>
    %63 = arith.addf %55, %62 : vector<81x64xf32>
    %c7 = arith.constant 7 : index
    %c0_56 = arith.constant 0 : index
    %c0_57 = arith.constant 0 : index
    %64 = vector.load %arg3[%c7, %c0_56, %c0_57] : memref<16x81x400xbf16, #tpu.memory_space<vmem>>, vector<1x81x400xbf16>
    %65 = vector.shape_cast %64 : vector<1x81x400xbf16> to vector<81x400xbf16>
    %cst_58 = arith.constant dense<0.000000e+00> : vector<81x32xf32>
    %66 = tpu.matmul %65, %6, %cst_58 {dimension_numbers = #tpu.dot_dimension_numbers<[1], [0], [0], [1], [0, 0, 1, 1], [], []>} : vector<81x400xbf16>, vector<400x32xbf16>, vector<81x32xf32> -> vector<81x32xf32>
    %67 = arith.truncf %66 : vector<81x32xf32> to vector<81x32xbf16>
    %c7_59 = arith.constant 7 : index
    %c0_60 = arith.constant 0 : index
    %c0_61 = arith.constant 0 : index
    %68 = vector.load %arg4[%c7_59, %c0_60, %c0_61] : memref<16x32x64xbf16, #tpu.memory_space<vmem>>, vector<1x32x64xbf16>
    %69 = vector.shape_cast %68 : vector<1x32x64xbf16> to vector<32x64xbf16>
    %cst_62 = arith.constant dense<0.000000e+00> : vector<81x64xf32>
    %70 = tpu.matmul %67, %69, %cst_62 {dimension_numbers = #tpu.dot_dimension_numbers<[1], [0], [0], [1], [0, 0, 1, 1], [], []>} : vector<81x32xbf16>, vector<32x64xbf16>, vector<81x64xf32> -> vector<81x64xf32>
    %71 = arith.addf %63, %70 : vector<81x64xf32>
    %c8 = arith.constant 8 : index
    %c0_63 = arith.constant 0 : index
    %c0_64 = arith.constant 0 : index
    %72 = vector.load %arg3[%c8, %c0_63, %c0_64] : memref<16x81x400xbf16, #tpu.memory_space<vmem>>, vector<1x81x400xbf16>
    %73 = vector.shape_cast %72 : vector<1x81x400xbf16> to vector<81x400xbf16>
    %cst_65 = arith.constant dense<0.000000e+00> : vector<81x32xf32>
    %74 = tpu.matmul %73, %6, %cst_65 {dimension_numbers = #tpu.dot_dimension_numbers<[1], [0], [0], [1], [0, 0, 1, 1], [], []>} : vector<81x400xbf16>, vector<400x32xbf16>, vector<81x32xf32> -> vector<81x32xf32>
    %75 = arith.truncf %74 : vector<81x32xf32> to vector<81x32xbf16>
    %c8_66 = arith.constant 8 : index
    %c0_67 = arith.constant 0 : index
    %c0_68 = arith.constant 0 : index
    %76 = vector.load %arg4[%c8_66, %c0_67, %c0_68] : memref<16x32x64xbf16, #tpu.memory_space<vmem>>, vector<1x32x64xbf16>
    %77 = vector.shape_cast %76 : vector<1x32x64xbf16> to vector<32x64xbf16>
    %cst_69 = arith.constant dense<0.000000e+00> : vector<81x64xf32>
    %78 = tpu.matmul %75, %77, %cst_69 {dimension_numbers = #tpu.dot_dimension_numbers<[1], [0], [0], [1], [0, 0, 1, 1], [], []>} : vector<81x32xbf16>, vector<32x64xbf16>, vector<81x64xf32> -> vector<81x64xf32>
    %79 = arith.addf %71, %78 : vector<81x64xf32>
    %c9 = arith.constant 9 : index
    %c0_70 = arith.constant 0 : index
    %c0_71 = arith.constant 0 : index
    %80 = vector.load %arg3[%c9, %c0_70, %c0_71] : memref<16x81x400xbf16, #tpu.memory_space<vmem>>, vector<1x81x400xbf16>
    %81 = vector.shape_cast %80 : vector<1x81x400xbf16> to vector<81x400xbf16>
    %cst_72 = arith.constant dense<0.000000e+00> : vector<81x32xf32>
    %82 = tpu.matmul %81, %6, %cst_72 {dimension_numbers = #tpu.dot_dimension_numbers<[1], [0], [0], [1], [0, 0, 1, 1], [], []>} : vector<81x400xbf16>, vector<400x32xbf16>, vector<81x32xf32> -> vector<81x32xf32>
    %83 = arith.truncf %82 : vector<81x32xf32> to vector<81x32xbf16>
    %c9_73 = arith.constant 9 : index
    %c0_74 = arith.constant 0 : index
    %c0_75 = arith.constant 0 : index
    %84 = vector.load %arg4[%c9_73, %c0_74, %c0_75] : memref<16x32x64xbf16, #tpu.memory_space<vmem>>, vector<1x32x64xbf16>
    %85 = vector.shape_cast %84 : vector<1x32x64xbf16> to vector<32x64xbf16>
    %cst_76 = arith.constant dense<0.000000e+00> : vector<81x64xf32>
    %86 = tpu.matmul %83, %85, %cst_76 {dimension_numbers = #tpu.dot_dimension_numbers<[1], [0], [0], [1], [0, 0, 1, 1], [], []>} : vector<81x32xbf16>, vector<32x64xbf16>, vector<81x64xf32> -> vector<81x64xf32>
    %87 = arith.addf %79, %86 : vector<81x64xf32>
    %c10 = arith.constant 10 : index
    %c0_77 = arith.constant 0 : index
    %c0_78 = arith.constant 0 : index
    %88 = vector.load %arg3[%c10, %c0_77, %c0_78] : memref<16x81x400xbf16, #tpu.memory_space<vmem>>, vector<1x81x400xbf16>
    %89 = vector.shape_cast %88 : vector<1x81x400xbf16> to vector<81x400xbf16>
    %cst_79 = arith.constant dense<0.000000e+00> : vector<81x32xf32>
    %90 = tpu.matmul %89, %6, %cst_79 {dimension_numbers = #tpu.dot_dimension_numbers<[1], [0], [0], [1], [0, 0, 1, 1], [], []>} : vector<81x400xbf16>, vector<400x32xbf16>, vector<81x32xf32> -> vector<81x32xf32>
    %91 = arith.truncf %90 : vector<81x32xf32> to vector<81x32xbf16>
    %c10_80 = arith.constant 10 : index
    %c0_81 = arith.constant 0 : index
    %c0_82 = arith.constant 0 : index
    %92 = vector.load %arg4[%c10_80, %c0_81, %c0_82] : memref<16x32x64xbf16, #tpu.memory_space<vmem>>, vector<1x32x64xbf16>
    %93 = vector.shape_cast %92 : vector<1x32x64xbf16> to vector<32x64xbf16>
    %cst_83 = arith.constant dense<0.000000e+00> : vector<81x64xf32>
    %94 = tpu.matmul %91, %93, %cst_83 {dimension_numbers = #tpu.dot_dimension_numbers<[1], [0], [0], [1], [0, 0, 1, 1], [], []>} : vector<81x32xbf16>, vector<32x64xbf16>, vector<81x64xf32> -> vector<81x64xf32>
    %95 = arith.addf %87, %94 : vector<81x64xf32>
    %c11 = arith.constant 11 : index
    %c0_84 = arith.constant 0 : index
    %c0_85 = arith.constant 0 : index
    %96 = vector.load %arg3[%c11, %c0_84, %c0_85] : memref<16x81x400xbf16, #tpu.memory_space<vmem>>, vector<1x81x400xbf16>
    %97 = vector.shape_cast %96 : vector<1x81x400xbf16> to vector<81x400xbf16>
    %cst_86 = arith.constant dense<0.000000e+00> : vector<81x32xf32>
    %98 = tpu.matmul %97, %6, %cst_86 {dimension_numbers = #tpu.dot_dimension_numbers<[1], [0], [0], [1], [0, 0, 1, 1], [], []>} : vector<81x400xbf16>, vector<400x32xbf16>, vector<81x32xf32> -> vector<81x32xf32>
    %99 = arith.truncf %98 : vector<81x32xf32> to vector<81x32xbf16>
    %c11_87 = arith.constant 11 : index
    %c0_88 = arith.constant 0 : index
    %c0_89 = arith.constant 0 : index
    %100 = vector.load %arg4[%c11_87, %c0_88, %c0_89] : memref<16x32x64xbf16, #tpu.memory_space<vmem>>, vector<1x32x64xbf16>
    %101 = vector.shape_cast %100 : vector<1x32x64xbf16> to vector<32x64xbf16>
    %cst_90 = arith.constant dense<0.000000e+00> : vector<81x64xf32>
    %102 = tpu.matmul %99, %101, %cst_90 {dimension_numbers = #tpu.dot_dimension_numbers<[1], [0], [0], [1], [0, 0, 1, 1], [], []>} : vector<81x32xbf16>, vector<32x64xbf16>, vector<81x64xf32> -> vector<81x64xf32>
    %103 = arith.addf %95, %102 : vector<81x64xf32>
    %c12 = arith.constant 12 : index
    %c0_91 = arith.constant 0 : index
    %c0_92 = arith.constant 0 : index
    %104 = vector.load %arg3[%c12, %c0_91, %c0_92] : memref<16x81x400xbf16, #tpu.memory_space<vmem>>, vector<1x81x400xbf16>
    %105 = vector.shape_cast %104 : vector<1x81x400xbf16> to vector<81x400xbf16>
    %cst_93 = arith.constant dense<0.000000e+00> : vector<81x32xf32>
    %106 = tpu.matmul %105, %6, %cst_93 {dimension_numbers = #tpu.dot_dimension_numbers<[1], [0], [0], [1], [0, 0, 1, 1], [], []>} : vector<81x400xbf16>, vector<400x32xbf16>, vector<81x32xf32> -> vector<81x32xf32>
    %107 = arith.truncf %106 : vector<81x32xf32> to vector<81x32xbf16>
    %c12_94 = arith.constant 12 : index
    %c0_95 = arith.constant 0 : index
    %c0_96 = arith.constant 0 : index
    %108 = vector.load %arg4[%c12_94, %c0_95, %c0_96] : memref<16x32x64xbf16, #tpu.memory_space<vmem>>, vector<1x32x64xbf16>
    %109 = vector.shape_cast %108 : vector<1x32x64xbf16> to vector<32x64xbf16>
    %cst_97 = arith.constant dense<0.000000e+00> : vector<81x64xf32>
    %110 = tpu.matmul %107, %109, %cst_97 {dimension_numbers = #tpu.dot_dimension_numbers<[1], [0], [0], [1], [0, 0, 1, 1], [], []>} : vector<81x32xbf16>, vector<32x64xbf16>, vector<81x64xf32> -> vector<81x64xf32>
    %111 = arith.addf %103, %110 : vector<81x64xf32>
    %c13 = arith.constant 13 : index
    %c0_98 = arith.constant 0 : index
    %c0_99 = arith.constant 0 : index
    %112 = vector.load %arg3[%c13, %c0_98, %c0_99] : memref<16x81x400xbf16, #tpu.memory_space<vmem>>, vector<1x81x400xbf16>
    %113 = vector.shape_cast %112 : vector<1x81x400xbf16> to vector<81x400xbf16>
    %cst_100 = arith.constant dense<0.000000e+00> : vector<81x32xf32>
    %114 = tpu.matmul %113, %6, %cst_100 {dimension_numbers = #tpu.dot_dimension_numbers<[1], [0], [0], [1], [0, 0, 1, 1], [], []>} : vector<81x400xbf16>, vector<400x32xbf16>, vector<81x32xf32> -> vector<81x32xf32>
    %115 = arith.truncf %114 : vector<81x32xf32> to vector<81x32xbf16>
    %c13_101 = arith.constant 13 : index
    %c0_102 = arith.constant 0 : index
    %c0_103 = arith.constant 0 : index
    %116 = vector.load %arg4[%c13_101, %c0_102, %c0_103] : memref<16x32x64xbf16, #tpu.memory_space<vmem>>, vector<1x32x64xbf16>
    %117 = vector.shape_cast %116 : vector<1x32x64xbf16> to vector<32x64xbf16>
    %cst_104 = arith.constant dense<0.000000e+00> : vector<81x64xf32>
    %118 = tpu.matmul %115, %117, %cst_104 {dimension_numbers = #tpu.dot_dimension_numbers<[1], [0], [0], [1], [0, 0, 1, 1], [], []>} : vector<81x32xbf16>, vector<32x64xbf16>, vector<81x64xf32> -> vector<81x64xf32>
    %119 = arith.addf %111, %118 : vector<81x64xf32>
    %c14 = arith.constant 14 : index
    %c0_105 = arith.constant 0 : index
    %c0_106 = arith.constant 0 : index
    %120 = vector.load %arg3[%c14, %c0_105, %c0_106] : memref<16x81x400xbf16, #tpu.memory_space<vmem>>, vector<1x81x400xbf16>
    %121 = vector.shape_cast %120 : vector<1x81x400xbf16> to vector<81x400xbf16>
    %cst_107 = arith.constant dense<0.000000e+00> : vector<81x32xf32>
    %122 = tpu.matmul %121, %6, %cst_107 {dimension_numbers = #tpu.dot_dimension_numbers<[1], [0], [0], [1], [0, 0, 1, 1], [], []>} : vector<81x400xbf16>, vector<400x32xbf16>, vector<81x32xf32> -> vector<81x32xf32>
    %123 = arith.truncf %122 : vector<81x32xf32> to vector<81x32xbf16>
    %c14_108 = arith.constant 14 : index
    %c0_109 = arith.constant 0 : index
    %c0_110 = arith.constant 0 : index
    %124 = vector.load %arg4[%c14_108, %c0_109, %c0_110] : memref<16x32x64xbf16, #tpu.memory_space<vmem>>, vector<1x32x64xbf16>
    %125 = vector.shape_cast %124 : vector<1x32x64xbf16> to vector<32x64xbf16>
    %cst_111 = arith.constant dense<0.000000e+00> : vector<81x64xf32>
    %126 = tpu.matmul %123, %125, %cst_111 {dimension_numbers = #tpu.dot_dimension_numbers<[1], [0], [0], [1], [0, 0, 1, 1], [], []>} : vector<81x32xbf16>, vector<32x64xbf16>, vector<81x64xf32> -> vector<81x64xf32>
    %127 = arith.addf %119, %126 : vector<81x64xf32>
    %c15 = arith.constant 15 : index
    %c0_112 = arith.constant 0 : index
    %c0_113 = arith.constant 0 : index
    %128 = vector.load %arg3[%c15, %c0_112, %c0_113] : memref<16x81x400xbf16, #tpu.memory_space<vmem>>, vector<1x81x400xbf16>
    %129 = vector.shape_cast %128 : vector<1x81x400xbf16> to vector<81x400xbf16>
    %cst_114 = arith.constant dense<0.000000e+00> : vector<81x32xf32>
    %130 = tpu.matmul %129, %6, %cst_114 {dimension_numbers = #tpu.dot_dimension_numbers<[1], [0], [0], [1], [0, 0, 1, 1], [], []>} : vector<81x400xbf16>, vector<400x32xbf16>, vector<81x32xf32> -> vector<81x32xf32>
    %131 = arith.truncf %130 : vector<81x32xf32> to vector<81x32xbf16>
    %c15_115 = arith.constant 15 : index
    %c0_116 = arith.constant 0 : index
    %c0_117 = arith.constant 0 : index
    %132 = vector.load %arg4[%c15_115, %c0_116, %c0_117] : memref<16x32x64xbf16, #tpu.memory_space<vmem>>, vector<1x32x64xbf16>
    %133 = vector.shape_cast %132 : vector<1x32x64xbf16> to vector<32x64xbf16>
    %cst_118 = arith.constant dense<0.000000e+00> : vector<81x64xf32>
    %134 = tpu.matmul %131, %133, %cst_118 {dimension_numbers = #tpu.dot_dimension_numbers<[1], [0], [0], [1], [0, 0, 1, 1], [], []>} : vector<81x32xbf16>, vector<32x64xbf16>, vector<81x64xf32> -> vector<81x64xf32>
    %135 = arith.addf %127, %134 : vector<81x64xf32>
    %cst_119 = arith.constant 0.000000e+00 : f32
    %136 = vector.broadcast %cst_119 : f32 to vector<81x64xf32>
    %137 = arith.maximumf %135, %136 : vector<81x64xf32>
    %138 = arith.truncf %137 : vector<81x64xf32> to vector<81x64xbf16>
    %cst_120 = arith.constant 0.000000e+00 : f32
    %139 = vector.broadcast %cst_120 : f32 to vector<49x32xf32>
    %c0_121 = arith.constant 0 : index
    %c0_122 = arith.constant 0 : index
    %c0_123 = arith.constant 0 : index
    %140 = vector.load %arg5[%c0_121, %c0_122, %c0_123] : memref<9x49x81xbf16, #tpu.memory_space<vmem>>, vector<1x49x81xbf16>
    %141 = vector.shape_cast %140 : vector<1x49x81xbf16> to vector<49x81xbf16>
    %cst_124 = arith.constant dense<0.000000e+00> : vector<49x64xf32>
    %142 = tpu.matmul %141, %138, %cst_124 {dimension_numbers = #tpu.dot_dimension_numbers<[1], [0], [0], [1], [0, 0, 1, 1], [], []>} : vector<49x81xbf16>, vector<81x64xbf16>, vector<49x64xf32> -> vector<49x64xf32>
    %143 = arith.truncf %142 : vector<49x64xf32> to vector<49x64xbf16>
    %c0_125 = arith.constant 0 : index
    %c0_126 = arith.constant 0 : index
    %c0_127 = arith.constant 0 : index
    %144 = vector.load %arg6[%c0_125, %c0_126, %c0_127] : memref<9x64x32xbf16, #tpu.memory_space<vmem>>, vector<1x64x32xbf16>
    %145 = vector.shape_cast %144 : vector<1x64x32xbf16> to vector<64x32xbf16>
    %cst_128 = arith.constant dense<0.000000e+00> : vector<49x32xf32>
    %146 = tpu.matmul %143, %145, %cst_128 {dimension_numbers = #tpu.dot_dimension_numbers<[1], [0], [0], [1], [0, 0, 1, 1], [], []>} : vector<49x64xbf16>, vector<64x32xbf16>, vector<49x32xf32> -> vector<49x32xf32>
    %147 = arith.addf %139, %146 : vector<49x32xf32>
    %c1_129 = arith.constant 1 : index
    %c0_130 = arith.constant 0 : index
    %c0_131 = arith.constant 0 : index
    %148 = vector.load %arg5[%c1_129, %c0_130, %c0_131] : memref<9x49x81xbf16, #tpu.memory_space<vmem>>, vector<1x49x81xbf16>
    %149 = vector.shape_cast %148 : vector<1x49x81xbf16> to vector<49x81xbf16>
    %cst_132 = arith.constant dense<0.000000e+00> : vector<49x64xf32>
    %150 = tpu.matmul %149, %138, %cst_132 {dimension_numbers = #tpu.dot_dimension_numbers<[1], [0], [0], [1], [0, 0, 1, 1], [], []>} : vector<49x81xbf16>, vector<81x64xbf16>, vector<49x64xf32> -> vector<49x64xf32>
    %151 = arith.truncf %150 : vector<49x64xf32> to vector<49x64xbf16>
    %c1_133 = arith.constant 1 : index
    %c0_134 = arith.constant 0 : index
    %c0_135 = arith.constant 0 : index
    %152 = vector.load %arg6[%c1_133, %c0_134, %c0_135] : memref<9x64x32xbf16, #tpu.memory_space<vmem>>, vector<1x64x32xbf16>
    %153 = vector.shape_cast %152 : vector<1x64x32xbf16> to vector<64x32xbf16>
    %cst_136 = arith.constant dense<0.000000e+00> : vector<49x32xf32>
    %154 = tpu.matmul %151, %153, %cst_136 {dimension_numbers = #tpu.dot_dimension_numbers<[1], [0], [0], [1], [0, 0, 1, 1], [], []>} : vector<49x64xbf16>, vector<64x32xbf16>, vector<49x32xf32> -> vector<49x32xf32>
    %155 = arith.addf %147, %154 : vector<49x32xf32>
    %c2_137 = arith.constant 2 : index
    %c0_138 = arith.constant 0 : index
    %c0_139 = arith.constant 0 : index
    %156 = vector.load %arg5[%c2_137, %c0_138, %c0_139] : memref<9x49x81xbf16, #tpu.memory_space<vmem>>, vector<1x49x81xbf16>
    %157 = vector.shape_cast %156 : vector<1x49x81xbf16> to vector<49x81xbf16>
    %cst_140 = arith.constant dense<0.000000e+00> : vector<49x64xf32>
    %158 = tpu.matmul %157, %138, %cst_140 {dimension_numbers = #tpu.dot_dimension_numbers<[1], [0], [0], [1], [0, 0, 1, 1], [], []>} : vector<49x81xbf16>, vector<81x64xbf16>, vector<49x64xf32> -> vector<49x64xf32>
    %159 = arith.truncf %158 : vector<49x64xf32> to vector<49x64xbf16>
    %c2_141 = arith.constant 2 : index
    %c0_142 = arith.constant 0 : index
    %c0_143 = arith.constant 0 : index
    %160 = vector.load %arg6[%c2_141, %c0_142, %c0_143] : memref<9x64x32xbf16, #tpu.memory_space<vmem>>, vector<1x64x32xbf16>
    %161 = vector.shape_cast %160 : vector<1x64x32xbf16> to vector<64x32xbf16>
    %cst_144 = arith.constant dense<0.000000e+00> : vector<49x32xf32>
    %162 = tpu.matmul %159, %161, %cst_144 {dimension_numbers = #tpu.dot_dimension_numbers<[1], [0], [0], [1], [0, 0, 1, 1], [], []>} : vector<49x64xbf16>, vector<64x32xbf16>, vector<49x32xf32> -> vector<49x32xf32>
    %163 = arith.addf %155, %162 : vector<49x32xf32>
    %c3_145 = arith.constant 3 : index
    %c0_146 = arith.constant 0 : index
    %c0_147 = arith.constant 0 : index
    %164 = vector.load %arg5[%c3_145, %c0_146, %c0_147] : memref<9x49x81xbf16, #tpu.memory_space<vmem>>, vector<1x49x81xbf16>
    %165 = vector.shape_cast %164 : vector<1x49x81xbf16> to vector<49x81xbf16>
    %cst_148 = arith.constant dense<0.000000e+00> : vector<49x64xf32>
    %166 = tpu.matmul %165, %138, %cst_148 {dimension_numbers = #tpu.dot_dimension_numbers<[1], [0], [0], [1], [0, 0, 1, 1], [], []>} : vector<49x81xbf16>, vector<81x64xbf16>, vector<49x64xf32> -> vector<49x64xf32>
    %167 = arith.truncf %166 : vector<49x64xf32> to vector<49x64xbf16>
    %c3_149 = arith.constant 3 : index
    %c0_150 = arith.constant 0 : index
    %c0_151 = arith.constant 0 : index
    %168 = vector.load %arg6[%c3_149, %c0_150, %c0_151] : memref<9x64x32xbf16, #tpu.memory_space<vmem>>, vector<1x64x32xbf16>
    %169 = vector.shape_cast %168 : vector<1x64x32xbf16> to vector<64x32xbf16>
    %cst_152 = arith.constant dense<0.000000e+00> : vector<49x32xf32>
    %170 = tpu.matmul %167, %169, %cst_152 {dimension_numbers = #tpu.dot_dimension_numbers<[1], [0], [0], [1], [0, 0, 1, 1], [], []>} : vector<49x64xbf16>, vector<64x32xbf16>, vector<49x32xf32> -> vector<49x32xf32>
    %171 = arith.addf %163, %170 : vector<49x32xf32>
    %c4_153 = arith.constant 4 : index
    %c0_154 = arith.constant 0 : index
    %c0_155 = arith.constant 0 : index
    %172 = vector.load %arg5[%c4_153, %c0_154, %c0_155] : memref<9x49x81xbf16, #tpu.memory_space<vmem>>, vector<1x49x81xbf16>
    %173 = vector.shape_cast %172 : vector<1x49x81xbf16> to vector<49x81xbf16>
    %cst_156 = arith.constant dense<0.000000e+00> : vector<49x64xf32>
    %174 = tpu.matmul %173, %138, %cst_156 {dimension_numbers = #tpu.dot_dimension_numbers<[1], [0], [0], [1], [0, 0, 1, 1], [], []>} : vector<49x81xbf16>, vector<81x64xbf16>, vector<49x64xf32> -> vector<49x64xf32>
    %175 = arith.truncf %174 : vector<49x64xf32> to vector<49x64xbf16>
    %c4_157 = arith.constant 4 : index
    %c0_158 = arith.constant 0 : index
    %c0_159 = arith.constant 0 : index
    %176 = vector.load %arg6[%c4_157, %c0_158, %c0_159] : memref<9x64x32xbf16, #tpu.memory_space<vmem>>, vector<1x64x32xbf16>
    %177 = vector.shape_cast %176 : vector<1x64x32xbf16> to vector<64x32xbf16>
    %cst_160 = arith.constant dense<0.000000e+00> : vector<49x32xf32>
    %178 = tpu.matmul %175, %177, %cst_160 {dimension_numbers = #tpu.dot_dimension_numbers<[1], [0], [0], [1], [0, 0, 1, 1], [], []>} : vector<49x64xbf16>, vector<64x32xbf16>, vector<49x32xf32> -> vector<49x32xf32>
    %179 = arith.addf %171, %178 : vector<49x32xf32>
    %c5_161 = arith.constant 5 : index
    %c0_162 = arith.constant 0 : index
    %c0_163 = arith.constant 0 : index
    %180 = vector.load %arg5[%c5_161, %c0_162, %c0_163] : memref<9x49x81xbf16, #tpu.memory_space<vmem>>, vector<1x49x81xbf16>
    %181 = vector.shape_cast %180 : vector<1x49x81xbf16> to vector<49x81xbf16>
    %cst_164 = arith.constant dense<0.000000e+00> : vector<49x64xf32>
    %182 = tpu.matmul %181, %138, %cst_164 {dimension_numbers = #tpu.dot_dimension_numbers<[1], [0], [0], [1], [0, 0, 1, 1], [], []>} : vector<49x81xbf16>, vector<81x64xbf16>, vector<49x64xf32> -> vector<49x64xf32>
    %183 = arith.truncf %182 : vector<49x64xf32> to vector<49x64xbf16>
    %c5_165 = arith.constant 5 : index
    %c0_166 = arith.constant 0 : index
    %c0_167 = arith.constant 0 : index
    %184 = vector.load %arg6[%c5_165, %c0_166, %c0_167] : memref<9x64x32xbf16, #tpu.memory_space<vmem>>, vector<1x64x32xbf16>
    %185 = vector.shape_cast %184 : vector<1x64x32xbf16> to vector<64x32xbf16>
    %cst_168 = arith.constant dense<0.000000e+00> : vector<49x32xf32>
    %186 = tpu.matmul %183, %185, %cst_168 {dimension_numbers = #tpu.dot_dimension_numbers<[1], [0], [0], [1], [0, 0, 1, 1], [], []>} : vector<49x64xbf16>, vector<64x32xbf16>, vector<49x32xf32> -> vector<49x32xf32>
    %187 = arith.addf %179, %186 : vector<49x32xf32>
    %c6_169 = arith.constant 6 : index
    %c0_170 = arith.constant 0 : index
    %c0_171 = arith.constant 0 : index
    %188 = vector.load %arg5[%c6_169, %c0_170, %c0_171] : memref<9x49x81xbf16, #tpu.memory_space<vmem>>, vector<1x49x81xbf16>
    %189 = vector.shape_cast %188 : vector<1x49x81xbf16> to vector<49x81xbf16>
    %cst_172 = arith.constant dense<0.000000e+00> : vector<49x64xf32>
    %190 = tpu.matmul %189, %138, %cst_172 {dimension_numbers = #tpu.dot_dimension_numbers<[1], [0], [0], [1], [0, 0, 1, 1], [], []>} : vector<49x81xbf16>, vector<81x64xbf16>, vector<49x64xf32> -> vector<49x64xf32>
    %191 = arith.truncf %190 : vector<49x64xf32> to vector<49x64xbf16>
    %c6_173 = arith.constant 6 : index
    %c0_174 = arith.constant 0 : index
    %c0_175 = arith.constant 0 : index
    %192 = vector.load %arg6[%c6_173, %c0_174, %c0_175] : memref<9x64x32xbf16, #tpu.memory_space<vmem>>, vector<1x64x32xbf16>
    %193 = vector.shape_cast %192 : vector<1x64x32xbf16> to vector<64x32xbf16>
    %cst_176 = arith.constant dense<0.000000e+00> : vector<49x32xf32>
    %194 = tpu.matmul %191, %193, %cst_176 {dimension_numbers = #tpu.dot_dimension_numbers<[1], [0], [0], [1], [0, 0, 1, 1], [], []>} : vector<49x64xbf16>, vector<64x32xbf16>, vector<49x32xf32> -> vector<49x32xf32>
    %195 = arith.addf %187, %194 : vector<49x32xf32>
    %c7_177 = arith.constant 7 : index
    %c0_178 = arith.constant 0 : index
    %c0_179 = arith.constant 0 : index
    %196 = vector.load %arg5[%c7_177, %c0_178, %c0_179] : memref<9x49x81xbf16, #tpu.memory_space<vmem>>, vector<1x49x81xbf16>
    %197 = vector.shape_cast %196 : vector<1x49x81xbf16> to vector<49x81xbf16>
    %cst_180 = arith.constant dense<0.000000e+00> : vector<49x64xf32>
    %198 = tpu.matmul %197, %138, %cst_180 {dimension_numbers = #tpu.dot_dimension_numbers<[1], [0], [0], [1], [0, 0, 1, 1], [], []>} : vector<49x81xbf16>, vector<81x64xbf16>, vector<49x64xf32> -> vector<49x64xf32>
    %199 = arith.truncf %198 : vector<49x64xf32> to vector<49x64xbf16>
    %c7_181 = arith.constant 7 : index
    %c0_182 = arith.constant 0 : index
    %c0_183 = arith.constant 0 : index
    %200 = vector.load %arg6[%c7_181, %c0_182, %c0_183] : memref<9x64x32xbf16, #tpu.memory_space<vmem>>, vector<1x64x32xbf16>
    %201 = vector.shape_cast %200 : vector<1x64x32xbf16> to vector<64x32xbf16>
    %cst_184 = arith.constant dense<0.000000e+00> : vector<49x32xf32>
    %202 = tpu.matmul %199, %201, %cst_184 {dimension_numbers = #tpu.dot_dimension_numbers<[1], [0], [0], [1], [0, 0, 1, 1], [], []>} : vector<49x64xbf16>, vector<64x32xbf16>, vector<49x32xf32> -> vector<49x32xf32>
    %203 = arith.addf %195, %202 : vector<49x32xf32>
    %c8_185 = arith.constant 8 : index
    %c0_186 = arith.constant 0 : index
    %c0_187 = arith.constant 0 : index
    %204 = vector.load %arg5[%c8_185, %c0_186, %c0_187] : memref<9x49x81xbf16, #tpu.memory_space<vmem>>, vector<1x49x81xbf16>
    %205 = vector.shape_cast %204 : vector<1x49x81xbf16> to vector<49x81xbf16>
    %cst_188 = arith.constant dense<0.000000e+00> : vector<49x64xf32>
    %206 = tpu.matmul %205, %138, %cst_188 {dimension_numbers = #tpu.dot_dimension_numbers<[1], [0], [0], [1], [0, 0, 1, 1], [], []>} : vector<49x81xbf16>, vector<81x64xbf16>, vector<49x64xf32> -> vector<49x64xf32>
    %207 = arith.truncf %206 : vector<49x64xf32> to vector<49x64xbf16>
    %c8_189 = arith.constant 8 : index
    %c0_190 = arith.constant 0 : index
    %c0_191 = arith.constant 0 : index
    %208 = vector.load %arg6[%c8_189, %c0_190, %c0_191] : memref<9x64x32xbf16, #tpu.memory_space<vmem>>, vector<1x64x32xbf16>
    %209 = vector.shape_cast %208 : vector<1x64x32xbf16> to vector<64x32xbf16>
    %cst_192 = arith.constant dense<0.000000e+00> : vector<49x32xf32>
    %210 = tpu.matmul %207, %209, %cst_192 {dimension_numbers = #tpu.dot_dimension_numbers<[1], [0], [0], [1], [0, 0, 1, 1], [], []>} : vector<49x64xbf16>, vector<64x32xbf16>, vector<49x32xf32> -> vector<49x32xf32>
    %211 = arith.addf %203, %210 : vector<49x32xf32>
    %cst_193 = arith.constant 0.000000e+00 : f32
    %212 = vector.broadcast %cst_193 : f32 to vector<49x32xf32>
    %213 = arith.maximumf %211, %212 : vector<49x32xf32>
    %214 = vector.extract_strided_slice %213 {offsets = [0, 0], sizes = [1, 32], strides = [1, 1]} : vector<49x32xf32> to vector<1x32xf32>
    %215 = vector.extract_strided_slice %213 {offsets = [1, 0], sizes = [1, 32], strides = [1, 1]} : vector<49x32xf32> to vector<1x32xf32>
    %216 = vector.extract_strided_slice %213 {offsets = [2, 0], sizes = [1, 32], strides = [1, 1]} : vector<49x32xf32> to vector<1x32xf32>
    %217 = vector.extract_strided_slice %213 {offsets = [3, 0], sizes = [1, 32], strides = [1, 1]} : vector<49x32xf32> to vector<1x32xf32>
    %218 = vector.extract_strided_slice %213 {offsets = [4, 0], sizes = [1, 32], strides = [1, 1]} : vector<49x32xf32> to vector<1x32xf32>
    %219 = vector.extract_strided_slice %213 {offsets = [5, 0], sizes = [1, 32], strides = [1, 1]} : vector<49x32xf32> to vector<1x32xf32>
    %220 = vector.extract_strided_slice %213 {offsets = [6, 0], sizes = [1, 32], strides = [1, 1]} : vector<49x32xf32> to vector<1x32xf32>
    %221 = vector.extract_strided_slice %213 {offsets = [7, 0], sizes = [1, 32], strides = [1, 1]} : vector<49x32xf32> to vector<1x32xf32>
    %222 = vector.extract_strided_slice %213 {offsets = [8, 0], sizes = [1, 32], strides = [1, 1]} : vector<49x32xf32> to vector<1x32xf32>
    %223 = vector.extract_strided_slice %213 {offsets = [9, 0], sizes = [1, 32], strides = [1, 1]} : vector<49x32xf32> to vector<1x32xf32>
    %224 = vector.extract_strided_slice %213 {offsets = [10, 0], sizes = [1, 32], strides = [1, 1]} : vector<49x32xf32> to vector<1x32xf32>
    %225 = vector.extract_strided_slice %213 {offsets = [11, 0], sizes = [1, 32], strides = [1, 1]} : vector<49x32xf32> to vector<1x32xf32>
    %226 = vector.extract_strided_slice %213 {offsets = [12, 0], sizes = [1, 32], strides = [1, 1]} : vector<49x32xf32> to vector<1x32xf32>
    %227 = vector.extract_strided_slice %213 {offsets = [13, 0], sizes = [1, 32], strides = [1, 1]} : vector<49x32xf32> to vector<1x32xf32>
    %228 = vector.extract_strided_slice %213 {offsets = [14, 0], sizes = [1, 32], strides = [1, 1]} : vector<49x32xf32> to vector<1x32xf32>
    %229 = vector.extract_strided_slice %213 {offsets = [15, 0], sizes = [1, 32], strides = [1, 1]} : vector<49x32xf32> to vector<1x32xf32>
    %230 = vector.extract_strided_slice %213 {offsets = [16, 0], sizes = [1, 32], strides = [1, 1]} : vector<49x32xf32> to vector<1x32xf32>
    %231 = vector.extract_strided_slice %213 {offsets = [17, 0], sizes = [1, 32], strides = [1, 1]} : vector<49x32xf32> to vector<1x32xf32>
    %232 = vector.extract_strided_slice %213 {offsets = [18, 0], sizes = [1, 32], strides = [1, 1]} : vector<49x32xf32> to vector<1x32xf32>
    %233 = vector.extract_strided_slice %213 {offsets = [19, 0], sizes = [1, 32], strides = [1, 1]} : vector<49x32xf32> to vector<1x32xf32>
    %234 = vector.extract_strided_slice %213 {offsets = [20, 0], sizes = [1, 32], strides = [1, 1]} : vector<49x32xf32> to vector<1x32xf32>
    %235 = vector.extract_strided_slice %213 {offsets = [21, 0], sizes = [1, 32], strides = [1, 1]} : vector<49x32xf32> to vector<1x32xf32>
    %236 = vector.extract_strided_slice %213 {offsets = [22, 0], sizes = [1, 32], strides = [1, 1]} : vector<49x32xf32> to vector<1x32xf32>
    %237 = vector.extract_strided_slice %213 {offsets = [23, 0], sizes = [1, 32], strides = [1, 1]} : vector<49x32xf32> to vector<1x32xf32>
    %238 = vector.extract_strided_slice %213 {offsets = [24, 0], sizes = [1, 32], strides = [1, 1]} : vector<49x32xf32> to vector<1x32xf32>
    %239 = vector.extract_strided_slice %213 {offsets = [25, 0], sizes = [1, 32], strides = [1, 1]} : vector<49x32xf32> to vector<1x32xf32>
    %240 = vector.extract_strided_slice %213 {offsets = [26, 0], sizes = [1, 32], strides = [1, 1]} : vector<49x32xf32> to vector<1x32xf32>
    %241 = vector.extract_strided_slice %213 {offsets = [27, 0], sizes = [1, 32], strides = [1, 1]} : vector<49x32xf32> to vector<1x32xf32>
    %242 = vector.extract_strided_slice %213 {offsets = [28, 0], sizes = [1, 32], strides = [1, 1]} : vector<49x32xf32> to vector<1x32xf32>
    %243 = vector.extract_strided_slice %213 {offsets = [29, 0], sizes = [1, 32], strides = [1, 1]} : vector<49x32xf32> to vector<1x32xf32>
    %244 = vector.extract_strided_slice %213 {offsets = [30, 0], sizes = [1, 32], strides = [1, 1]} : vector<49x32xf32> to vector<1x32xf32>
    %245 = vector.extract_strided_slice %213 {offsets = [31, 0], sizes = [1, 32], strides = [1, 1]} : vector<49x32xf32> to vector<1x32xf32>
    %246 = vector.extract_strided_slice %213 {offsets = [32, 0], sizes = [1, 32], strides = [1, 1]} : vector<49x32xf32> to vector<1x32xf32>
    %247 = vector.extract_strided_slice %213 {offsets = [33, 0], sizes = [1, 32], strides = [1, 1]} : vector<49x32xf32> to vector<1x32xf32>
    %248 = vector.extract_strided_slice %213 {offsets = [34, 0], sizes = [1, 32], strides = [1, 1]} : vector<49x32xf32> to vector<1x32xf32>
    %249 = vector.extract_strided_slice %213 {offsets = [35, 0], sizes = [1, 32], strides = [1, 1]} : vector<49x32xf32> to vector<1x32xf32>
    %250 = vector.extract_strided_slice %213 {offsets = [36, 0], sizes = [1, 32], strides = [1, 1]} : vector<49x32xf32> to vector<1x32xf32>
    %251 = vector.extract_strided_slice %213 {offsets = [37, 0], sizes = [1, 32], strides = [1, 1]} : vector<49x32xf32> to vector<1x32xf32>
    %252 = vector.extract_strided_slice %213 {offsets = [38, 0], sizes = [1, 32], strides = [1, 1]} : vector<49x32xf32> to vector<1x32xf32>
    %253 = vector.extract_strided_slice %213 {offsets = [39, 0], sizes = [1, 32], strides = [1, 1]} : vector<49x32xf32> to vector<1x32xf32>
    %254 = vector.extract_strided_slice %213 {offsets = [40, 0], sizes = [1, 32], strides = [1, 1]} : vector<49x32xf32> to vector<1x32xf32>
    %255 = vector.extract_strided_slice %213 {offsets = [41, 0], sizes = [1, 32], strides = [1, 1]} : vector<49x32xf32> to vector<1x32xf32>
    %256 = vector.extract_strided_slice %213 {offsets = [42, 0], sizes = [1, 32], strides = [1, 1]} : vector<49x32xf32> to vector<1x32xf32>
    %257 = vector.extract_strided_slice %213 {offsets = [43, 0], sizes = [1, 32], strides = [1, 1]} : vector<49x32xf32> to vector<1x32xf32>
    %258 = vector.extract_strided_slice %213 {offsets = [44, 0], sizes = [1, 32], strides = [1, 1]} : vector<49x32xf32> to vector<1x32xf32>
    %259 = vector.extract_strided_slice %213 {offsets = [45, 0], sizes = [1, 32], strides = [1, 1]} : vector<49x32xf32> to vector<1x32xf32>
    %260 = vector.extract_strided_slice %213 {offsets = [46, 0], sizes = [1, 32], strides = [1, 1]} : vector<49x32xf32> to vector<1x32xf32>
    %261 = vector.extract_strided_slice %213 {offsets = [47, 0], sizes = [1, 32], strides = [1, 1]} : vector<49x32xf32> to vector<1x32xf32>
    %262 = vector.extract_strided_slice %213 {offsets = [48, 0], sizes = [1, 32], strides = [1, 1]} : vector<49x32xf32> to vector<1x32xf32>
    %263 = tpu.concatenate %214, %215, %216, %217, %218, %219, %220, %221, %222, %223, %224, %225, %226, %227, %228, %229 in 1 : vector<1x32xf32>, vector<1x32xf32>, vector<1x32xf32>, vector<1x32xf32>, vector<1x32xf32>, vector<1x32xf32>, vector<1x32xf32>, vector<1x32xf32>, vector<1x32xf32>, vector<1x32xf32>, vector<1x32xf32>, vector<1x32xf32>, vector<1x32xf32>, vector<1x32xf32>, vector<1x32xf32>, vector<1x32xf32> -> vector<1x512xf32>
    %264 = tpu.concatenate %230, %231, %232, %233, %234, %235, %236, %237, %238, %239, %240, %241, %242, %243, %244, %245 in 1 : vector<1x32xf32>, vector<1x32xf32>, vector<1x32xf32>, vector<1x32xf32>, vector<1x32xf32>, vector<1x32xf32>, vector<1x32xf32>, vector<1x32xf32>, vector<1x32xf32>, vector<1x32xf32>, vector<1x32xf32>, vector<1x32xf32>, vector<1x32xf32>, vector<1x32xf32>, vector<1x32xf32>, vector<1x32xf32> -> vector<1x512xf32>
    %265 = tpu.concatenate %246, %247, %248, %249, %250, %251, %252, %253, %254, %255, %256, %257, %258, %259, %260, %261 in 1 : vector<1x32xf32>, vector<1x32xf32>, vector<1x32xf32>, vector<1x32xf32>, vector<1x32xf32>, vector<1x32xf32>, vector<1x32xf32>, vector<1x32xf32>, vector<1x32xf32>, vector<1x32xf32>, vector<1x32xf32>, vector<1x32xf32>, vector<1x32xf32>, vector<1x32xf32>, vector<1x32xf32>, vector<1x32xf32> -> vector<1x512xf32>
    %266 = tpu.concatenate %263, %264, %265, %262 in 1 : vector<1x512xf32>, vector<1x512xf32>, vector<1x512xf32>, vector<1x32xf32> -> vector<1x1568xf32>
    %267 = arith.truncf %266 : vector<1x1568xf32> to vector<1x1568xbf16>
    %c0_194 = arith.constant 0 : index
    %c0_195 = arith.constant 0 : index
    %268 = vector.load %arg7[%c0_194, %c0_195] : memref<1568x32xbf16, #tpu.memory_space<vmem>>, vector<1568x32xbf16>
    %cst_196 = arith.constant dense<0.000000e+00> : vector<1x32xf32>
    %269 = tpu.matmul %267, %268, %cst_196 {dimension_numbers = #tpu.dot_dimension_numbers<[1], [0], [0], [1], [0, 0, 1, 1], [], []>} : vector<1x1568xbf16>, vector<1568x32xbf16>, vector<1x32xf32> -> vector<1x32xf32>
    %cst_197 = arith.constant 0.000000e+00 : f32
    %270 = vector.broadcast %cst_197 : f32 to vector<1x32xf32>
    %271 = arith.maximumf %269, %270 : vector<1x32xf32>
    %272 = arith.truncf %271 : vector<1x32xf32> to vector<1x32xbf16>
    %c0_198 = arith.constant 0 : index
    %c0_199 = arith.constant 0 : index
    %273 = vector.load %arg8[%c0_198, %c0_199] : memref<32x6xbf16, #tpu.memory_space<vmem>>, vector<32x6xbf16>
    %cst_200 = arith.constant dense<0.000000e+00> : vector<1x6xf32>
    %274 = tpu.matmul %272, %273, %cst_200 {dimension_numbers = #tpu.dot_dimension_numbers<[1], [0], [0], [1], [0, 0, 1, 1], [], []>} : vector<1x32xbf16>, vector<32x6xbf16>, vector<1x6xf32> -> vector<1x6xf32>
    %cst_201 = arith.constant dense<0xFF800000> : vector<1xf32>
    %275 = vector.multi_reduction <maximumf>, %274, %cst_201 [1] : vector<1x6xf32> to vector<1xf32>
    %276 = vector.shape_cast %275 : vector<1xf32> to vector<1x1xf32>
    %277 = vector.broadcast %276 : vector<1x1xf32> to vector<1x6xf32>
    %278 = arith.subf %274, %277 : vector<1x6xf32>
    %279 = math.exp %278 : vector<1x6xf32>
    %cst_202 = arith.constant dense<0.000000e+00> : vector<1xf32>
    %280 = vector.multi_reduction <add>, %279, %cst_202 [1] : vector<1x6xf32> to vector<1xf32>
    %281 = vector.shape_cast %280 : vector<1xf32> to vector<1x1xf32>
    %282 = math.log %281 : vector<1x1xf32>
    %283 = vector.broadcast %282 : vector<1x1xf32> to vector<1x6xf32>
    %284 = arith.subf %278, %283 : vector<1x6xf32>
    %c0_203 = arith.constant 0 : index
    %c0_204 = arith.constant 0 : index
    %c0_205 = arith.constant 0 : index
    %285 = vector.load %arg9[%c0_203, %c0_204, %c0_205] : memref<1x1x6xf32, #tpu.memory_space<vmem>>, vector<1x1x6xf32>
    %286 = vector.shape_cast %285 : vector<1x1x6xf32> to vector<1x6xf32>
    %287 = vector.shape_cast %284 : vector<1x6xf32> to vector<1x1x6xf32>
    tpu.vector_store %arg9[%c0_203, %c0_204, %c0_205], %287 {strides = array<i32>} : memref<1x1x6xf32, #tpu.memory_space<vmem>>, vector<1x1x6xf32>,
    return
  }
  func.func @transform_0(%arg0: i32) -> (i32, i32, i32) {
    %c0_i32 = arith.constant 0 : i32
    %c0_i32_0 = arith.constant 0 : i32
    %c0_i32_1 = arith.constant 0 : i32
    return %arg0, %c0_i32, %c0_i32_0 : i32, i32, i32
  }
  func.func @transform_1(%arg0: i32) -> (i32, i32) {
    %c0_i32 = arith.constant 0 : i32
    %c0_i32_0 = arith.constant 0 : i32
    %c0_i32_1 = arith.constant 0 : i32
    return %c0_i32, %c0_i32_0 : i32, i32
  }
  func.func @transform_2(%arg0: i32) -> (i32, i32, i32) {
    %c0_i32 = arith.constant 0 : i32
    %c0_i32_0 = arith.constant 0 : i32
    %c0_i32_1 = arith.constant 0 : i32
    %c0_i32_2 = arith.constant 0 : i32
    return %c0_i32, %c0_i32_0, %c0_i32_1 : i32, i32, i32
  }
  func.func @transform_3(%arg0: i32) -> (i32, i32, i32) {
    %c0_i32 = arith.constant 0 : i32
    %c0_i32_0 = arith.constant 0 : i32
    %c0_i32_1 = arith.constant 0 : i32
    %c0_i32_2 = arith.constant 0 : i32
    return %c0_i32, %c0_i32_0, %c0_i32_1 : i32, i32, i32
  }
  func.func @transform_4(%arg0: i32) -> (i32, i32, i32) {
    %c0_i32 = arith.constant 0 : i32
    %c0_i32_0 = arith.constant 0 : i32
    %c0_i32_1 = arith.constant 0 : i32
    %c0_i32_2 = arith.constant 0 : i32
    return %c0_i32, %c0_i32_0, %c0_i32_1 : i32, i32, i32
  }
  func.func @transform_5(%arg0: i32) -> (i32, i32, i32) {
    %c0_i32 = arith.constant 0 : i32
    %c0_i32_0 = arith.constant 0 : i32
    %c0_i32_1 = arith.constant 0 : i32
    %c0_i32_2 = arith.constant 0 : i32
    return %c0_i32, %c0_i32_0, %c0_i32_1 : i32, i32, i32
  }
  func.func @transform_6(%arg0: i32) -> (i32, i32) {
    %c0_i32 = arith.constant 0 : i32
    %c0_i32_0 = arith.constant 0 : i32
    %c0_i32_1 = arith.constant 0 : i32
    return %c0_i32, %c0_i32_0 : i32, i32
  }
  func.func @transform_7(%arg0: i32) -> (i32, i32) {
    %c0_i32 = arith.constant 0 : i32
    %c0_i32_0 = arith.constant 0 : i32
    %c0_i32_1 = arith.constant 0 : i32
    return %c0_i32, %c0_i32_0 : i32, i32
  }
  func.func @transform_8(%arg0: i32) -> (i32, i32, i32) {
    %c0_i32 = arith.constant 0 : i32
    %c0_i32_0 = arith.constant 0 : i32
    %c0_i32_1 = arith.constant 0 : i32
    return %arg0, %c0_i32, %c0_i32_0 : i32, i32, i32
  }
}

</mosaic_0001>

<bundles_post_ra>
// kernel: escnn_forward.1
= control target key start
LH: loop header
LB: loop body
LE: loop exit
PB: predicated region body
PF: predicated region fallthrough
CT: control target
= control target key end

     0   :  { %13 = vsyncpa [#allocation3], 0  ;;  %s20128_s0 = inlined_call_operand.vmem [shape: bf16[2,400,256], index: 0, kind: input, shape index: {}]   ;;  %s20129_s1 = inlined_call_operand.vmem [shape: bf16[256,32], index: 1, kind: input, shape index: {}]   ;;  %s20130_s2 = inlined_call_operand.vmem [shape: bf16[16,81,400], index: 2, kind: input, shape index: {}]   ;;  %s20131_s3 = inlined_call_operand.vmem [shape: bf16[16,32,64], index: 3, kind: input, shape index: {}]   ;;  %s20132_s4 = inlined_call_operand.vmem [shape: bf16[9,49,81], index: 4, kind: input, shape index: {}]   ;;  %s20133_s5 = inlined_call_operand.vmem [shape: bf16[9,64,32], index: 5, kind: input, shape index: {}]   ;;  %s20134_s6 = inlined_call_operand.vmem [shape: bf16[1568,32], index: 6, kind: input, shape index: {}]   ;;  %s20135_s7 = inlined_call_operand.vmem [shape: bf16[32,6], index: 7, kind: input, shape index: {}]   ;;  %s20136_s8 = inlined_call_operand.hbm [shape: f32[2,1,6], index: 8, kind: output, shape index: {}]  }
   0x1   :  { %15 = vsyncpa [#allocation3 + $0x1], 0  ;;  %s16143_s27 = smov 0   ;;  %s16145_s28 = smov 0  }
   0x2   :  { %s16147_s29 = smov 0   ;;  %s16149_s30 = smov 0  }
   0x3 LB: > { %s16164_s9 = sadd.s32 4294967295, %s16089_s30   ;;  %s11510_s10 = sadd.s32 4294967294, %s16089_s30   ;;  %s16089_s30 = sphi %s16149_s30, %s20271_s30   ;;  %s16085_s29 = sphi %s16147_s29, %s20270_s29   ;;  %s16081_s28 = sphi %s16145_s28, %s20269_s28   ;;  %s16077_s27 = sphi %s16143_s27, %s20268_s27  }
   0x4   : > { %s16168_s11 = sadd.s32 1, %s16089_s30   ;;  %s201_s12 = sadd.s32 1, %s16085_s29 }
   0x5   : > { %s198_s13 = ssub.s32 %s16089_s30, %s16168_s11  ;;  %p211_p0 = scmp.ne.s32.totalorder %s16085_s29, %s16081_s28 }
   0x6   : > { %p199_p1 = scmp.eq.s32.totalorder %s198_s13, 0  ;;  %p212_p2 = scmp.eq.s32.totalorder %s16164_s9, 1 }
   0x7   : > { %p217_p3 = scmp.ne.s32.totalorder %s16081_s28, %s16077_s27  ;;  %p218_p4 = scmp.eq.s32.totalorder %s11510_s10, 1 }
   0x8   : > { %s16179_s14 = scalar_select %p199_p1, %s16085_s29, %s201_s12  }
   0x9   : > { %p16181_p5 = por %p212_p2, %p211_p0  ;;  %p16185_p6 = por %p218_p4, %p217_p3 }
   0xa   : > { %p11513_p7 = scmp.ge.s32.totalorder %s16089_s30, 1  ;;  %p265_p8 = scmp.lt.s32.totalorder %s16089_s30, 3 }
   0xc   : > { %p266_p9 = pnand %p11513_p7, %p265_p8 }
   0xe   : > { %269 = sbr.rel (%p266_p9) target bundleno = 5670 (0x1626), region = 52 }
  0x15   : > { %v15184_v0 = vld [vmem:[%s20129_s1] sm:$0xff]   ;;  %v20137_v1 = vmov 0   ;;  %v15185_v2 = vld [vmem:[%s20129_s1 + $0x8] sm:$0xff]   ;;  %p298_p10 = scmp.lt.s32.totalorder %s16164_s9, 1  ;;  %v15186_v3 = vld [vmem:[%s20129_s1 + $0x10] sm:$0xff]   ;;  %vm1170_vm0 = vcmask 130048  }
  0x16   : > { %732 = vmatprep.subr.bf16.mxu0 %v20137_v1  ;;  %v15187_v4 = vld [vmem:[%s20129_s1 + $0x18] sm:$0xff]   ;;  %v15188_v5 = vld [vmem:[%s20129_s1 + $0x20] sm:$0xff]   ;;  %v15189_v7 = vld [vmem:[%s20129_s1 + $0x28] sm:$0xff]   ;;  %vm1691_vm1 = vcmask 261120   ;;  %vm8116_vm2 = vcmask 662528   ;;  %vm8129_vm3 = vcmask 1040384  }
  0x17   : > { %733 = vmatpush1.bf16.msra.mxu0 %v15184_v0  ;;  %s299_s23 = scalar_select %p298_p10, %s16164_s9, 1  ;;  %v15190_v8 = vld [vmem:[%s20129_s1 + $0x30] sm:$0xff]   ;;  %v15191_v9 = vld [vmem:[%s20129_s1 + $0x38] sm:$0xff]   ;;  %v15192_v10 = vld [vmem:[%s20129_s1 + $0x40] sm:$0xff]   ;;  %vm8350_vm4 = vcmask 523264   ;;  %vm10144_vm5 = vcmask 785408  }
  0x18   : > { %734 = vmatprep.subr.bf16.mxu0 %v20137_v1  ;;  %v15193_v11 = vld [vmem:[%s20129_s1 + $0x48] sm:$0xff]   ;;  %v15194_v12 = vld [vmem:[%s20129_s1 + $0x50] sm:$0xff]   ;;  %v15195_v13 = vld [vmem:[%s20129_s1 + $0x58] sm:$0xff]   ;;  %s16093_s19 = smov 32   ;;  %vm16096_vm6 = vmmov 0   ;;  %vm11428_vm7 = vcmask 40960  }
  0x19   : > { %s15048_s26 = smul.u32 400, %s299_s23  ;;  %v15196_v14 = vld [vmem:[%s20129_s1 + $0x60] sm:$0xff]   ;;  %v15197_v15 = vld [vmem:[%s20129_s1 + $0x68] sm:$0xff]   ;;  %v15198_v16 = vld [vmem:[%s20129_s1 + $0x70] sm:$0xff]   ;;  %s16094_s23 = smov 64  }
  0x1a   : > { %v15199_v17 = vld [vmem:[%s20129_s1 + $0x78] sm:$0xff]   ;;  %s12945_s10 = sshll.u32 %s16164_s9, 4  ;;  %s16097_s9 = smov [#allocation2]  }
  0x1b   : > { %735 = vmatpush1.bf16.msra.mxu0 %v15185_v2  ;;  %s16215_s18 = scalar_lea.vmem %s20128_s0, %s15048_s26  ;;  %s16092_s26 = smov 96  }
  0x1c   : > { %736 = vmatprep.subr.bf16.mxu0 %v20137_v1  ;;  %v15202_v6 = vld [vmem:[%s16215_s18 + $0x4] ss:$8 sps:$4 sm:$0xff]   ;;  %v15200_v18 = vld [vmem:[%s16215_s18] ss:$8 sps:$4 sm:$0xff]   ;;  %v15203_v19 = vld [vmem:[%s16215_s18 + $0x14] ss:$8 sps:$4 sm:$0xff]   ;;  %s20085_s20 = scalar_lea.hbm %s20136_s8, %s12945_s10 }
  0x1d   : > { %764 = vmatprep.mubr.bf16.mxu0 %v15202_v6  ;;  %v15205_v20 = vld [vmem:[%s16215_s18 + $0x10] ss:$8 sps:$4 sm:$0xff]   ;;  %v15206_v21 = vld [vmem:[%s16215_s18 + $0x24] ss:$8 sps:$4 sm:$0xff]   ;;  %v15208_v22 = vld [vmem:[%s16215_s18 + $0x20] ss:$8 sps:$4 sm:$0xff]  }
  0x1e   : > { %v15209_v23 = vld [vmem:[%s16215_s18 + $0x34] ss:$8 sps:$4 sm:$0xff]   ;;  %v15211_v24 = vld [vmem:[%s16215_s18 + $0x30] ss:$8 sps:$4 sm:$0xff]   ;;  %v15212_v25 = vld [vmem:[%s16215_s18 + $0x44] ss:$8 sps:$4 sm:$0xff]  }
  0x1f   : > { %737 = vmatpush1.bf16.msra.mxu0 %v15186_v3  ;;  %v15214_v26 = vld [vmem:[%s16215_s18 + $0x40] ss:$8 sps:$4 sm:$0xff]   ;;  %v15215_v27 = vld [vmem:[%s16215_s18 + $0x54] ss:$8 sps:$4 sm:$0xff]   ;;  %v15217_v28 = vld [vmem:[%s16215_s18 + $0x50] ss:$8 sps:$4 sm:$0xff]  }
  0x20   : > { %738 = vmatprep.subr.bf16.mxu0 %v20137_v1  ;;  %v15218_v29 = vld [vmem:[%s16215_s18 + $0x64] ss:$8 sps:$4 sm:$0xff]   ;;  %v15220_v30 = vld [vmem:[%s16215_s18 + $0x60] ss:$8 sps:$4 sm:$0xff]   ;;  %v15221_v31 = vld [vmem:[%s16215_s18 + $0x74] ss:$8 sps:$4 sm:$0xff]  }
  0x21   : > { %v15223_v32 = vld [vmem:[%s16215_s18 + $0x70] ss:$8 sps:$4 sm:$0xff]   ;;  %v15224_v33 = vld [vmem:[%s16215_s18 + $0x84] ss:$8 sps:$4 sm:$0xff]   ;;  %v15226_v34 = vld [vmem:[%s16215_s18 + $0x80] ss:$8 sps:$4 sm:$0xff]  }
  0x22   : > { %v15227_v35 = vld [vmem:[%s16215_s18 + $0x94] ss:$8 sps:$4 sm:$0xff]   ;;  %v15229_v36 = vld [vmem:[%s16215_s18 + $0x90] ss:$8 sps:$4 sm:$0xff]   ;;  %v15230_v37 = vld [vmem:[%s16215_s18 + $0xa4] ss:$8 sps:$4 sm:$0xff]  }
  0x23   : > { %739 = vmatpush1.bf16.msra.mxu0 %v15187_v4  ;;  %v15232_v38 = vld [vmem:[%s16215_s18 + $0xa0] ss:$8 sps:$4 sm:$0xff]   ;;  %v15233_v39 = vld [vmem:[%s16215_s18 + $0xb4] ss:$8 sps:$4 sm:$0xff]   ;;  %v15235_v40 = vld [vmem:[%s16215_s18 + $0xb0] ss:$8 sps:$4 sm:$0xff]  }
  0x24   : > { %740 = vmatprep.subr.bf16.mxu0 %v20137_v1  ;;  %v15236_v41 = vld [vmem:[%s16215_s18 + $0xc4] ss:$8 sps:$4 sm:$0xff]   ;;  %v15238_v42 = vld [vmem:[%s16215_s18 + $0xc0] ss:$8 sps:$4 sm:$0xff]   ;;  %v15239_v43 = vld [vmem:[%s16215_s18 + $0xd4] ss:$8 sps:$4 sm:$0xff]  }
  0x25   : > { %v15241_v44 = vld [vmem:[%s16215_s18 + $0xd0] ss:$8 sps:$4 sm:$0xff]   ;;  %v15242_v45 = vld [vmem:[%s16215_s18 + $0xe4] ss:$8 sps:$4 sm:$0xff]   ;;  %v15244_v46 = vld [vmem:[%s16215_s18 + $0xe0] ss:$8 sps:$4 sm:$0xff]  }
  0x26   : > { %v15245_v47 = vld [vmem:[%s16215_s18 + $0xf4] ss:$8 sps:$4 sm:$0xff]   ;;  %v15247_v48 = vld [vmem:[%s16215_s18 + $0xf0] ss:$8 sps:$4 sm:$0xff]   ;;  %v15248_v49 = vld [vmem:[%s16215_s18 + $0x104] ss:$8 sps:$4 sm:$0xff]  }
  0x27   : > { %741 = vmatpush1.bf16.msra.mxu0 %v15188_v5  ;;  %v15250_v50 = vld [vmem:[%s16215_s18 + $0x100] ss:$8 sps:$4 sm:$0xff]   ;;  %v15251_v51 = vld [vmem:[%s16215_s18 + $0x114] ss:$8 sps:$4 sm:$0xff]   ;;  %v15253_v52 = vld [vmem:[%s16215_s18 + $0x110] ss:$8 sps:$4 sm:$0xff]  }
  0x28   : > { %742 = vmatprep.subr.bf16.mxu0 %v20137_v1  ;;  %v15254_v53 = vld [vmem:[%s16215_s18 + $0x124] ss:$8 sps:$4 sm:$0xff]   ;;  %v15256_v54 = vld [vmem:[%s16215_s18 + $0x120] ss:$8 sps:$4 sm:$0xff]   ;;  %v15257_v55 = vld [vmem:[%s16215_s18 + $0x134] ss:$8 sps:$4 sm:$0xff]  }
  0x29   : > { %v15259_v56 = vld [vmem:[%s16215_s18 + $0x130] ss:$8 sps:$4 sm:$0xff]   ;;  %v15260_v57 = vld [vmem:[%s16215_s18 + $0x144] ss:$8 sps:$4 sm:$0xff]   ;;  %v15262_v58 = vld [vmem:[%s16215_s18 + $0x140] ss:$8 sps:$4 sm:$0xff]  }
  0x2a   : > { %v15263_v59 = vld [vmem:[%s16215_s18 + $0x154] ss:$8 sps:$4 sm:$0xff]   ;;  %v15265_v60 = vld [vmem:[%s16215_s18 + $0x150] ss:$8 sps:$4 sm:$0xff]   ;;  %v15266_v61 = vld [vmem:[%s16215_s18 + $0x164] ss:$8 sps:$4 sm:$0xff]  }
  0x2b   : > { %743 = vmatpush1.bf16.msra.mxu0 %v15189_v7  ;;  %v15268_v62 = vld [vmem:[%s16215_s18 + $0x160] ss:$8 sps:$4 sm:$0xff]   ;;  %v15269_v63 = vld [vmem:[%s16215_s18 + $0x174] ss:$8 sps:$4 sm:$0xff]   ;;  %v15271_v0 = vld [vmem:[%s16215_s18 + $0x170] ss:$8 sps:$4 sm:$0xff]  }
  0x2c   : > { %744 = vmatprep.subr.bf16.mxu0 %v20137_v1  ;;  %v15272_v2 = vld [vmem:[%s16215_s18 + $0x184] ss:$8 sps:$4 sm:$0xff]   ;;  %v15274_v3 = vld [vmem:[%s16215_s18 + $0x180] ss:$8 sps:$4 sm:$0xff]   ;;  %s16031_s22 = sshll.u32 %s16097_s9, 4  ;;  %s16032_s22 = int_to_ptr.vmem [resolvable:$false] %s16031_s22 }
  0x2d   : > { %v15277_v5 = vld [vmem:[%s20130_s2 + $0x164] ss:$16 sps:$4 sm:$0xff]  }
  0x2f   : > { %745 = vmatpush1.bf16.msra.mxu0 %v15190_v8 }
  0x30   : > { %746 = vmatprep.subr.bf16.mxu0 %v20137_v1 }
  0x33   : > { %747 = vmatpush1.bf16.msra.mxu0 %v15191_v9 }
  0x34   : > { %748 = vmatprep.subr.bf16.mxu0 %v20137_v1 }
  0x37   : > { %749 = vmatpush1.bf16.msra.mxu0 %v15192_v10 }
  0x38   : > { %750 = vmatprep.subr.bf16.mxu0 %v20137_v1 }
  0x3b   : > { %751 = vmatpush1.bf16.msra.mxu0 %v15193_v11  ;;  %v15280_v11 = vld [vmem:[%s20130_s2 + $0x4] ss:$16 sps:$4 sm:$0xff]  }
  0x3c   : > { %752 = vmatprep.subr.bf16.mxu0 %v20137_v1  ;;  %1221 = vmatprep.mubr.bf16.mxu1 %v15280_v11 }
  0x3f   : > { %753 = vmatpush1.bf16.msra.mxu0 %v15194_v12 }
  0x40   : > { %754 = vmatprep.subr.bf16.mxu0 %v20137_v1 }
  0x43   : > { %755 = vmatpush1.bf16.msra.mxu0 %v15195_v13 }
  0x44   : > { %756 = vmatprep.subr.bf16.mxu0 %v20137_v1 }
  0x47   : > { %757 = vmatpush1.bf16.msra.mxu0 %v15196_v14 }
  0x48   : > { %758 = vmatprep.subr.bf16.mxu0 %v20137_v1 }
  0x4b   : > { %759 = vmatpush1.bf16.msra.mxu0 %v15197_v15 }
  0x4c   : > { %760 = vmatprep.subr.bf16.mxu0 %v20137_v1 }
  0x4f   : > { %761 = vmatpush1.bf16.msra.mxu0 %v15198_v16 }
  0x50   : > { %762 = vmatprep.subr.bf16.mxu0 %v20137_v1 }
  0x53   : > { %763 = vmatpush1.bf16.msra.mxu0 %v15199_v17 }
  0x56   : > { %765 = vmatmul.mubr.bf16.vlgmr.msra.gmra.mrb[0].mxu0 %v15200_v18 }
  0x57   : > { %772 = vmatprep.mubr.bf16.mxu0 %v15203_v19 }
  0x5e   : > { %773 = vmatmul.mubr.bf16.gmra.mrb[4].mxu0 %v15205_v20 }
  0x5f   : > { %780 = vmatprep.mubr.bf16.mxu0 %v15206_v21 }
  0x66   : > { %781 = vmatmul.mubr.bf16.gmra.mrb[8].mxu0 %v15208_v22 }
  0x67   : > { %788 = vmatprep.mubr.bf16.mxu0 %v15209_v23 }
  0x6e   : > { %789 = vmatmul.mubr.bf16.gmra.mrb[12].mxu0 %v15211_v24 }
  0x6f   : > { %796 = vmatprep.mubr.bf16.mxu0 %v15212_v25 }
  0x76   : > { %797 = vmatmul.mubr.bf16.gmra.mrb[16].mxu0 %v15214_v26 }
  0x77   : > { %804 = vmatprep.mubr.bf16.mxu0 %v15215_v27 }
  0x7e   : > { %805 = vmatmul.mubr.bf16.gmra.mrb[20].mxu0 %v15217_v28 }
  0x7f   : > { %812 = vmatprep.mubr.bf16.mxu0 %v15218_v29 }
  0x86   : > { %813 = vmatmul.mubr.bf16.gmra.mrb[24].mxu0 %v15220_v30 }
  0x87   : > { %820 = vmatprep.mubr.bf16.mxu0 %v15221_v31 }
  0x8e   : > { %821 = vmatmul.mubr.bf16.gmra.mrb[28].mxu0 %v15223_v32 }
  0x8f   : > { %828 = vmatprep.mubr.bf16.mxu0 %v15224_v33 }
  0x96   : > { %829 = vmatmul.mubr.bf16.gmra.mrb[32].mxu0 %v15226_v34 }
  0x97   : > { %836 = vmatprep.mubr.bf16.mxu0 %v15227_v35 }
  0x9e   : > { %837 = vmatmul.mubr.bf16.gmra.mrb[36].mxu0 %v15229_v36 }
  0x9f   : > { %844 = vmatprep.mubr.bf16.mxu0 %v15230_v37 }
  0xa6   : > { %845 = vmatmul.mubr.bf16.gmra.mrb[40].mxu0 %v15232_v38 }
  0xa7   : > { %852 = vmatprep.mubr.bf16.mxu0 %v15233_v39 }
  0xae   : > { %853 = vmatmul.mubr.bf16.gmra.mrb[44].mxu0 %v15235_v40 }
  0xaf   : > { %860 = vmatprep.mubr.bf16.mxu0 %v15236_v41 }
  0xb6   : > { %861 = vmatmul.mubr.bf16.gmra.mrb[48].mxu0 %v15238_v42 }
  0xb7   : > { %868 = vmatprep.mubr.bf16.mxu0 %v15239_v43 }
  0xbe   : > { %869 = vmatmul.mubr.bf16.gmra.mrb[52].mxu0 %v15241_v44 }
  0xbf   : > { %876 = vmatprep.mubr.bf16.mxu0 %v15242_v45 }
  0xc6   : > { %877 = vmatmul.mubr.bf16.gmra.mrb[56].mxu0 %v15244_v46 }
  0xc7   : > { %884 = vmatprep.mubr.bf16.mxu0 %v15245_v47 }
  0xce   : > { %885 = vmatmul.mubr.bf16.gmra.mrb[60].mxu0 %v15247_v48 }
  0xcf   : > { %892 = vmatprep.mubr.bf16.mxu0 %v15248_v49 }
  0xd6   : > { %893 = vmatmul.mubr.bf16.gmra.mrb[64].mxu0 %v15250_v50 }
  0xd7   : > { %900 = vmatprep.mubr.bf16.mxu0 %v15251_v51 }
  0xde   : > { %901 = vmatmul.mubr.bf16.gmra.mrb[68].mxu0 %v15253_v52 }
  0xdf   : > { %908 = vmatprep.mubr.bf16.mxu0 %v15254_v53 }
  0xe6   : > { %909 = vmatmul.mubr.bf16.gmra.mrb[72].mxu0 %v15256_v54 }
  0xe7   : > { %916 = vmatprep.mubr.bf16.mxu0 %v15257_v55 }
  0xee   : > { %917 = vmatmul.mubr.bf16.gmra.mrb[76].mxu0 %v15259_v56 }
  0xef   : > { %924 = vmatprep.mubr.bf16.mxu0 %v15260_v57 }
  0xf6   : > { %925 = vmatmul.mubr.bf16.gmra.mrb[80].mxu0 %v15262_v58 }
  0xf7   : > { %932 = vmatprep.mubr.bf16.mxu0 %v15263_v59 }
  0xfe   : > { %933 = vmatmul.mubr.bf16.gmra.mrb[84].mxu0 %v15265_v60 }
  0xff   : > { %940 = vmatprep.mubr.bf16.mxu0 %v15266_v61 }
 0x106   : > { %941 = vmatmul.mubr.bf16.gmra.mrb[88].mxu0 %v15268_v62 }
 0x107   : > { %948 = vmatprep.mubr.bf16.mxu0 %v15269_v63 }
 0x10e   : > { %949 = vmatmul.mubr.bf16.gmra.mrb[92].mxu0 %v15271_v0 }
 0x10f   : > { %956 = vmatprep.mubr.bf16.mxu0 %v15272_v2 }
 0x116   : > { %957 = vmatmul.mubr.bf16.gmra.mrb[96].mxu0 %v15274_v3 }
 0x117   : > { %2081 = vmatprep.mubr.bf16.mxu0 %v15277_v5 }
 0x129   : > { %v766_v4 = vpop.f32.mrb[0].mxu0 }
 0x12a   : > { %v768_v6 = vpop.f32.mrb[1].mxu0  ;;  %v965_v7 = vmax.f32 %v766_v4, 0.0 }
 0x12b   : > { %v769_v8 = vpop.f32.mrb[2].mxu0 }
 0x12c   : > { %v966_v9 = vmax.f32 %v769_v8, 0.0  ;;  %v771_v10 = vpop.f32.mrb[3].mxu0 }
 0x12e   : > { %v16318_v12 = vpack.c.bf16 %v966_v9, %v965_v7 }
 0x130   : > { %20157 = vst [vmem:[#allocation5_spill] sm:$0xff] %v16318_v12 }
 0x131   : > { %v774_v13 = vpop.f32.mrb[4].mxu0 }
 0x132   : > { %v776_v14 = vpop.f32.mrb[5].mxu0  ;;  %v967_v15 = vmax.f32 %v774_v13, 0.0 }
 0x133   : > { %v777_v16 = vpop.f32.mrb[6].mxu0 }
 0x134   : > { %v968_v17 = vmax.f32 %v777_v16, 0.0  ;;  %v779_v18 = vpop.f32.mrb[7].mxu0 }
 0x136   : > { %v16320_v19 = vpack.c.bf16 %v968_v17, %v967_v15 }
 0x138   : > { %20158 = vst [vmem:[#allocation6_spill] sm:$0xff] %v16320_v19 }
 0x139   : > { %v782_v20 = vpop.f32.mrb[8].mxu0 }
 0x13a   : > { %v784_v21 = vpop.f32.mrb[9].mxu0  ;;  %v969_v23 = vmax.f32 %v782_v20, 0.0 }
 0x13b   : > { %v785_v22 = vpop.f32.mrb[10].mxu0 }
 0x13c   : > { %v970_v24 = vmax.f32 %v785_v22, 0.0  ;;  %v787_v25 = vpop.f32.mrb[11].mxu0 }
 0x13e   : > { %v16322_v26 = vpack.c.bf16 %v970_v24, %v969_v23 }
 0x140   : > { %20159 = vst [vmem:[#allocation7_spill] sm:$0xff] %v16322_v26 }
 0x141   : > { %v790_v27 = vpop.f32.mrb[12].mxu0 }
 0x142   : > { %v792_v28 = vpop.f32.mrb[13].mxu0  ;;  %v971_v30 = vmax.f32 %v790_v27, 0.0 }
 0x143   : > { %v793_v29 = vpop.f32.mrb[14].mxu0 }
 0x144   : > { %v972_v31 = vmax.f32 %v793_v29, 0.0  ;;  %v795_v32 = vpop.f32.mrb[15].mxu0 }
 0x146   : > { %v16324_v33 = vpack.c.bf16 %v972_v31, %v971_v30 }
 0x148   : > { %20160 = vst [vmem:[#allocation8_spill] sm:$0xff] %v16324_v33 }
 0x149   : > { %v798_v34 = vpop.f32.mrb[16].mxu0 }
 0x14a   : > { %v800_v35 = vpop.f32.mrb[17].mxu0  ;;  %v973_v37 = vmax.f32 %v798_v34, 0.0 }
 0x14b   : > { %v801_v36 = vpop.f32.mrb[18].mxu0 }
 0x14c   : > { %v974_v38 = vmax.f32 %v801_v36, 0.0  ;;  %v803_v39 = vpop.f32.mrb[19].mxu0 }
 0x14e   : > { %v16326_v40 = vpack.c.bf16 %v974_v38, %v973_v37 }
 0x150   : > { %20161 = vst [vmem:[#allocation9_spill] sm:$0xff] %v16326_v40 }
 0x151   : > { %v806_v41 = vpop.f32.mrb[20].mxu0 }
 0x152   : > { %v808_v42 = vpop.f32.mrb[21].mxu0  ;;  %v975_v44 = vmax.f32 %v806_v41, 0.0 }
 0x153   : > { %v809_v43 = vpop.f32.mrb[22].mxu0 }
 0x154   : > { %v976_v45 = vmax.f32 %v809_v43, 0.0  ;;  %v811_v46 = vpop.f32.mrb[23].mxu0 }
 0x156   : > { %v16328_v47 = vpack.c.bf16 %v976_v45, %v975_v44 }
 0x158   : > { %20162 = vst [vmem:[#allocation10_spill] sm:$0xff] %v16328_v47 }
 0x159   : > { %v814_v48 = vpop.f32.mrb[24].mxu0 }
 0x15a   : > { %v816_v49 = vpop.f32.mrb[25].mxu0  ;;  %v977_v51 = vmax.f32 %v814_v48, 0.0 }
 0x15b   : > { %v817_v50 = vpop.f32.mrb[26].mxu0 }
 0x15c   : > { %v978_v52 = vmax.f32 %v817_v50, 0.0  ;;  %v819_v53 = vpop.f32.mrb[27].mxu0 }
 0x15e   : > { %v16330_v54 = vpack.c.bf16 %v978_v52, %v977_v51 }
 0x160   : > { %20163 = vst [vmem:[#allocation11_spill] sm:$0xff] %v16330_v54 }
 0x161   : > { %v822_v55 = vpop.f32.mrb[28].mxu0 }
 0x162   : > { %v824_v56 = vpop.f32.mrb[29].mxu0  ;;  %v979_v58 = vmax.f32 %v822_v55, 0.0 }
 0x163   : > { %v825_v57 = vpop.f32.mrb[30].mxu0 }
 0x164   : > { %v980_v59 = vmax.f32 %v825_v57, 0.0  ;;  %v827_v60 = vpop.f32.mrb[31].mxu0 }
 0x166   : > { %v16332_v61 = vpack.c.bf16 %v980_v59, %v979_v58 }
 0x168   : > { %20164 = vst [vmem:[#allocation12_spill] sm:$0xff] %v16332_v61 }
 0x169   : > { %v830_v62 = vpop.f32.mrb[32].mxu0 }
 0x16a   : > { %v832_v63 = vpop.f32.mrb[33].mxu0  ;;  %v981_v2 = vmax.f32 %v830_v62, 0.0 }
 0x16b   : > { %v833_v0 = vpop.f32.mrb[34].mxu0  ;;  %v15275_v63 = vld [vmem:[%s20130_s2 + $0x160] ss:$16 sps:$4 sm:$0xff]  }
 0x16c   : > { %v982_v3 = vmax.f32 %v833_v0, 0.0  ;;  %v835_v4 = vpop.f32.mrb[35].mxu0  ;;  %v15278_v0 = vld [vmem:[%s20130_s2] ss:$16 sps:$4 sm:$0xff]  }
 0x16e   : > { %v16334_v5 = vpack.c.bf16 %v982_v3, %v981_v2  ;;  %v15281_v3 = vld [vmem:[%s20130_s2 + $0x184] ss:$16 sps:$4 sm:$0xff]  }
 0x170   : > { %20165 = vst [vmem:[#allocation13_spill] sm:$0xff] %v16334_v5  ;;  %12948 = vmatprep.subr.bf16.mxu1 %v16334_v5  ;;  %13068 = vmatprep.subr.bf16.mxu0 %v16334_v5 }
 0x171   : > { %v838_v6 = vpop.f32.mrb[36].mxu0  ;;  %12949 = vmatpush3.bf16.msra.mxu1 %v16318_v12  ;;  %13069 = vmatpush3.bf16.msra.mxu0 %v16318_v12 }
 0x172   : > { %v840_v7 = vpop.f32.mrb[37].mxu0  ;;  %v983_v9 = vmax.f32 %v838_v6, 0.0  ;;  %v15290_v6 = vld [vmem:[%s20130_s2 + $0x24] ss:$16 sps:$4 sm:$0xff]  }
 0x173   : > { %v841_v8 = vpop.f32.mrb[38].mxu0 }
 0x174   : > { %v984_v10 = vmax.f32 %v841_v8, 0.0  ;;  %v843_v11 = vpop.f32.mrb[39].mxu0 }
 0x176   : > { %v16340_v13 = vpack.c.bf16 %v984_v10, %v983_v9 }
 0x178   : > { %20166 = vst [vmem:[#allocation14_spill] sm:$0xff] %v16340_v13  ;;  %12950 = vmatprep.subr.bf16.mxu1 %v16340_v13  ;;  %13070 = vmatprep.subr.bf16.mxu0 %v16340_v13 }
 0x179   : > { %v846_v14 = vpop.f32.mrb[40].mxu0  ;;  %12951 = vmatpush3.bf16.msra.mxu1 %v16320_v19  ;;  %13071 = vmatpush3.bf16.msra.mxu0 %v16320_v19 }
 0x17a   : > { %v848_v15 = vpop.f32.mrb[41].mxu0  ;;  %v985_v17 = vmax.f32 %v846_v14, 0.0  ;;  %v15283_v14 = vld [vmem:[%s20130_s2 + $0x180] ss:$16 sps:$4 sm:$0xff]  }
 0x17b   : > { %v849_v16 = vpop.f32.mrb[42].mxu0  ;;  %v15292_v15 = vld [vmem:[%s20130_s2 + $0x20] ss:$16 sps:$4 sm:$0xff]  }
 0x17c   : > { %v986_v18 = vmax.f32 %v849_v16, 0.0  ;;  %v851_v20 = vpop.f32.mrb[43].mxu0 }
 0x17d   : > { %v15296_v20 = vld [vmem:[%s20130_s2 + $0x44] ss:$16 sps:$4 sm:$0xff]  }
 0x17e   : > { %v16346_v21 = vpack.c.bf16 %v986_v18, %v985_v17  ;;  %v15284_v17 = vld [vmem:[%s20130_s2 + $0x1a4] ss:$16 sps:$4 sm:$0xff]  }
 0x180   : > { %20167 = vst [vmem:[#allocation15_spill] sm:$0xff] %v16346_v21  ;;  %12952 = vmatprep.subr.bf16.mxu1 %v16346_v21  ;;  %13072 = vmatprep.subr.bf16.mxu0 %v16346_v21 }
 0x181   : > { %v854_v22 = vpop.f32.mrb[44].mxu0  ;;  %12953 = vmatpush3.bf16.msra.mxu1 %v16322_v26  ;;  %13073 = vmatpush3.bf16.msra.mxu0 %v16322_v26 }
 0x182   : > { %v856_v23 = vpop.f32.mrb[45].mxu0  ;;  %v987_v25 = vmax.f32 %v854_v22, 0.0 }
 0x183   : > { %v857_v24 = vpop.f32.mrb[46].mxu0 }
 0x184   : > { %v988_v27 = vmax.f32 %v857_v24, 0.0  ;;  %v859_v28 = vpop.f32.mrb[47].mxu0 }
 0x185   : > { %v15286_v28 = vld [vmem:[%s20130_s2 + $0x1a0] ss:$16 sps:$4 sm:$0xff]  }
 0x186   : > { %v16352_v29 = vpack.c.bf16 %v988_v27, %v987_v25 }
 0x188   : > { %20168 = vst [vmem:[#allocation16_spill] sm:$0xff] %v16352_v29  ;;  %12954 = vmatprep.subr.bf16.mxu1 %v16352_v29  ;;  %13074 = vmatprep.subr.bf16.mxu0 %v16352_v29 }
 0x189   : > { %v862_v30 = vpop.f32.mrb[48].mxu0  ;;  %12955 = vmatpush3.bf16.msra.mxu1 %v16324_v33  ;;  %13075 = vmatpush3.bf16.msra.mxu0 %v16324_v33 }
 0x18a   : > { %v864_v31 = vpop.f32.mrb[49].mxu0  ;;  %v989_v34 = vmax.f32 %v862_v30, 0.0  ;;  %v15298_v30 = vld [vmem:[%s20130_s2 + $0x40] ss:$16 sps:$4 sm:$0xff]  }
 0x18b   : > { %v865_v32 = vpop.f32.mrb[50].mxu0 }
 0x18c   : > { %v990_v35 = vmax.f32 %v865_v32, 0.0  ;;  %v867_v36 = vpop.f32.mrb[51].mxu0  ;;  %v15287_v32 = vld [vmem:[%s20130_s2 + $0x1c4] ss:$16 sps:$4 sm:$0xff]  }
 0x18e   : > { %v16358_v37 = vpack.c.bf16 %v990_v35, %v989_v34  ;;  %v15301_v35 = vld [vmem:[%s20130_s2 + $0x64] ss:$16 sps:$4 sm:$0xff]  }
 0x190   : > { %20169 = vst [vmem:[#allocation17_spill] sm:$0xff] %v16358_v37  ;;  %12956 = vmatprep.subr.bf16.mxu1 %v16358_v37  ;;  %13076 = vmatprep.subr.bf16.mxu0 %v16358_v37 }
 0x191   : > { %v870_v38 = vpop.f32.mrb[52].mxu0  ;;  %12957 = vmatpush3.bf16.msra.mxu1 %v16326_v40  ;;  %13077 = vmatpush3.bf16.msra.mxu0 %v16326_v40 }
 0x192   : > { %v872_v39 = vpop.f32.mrb[53].mxu0  ;;  %v991_v42 = vmax.f32 %v870_v38, 0.0 }
 0x193   : > { %v873_v41 = vpop.f32.mrb[54].mxu0 }
 0x194   : > { %v992_v43 = vmax.f32 %v873_v41, 0.0  ;;  %v875_v44 = vpop.f32.mrb[55].mxu0 }
 0x195   : > { %v15303_v44 = vld [vmem:[%s20130_s2 + $0x60] ss:$16 sps:$4 sm:$0xff]  }
 0x196   : > { %v16364_v45 = vpack.c.bf16 %v992_v43, %v991_v42  ;;  %v15289_v43 = vld [vmem:[%s20130_s2 + $0x1c0] ss:$16 sps:$4 sm:$0xff]  }
 0x198   : > { %20170 = vst [vmem:[#allocation18_spill] sm:$0xff] %v16364_v45  ;;  %12958 = vmatprep.subr.bf16.mxu1 %v16364_v45  ;;  %13078 = vmatprep.subr.bf16.mxu0 %v16364_v45 }
 0x199   : > { %v878_v46 = vpop.f32.mrb[56].mxu0  ;;  %12959 = vmatpush3.bf16.msra.mxu1 %v16328_v47  ;;  %13079 = vmatpush3.bf16.msra.mxu0 %v16328_v47 }
 0x19a   : > { %v880_v48 = vpop.f32.mrb[57].mxu0  ;;  %v993_v50 = vmax.f32 %v878_v46, 0.0 }
 0x19b   : > { %v881_v49 = vpop.f32.mrb[58].mxu0  ;;  %v15293_v48 = vld [vmem:[%s20130_s2 + $0x1e4] ss:$16 sps:$4 sm:$0xff]  }
 0x19c   : > { %v994_v51 = vmax.f32 %v881_v49, 0.0  ;;  %v883_v52 = vpop.f32.mrb[59].mxu0 }
 0x19e   : > { %v16370_v53 = vpack.c.bf16 %v994_v51, %v993_v50  ;;  %v15307_v50 = vld [vmem:[%s20130_s2 + $0x84] ss:$16 sps:$4 sm:$0xff]  }
 0x1a0   : > { %20171 = vst [vmem:[#allocation19_spill] sm:$0xff] %v16370_v53  ;;  %12960 = vmatprep.subr.bf16.mxu1 %v16370_v53  ;;  %13080 = vmatprep.subr.bf16.mxu0 %v16370_v53 }
 0x1a1   : > { %v886_v55 = vpop.f32.mrb[60].mxu0  ;;  %12961 = vmatpush3.bf16.msra.mxu1 %v16330_v54  ;;  %13081 = vmatpush3.bf16.msra.mxu0 %v16330_v54 }
 0x1a2   : > { %v888_v56 = vpop.f32.mrb[61].mxu0  ;;  %v995_v58 = vmax.f32 %v886_v55, 0.0 }
 0x1a3   : > { %v889_v57 = vpop.f32.mrb[62].mxu0 }
 0x1a4   : > { %v996_v59 = vmax.f32 %v889_v57, 0.0  ;;  %v891_v60 = vpop.f32.mrb[63].mxu0 }
 0x1a5   : > { %v15295_v60 = vld [vmem:[%s20130_s2 + $0x1e0] ss:$16 sps:$4 sm:$0xff]  }
 0x1a6   : > { %v16376_v62 = vpack.c.bf16 %v996_v59, %v995_v58  ;;  %v11703_v58 = vld [vmem:[%s20130_s2 + $0x200] sm:$0x11] }
 0x1a7   : > { %v1060_v59 = vld [vmem:[%s20130_s2 + $0xa0] sm:$0x11] }
 0x1a8   : > { %20172 = vst [vmem:[#allocation20_spill] sm:$0xff] %v16376_v62  ;;  %12962 = vmatprep.subr.bf16.mxu1 %v16376_v62  ;;  %13082 = vmatprep.subr.bf16.mxu0 %v16376_v62 }
 0x1a9   : > { %v894_v2 = vpop.f32.mrb[64].mxu0  ;;  %12963 = vmatpush3.bf16.msra.mxu1 %v16332_v61  ;;  %13083 = vmatpush3.bf16.msra.mxu0 %v16332_v61 }
 0x1aa   : > { %v896_v4 = vpop.f32.mrb[65].mxu0  ;;  %13128 = vmatprep.subr.bf16.mxu0 %v16334_v5  ;;  %1269 = vmatprep.subr.bf16.mxu1 %v20137_v1  ;;  %v997_v8 = vmax.f32 %v894_v2, 0.0  ;;  %v11726_v2 = vcombine.high %v11703_v58, %v11703_v58 }
 0x1ab   : > { %v897_v7 = vpop.f32.mrb[66].mxu0 }
 0x1ac   : > { %v998_v9 = vmax.f32 %v897_v7, 0.0  ;;  %v899_v10 = vpop.f32.mrb[67].mxu0  ;;  %2082 = vmatmul.mubr.bf16.vlgmr.msra.gmra.mrb[100].mxu0 %v15275_v63  ;;  %1222 = vmatmul.mubr.bf16.vlgmr.msra.gmra.mrb[0].mxu1 %v15278_v0  ;;  %v15309_v63 = vld [vmem:[%s20130_s2 + $0x80] ss:$16 sps:$4 sm:$0xff]  }
 0x1ad   : > { %13129 = vmatpush3.bf16.msra.mxu0 %v16318_v12  ;;  %2089 = vmatprep.mubr.bf16.mxu0 %v15281_v3  ;;  %v11602_v3 = vcombine.high %v1060_v59, %v1060_v59 }
 0x1ae   : > { %v16397_v11 = vpack.c.bf16 %v998_v9, %v997_v8  ;;  %13130 = vmatprep.subr.bf16.mxu0 %v16340_v13  ;;  %1229 = vmatprep.mubr.bf16.mxu1 %v15290_v6 }
 0x1b0   : > { %1270 = vmatpush1.bf16.msra.mxu1 %v16397_v11 }
 0x1b1   : > { %v902_v16 = vpop.f32.mrb[68].mxu0  ;;  %13131 = vmatpush3.bf16.msra.mxu0 %v16320_v19  ;;  %1271 = vmatprep.subr.bf16.mxu1 %v20137_v1 }
 0x1b2   : > { %v904_v18 = vpop.f32.mrb[69].mxu0  ;;  %13132 = vmatprep.subr.bf16.mxu0 %v16346_v21  ;;  %v999_v23 = vmax.f32 %v902_v16, 0.0 }
 0x1b3   : > { %v905_v22 = vpop.f32.mrb[70].mxu0  ;;  %v15320_v18 = vld [vmem:[%s20130_s2 + $0xc] ss:$16 sps:$4 sm:$0xff]  }
 0x1b4   : > { %v1000_v24 = vmax.f32 %v905_v22, 0.0  ;;  %v907_v25 = vpop.f32.mrb[71].mxu0  ;;  %2090 = vmatmul.mubr.bf16.gmra.mrb[104].mxu0 %v15283_v14  ;;  %1230 = vmatmul.mubr.bf16.gmra.mrb[4].mxu1 %v15292_v15  ;;  %v11725_v14 = vcombine.low %v11703_v58, %v11703_v58  ;;  %v11601_v15 = vcombine.low %v1060_v59, %v1060_v59  ;;  %v15321_v59 = vld [vmem:[%s20130_s2 + $0x274] ss:$16 sps:$4 sm:$0xff]  }
 0x1b5   : > { %13133 = vmatpush3.bf16.msra.mxu0 %v16322_v26  ;;  %2097 = vmatprep.mubr.bf16.mxu0 %v15284_v17  ;;  %v15306_v17 = vld [vmem:[%s20130_s2 + $0x214] ss:$16 sps:$4 sm:$0xff]  }
 0x1b6   : > { %v16417_v27 = vpack.c.bf16 %v1000_v24, %v999_v23  ;;  %13134 = vmatprep.subr.bf16.mxu0 %v16352_v29  ;;  %1237 = vmatprep.mubr.bf16.mxu1 %v15296_v20 }
 0x1b8   : > { %1272 = vmatpush1.bf16.msra.mxu1 %v16417_v27 }
 0x1b9   : > { %v910_v31 = vpop.f32.mrb[72].mxu0  ;;  %13135 = vmatpush3.bf16.msra.mxu0 %v16324_v33  ;;  %1273 = vmatprep.subr.bf16.mxu1 %v20137_v1 }
 0x1ba   : > { %v912_v34 = vpop.f32.mrb[73].mxu0  ;;  %13136 = vmatprep.subr.bf16.mxu0 %v16358_v37  ;;  %v1001_v38 = vmax.f32 %v910_v31, 0.0 }
 0x1bb   : > { %v913_v36 = vpop.f32.mrb[74].mxu0 }
 0x1bc   : > { %v1002_v39 = vmax.f32 %v913_v36, 0.0  ;;  %v915_v41 = vpop.f32.mrb[75].mxu0  ;;  %2098 = vmatmul.mubr.bf16.gmra.mrb[108].mxu0 %v15286_v28  ;;  %1238 = vmatmul.mubr.bf16.gmra.mrb[8].mxu1 %v15298_v30  ;;  %v15304_v30 = vld [vmem:[%s20130_s2 + $0x210] ss:$16 sps:$4 sm:$0xff]  }
 0x1bd   : > { %13137 = vmatpush3.bf16.msra.mxu0 %v16326_v40  ;;  %2105 = vmatprep.mubr.bf16.mxu0 %v15287_v32  ;;  %v15310_v32 = vld [vmem:[%s20130_s2 + $0x234] ss:$16 sps:$4 sm:$0xff]  }
 0x1be   : > { %v16437_v42 = vpack.c.bf16 %v1002_v39, %v1001_v38  ;;  %13138 = vmatprep.subr.bf16.mxu0 %v16364_v45  ;;  %1245 = vmatprep.mubr.bf16.mxu1 %v15301_v35 }
 0x1c0   : > { %1274 = vmatpush1.bf16.msra.mxu1 %v16437_v42 }
 0x1c1   : > { %v918_v46 = vpop.f32.mrb[76].mxu0  ;;  %13139 = vmatpush3.bf16.msra.mxu0 %v16328_v47  ;;  %1275 = vmatprep.subr.bf16.mxu1 %v20137_v1 }
 0x1c2   : > { %v920_v49 = vpop.f32.mrb[77].mxu0  ;;  %13140 = vmatprep.subr.bf16.mxu0 %v16370_v53  ;;  %v1003_v52 = vmax.f32 %v918_v46, 0.0  ;;  %v15315_v46 = vld [vmem:[%s20130_s2 + $0x254] ss:$16 sps:$4 sm:$0xff]  }
 0x1c3   : > { %v921_v51 = vpop.f32.mrb[78].mxu0 }
 0x1c4   : > { %v1004_v55 = vmax.f32 %v921_v51, 0.0  ;;  %v923_v56 = vpop.f32.mrb[79].mxu0  ;;  %2106 = vmatmul.mubr.bf16.gmra.mrb[112].mxu0 %v15289_v43  ;;  %1246 = vmatmul.mubr.bf16.gmra.mrb[12].mxu1 %v15303_v44  ;;  %v15312_v43 = vld [vmem:[%s20130_s2 + $0x230] ss:$16 sps:$4 sm:$0xff]  }
 0x1c5   : > { %13141 = vmatpush3.bf16.msra.mxu0 %v16330_v54  ;;  %2113 = vmatprep.mubr.bf16.mxu0 %v15293_v48  ;;  %v15317_v56 = vld [vmem:[%s20130_s2 + $0x250] ss:$16 sps:$4 sm:$0xff]  }
 0x1c6   : > { %v16457_v57 = vpack.c.bf16 %v1004_v55, %v1003_v52  ;;  %13142 = vmatprep.subr.bf16.mxu0 %v16376_v62  ;;  %1253 = vmatprep.mubr.bf16.mxu1 %v15307_v50 }
 0x1c8   : > { %1276 = vmatpush1.bf16.msra.mxu1 %v16457_v57 }
 0x1c9   : > { %v926_v0 = vpop.f32.mrb[80].mxu0  ;;  %13143 = vmatpush3.bf16.msra.mxu0 %v16332_v61  ;;  %1277 = vmatprep.subr.bf16.mxu1 %v20137_v1 }
 0x1ca   : > { %v928_v4 = vpop.f32.mrb[81].mxu0  ;;  %2570 = vmatprep.subr.bf16.mxu0 %v20137_v1  ;;  %v1005_v7 = vmax.f32 %v926_v0, 0.0 }
 0x1cb   : > { %v929_v6 = vpop.f32.mrb[82].mxu0 }
 0x1cc   : > { %v1006_v8 = vmax.f32 %v929_v6, 0.0  ;;  %v931_v9 = vpop.f32.mrb[83].mxu0  ;;  %2114 = vmatmul.mubr.bf16.gmra.mrb[116].mxu0 %v15295_v60  ;;  %1254 = vmatmul.mubr.bf16.gmra.mrb[16].mxu1 %v15309_v63  ;;  %v15318_v6 = vld [vmem:[%s20130_s2 + $0x8] ss:$16 sps:$4 sm:$0xff]  }
 0x1cd   : > { %2121 = vmatprep.mubr.bf16.mxu0 %v11726_v2  ;;  %1261 = vmatprep.mubr.bf16.mxu1 %v11602_v3  ;;  %v15327_v9 = vld [vmem:[%s20130_s2 + $0x294] ss:$16 sps:$4 sm:$0xff]  }
 0x1ce   : > { %v16476_v10 = vpack.c.bf16 %v1006_v8, %v1005_v7  ;;  %v15323_v7 = vld [vmem:[%s20130_s2 + $0x270] ss:$16 sps:$4 sm:$0xff]   ;;  %v15324_v8 = vld [vmem:[%s20130_s2 + $0x2c] ss:$16 sps:$4 sm:$0xff]  }
 0x1d0   : > { %1278 = vmatpush1.bf16.msra.mxu1 %v16476_v10 }
 0x1d1   : > { %v934_v16 = vpop.f32.mrb[84].mxu0  ;;  %1279 = vmatprep.subr.bf16.mxu1 %v20137_v1 }
 0x1d2   : > { %v936_v20 = vpop.f32.mrb[85].mxu0  ;;  %v1007_v23 = vmax.f32 %v934_v16, 0.0  ;;  %v15329_v16 = vld [vmem:[%s20130_s2 + $0x290] ss:$16 sps:$4 sm:$0xff]  }
 0x1d3   : > { %v937_v22 = vpop.f32.mrb[86].mxu0  ;;  %v15332_v20 = vld [vmem:[%s20130_s2 + $0x48] ss:$16 sps:$4 sm:$0xff]  }
 0x1d4   : > { %v1008_v24 = vmax.f32 %v937_v22, 0.0  ;;  %v939_v25 = vpop.f32.mrb[87].mxu0  ;;  %2122 = vmatmul.mubr.bf16.gmra.mrb[120].mxu0 %v11725_v14  ;;  %1262 = vmatmul.mubr.bf16.gmra.mrb[20].mxu1 %v11601_v15  ;;  %v15326_v14 = vld [vmem:[%s20130_s2 + $0x28] ss:$16 sps:$4 sm:$0xff]   ;;  %v11767_v15 = vld [vmem:[%s20130_s2 + $0x2b0] sm:$0x11] }
 0x1d5   : > { %2522 = vmatprep.mubr.bf16.mxu0 %v15306_v17  ;;  %11605 = vmatprep.mubr.msk.bf16.mxu1 %vm1170_vm0, %v15320_v18  ;;  %v15330_v17 = vld [vmem:[%s20130_s2 + $0x4c] ss:$16 sps:$4 sm:$0xff]   ;;  %v11790_v18 = vcombine.high %v11767_v15, %v11767_v15  ;;  %v11789_v22 = vcombine.low %v11767_v15, %v11767_v15  ;;  %v15337_v25 = vld [vmem:[%s20130_s2 + $0x68] ss:$16 sps:$4 sm:$0xff]   ;;  %v11631_v15 = vld [vmem:[%s20130_s2 + $0x150] sm:$0x11] }
 0x1d6   : > { %v16487_v28 = vpack.c.bf16 %v1008_v24, %v1007_v23  ;;  %v15335_v23 = vld [vmem:[%s20130_s2 + $0x6c] ss:$16 sps:$4 sm:$0xff]  }
 0x1d7   : > { %v15340_v24 = vld [vmem:[%s20130_s2 + $0x21c] ss:$16 sps:$4 sm:$0xff]  }
 0x1d8   : > { %1280 = vmatpush1.bf16.msra.mxu1 %v16487_v28 }
 0x1d9   : > { %v942_v31 = vpop.f32.mrb[88].mxu0  ;;  %1281 = vmatprep.subr.bf16.mxu1 %v20137_v1 }
 0x1da   : > { %v944_v34 = vpop.f32.mrb[89].mxu0  ;;  %v1009_v36 = vmax.f32 %v942_v31, 0.0  ;;  %v15341_v31 = vld [vmem:[%s20130_s2 + $0x8c] ss:$16 sps:$4 sm:$0xff]  }
 0x1db   : > { %v945_v35 = vpop.f32.mrb[90].mxu0  ;;  %v1061_v34 = vld [vmem:[%s20130_s2 + $0xa8] sm:$0x11] }
 0x1dc   : > { %v1010_v38 = vmax.f32 %v945_v35, 0.0  ;;  %v947_v39 = vpop.f32.mrb[91].mxu0  ;;  %2523 = vmatmul.mubr.bf16.vlgmr.msra.gmra.mrb[124].mxu0 %v15304_v30  ;;  %v15338_v30 = vld [vmem:[%s20130_s2 + $0x218] ss:$16 sps:$4 sm:$0xff]  }
 0x1dd   : > { %2571 = vmatpush1.bf16.msra.mxu0 %v16397_v11  ;;  %2530 = vmatprep.mubr.bf16.mxu0 %v15310_v32  ;;  %v15344_v32 = vld [vmem:[%s20130_s2 + $0x23c] ss:$16 sps:$4 sm:$0xff]   ;;  %v15343_v35 = vld [vmem:[%s20130_s2 + $0x88] ss:$16 sps:$4 sm:$0xff]  }
 0x1de   : > { %v16498_v41 = vpack.c.bf16 %v1010_v38, %v1009_v36  ;;  %2572 = vmatprep.subr.bf16.mxu0 %v20137_v1  ;;  %v15346_v36 = vld [vmem:[%s20130_s2 + $0x238] ss:$16 sps:$4 sm:$0xff]   ;;  %v11604_v38 = vcombine.high %v1061_v34, %v1061_v34  ;;  %v15349_v39 = vld [vmem:[%s20130_s2 + $0x25c] ss:$16 sps:$4 sm:$0xff]  }
 0x1e0   : > { %1282 = vmatpush1.bf16.msra.mxu1 %v16498_v41 }
 0x1e1   : > { %2573 = vmatpush1.bf16.msra.mxu0 %v16417_v27  ;;  %v950_v44 = vpop.f32.mrb[92].mxu0  ;;  %1283 = vmatprep.subr.bf16.mxu1 %v20137_v1 }
 0x1e2   : > { %v952_v48 = vpop.f32.mrb[93].mxu0  ;;  %2574 = vmatprep.subr.bf16.mxu0 %v20137_v1  ;;  %v1011_v50 = vmax.f32 %v950_v44, 0.0  ;;  %v15351_v44 = vld [vmem:[%s20130_s2 + $0x258] ss:$16 sps:$4 sm:$0xff]  }
 0x1e3   : > { %v953_v49 = vpop.f32.mrb[94].mxu0  ;;  %v15355_v48 = vld [vmem:[%s20130_s2 + $0x27c] ss:$16 sps:$4 sm:$0xff]  }
 0x1e4   : > { %v1012_v51 = vmax.f32 %v953_v49, 0.0  ;;  %v955_v52 = vpop.f32.mrb[95].mxu0  ;;  %2531 = vmatmul.mubr.bf16.gmra.mrb[128].mxu0 %v15312_v43  ;;  %v11603_v43 = vcombine.low %v1061_v34, %v1061_v34  ;;  %v15352_v49 = vld [vmem:[%s20130_s2 + $0xb0] ss:$16 sps:$4 sm:$0xff]   ;;  %v15395_v34 = vld [vmem:[%s20130_s2 + $0x34c] ss:$16 sps:$4 sm:$0xff]  }
 0x1e5   : > { %2575 = vmatpush1.bf16.msra.mxu0 %v16437_v42  ;;  %2538 = vmatprep.mubr.bf16.mxu0 %v15315_v46  ;;  %v15354_v46 = vld [vmem:[%s20130_s2 + $0xb4] ss:$16 sps:$4 sm:$0xff]   ;;  %v15361_v52 = vld [vmem:[%s20130_s2 + $0x29c] ss:$16 sps:$4 sm:$0xff]  }
 0x1e6   : > { %v16512_v55 = vpack.c.bf16 %v1012_v51, %v1011_v50  ;;  %2576 = vmatprep.subr.bf16.mxu0 %v20137_v1  ;;  %v15357_v50 = vld [vmem:[%s20130_s2 + $0x278] ss:$16 sps:$4 sm:$0xff]   ;;  %v15358_v51 = vld [vmem:[%s20130_s2 + $0xd4] ss:$16 sps:$4 sm:$0xff]  }
 0x1e8   : > { %1284 = vmatpush1.bf16.msra.mxu1 %v16512_v55 }
 0x1e9   : > { %2577 = vmatpush1.bf16.msra.mxu0 %v16457_v57  ;;  %v958_v58 = vpop.f32.mrb[96].mxu0  ;;  %1285 = vmatprep.subr.bf16.mxu1 %v20137_v1 }
 0x1ea   : > { %v960_v60 = vpop.f32.mrb[97].mxu0  ;;  %2578 = vmatprep.subr.bf16.mxu0 %v20137_v1  ;;  %v1013_v0 = vmax.f32 %v958_v58, 0.0  ;;  %v15363_v58 = vld [vmem:[%s20130_s2 + $0x298] ss:$16 sps:$4 sm:$0xff]  }
 0x1eb   : > { %v961_v63 = vpop.f32.mrb[98].mxu0  ;;  %v15364_v60 = vld [vmem:[%s20130_s2 + $0xf4] ss:$16 sps:$4 sm:$0xff]  }
 0x1ec   : > { %v1014_v2 = vmax.f32 %v961_v63, 0.0  ;;  %v963_v3 = vpop.f32.mrb[99].mxu0  ;;  %2539 = vmatmul.mubr.bf16.gmra.mrb[132].mxu0 %v15317_v56  ;;  %v15360_v56 = vld [vmem:[%s20130_s2 + $0xd0] ss:$16 sps:$4 sm:$0xff]  }
 0x1ed   : > { %2579 = vmatpush1.bf16.msra.mxu0 %v16476_v10  ;;  %2546 = vmatprep.mubr.bf16.mxu0 %v15321_v59  ;;  %v11768_v59 = vld [vmem:[%s20130_s2 + $0x2b8] sm:$0x11]  ;;  %v15369_v3 = vld [vmem:[%s20130_s2 + $0x114] ss:$16 sps:$4 sm:$0xff]  }
 0x1ee   : > { %v16526_v4 = vpack.c.bf16 %v1014_v2, %v1013_v0  ;;  %2580 = vmatprep.subr.bf16.mxu0 %v20137_v1  ;;  %v11792_v63 = vcombine.high %v11768_v59, %v11768_v59  ;;  %v15366_v0 = vld [vmem:[%s20130_s2 + $0xf0] ss:$16 sps:$4 sm:$0xff]   ;;  %v11791_v2 = vcombine.low %v11768_v59, %v11768_v59  ;;  %v15411_v59 = vld [vmem:[%s20130_s2 + $0x138] ss:$16 sps:$4 sm:$0xff]  }
 0x1f0   : > { %1286 = vmatpush1.bf16.msra.mxu1 %v16526_v4 }
 0x1f1   : > { %2581 = vmatpush1.bf16.msra.mxu0 %v16487_v28  ;;  %13000 = vmatprep.subr.bf16.mxu1 %v16334_v5 }
 0x1f2   : > { %2582 = vmatprep.subr.bf16.mxu0 %v20137_v1 }
 0x1f3   : > { %1302 = vmatmul.mubr.bf16.vlgmr.msra.gmra.mrb[24].mxu1 %v15318_v6  ;;  %v15374_v6 = vld [vmem:[%s20130_s2 + $0x2cc] ss:$16 sps:$4 sm:$0xff]  }
 0x1f4   : > { %13001 = vmatpush3.bf16.msra.mxu1 %v16318_v12  ;;  %2547 = vmatmul.mubr.bf16.gmra.mrb[136].mxu0 %v15323_v7  ;;  %v15371_v7 = vld [vmem:[%s20130_s2 + $0x110] ss:$16 sps:$4 sm:$0xff]  }
 0x1f5   : > { %2583 = vmatpush1.bf16.msra.mxu0 %v16498_v41  ;;  %13002 = vmatprep.subr.bf16.mxu1 %v16340_v13 }
 0x1f6   : > { %2584 = vmatprep.subr.bf16.mxu0 %v20137_v1  ;;  %11606 = vmatprep.mubr.msk.bf16.mxu1 %vm1170_vm0, %v15324_v8  ;;  %v15372_v8 = vld [vmem:[%s20130_s2 + $0x2c8] ss:$16 sps:$4 sm:$0xff]  }
 0x1f7   : > { %2554 = vmatprep.mubr.bf16.mxu0 %v15327_v9  ;;  %v15375_v9 = vld [vmem:[%s20130_s2 + $0x134] ss:$16 sps:$4 sm:$0xff]  }
 0x1f8   : > { %13003 = vmatpush3.bf16.msra.mxu1 %v16320_v19 }
 0x1f9   : > { %2585 = vmatpush1.bf16.msra.mxu0 %v16512_v55  ;;  %13004 = vmatprep.subr.bf16.mxu1 %v16346_v21 }
 0x1fa   : > { %2586 = vmatprep.subr.bf16.mxu0 %v20137_v1 }
 0x1fb   : > { %1310 = vmatmul.mubr.bf16.gmra.mrb[28].mxu1 %v15326_v14  ;;  %v15378_v14 = vld [vmem:[%s20130_s2 + $0x2ec] ss:$16 sps:$4 sm:$0xff]  }
 0x1fc   : > { %13005 = vmatpush3.bf16.msra.mxu1 %v16322_v26  ;;  %2555 = vmatmul.mubr.bf16.gmra.mrb[140].mxu0 %v15329_v16  ;;  %v15377_v16 = vld [vmem:[%s20130_s2 + $0x130] ss:$16 sps:$4 sm:$0xff]  }
 0x1fd   : > { %2587 = vmatpush1.bf16.msra.mxu0 %v16526_v4  ;;  %13006 = vmatprep.subr.bf16.mxu1 %v16352_v29 }
 0x1fe   : > { %11607 = vmatprep.mubr.msk.bf16.mxu1 %vm1170_vm0, %v15330_v17  ;;  %2562 = vmatprep.mubr.bf16.mxu0 %v11790_v18  ;;  %v15380_v17 = vld [vmem:[%s20130_s2 + $0x2e8] ss:$16 sps:$4 sm:$0xff]   ;;  %v11654_v18 = vcombine.high %v11631_v15, %v11631_v15 }
 0x1ff   : > { %3011 = vmatprep.subr.bf16.mxu0 %v20137_v1 }
 0x200   : > { %13007 = vmatpush3.bf16.msra.mxu1 %v16324_v33 }
 0x201   : > { %13008 = vmatprep.subr.bf16.mxu1 %v16358_v37 }
 0x203   : > { %1318 = vmatmul.mubr.bf16.gmra.mrb[32].mxu1 %v15332_v20  ;;  %v15383_v20 = vld [vmem:[%s20130_s2 + $0x30c] ss:$16 sps:$4 sm:$0xff]  }
 0x204   : > { %13009 = vmatpush3.bf16.msra.mxu1 %v16326_v40  ;;  %2563 = vmatmul.mubr.bf16.gmra.mrb[144].mxu0 %v11789_v22  ;;  %v11653_v22 = vcombine.low %v11631_v15, %v11631_v15 }
 0x205   : > { %13010 = vmatprep.subr.bf16.mxu1 %v16364_v45  ;;  %11608 = vmatprep.mubr.msk.bf16.mxu1 %vm1170_vm0, %v15335_v23  ;;  %v15385_v23 = vld [vmem:[%s20130_s2 + $0x308] ss:$16 sps:$4 sm:$0xff]  }
 0x206   : > { %11793 = vmatprep.mubr.msk.bf16.mxu0 %vm1170_vm0, %v15340_v24  ;;  %v15388_v24 = vld [vmem:[%s20130_s2 + $0xbc] ss:$16 sps:$4 sm:$0xff]  }
 0x208   : > { %13011 = vmatpush3.bf16.msra.mxu1 %v16328_v47 }
 0x209   : > { %13012 = vmatprep.subr.bf16.mxu1 %v16370_v53 }
 0x20b   : > { %1326 = vmatmul.mubr.bf16.gmra.mrb[36].mxu1 %v15337_v25  ;;  %v15389_v25 = vld [vmem:[%s20130_s2 + $0x32c] ss:$16 sps:$4 sm:$0xff]  }
 0x20c   : > { %13013 = vmatpush3.bf16.msra.mxu1 %v16330_v54  ;;  %2603 = vmatmul.mubr.bf16.vlgmr.msra.gmra.mrb[148].mxu0 %v15338_v30  ;;  %v15386_v30 = vld [vmem:[%s20130_s2 + $0xb8] ss:$16 sps:$4 sm:$0xff]  }
 0x20d   : > { %3012 = vmatpush1.bf16.msra.mxu0 %v16397_v11  ;;  %13014 = vmatprep.subr.bf16.mxu1 %v16376_v62 }
 0x20e   : > { %3013 = vmatprep.subr.bf16.mxu0 %v20137_v1  ;;  %11609 = vmatprep.mubr.msk.bf16.mxu1 %vm1170_vm0, %v15341_v31  ;;  %v15391_v31 = vld [vmem:[%s20130_s2 + $0x328] ss:$16 sps:$4 sm:$0xff]  }
 0x20f   : > { %11794 = vmatprep.mubr.msk.bf16.mxu0 %vm1170_vm0, %v15344_v32  ;;  %v15392_v32 = vld [vmem:[%s20130_s2 + $0xdc] ss:$16 sps:$4 sm:$0xff]  }
 0x210   : > { %13015 = vmatpush3.bf16.msra.mxu1 %v16332_v61 }
 0x211   : > { %3014 = vmatpush1.bf16.msra.mxu0 %v16417_v27  ;;  %1588 = vmatprep.subr.bf16.mxu1 %v20137_v1 }
 0x212   : > { %3015 = vmatprep.subr.bf16.mxu0 %v20137_v1 }
 0x213   : > { %1334 = vmatmul.mubr.bf16.gmra.mrb[40].mxu1 %v15343_v35  ;;  %v11832_v35 = vld [vmem:[%s20130_s2 + $0x368] sm:$0x11] }
 0x214   : > { %2611 = vmatmul.mubr.bf16.gmra.mrb[152].mxu0 %v15346_v36  ;;  %11610 = vmatprep.mubr.msk.bf16.mxu1 %vm1170_vm0, %v11604_v38  ;;  %v15394_v36 = vld [vmem:[%s20130_s2 + $0xd8] ss:$16 sps:$4 sm:$0xff]  }
 0x215   : > { %3016 = vmatpush1.bf16.msra.mxu0 %v16437_v42  ;;  %11795 = vmatprep.mubr.msk.bf16.mxu0 %vm1170_vm0, %v15349_v39  ;;  %v15397_v38 = vld [vmem:[%s20130_s2 + $0x348] ss:$16 sps:$4 sm:$0xff]   ;;  %v15398_v39 = vld [vmem:[%s20130_s2 + $0xfc] ss:$16 sps:$4 sm:$0xff]  }
 0x216   : > { %3017 = vmatprep.subr.bf16.mxu0 %v20137_v1 }
 0x219   : > { %3018 = vmatpush1.bf16.msra.mxu0 %v16457_v57 }
 0x21a   : > { %3019 = vmatprep.subr.bf16.mxu0 %v20137_v1 }
 0x21b   : > { %1342 = vmatmul.mubr.bf16.gmra.mrb[44].mxu1 %v11603_v43  ;;  %v11856_v43 = vcombine.high %v11832_v35, %v11832_v35 }
 0x21c   : > { %2619 = vmatmul.mubr.bf16.gmra.mrb[156].mxu0 %v15351_v44  ;;  %1540 = vmatprep.mubr.bf16.mxu1 %v15354_v46  ;;  %v15400_v44 = vld [vmem:[%s20130_s2 + $0xf8] ss:$16 sps:$4 sm:$0xff]   ;;  %v11855_v46 = vcombine.low %v11832_v35, %v11832_v35 }
 0x21d   : > { %3020 = vmatpush1.bf16.msra.mxu0 %v16476_v10  ;;  %11796 = vmatprep.mubr.msk.bf16.mxu0 %vm1170_vm0, %v15355_v48  ;;  %v15403_v48 = vld [vmem:[%s20130_s2 + $0x11c] ss:$16 sps:$4 sm:$0xff]  }
 0x21e   : > { %3021 = vmatprep.subr.bf16.mxu0 %v20137_v1 }
 0x221   : > { %3022 = vmatpush1.bf16.msra.mxu0 %v16487_v28 }
 0x222   : > { %3023 = vmatprep.subr.bf16.mxu0 %v20137_v1 }
 0x223   : > { %1541 = vmatmul.mubr.bf16.vlgmr.msra.gmra.mrb[48].mxu1 %v15352_v49  ;;  %v15408_v49 = vld [vmem:[%s20130_s2 + $0x374] ss:$16 sps:$4 sm:$0xff]  }
 0x224   : > { %1589 = vmatpush1.bf16.msra.mxu1 %v16397_v11  ;;  %2627 = vmatmul.mubr.bf16.gmra.mrb[160].mxu0 %v15357_v50  ;;  %v15405_v50 = vld [vmem:[%s20130_s2 + $0x118] ss:$16 sps:$4 sm:$0xff]  }
 0x225   : > { %3024 = vmatpush1.bf16.msra.mxu0 %v16498_v41  ;;  %1590 = vmatprep.subr.bf16.mxu1 %v20137_v1 }
 0x226   : > { %3025 = vmatprep.subr.bf16.mxu0 %v20137_v1  ;;  %1548 = vmatprep.mubr.bf16.mxu1 %v15358_v51  ;;  %v15406_v51 = vld [vmem:[%s20130_s2 + $0x370] ss:$16 sps:$4 sm:$0xff]  }
 0x227   : > { %11797 = vmatprep.mubr.msk.bf16.mxu0 %vm1170_vm0, %v15361_v52  ;;  %v15409_v52 = vld [vmem:[%s20130_s2 + $0x13c] ss:$16 sps:$4 sm:$0xff]  }
 0x228   : > { %1591 = vmatpush1.bf16.msra.mxu1 %v16417_v27 }
 0x229   : > { %3026 = vmatpush1.bf16.msra.mxu0 %v16512_v55  ;;  %1592 = vmatprep.subr.bf16.mxu1 %v20137_v1 }
 0x22a   : > { %3027 = vmatprep.subr.bf16.mxu0 %v20137_v1 }
 0x22b   : > { %1549 = vmatmul.mubr.bf16.gmra.mrb[52].mxu1 %v15360_v56  ;;  %v15412_v56 = vld [vmem:[%s20130_s2 + $0x394] ss:$16 sps:$4 sm:$0xff]  }
 0x22c   : > { %1593 = vmatpush1.bf16.msra.mxu1 %v16437_v42  ;;  %2635 = vmatmul.mubr.bf16.gmra.mrb[164].mxu0 %v15363_v58  ;;  %v11632_v58 = vld [vmem:[%s20130_s2 + $0x158] sm:$0x11] }
 0x22d   : > { %3028 = vmatpush1.bf16.msra.mxu0 %v16526_v4  ;;  %1594 = vmatprep.subr.bf16.mxu1 %v20137_v1 }
 0x22e   : > { %13248 = vmatprep.subr.bf16.mxu0 %v16334_v5  ;;  %1556 = vmatprep.mubr.bf16.mxu1 %v15364_v60  ;;  %v15414_v60 = vld [vmem:[%s20130_s2 + $0x390] ss:$16 sps:$4 sm:$0xff]  }
 0x22f   : > { %11798 = vmatprep.mubr.msk.bf16.mxu0 %vm1170_vm0, %v11792_v63  ;;  %v11656_v63 = vcombine.high %v11632_v58, %v11632_v58 }
 0x230   : > { %1595 = vmatpush1.bf16.msra.mxu1 %v16457_v57 }
 0x231   : > { %1596 = vmatprep.subr.bf16.mxu1 %v20137_v1 }
 0x233   : > { %1557 = vmatmul.mubr.bf16.gmra.mrb[56].mxu1 %v15366_v0  ;;  %v15417_v0 = vld [vmem:[%s20130_s2 + $0x3b4] ss:$16 sps:$4 sm:$0xff]  }
 0x234   : > { %1597 = vmatpush1.bf16.msra.mxu1 %v16476_v10  ;;  %2643 = vmatmul.mubr.bf16.gmra.mrb[168].mxu0 %v11791_v2  ;;  %v11655_v2 = vcombine.low %v11632_v58, %v11632_v58 }
 0x235   : > { %1598 = vmatprep.subr.bf16.mxu1 %v20137_v1  ;;  %1564 = vmatprep.mubr.bf16.mxu1 %v15369_v3  ;;  %v15419_v3 = vld [vmem:[%s20130_s2 + $0x3b0] ss:$16 sps:$4 sm:$0xff]  }
 0x236   : > { %11857 = vmatprep.mubr.msk.bf16.mxu0 %vm1170_vm0, %v15374_v6  ;;  %v15420_v6 = vld [vmem:[%s20130_s2 + $0x3d4] ss:$16 sps:$4 sm:$0xff]  }
 0x238   : > { %1599 = vmatpush1.bf16.msra.mxu1 %v16487_v28 }
 0x239   : > { %1600 = vmatprep.subr.bf16.mxu1 %v20137_v1 }
 0x23b   : > { %1565 = vmatmul.mubr.bf16.gmra.mrb[60].mxu1 %v15371_v7 }
 0x23c   : > { %1601 = vmatpush1.bf16.msra.mxu1 %v16498_v41  ;;  %3044 = vmatmul.mubr.bf16.vlgmr.msra.gmra.mrb[172].mxu0 %v15372_v8  ;;  %v15422_v8 = vld [vmem:[%s20130_s2 + $0x3d0] ss:$16 sps:$4 sm:$0xff]  }
 0x23d   : > { %13249 = vmatpush3.bf16.msra.mxu0 %v16318_v12  ;;  %1602 = vmatprep.subr.bf16.mxu1 %v20137_v1 }
 0x23e   : > { %13250 = vmatprep.subr.bf16.mxu0 %v16340_v13  ;;  %1572 = vmatprep.mubr.bf16.mxu1 %v15375_v9 }
 0x23f   : > { %11858 = vmatprep.mubr.msk.bf16.mxu0 %vm1170_vm0, %v15378_v14  ;;  %v15423_v14 = vld [vmem:[%s20130_s2 + $0x3f4] ss:$16 sps:$4 sm:$0xff]  }
 0x240   : > { %1603 = vmatpush1.bf16.msra.mxu1 %v16512_v55 }
 0x241   : > { %13251 = vmatpush3.bf16.msra.mxu0 %v16320_v19  ;;  %1604 = vmatprep.subr.bf16.mxu1 %v20137_v1 }
 0x242   : > { %13252 = vmatprep.subr.bf16.mxu0 %v16346_v21 }
 0x243   : > { %1573 = vmatmul.mubr.bf16.gmra.mrb[64].mxu1 %v15377_v16 }
 0x244   : > { %1605 = vmatpush1.bf16.msra.mxu1 %v16526_v4  ;;  %3052 = vmatmul.mubr.bf16.gmra.mrb[176].mxu0 %v15380_v17 }
 0x245   : > { %13253 = vmatpush3.bf16.msra.mxu0 %v16322_v26  ;;  %1580 = vmatprep.mubr.bf16.mxu1 %v11654_v18 }
 0x246   : > { %13254 = vmatprep.subr.bf16.mxu0 %v16352_v29  ;;  %11859 = vmatprep.mubr.msk.bf16.mxu0 %vm1170_vm0, %v15383_v20  ;;  %v11895_v20 = vld [vmem:[%s20130_s2 + $0x410] sm:$0x11] }
 0x249   : > { %13255 = vmatpush3.bf16.msra.mxu0 %v16324_v33 }
 0x24a   : > { %13256 = vmatprep.subr.bf16.mxu0 %v16358_v37 }
 0x24b   : > { %1581 = vmatmul.mubr.bf16.gmra.mrb[68].mxu1 %v11653_v22 }
 0x24c   : > { %3060 = vmatmul.mubr.bf16.gmra.mrb[180].mxu0 %v15385_v23  ;;  %11657 = vmatprep.mubr.msk.bf16.mxu1 %vm1170_vm0, %v15388_v24  ;;  %v15425_v23 = vld [vmem:[%s20130_s2 + $0x3f0] ss:$16 sps:$4 sm:$0xff]  }
 0x24d   : > { %13257 = vmatpush3.bf16.msra.mxu0 %v16326_v40  ;;  %11860 = vmatprep.mubr.msk.bf16.mxu0 %vm1170_vm0, %v15389_v25  ;;  %v11918_v25 = vcombine.high %v11895_v20, %v11895_v20 }
 0x24e   : > { %13258 = vmatprep.subr.bf16.mxu0 %v16364_v45 }
 0x251   : > { %13259 = vmatpush3.bf16.msra.mxu0 %v16328_v47 }
 0x252   : > { %13260 = vmatprep.subr.bf16.mxu0 %v16370_v53 }
 0x253   : > { %1621 = vmatmul.mubr.bf16.vlgmr.msra.gmra.mrb[72].mxu1 %v15386_v30 }
 0x254   : > { %3068 = vmatmul.mubr.bf16.gmra.mrb[184].mxu0 %v15391_v31  ;;  %11658 = vmatprep.mubr.msk.bf16.mxu1 %vm1170_vm0, %v15392_v32 }
 0x255   : > { %13261 = vmatpush3.bf16.msra.mxu0 %v16330_v54  ;;  %11861 = vmatprep.mubr.msk.bf16.mxu0 %vm1170_vm0, %v15395_v34 }
 0x256   : > { %13262 = vmatprep.subr.bf16.mxu0 %v16376_v62 }
 0x259   : > { %13263 = vmatpush3.bf16.msra.mxu0 %v16332_v61 }
 0x25a   : > { %13308 = vmatprep.subr.bf16.mxu0 %v16334_v5 }
 0x25b   : > { %1629 = vmatmul.mubr.bf16.gmra.mrb[76].mxu1 %v15394_v36  ;;  %v11917_v36 = vcombine.low %v11895_v20, %v11895_v20 }
 0x25c   : > { %3076 = vmatmul.mubr.bf16.gmra.mrb[188].mxu0 %v15397_v38  ;;  %11659 = vmatprep.mubr.msk.bf16.mxu1 %vm1170_vm0, %v15398_v39  ;;  %v15430_v39 = vld [vmem:[%s20130_s2 + $0x424] ss:$16 sps:$4 sm:$0xff]  }
 0x25d   : > { %11862 = vmatprep.mubr.msk.bf16.mxu0 %vm1170_vm0, %v11856_v43 }
 0x263   : > { %1637 = vmatmul.mubr.bf16.gmra.mrb[80].mxu1 %v15400_v44 }
 0x264   : > { %3084 = vmatmul.mubr.bf16.gmra.mrb[192].mxu0 %v11855_v46  ;;  %11660 = vmatprep.mubr.msk.bf16.mxu1 %vm1170_vm0, %v15403_v48 }
 0x265   : > { %3404 = vmatprep.mubr.bf16.mxu0 %v15408_v49 }
 0x26b   : > { %1645 = vmatmul.mubr.bf16.gmra.mrb[84].mxu1 %v15405_v50  ;;  %v15428_v50 = vld [vmem:[%s20130_s2 + $0x420] ss:$16 sps:$4 sm:$0xff]  }
 0x26c   : > { %3405 = vmatmul.mubr.bf16.vlgmr.msra.gmra.mrb[196].mxu0 %v15406_v51  ;;  %11661 = vmatprep.mubr.msk.bf16.mxu1 %vm1170_vm0, %v15409_v52  ;;  %v15431_v52 = vld [vmem:[%s20130_s2 + $0x444] ss:$16 sps:$4 sm:$0xff]  }
 0x26d   : > { %13309 = vmatpush3.bf16.msra.mxu0 %v16318_v12  ;;  %3412 = vmatprep.mubr.bf16.mxu0 %v15412_v56 }
 0x26e   : > { %13310 = vmatprep.subr.bf16.mxu0 %v16340_v13 }
 0x271   : > { %13311 = vmatpush3.bf16.msra.mxu0 %v16320_v19 }
 0x272   : > { %13312 = vmatprep.subr.bf16.mxu0 %v16346_v21 }
 0x273   : > { %1653 = vmatmul.mubr.bf16.gmra.mrb[88].mxu1 %v15411_v59 }
 0x274   : > { %3413 = vmatmul.mubr.bf16.gmra.mrb[200].mxu0 %v15414_v60  ;;  %11662 = vmatprep.mubr.msk.bf16.mxu1 %vm1170_vm0, %v11656_v63  ;;  %v15477_v60 = vld [vmem:[%s20131_s3 + $0x10] sm:$0xff]  }
 0x275   : > { %13313 = vmatpush3.bf16.msra.mxu0 %v16322_v26  ;;  %3420 = vmatprep.mubr.bf16.mxu0 %v15417_v0 }
 0x276   : > { %13314 = vmatprep.subr.bf16.mxu0 %v16352_v29  ;;  %14208 = vmatprep.subr.bf16.mxu1 %v15477_v60 }
 0x277   : > { %14209 = vmatpush3.bf16.msra.mxu1 %v15477_v60 }
 0x279   : > { %13315 = vmatpush3.bf16.msra.mxu0 %v16324_v33 }
 0x27a   : > { %13316 = vmatprep.subr.bf16.mxu0 %v16358_v37 }
 0x27b   : > { %1661 = vmatmul.mubr.bf16.gmra.mrb[92].mxu1 %v11655_v2  ;;  %v15433_v2 = vld [vmem:[%s20130_s2 + $0x440] ss:$16 sps:$4 sm:$0xff]  }
 0x27c   : > { %3421 = vmatmul.mubr.bf16.gmra.mrb[204].mxu0 %v15419_v3 }
 0x27d   : > { %13317 = vmatpush3.bf16.msra.mxu0 %v16326_v40  ;;  %3428 = vmatprep.mubr.bf16.mxu0 %v15420_v6  ;;  %v15434_v6 = vld [vmem:[%s20130_s2 + $0x464] ss:$16 sps:$4 sm:$0xff]  }
 0x27e   : > { %13318 = vmatprep.subr.bf16.mxu0 %v16364_v45 }
 0x27f   : > { %v12964_v7 = vpop.f32.mrb[0].mxu1 }
 0x280   : > { %v12965_v9 = vpop.f32.mrb[1].mxu1 }
 0x281   : > { %13319 = vmatpush3.bf16.msra.mxu0 %v16328_v47  ;;  %v16841_v15 = vadd.f32 %v12965_v9, %v12964_v7  ;;  %v12967_v16 = vpop.f32.mrb[2].mxu1 }
 0x282   : > { %13320 = vmatprep.subr.bf16.mxu0 %v16370_v53  ;;  %v12968_v17 = vpop.f32.mrb[3].mxu1 }
 0x283   : > { %v16844_v18 = vadd.f32 %v12968_v17, %v12967_v16  ;;  %v15436_v17 = vld [vmem:[%s20130_s2 + $0x460] ss:$16 sps:$4 sm:$0xff]  }
 0x284   : > { %3429 = vmatmul.mubr.bf16.gmra.mrb[208].mxu0 %v15422_v8 }
 0x285   : > { %13321 = vmatpush3.bf16.msra.mxu0 %v16330_v54  ;;  %3436 = vmatprep.mubr.bf16.mxu0 %v15423_v14 }
 0x286   : > { %13322 = vmatprep.subr.bf16.mxu0 %v16376_v62 }
 0x287   : > { %v12970_v22 = vpop.f32.mrb[4].mxu1 }
 0x288   : > { %v12971_v24 = vpop.f32.mrb[5].mxu1 }
 0x289   : > { %13323 = vmatpush3.bf16.msra.mxu0 %v16332_v61  ;;  %v16855_v30 = vadd.f32 %v12971_v24, %v12970_v22  ;;  %v12973_v31 = vpop.f32.mrb[6].mxu1  ;;  %v15437_v22 = vld [vmem:[%s20130_s2 + $0x484] ss:$16 sps:$4 sm:$0xff]  }
 0x28a   : > { %3893 = vmatprep.subr.bf16.mxu0 %v20137_v1  ;;  %v12974_v32 = vpop.f32.mrb[7].mxu1 }
 0x28b   : > { %v16858_v34 = vadd.f32 %v12974_v32, %v12973_v31  ;;  %v15439_v31 = vld [vmem:[%s20130_s2 + $0x480] ss:$16 sps:$4 sm:$0xff]   ;;  %v15483_v32 = vld [vmem:[%s20131_s3 + $0x18] sm:$0xff]  }
 0x28c   : > { %3437 = vmatmul.mubr.bf16.gmra.mrb[212].mxu0 %v15425_v23  ;;  %14210 = vmatprep.subr.bf16.mxu1 %v15483_v32 }
 0x28d   : > { %3444 = vmatprep.mubr.bf16.mxu0 %v11918_v25  ;;  %14211 = vmatpush3.bf16.msra.mxu1 %v15483_v32 }
 0x28f   : > { %v12976_v35 = vpop.f32.mrb[8].mxu1 }
 0x290   : > { %v12977_v38 = vpop.f32.mrb[9].mxu1 }
 0x291   : > { %v16863_v43 = vadd.f32 %v12977_v38, %v12976_v35  ;;  %v12979_v44 = vpop.f32.mrb[10].mxu1  ;;  %v15440_v35 = vld [vmem:[%s20130_s2 + $0x4a4] ss:$16 sps:$4 sm:$0xff]   ;;  %v15442_v38 = vld [vmem:[%s20130_s2 + $0x4a0] ss:$16 sps:$4 sm:$0xff]  }
 0x292   : > { %v12980_v46 = vpop.f32.mrb[11].mxu1 }
 0x293   : > { %v16865_v48 = vadd.f32 %v12980_v46, %v12979_v44  ;;  %v15447_v46 = vld [vmem:[%s20130_s2 + $0x42c] ss:$16 sps:$4 sm:$0xff]  }
 0x294   : > { %3445 = vmatmul.mubr.bf16.gmra.mrb[216].mxu0 %v11917_v36  ;;  %v11959_v36 = vld [vmem:[%s20130_s2 + $0x4c0] sm:$0x11] }
 0x295   : > { %3845 = vmatprep.mubr.bf16.mxu0 %v15430_v39  ;;  %v11982_v39 = vcombine.high %v11959_v36, %v11959_v36  ;;  %v11981_v44 = vcombine.low %v11959_v36, %v11959_v36  ;;  %v15456_v36 = vld [vmem:[%s20130_s2 + $0x48c] ss:$16 sps:$4 sm:$0xff]  }
 0x297   : > { %v12982_v49 = vpop.f32.mrb[12].mxu1 }
 0x298   : > { %v12983_v51 = vpop.f32.mrb[13].mxu1 }
 0x299   : > { %v16873_v56 = vadd.f32 %v12983_v51, %v12982_v49  ;;  %v12985_v58 = vpop.f32.mrb[14].mxu1 }
 0x29a   : > { %v12986_v59 = vpop.f32.mrb[15].mxu1 }
 0x29b   : > { %v16878_v63 = vadd.f32 %v12986_v59, %v12985_v58  ;;  %v15445_v58 = vld [vmem:[%s20130_s2 + $0x428] ss:$16 sps:$4 sm:$0xff]  }
 0x29c   : > { %3846 = vmatmul.mubr.bf16.vlgmr.msra.gmra.mrb[220].mxu0 %v15428_v50 }
 0x29d   : > { %3894 = vmatpush1.bf16.msra.mxu0 %v16397_v11  ;;  %3853 = vmatprep.mubr.bf16.mxu0 %v15431_v52 }
 0x29e   : > { %3895 = vmatprep.subr.bf16.mxu0 %v20137_v1 }
 0x29f   : > { %v12988_v0 = vpop.f32.mrb[16].mxu1 }
 0x2a0   : > { %v12989_v3 = vpop.f32.mrb[17].mxu1 }
 0x2a1   : > { %3896 = vmatpush1.bf16.msra.mxu0 %v16417_v27  ;;  %v16889_v7 = vadd.f32 %v12989_v3, %v12988_v0  ;;  %v12991_v8 = vpop.f32.mrb[18].mxu1  ;;  %v15448_v0 = vld [vmem:[%s20130_s2 + $0x44c] ss:$16 sps:$4 sm:$0xff]  }
 0x2a2   : > { %3897 = vmatprep.subr.bf16.mxu0 %v20137_v1  ;;  %v12992_v9 = vpop.f32.mrb[19].mxu1 }
 0x2a3   : > { %v16892_v14 = vadd.f32 %v12992_v9, %v12991_v8  ;;  %v15450_v9 = vld [vmem:[%s20130_s2 + $0x448] ss:$16 sps:$4 sm:$0xff]  }
 0x2a4   : > { %3854 = vmatmul.mubr.bf16.gmra.mrb[224].mxu0 %v15433_v2 }
 0x2a5   : > { %3898 = vmatpush1.bf16.msra.mxu0 %v16437_v42  ;;  %3861 = vmatprep.mubr.bf16.mxu0 %v15434_v6 }
 0x2a6   : > { %3899 = vmatprep.subr.bf16.mxu0 %v20137_v1 }
 0x2a7   : > { %v12994_v16 = vpop.f32.mrb[20].mxu1 }
 0x2a8   : > { %v12995_v20 = vpop.f32.mrb[21].mxu1 }
 0x2a9   : > { %3900 = vmatpush1.bf16.msra.mxu0 %v16457_v57  ;;  %v16903_v23 = vadd.f32 %v12995_v20, %v12994_v16  ;;  %v12997_v24 = vpop.f32.mrb[22].mxu1  ;;  %v15451_v20 = vld [vmem:[%s20130_s2 + $0x46c] ss:$16 sps:$4 sm:$0xff]  }
 0x2aa   : > { %3901 = vmatprep.subr.bf16.mxu0 %v20137_v1  ;;  %v12998_v25 = vpop.f32.mrb[23].mxu1 }
 0x2ac   : > { %3862 = vmatmul.mubr.bf16.gmra.mrb[228].mxu0 %v15436_v17 }
 0x2ad   : > { %3902 = vmatpush1.bf16.msra.mxu0 %v16476_v10  ;;  %3869 = vmatprep.mubr.bf16.mxu0 %v15437_v22 }
 0x2ae   : > { %3903 = vmatprep.subr.bf16.mxu0 %v20137_v1 }
 0x2b1   : > { %3904 = vmatpush1.bf16.msra.mxu0 %v16487_v28 }
 0x2b2   : > { %3905 = vmatprep.subr.bf16.mxu0 %v20137_v1 }
 0x2b4   : > { %3870 = vmatmul.mubr.bf16.gmra.mrb[232].mxu0 %v15439_v31  ;;  %v15453_v31 = vld [vmem:[%s20130_s2 + $0x468] ss:$16 sps:$4 sm:$0xff]  }
 0x2b5   : > { %3906 = vmatpush1.bf16.msra.mxu0 %v16498_v41  ;;  %3877 = vmatprep.mubr.bf16.mxu0 %v15440_v35 }
 0x2b6   : > { %3907 = vmatprep.subr.bf16.mxu0 %v20137_v1 }
 0x2b9   : > { %3908 = vmatpush1.bf16.msra.mxu0 %v16512_v55 }
 0x2ba   : > { %3909 = vmatprep.subr.bf16.mxu0 %v20137_v1 }
 0x2bc   : > { %3878 = vmatmul.mubr.bf16.gmra.mrb[236].mxu0 %v15442_v38 }
 0x2bd   : > { %3910 = vmatpush1.bf16.msra.mxu0 %v16526_v4  ;;  %3885 = vmatprep.mubr.bf16.mxu0 %v11982_v39 }
 0x2be   : > { %4334 = vmatprep.subr.bf16.mxu0 %v20137_v1 }
 0x2c4   : > { %3886 = vmatmul.mubr.bf16.gmra.mrb[240].mxu0 %v11981_v44 }
 0x2c5   : > { %11985 = vmatprep.mubr.msk.bf16.mxu0 %vm1170_vm0, %v15447_v46  ;;  %v15454_v46 = vld [vmem:[%s20130_s2 + $0x488] ss:$16 sps:$4 sm:$0xff]  }
 0x2c6   : > { %v1303_v49 = vpop.f32.mrb[24].mxu1 }
 0x2c7   : > { %v16936_v50 = vadd.f32 %v16841_v15, %v1303_v49  ;;  %v1305_v51 = vpop.f32.mrb[25].mxu1  ;;  %v16952_v15 = vld [vmem:[%s20131_s3] sm:$0xff]  }
 0x2c8   : > { %v1306_v52 = vpop.f32.mrb[26].mxu1  ;;  %14224 = vmatprep.subr.bf16.mxu1 %v16952_v15 }
 0x2c9   : > { %v16942_v59 = vadd.f32 %v16844_v18, %v1306_v52  ;;  %v1308_v60 = vpop.f32.mrb[27].mxu1  ;;  %v15459_v52 = vld [vmem:[%s20130_s2 + $0x4ac] ss:$16 sps:$4 sm:$0xff]  }
 0x2cc   : > { %3926 = vmatmul.mubr.bf16.vlgmr.msra.gmra.mrb[244].mxu0 %v15445_v58 }
 0x2cd   : > { %4335 = vmatpush1.bf16.msra.mxu0 %v16397_v11  ;;  %11986 = vmatprep.mubr.msk.bf16.mxu0 %vm1170_vm0, %v15448_v0 }
 0x2ce   : > { %v1311_v18 = vpop.f32.mrb[28].mxu1  ;;  %4336 = vmatprep.subr.bf16.mxu0 %v20137_v1 }
 0x2cf   : > { %v16959_v3 = vadd.f32 %v16855_v30, %v1311_v18  ;;  %v1313_v6 = vpop.f32.mrb[29].mxu1 }
 0x2d0   : > { %v1314_v8 = vpop.f32.mrb[30].mxu1  ;;  %v15457_v6 = vld [vmem:[%s20130_s2 + $0x4a8] ss:$16 sps:$4 sm:$0xff]  }
 0x2d1   : > { %v16965_v16 = vadd.f32 %v16858_v34, %v1314_v8  ;;  %4337 = vmatpush1.bf16.msra.mxu0 %v16417_v27  ;;  %v1316_v17 = vpop.f32.mrb[31].mxu1 }
 0x2d2   : > { %4338 = vmatprep.subr.bf16.mxu0 %v20137_v1 }
 0x2d4   : > { %3934 = vmatmul.mubr.bf16.gmra.mrb[248].mxu0 %v15450_v9 }
 0x2d5   : > { %4339 = vmatpush1.bf16.msra.mxu0 %v16437_v42  ;;  %11987 = vmatprep.mubr.msk.bf16.mxu0 %vm1170_vm0, %v15451_v20  ;;  %v15482_v20 = vld [vmem:[%s20130_s2 + $0x584] ss:$16 sps:$4 sm:$0xff]  }
 0x2d6   : > { %v1319_v22 = vpop.f32.mrb[32].mxu1  ;;  %4340 = vmatprep.subr.bf16.mxu0 %v20137_v1 }
 0x2d7   : > { %v16978_v34 = vadd.f32 %v16863_v43, %v1319_v22  ;;  %v1321_v24 = vpop.f32.mrb[33].mxu1 }
 0x2d8   : > { %v1322_v25 = vpop.f32.mrb[34].mxu1 }
 0x2d9   : > { %v16984_v32 = vadd.f32 %v16865_v48, %v1322_v25  ;;  %4341 = vmatpush1.bf16.msra.mxu0 %v16457_v57  ;;  %v1324_v35 = vpop.f32.mrb[35].mxu1 }
 0x2da   : > { %4342 = vmatprep.subr.bf16.mxu0 %v20137_v1  ;;  %v15464_v35 = vld [vmem:[%s20130_s2 + $0x4dc] ss:$16 sps:$4 sm:$0xff]  }
 0x2dc   : > { %3942 = vmatmul.mubr.bf16.gmra.mrb[252].mxu0 %v15453_v31 }
 0x2dd   : > { %4343 = vmatpush1.bf16.msra.mxu0 %v16476_v10  ;;  %11988 = vmatprep.mubr.msk.bf16.mxu0 %vm1170_vm0, %v15456_v36 }
 0x2de   : > { %v1327_v38 = vpop.f32.mrb[36].mxu1  ;;  %4344 = vmatprep.subr.bf16.mxu0 %v20137_v1 }
 0x2df   : > { %v16997_v48 = vadd.f32 %v16873_v56, %v1327_v38  ;;  %v1329_v39 = vpop.f32.mrb[37].mxu1 }
 0x2e0   : > { %v1330_v44 = vpop.f32.mrb[38].mxu1 }
 0x2e1   : > { %v17003_v49 = vadd.f32 %v16878_v63, %v1330_v44  ;;  %4345 = vmatpush1.bf16.msra.mxu0 %v16487_v28  ;;  %v1332_v51 = vpop.f32.mrb[39].mxu1  ;;  %v11960_v63 = vld [vmem:[%s20130_s2 + $0x4c8] sm:$0x11] }
 0x2e2   : > { %4346 = vmatprep.subr.bf16.mxu0 %v20137_v1  ;;  %v11984_v17 = vcombine.high %v11960_v63, %v11960_v63  ;;  %v11983_v25 = vcombine.low %v11960_v63, %v11960_v63  ;;  %v15467_v51 = vld [vmem:[%s20130_s2 + $0x4fc] ss:$16 sps:$4 sm:$0xff]  }
 0x2e4   : > { %3950 = vmatmul.mubr.bf16.gmra.mrb[0].mxu0 %v15454_v46 }
 0x2e5   : > { %4347 = vmatpush1.bf16.msra.mxu0 %v16498_v41  ;;  %11989 = vmatprep.mubr.msk.bf16.mxu0 %vm1170_vm0, %v15459_v52 }
 0x2e6   : > { %v1335_v58 = vpop.f32.mrb[40].mxu1  ;;  %4348 = vmatprep.subr.bf16.mxu0 %v20137_v1 }
 0x2e7   : > { %v17019_v60 = vadd.f32 %v16889_v7, %v1335_v58  ;;  %v1337_v0 = vpop.f32.mrb[41].mxu1 }
 0x2e8   : > { %v1338_v18 = vpop.f32.mrb[42].mxu1 }
 0x2e9   : > { %v17025_v8 = vadd.f32 %v16892_v14, %v1338_v18  ;;  %4349 = vmatpush1.bf16.msra.mxu0 %v16512_v55  ;;  %v1340_v9 = vpop.f32.mrb[43].mxu1 }
 0x2ea   : > { %4350 = vmatprep.subr.bf16.mxu0 %v20137_v1 }
 0x2ec   : > { %3958 = vmatmul.mubr.bf16.gmra.mrb[4].mxu0 %v15457_v6  ;;  %v15465_v6 = vld [vmem:[%s20130_s2 + $0x4f8] ss:$16 sps:$4 sm:$0xff]  }
 0x2ed   : > { %4351 = vmatpush1.bf16.msra.mxu0 %v16526_v4  ;;  %11990 = vmatprep.mubr.msk.bf16.mxu0 %vm1170_vm0, %v11984_v17  ;;  %v15470_v17 = vld [vmem:[%s20130_s2 + $0x51c] ss:$16 sps:$4 sm:$0xff]  }
 0x2ee   : > { %13428 = vmatprep.subr.bf16.mxu0 %v16334_v5  ;;  %v1343_v7 = vpop.f32.mrb[44].mxu1 }
 0x2ef   : > { %v17035_v14 = vadd.f32 %v16903_v23, %v1343_v7  ;;  %v1345_v22 = vpop.f32.mrb[45].mxu1  ;;  %v15462_v23 = vld [vmem:[%s20130_s2 + $0x4d8] ss:$16 sps:$4 sm:$0xff]  }
 0x2f0   : > { %v1346_v24 = vpop.f32.mrb[46].mxu1 }
 0x2f1   : > { %v1347_v31 = vpop.f32.mrb[47].mxu1 }
 0x2f4   : > { %3966 = vmatmul.mubr.bf16.gmra.mrb[8].mxu0 %v11983_v25 }
 0x2f5   : > { %12049 = vmatprep.mubr.msk.bf16.mxu0 %vm1170_vm0, %v15464_v35  ;;  %v15468_v35 = vld [vmem:[%s20130_s2 + $0x518] ss:$16 sps:$4 sm:$0xff]  }
 0x2f6   : > { %v13016_v36 = vpop.f32.mrb[48].mxu1 }
 0x2f7   : > { %v13017_v38 = vpop.f32.mrb[49].mxu1 }
 0x2f8   : > { %v17041_v39 = vadd.f32 %v13017_v38, %v13016_v36  ;;  %v13019_v44 = vpop.f32.mrb[50].mxu1  ;;  %v15473_v38 = vld [vmem:[%s20130_s2 + $0x53c] ss:$16 sps:$4 sm:$0xff]  }
 0x2f9   : > { %v13020_v46 = vpop.f32.mrb[51].mxu1 }
 0x2fa   : > { %v17049_v52 = vadd.f32 %v13020_v46, %v13019_v44 }
 0x2fc   : > { %4367 = vmatmul.mubr.bf16.vlgmr.msra.gmra.mrb[12].mxu0 %v15462_v23 }
 0x2fd   : > { %13429 = vmatpush3.bf16.msra.mxu0 %v16318_v12  ;;  %12050 = vmatprep.mubr.msk.bf16.mxu0 %vm1170_vm0, %v15467_v51 }
 0x2fe   : > { %13430 = vmatprep.subr.bf16.mxu0 %v16340_v13  ;;  %v13022_v58 = vpop.f32.mrb[52].mxu1 }
 0x2ff   : > { %v13023_v63 = vpop.f32.mrb[53].mxu1 }
 0x300   : > { %v17054_v0 = vadd.f32 %v13023_v63, %v13022_v58  ;;  %v13025_v18 = vpop.f32.mrb[54].mxu1  ;;  %v15471_v63 = vld [vmem:[%s20130_s2 + $0x538] ss:$16 sps:$4 sm:$0xff]  }
 0x301   : > { %13431 = vmatpush3.bf16.msra.mxu0 %v16320_v19  ;;  %v13026_v9 = vpop.f32.mrb[55].mxu1 }
 0x302   : > { %v17063_v7 = vadd.f32 %v13026_v9, %v13025_v18  ;;  %13432 = vmatprep.subr.bf16.mxu0 %v16346_v21 }
 0x304   : > { %4375 = vmatmul.mubr.bf16.gmra.mrb[16].mxu0 %v15465_v6  ;;  %v15476_v6 = vld [vmem:[%s20130_s2 + $0x55c] ss:$16 sps:$4 sm:$0xff]  }
 0x305   : > { %13433 = vmatpush3.bf16.msra.mxu0 %v16322_v26  ;;  %12051 = vmatprep.mubr.msk.bf16.mxu0 %vm1170_vm0, %v15470_v17 }
 0x306   : > { %13434 = vmatprep.subr.bf16.mxu0 %v16352_v29  ;;  %v13028_v22 = vpop.f32.mrb[56].mxu1 }
 0x307   : > { %v13029_v24 = vpop.f32.mrb[57].mxu1 }
 0x308   : > { %v17069_v25 = vadd.f32 %v13029_v24, %v13028_v22  ;;  %v13031_v31 = vpop.f32.mrb[58].mxu1  ;;  %v12024_v22 = vld [vmem:[%s20130_s2 + $0x578] sm:$0x11] }
 0x309   : > { %13435 = vmatpush3.bf16.msra.mxu0 %v16324_v33  ;;  %v13032_v36 = vpop.f32.mrb[59].mxu1 }
 0x30a   : > { %v17078_v44 = vadd.f32 %v13032_v36, %v13031_v31  ;;  %13436 = vmatprep.subr.bf16.mxu0 %v16358_v37  ;;  %v15474_v36 = vld [vmem:[%s20130_s2 + $0x558] ss:$16 sps:$4 sm:$0xff]  }
 0x30c   : > { %4383 = vmatmul.mubr.bf16.gmra.mrb[20].mxu0 %v15468_v35 }
 0x30d   : > { %13437 = vmatpush3.bf16.msra.mxu0 %v16326_v40  ;;  %12052 = vmatprep.mubr.msk.bf16.mxu0 %vm1170_vm0, %v15473_v38 }
 0x30e   : > { %13438 = vmatprep.subr.bf16.mxu0 %v16364_v45  ;;  %v13034_v23 = vpop.f32.mrb[60].mxu1 }
 0x30f   : > { %v13035_v46 = vpop.f32.mrb[61].mxu1 }
 0x310   : > { %v17084_v51 = vadd.f32 %v13035_v46, %v13034_v23  ;;  %v13037_v58 = vpop.f32.mrb[62].mxu1  ;;  %v12048_v23 = vcombine.high %v12024_v22, %v12024_v22 }
 0x311   : > { %13439 = vmatpush3.bf16.msra.mxu0 %v16328_v47  ;;  %v13038_v18 = vpop.f32.mrb[63].mxu1 }
 0x312   : > { %v17093_v9 = vadd.f32 %v13038_v18, %v13037_v58  ;;  %13440 = vmatprep.subr.bf16.mxu0 %v16370_v53 }
 0x314   : > { %4391 = vmatmul.mubr.bf16.gmra.mrb[24].mxu0 %v15471_v63 }
 0x315   : > { %13441 = vmatpush3.bf16.msra.mxu0 %v16330_v54  ;;  %12053 = vmatprep.mubr.msk.bf16.mxu0 %vm1170_vm0, %v15476_v6 }
 0x316   : > { %13442 = vmatprep.subr.bf16.mxu0 %v16376_v62  ;;  %v13040_v17 = vpop.f32.mrb[64].mxu1 }
 0x317   : > { %v13041_v24 = vpop.f32.mrb[65].mxu1 }
 0x318   : > { %v17102_v31 = vadd.f32 %v13041_v24, %v13040_v17  ;;  %v13043_v35 = vpop.f32.mrb[66].mxu1  ;;  %v12047_v17 = vcombine.low %v12024_v22, %v12024_v22  ;;  %v15486_v22 = vld [vmem:[%s20130_s2 + $0x5a4] ss:$16 sps:$4 sm:$0xff]  }
 0x319   : > { %13443 = vmatpush3.bf16.msra.mxu0 %v16332_v61  ;;  %v13044_v38 = vpop.f32.mrb[67].mxu1 }
 0x31a   : > { %v17108_v46 = vadd.f32 %v13044_v38, %v13043_v35  ;;  %13488 = vmatprep.subr.bf16.mxu0 %v16334_v5 }
 0x31c   : > { %4399 = vmatmul.mubr.bf16.gmra.mrb[28].mxu0 %v15474_v36 }
 0x31d   : > { %12054 = vmatprep.mubr.msk.bf16.mxu0 %vm1170_vm0, %v12048_v23  ;;  %v15480_v23 = vld [vmem:[%s20130_s2 + $0x580] ss:$16 sps:$4 sm:$0xff]  }
 0x31e   : > { %v13046_v58 = vpop.f32.mrb[68].mxu1 }
 0x31f   : > { %v13047_v63 = vpop.f32.mrb[69].mxu1 }
 0x320   : > { %v17112_v18 = vadd.f32 %v13047_v63, %v13046_v58  ;;  %v13049_v6 = vpop.f32.mrb[70].mxu1 }
 0x321   : > { %v13050_v24 = vpop.f32.mrb[71].mxu1  ;;  %v13084_v6 = vpop.f32.mrb[100].mxu0 }
 0x324   : > { %4407 = vmatmul.mubr.bf16.gmra.mrb[32].mxu0 %v12047_v17 }
 0x325   : > { %4727 = vmatprep.mubr.bf16.mxu0 %v15482_v20  ;;  %v13085_v20 = vpop.f32.mrb[101].mxu0 }
 0x326   : > { %v1622_v35 = vpop.f32.mrb[72].mxu1  ;;  %v17125_v24 = vadd.f32 %v13085_v20, %v13084_v6 }
 0x327   : > { %v1623_v38 = vadd.f32 %v17041_v39, %v1622_v35  ;;  %v1624_v56 = vpop.f32.mrb[73].mxu1 }
 0x328   : > { %v1625_v36 = vpop.f32.mrb[74].mxu1  ;;  %v13087_v56 = vpop.f32.mrb[102].mxu0 }
 0x329   : > { %v1626_v58 = vadd.f32 %v17049_v52, %v1625_v36  ;;  %v1627_v63 = vpop.f32.mrb[75].mxu1  ;;  %v13088_v39 = vpop.f32.mrb[103].mxu0 }
 0x32a   : > { %v17130_v35 = vadd.f32 %v13088_v39, %v13087_v56 }
 0x32b   : > { %v1668_v17 = vpack.c.bf16 %v1626_v58, %v1623_v38  ;;  %v13090_v38 = vpop.f32.mrb[104].mxu0 }
 0x32c   : > { %4728 = vmatmul.mubr.bf16.vlgmr.msra.gmra.mrb[36].mxu0 %v15480_v23  ;;  %v15484_v23 = vld [vmem:[%s20130_s2 + $0x5a0] ss:$16 sps:$4 sm:$0xff]   ;;  %v13091_v6 = vpop.f32.mrb[105].mxu0 }
 0x32d   : > { %13489 = vmatpush3.bf16.msra.mxu0 %v16318_v12  ;;  %14212 = vmatprep.mubr.msk.bf16.mxu1 %vm1691_vm1, %v1668_v17  ;;  %v17138_v43 = vadd.f32 %v13091_v6, %v13090_v38 }
 0x32e   : > { %13490 = vmatprep.subr.bf16.mxu0 %v16340_v13  ;;  %v1630_v52 = vpop.f32.mrb[76].mxu1  ;;  %4735 = vmatprep.mubr.bf16.mxu0 %v15486_v22  ;;  %v13093_v22 = vpop.f32.mrb[106].mxu0 }
 0x32f   : > { %v1631_v36 = vadd.f32 %v17054_v0, %v1630_v52  ;;  %v1632_v63 = vpop.f32.mrb[77].mxu1  ;;  %v15489_v0 = vld [vmem:[%s20130_s2 + $0x5c4] ss:$16 sps:$4 sm:$0xff]   ;;  %v13094_v56 = vpop.f32.mrb[107].mxu0 }
 0x330   : > { %v1633_v58 = vpop.f32.mrb[78].mxu1  ;;  %v17144_v52 = vadd.f32 %v13094_v56, %v13093_v22  ;;  %v13096_v63 = vpop.f32.mrb[108].mxu0  ;;  %v15487_v22 = vld [vmem:[%s20130_s2 + $0x5c0] ss:$16 sps:$4 sm:$0xff]  }
 0x331   : > { %v1634_v20 = vadd.f32 %v17063_v7, %v1633_v58  ;;  %13491 = vmatpush3.bf16.msra.mxu0 %v16320_v19  ;;  %v1635_v17 = vpop.f32.mrb[79].mxu1  ;;  %v15499_v7 = vld [vmem:[%s20131_s3 + $0x8] sm:$0xff]   ;;  %v13097_v58 = vpop.f32.mrb[109].mxu0 }
 0x332   : > { %13492 = vmatprep.subr.bf16.mxu0 %v16346_v21 }
 0x333   : > { %v1669_v39 = vpack.c.bf16 %v1634_v20, %v1631_v36  ;;  %v13099_v20 = vpop.f32.mrb[110].mxu0 }
 0x334   : > { %4736 = vmatmul.mubr.bf16.gmra.mrb[40].mxu0 %v15484_v23  ;;  %v17154_v23 = vadd.f32 %v13097_v58, %v13096_v63  ;;  %v13100_v56 = vpop.f32.mrb[111].mxu0 }
 0x335   : > { %13493 = vmatpush3.bf16.msra.mxu0 %v16322_v26  ;;  %14213 = vmatmul.mubr.msk.bf16.vlgmr.msra.gmra.mrb[96].mxu1 %vm1691_vm1, %v1669_v39  ;;  %v17161_v30 = vadd.f32 %v13100_v56, %v13099_v20  ;;  %v15495_v20 = vld [vmem:[%s20130_s2 + $0x604] ss:$16 sps:$4 sm:$0xff]  }
 0x336   : > { %13494 = vmatprep.subr.bf16.mxu0 %v16352_v29  ;;  %v1638_v38 = vpop.f32.mrb[80].mxu1  ;;  %4743 = vmatprep.mubr.bf16.mxu0 %v15489_v0 }
 0x337   : > { %v1639_v6 = vadd.f32 %v17069_v25, %v1638_v38  ;;  %v1640_v36 = vpop.f32.mrb[81].mxu1  ;;  %14225 = vmatpush3.bf16.msra.mxu1 %v16952_v15  ;;  %v15492_v15 = vld [vmem:[%s20130_s2 + $0x5e4] ss:$16 sps:$4 sm:$0xff]  }
 0x338   : > { %v1641_v17 = vpop.f32.mrb[82].mxu1  ;;  %14226 = vmatprep.subr.bf16.mxu1 %v15499_v7 }
 0x339   : > { %v1642_v39 = vadd.f32 %v17078_v44, %v1641_v17  ;;  %13495 = vmatpush3.bf16.msra.mxu0 %v16324_v33  ;;  %v1643_v0 = vpop.f32.mrb[83].mxu1  ;;  %v13102_v17 = vpop.f32.mrb[112].mxu0 }
 0x33a   : > { %13496 = vmatprep.subr.bf16.mxu0 %v16358_v37 }
 0x33b   : > { %v1670_v25 = vpack.c.bf16 %v1642_v39, %v1639_v6  ;;  %14227 = vmatpush3.bf16.msra.mxu1 %v15499_v7  ;;  %v15490_v6 = vld [vmem:[%s20130_s2 + $0x5e0] ss:$16 sps:$4 sm:$0xff]  }
 0x33c   : > { %4744 = vmatmul.mubr.bf16.gmra.mrb[44].mxu0 %v15487_v22  ;;  %2129 = vmatprep.subr.bf16.mxu1 %v20137_v1 }
 0x33d   : > { %13497 = vmatpush3.bf16.msra.mxu0 %v16326_v40  ;;  %14216 = vmatprep.mubr.msk.bf16.mxu1 %vm1691_vm1, %v1670_v25 }
 0x33e   : > { %13498 = vmatprep.subr.bf16.mxu0 %v16364_v45  ;;  %v1646_v44 = vpop.f32.mrb[84].mxu1  ;;  %4751 = vmatprep.mubr.bf16.mxu0 %v15492_v15  ;;  %v12087_v15 = vld [vmem:[%s20130_s2 + $0x620] sm:$0x11] }
 0x33f   : > { %v1647_v63 = vadd.f32 %v17084_v51, %v1646_v44  ;;  %v1648_v38 = vpop.f32.mrb[85].mxu1  ;;  %v13103_v51 = vpop.f32.mrb[113].mxu0 }
 0x340   : > { %v1649_v58 = vpop.f32.mrb[86].mxu1  ;;  %v17181_v56 = vadd.f32 %v13103_v51, %v13102_v17  ;;  %v13105_v39 = vpop.f32.mrb[114].mxu0 }
 0x341   : > { %v1650_v7 = vadd.f32 %v17093_v9, %v1649_v58  ;;  %13499 = vmatpush3.bf16.msra.mxu0 %v16328_v47  ;;  %v1651_v36 = vpop.f32.mrb[87].mxu1  ;;  %v13106_v9 = vpop.f32.mrb[115].mxu0  ;;  %v15493_v58 = vld [vmem:[%s20130_s2 + $0x600] ss:$16 sps:$4 sm:$0xff]  }
 0x342   : > { %13500 = vmatprep.subr.bf16.mxu0 %v16370_v53  ;;  %v17189_v25 = vadd.f32 %v13106_v9, %v13105_v39  ;;  %v12110_v36 = vcombine.high %v12087_v15, %v12087_v15 }
 0x343   : > { %v1671_v22 = vpack.c.bf16 %v1650_v7, %v1647_v63 }
 0x344   : > { %4752 = vmatmul.mubr.bf16.gmra.mrb[48].mxu0 %v15490_v6 }
 0x345   : > { %13501 = vmatpush3.bf16.msra.mxu0 %v16330_v54  ;;  %14217 = vmatmul.mubr.msk.bf16.gmra.mrb[100].mxu1 %vm1691_vm1, %v1671_v22 }
 0x346   : > { %13502 = vmatprep.subr.bf16.mxu0 %v16376_v62  ;;  %v1654_v0 = vpop.f32.mrb[88].mxu1  ;;  %4759 = vmatprep.mubr.bf16.mxu0 %v15495_v20  ;;  %v13108_v20 = vpop.f32.mrb[116].mxu0 }
 0x347   : > { %v1655_v44 = vadd.f32 %v17102_v31, %v1654_v0  ;;  %v1656_v63 = vpop.f32.mrb[89].mxu1  ;;  %v13109_v22 = vpop.f32.mrb[117].mxu0 }
 0x348   : > { %v1657_v38 = vpop.f32.mrb[90].mxu1  ;;  %v17198_v51 = vadd.f32 %v13109_v22, %v13108_v20  ;;  %v13111_v31 = vpop.f32.mrb[118].mxu0  ;;  %v20175_v22 = vpack.c.bf16 %v16984_v32, %v16978_v34 }
 0x349   : > { %v1658_v6 = vadd.f32 %v17108_v46, %v1657_v38  ;;  %13503 = vmatpush3.bf16.msra.mxu0 %v16332_v61  ;;  %v1659_v7 = vpop.f32.mrb[91].mxu1  ;;  %v13112_v39 = vpop.f32.mrb[119].mxu0 }
 0x34a   : > { %5216 = vmatprep.subr.bf16.mxu0 %v20137_v1  ;;  %v17201_v0 = vadd.f32 %v13112_v39, %v13111_v31  ;;  %v12109_v7 = vcombine.low %v12087_v15, %v12087_v15 }
 0x34b   : > { %v1672_v17 = vpack.c.bf16 %v1658_v6, %v1655_v44  ;;  %v15502_v44 = vld [vmem:[%s20130_s2 + $0x634] ss:$16 sps:$4 sm:$0xff]  }
 0x34c   : > { %4760 = vmatmul.mubr.bf16.gmra.mrb[52].mxu0 %v15493_v58  ;;  %v13114_v58 = vpop.f32.mrb[120].mxu0 }
 0x34d   : > { %14220 = vmatprep.mubr.msk.bf16.mxu1 %vm1691_vm1, %v1672_v17  ;;  %4767 = vmatprep.mubr.bf16.mxu0 %v12110_v36  ;;  %v13115_v6 = vpop.f32.mrb[121].mxu0  ;;  %v20173_v36 = vpack.c.bf16 %v16942_v59, %v16936_v50  ;;  %v20174_v50 = vpack.c.bf16 %v16965_v16, %v16959_v3 }
 0x34e   : > { %v1662_v9 = vpop.f32.mrb[92].mxu1  ;;  %v13117_v20 = vpop.f32.mrb[122].mxu0 }
 0x34f   : > { %v1663_v46 = vadd.f32 %v17112_v18, %v1662_v9  ;;  %v1664_v63 = vpop.f32.mrb[93].mxu1  ;;  %v17212_v18 = vadd.f32 %v13115_v6, %v13114_v58  ;;  %v13118_v15 = vpop.f32.mrb[123].mxu0  ;;  %v20176_v9 = vmov 0   ;;  %v20177_v6 = vpack.c.bf16 %v17003_v49, %v16997_v48 }
 0x350   : > { %v1665_v38 = vpop.f32.mrb[94].mxu1  ;;  %v13144_v17 = vpop.f32.mrb[124].mxu0 }
 0x351   : > { %v1673_v1 = vpack.c.bf16 %v1663_v46, %v1663_v46  ;;  %v1666_v2 = vpop.f32.mrb[95].mxu1  ;;  %v13145_v59 = vpop.f32.mrb[125].mxu0  ;;  %v15503_v38 = vld [vmem:[%s20130_s2 + $0x650] ss:$16 sps:$4 sm:$0xff]  }
 0x352   : > { %v15500_v2 = vld [vmem:[%s20130_s2 + $0x630] ss:$16 sps:$4 sm:$0xff]   ;;  %v17229_v31 = vadd.f32 %v13145_v59, %v13144_v17  ;;  %v13147_v39 = vpop.f32.mrb[126].mxu0  ;;  %v15514_v59 = vld [vmem:[%s20130_s2 + $0x6b4] ss:$16 sps:$4 sm:$0xff]  }
 0x353   : > { %14221 = vmatmul.mubr.msk.bf16.gmra.mrb[104].mxu1 %vm1691_vm1, %v1673_v1  ;;  %v15505_v1 = vld [vmem:[%s20130_s2 + $0x654] ss:$16 sps:$4 sm:$0xff]   ;;  %v13148_v46 = vpop.f32.mrb[127].mxu0 }
 0x354   : > { %14228 = vmatprep.mubr.msk.bf16.mxu1 %vm1691_vm1, %v20173_v36  ;;  %4768 = vmatmul.mubr.bf16.gmra.mrb[56].mxu0 %v12109_v7  ;;  %v17233_v3 = vadd.f32 %v13148_v46, %v13147_v39  ;;  %v13150_v16 = vpop.f32.mrb[128].mxu0  ;;  %v20178_v36 = vpack.c.bf16 %v17025_v8, %v17019_v60  ;;  %v15517_v60 = vld [vmem:[%s20130_s2 + $0x16c] ss:$16 sps:$4 sm:$0xff]  }
 0x355   : > { %5168 = vmatprep.mubr.bf16.mxu0 %v15502_v44  ;;  %v13151_v63 = vpop.f32.mrb[129].mxu0  ;;  %v15508_v44 = vld [vmem:[%s20130_s2 + $0x674] ss:$16 sps:$4 sm:$0xff]  }
 0x356   : > { %v17237_v34 = vadd.f32 %v13151_v63, %v13150_v16  ;;  %v13153_v32 = vpop.f32.mrb[130].mxu0 }
 0x357   : > { %v13154_v7 = vpop.f32.mrb[131].mxu0 }
 0x358   : > { %v17247_v58 = vadd.f32 %v13154_v7, %v13153_v32  ;;  %v13156_v20 = vpop.f32.mrb[132].mxu0  ;;  %v15512_v7 = vld [vmem:[%s20130_s2 + $0x6b0] ss:$16 sps:$4 sm:$0xff]  }
 0x359   : > { %v13157_v15 = vpop.f32.mrb[133].mxu0 }
 0x35a   : > { %v17262_v48 = vadd.f32 %v13157_v15, %v13156_v20  ;;  %v13159_v49 = vpop.f32.mrb[134].mxu0  ;;  %v15520_v15 = vld [vmem:[%s20130_s2 + $0x18c] ss:$16 sps:$4 sm:$0xff]  }
 0x35b   : > { %14229 = vmatmul.mubr.msk.bf16.vlgmr.msra.gmra.mrb[96].mxu1 %vm1691_vm1, %v20174_v50  ;;  %v13160_v8 = vpop.f32.mrb[135].mxu0  ;;  %v15511_v50 = vld [vmem:[%s20130_s2 + $0x694] ss:$16 sps:$4 sm:$0xff]  }
 0x35c   : > { %2130 = vmatpush1.bf16.msra.mxu1 %v16397_v11  ;;  %14232 = vmatprep.mubr.msk.bf16.mxu1 %vm1691_vm1, %v20175_v22  ;;  %v17274_v17 = vadd.f32 %v13160_v8, %v13159_v49  ;;  %v13162_v22 = vpop.f32.mrb[136].mxu0 }
 0x35d   : > { %5169 = vmatmul.mubr.bf16.vlgmr.msra.gmra.mrb[60].mxu0 %v15500_v2  ;;  %2131 = vmatprep.subr.bf16.mxu1 %v20176_v9  ;;  %v1354_v2 = vpack.c.bf16 %v17035_v14, %v17035_v14  ;;  %v15509_v14 = vld [vmem:[%s20130_s2 + $0x690] ss:$16 sps:$4 sm:$0xff]   ;;  %v13163_v39 = vpop.f32.mrb[137].mxu0 }
 0x35e   : > { %5217 = vmatpush1.bf16.msra.mxu0 %v16397_v11  ;;  %5176 = vmatprep.mubr.bf16.mxu0 %v15505_v1  ;;  %v15506_v1 = vld [vmem:[%s20130_s2 + $0x670] ss:$16 sps:$4 sm:$0xff]   ;;  %v17298_v46 = vadd.f32 %v13163_v39, %v13162_v22  ;;  %v13165_v16 = vpop.f32.mrb[138].mxu0  ;;  %v15526_v39 = vld [vmem:[%s20130_s2 + $0x1ac] ss:$16 sps:$4 sm:$0xff]  }
 0x35f   : > { %5218 = vmatprep.subr.bf16.mxu0 %v20176_v9  ;;  %v13166_v63 = vpop.f32.mrb[139].mxu0 }
 0x360   : > { %2132 = vmatpush1.bf16.msra.mxu1 %v16417_v27  ;;  %v17302_v32 = vadd.f32 %v13166_v63, %v13165_v16 }
 0x361   : > { %2133 = vmatprep.subr.bf16.mxu1 %v20176_v9 }
 0x362   : > { %5219 = vmatpush1.bf16.msra.mxu0 %v16417_v27 }
 0x363   : > { %14233 = vmatmul.mubr.msk.bf16.gmra.mrb[100].mxu1 %vm1691_vm1, %v20177_v6  ;;  %5220 = vmatprep.subr.bf16.mxu0 %v20176_v9  ;;  %v13168_v6 = vpop.f32.mrb[140].mxu0 }
 0x364   : > { %2134 = vmatpush1.bf16.msra.mxu1 %v16437_v42  ;;  %14236 = vmatprep.mubr.msk.bf16.mxu1 %vm1691_vm1, %v20178_v36  ;;  %v15515_v36 = vld [vmem:[%s20130_s2 + $0x168] ss:$16 sps:$4 sm:$0xff]   ;;  %v13169_v20 = vpop.f32.mrb[141].mxu0 }
 0x365   : > { %5177 = vmatmul.mubr.bf16.gmra.mrb[64].mxu0 %v15503_v38  ;;  %2135 = vmatprep.subr.bf16.mxu1 %v20176_v9  ;;  %v12151_v38 = vld [vmem:[%s20130_s2 + $0x6d0] sm:$0x11]  ;;  %v17322_v49 = vadd.f32 %v13169_v20, %v13168_v6 }
 0x366   : > { %5221 = vmatpush1.bf16.msra.mxu0 %v16437_v42  ;;  %5184 = vmatprep.mubr.bf16.mxu0 %v15508_v44  ;;  %v12174_v44 = vcombine.high %v12151_v38, %v12151_v38 }
 0x367   : > { %5222 = vmatprep.subr.bf16.mxu0 %v20176_v9 }
 0x368   : > { %2136 = vmatpush1.bf16.msra.mxu1 %v16457_v57 }
 0x369   : > { %2137 = vmatprep.subr.bf16.mxu1 %v20176_v9 }
 0x36a   : > { %5223 = vmatpush1.bf16.msra.mxu0 %v16457_v57 }
 0x36b   : > { %14237 = vmatmul.mubr.msk.bf16.gmra.mrb[104].mxu1 %vm1691_vm1, %v1354_v2  ;;  %5224 = vmatprep.subr.bf16.mxu0 %v20176_v9 }
 0x36c   : > { %2138 = vmatpush1.bf16.msra.mxu1 %v16476_v10  ;;  %11729 = vmatprep.mubr.msk.bf16.mxu1 %vm1170_vm0, %v15517_v60  ;;  %v13171_v60 = vpop.f32.mrb[142].mxu0 }
 0x36d   : > { %5185 = vmatmul.mubr.bf16.gmra.mrb[68].mxu0 %v15506_v1  ;;  %2139 = vmatprep.subr.bf16.mxu1 %v20176_v9  ;;  %v13172_v8 = vpop.f32.mrb[143].mxu0  ;;  %v12173_v1 = vcombine.low %v12151_v38, %v12151_v38  ;;  %v15523_v38 = vld [vmem:[%s20130_s2 + $0x638] ss:$16 sps:$4 sm:$0xff]  }
 0x36e   : > { %5225 = vmatpush1.bf16.msra.mxu0 %v16476_v10  ;;  %5192 = vmatprep.mubr.bf16.mxu0 %v15511_v50  ;;  %v17325_v2 = vadd.f32 %v13172_v8, %v13171_v60  ;;  %v15525_v50 = vld [vmem:[%s20130_s2 + $0x63c] ss:$16 sps:$4 sm:$0xff]  }
 0x36f   : > { %5226 = vmatprep.subr.bf16.mxu0 %v20176_v9  ;;  %v15532_v60 = vld [vmem:[%s20130_s2 + $0x1cc] ss:$16 sps:$4 sm:$0xff]  }
 0x370   : > { %2140 = vmatpush1.bf16.msra.mxu1 %v16487_v28 }
 0x371   : > { %2141 = vmatprep.subr.bf16.mxu1 %v20176_v9 }
 0x372   : > { %5227 = vmatpush1.bf16.msra.mxu0 %v16487_v28 }
 0x373   : > { %5228 = vmatprep.subr.bf16.mxu0 %v20176_v9 }
 0x374   : > { %2142 = vmatpush1.bf16.msra.mxu1 %v16498_v41 }
 0x375   : > { %5193 = vmatmul.mubr.bf16.gmra.mrb[72].mxu0 %v15509_v14  ;;  %2143 = vmatprep.subr.bf16.mxu1 %v20176_v9  ;;  %v13174_v14 = vpop.f32.mrb[144].mxu0 }
 0x376   : > { %5229 = vmatpush1.bf16.msra.mxu0 %v16498_v41  ;;  %5200 = vmatprep.mubr.bf16.mxu0 %v15514_v59  ;;  %v15522_v59 = vld [vmem:[%s20130_s2 + $0x188] ss:$16 sps:$4 sm:$0xff]   ;;  %v13175_v22 = vpop.f32.mrb[145].mxu0 }
 0x377   : > { %5230 = vmatprep.subr.bf16.mxu0 %v20176_v9  ;;  %v17338_v16 = vadd.f32 %v13175_v22, %v13174_v14  ;;  %v13177_v63 = vpop.f32.mrb[146].mxu0 }
 0x378   : > { %2144 = vmatpush1.bf16.msra.mxu1 %v16512_v55 }
 0x379   : > { %2145 = vmatprep.subr.bf16.mxu1 %v20176_v9 }
 0x37a   : > { %5231 = vmatpush1.bf16.msra.mxu0 %v16512_v55 }
 0x37b   : > { %5232 = vmatprep.subr.bf16.mxu0 %v20176_v9 }
 0x37c   : > { %2146 = vmatpush1.bf16.msra.mxu1 %v16526_v4 }
 0x37d   : > { %5201 = vmatmul.mubr.bf16.gmra.mrb[76].mxu0 %v15512_v7  ;;  %v13178_v7 = vpop.f32.mrb[147].mxu0 }
 0x37e   : > { %5233 = vmatpush1.bf16.msra.mxu0 %v16526_v4  ;;  %5208 = vmatprep.mubr.bf16.mxu0 %v12174_v44  ;;  %v15531_v44 = vld [vmem:[%s20130_s2 + $0x65c] ss:$16 sps:$4 sm:$0xff]   ;;  %v2604_v6 = vpop.f32.mrb[148].mxu0 }
 0x37f   : > { %2162 = vmatmul.mubr.bf16.vlgmr.msra.gmra.mrb[108].mxu1 %v15515_v36  ;;  %5657 = vmatprep.subr.bf16.mxu0 %v20176_v9  ;;  %v15528_v36 = vld [vmem:[%s20130_s2 + $0x1a8] ss:$16 sps:$4 sm:$0xff]   ;;  %v17352_v20 = vadd.f32 %v17229_v31, %v2604_v6 }
 0x380   : > { %11730 = vmatprep.mubr.msk.bf16.mxu1 %vm1170_vm0, %v15520_v15  ;;  %v2606_v15 = vpop.f32.mrb[149].mxu0 }
 0x381   : > { %v2607_v8 = vpop.f32.mrb[150].mxu0 }
 0x385   : > { %5209 = vmatmul.mubr.bf16.gmra.mrb[80].mxu0 %v12173_v1  ;;  %v17358_v1 = vadd.f32 %v17233_v3, %v2607_v8 }
 0x386   : > { %12177 = vmatprep.mubr.msk.bf16.mxu0 %vm1170_vm0, %v15525_v50  ;;  %v2609_v50 = vpop.f32.mrb[151].mxu0 }
 0x387   : > { %2170 = vmatmul.mubr.bf16.gmra.mrb[112].mxu1 %v15522_v59  ;;  %v2612_v14 = vpop.f32.mrb[152].mxu0 }
 0x388   : > { %11731 = vmatprep.mubr.msk.bf16.mxu1 %vm1170_vm0, %v15526_v39  ;;  %v17366_v59 = vadd.f32 %v17237_v34, %v2612_v14  ;;  %v2614_v22 = vpop.f32.mrb[153].mxu0  ;;  %v15529_v39 = vld [vmem:[%s20130_s2 + $0x658] ss:$16 sps:$4 sm:$0xff]  }
 0x389   : > { %v2615_v3 = vpop.f32.mrb[154].mxu0  ;;  %v15534_v34 = vld [vmem:[%s20130_s2 + $0x1c8] ss:$16 sps:$4 sm:$0xff]   ;;  %v15543_v22 = vld [vmem:[%s20130_s2 + $0x69c] ss:$16 sps:$4 sm:$0xff]  }
 0x38a   : > { %v17373_v63 = vadd.f32 %v17247_v58, %v2615_v3  ;;  %v2617_v7 = vpop.f32.mrb[155].mxu0  ;;  %v15538_v58 = vld [vmem:[%s20130_s2 + $0x1ec] ss:$16 sps:$4 sm:$0xff]   ;;  %v15535_v14 = vld [vmem:[%s20130_s2 + $0x678] ss:$16 sps:$4 sm:$0xff]  }
 0x38b   : > { %v2620_v6 = vpop.f32.mrb[156].mxu0  ;;  %v15541_v7 = vld [vmem:[%s20130_s2 + $0x698] ss:$16 sps:$4 sm:$0xff]  }
 0x38c   : > { %v2622_v15 = vpop.f32.mrb[157].mxu0  ;;  %v15563_v3 = vld [vmem:[%s20130_s2 + $0x768] ss:$16 sps:$4 sm:$0xff]  }
 0x38d   : > { %5249 = vmatmul.mubr.bf16.vlgmr.msra.gmra.mrb[84].mxu0 %v15523_v38  ;;  %v15537_v38 = vld [vmem:[%s20130_s2 + $0x67c] ss:$16 sps:$4 sm:$0xff]  }
 0x38e   : > { %5658 = vmatpush1.bf16.msra.mxu0 %v16397_v11  ;;  %12178 = vmatprep.mubr.msk.bf16.mxu0 %vm1170_vm0, %v15531_v44 }
 0x38f   : > { %2178 = vmatmul.mubr.bf16.gmra.mrb[116].mxu1 %v15528_v36  ;;  %5659 = vmatprep.subr.bf16.mxu0 %v20176_v9  ;;  %v17391_v36 = vadd.f32 %v17262_v48, %v2620_v6  ;;  %v11704_v48 = vld [vmem:[%s20130_s2 + $0x208] sm:$0x11] }
 0x390   : > { %11732 = vmatprep.mubr.msk.bf16.mxu1 %vm1170_vm0, %v15532_v60  ;;  %v2623_v60 = vpop.f32.mrb[158].mxu0 }
 0x391   : > { %v17396_v8 = vadd.f32 %v17274_v17, %v2623_v60  ;;  %v2625_v50 = vpop.f32.mrb[159].mxu0  ;;  %v15540_v17 = vld [vmem:[%s20130_s2 + $0x1e8] ss:$16 sps:$4 sm:$0xff]  }
 0x392   : > { %5660 = vmatpush1.bf16.msra.mxu0 %v16417_v27 }
 0x393   : > { %5661 = vmatprep.subr.bf16.mxu0 %v20176_v9 }
 0x395   : > { %5257 = vmatmul.mubr.bf16.gmra.mrb[88].mxu0 %v15529_v39  ;;  %v11728_v39 = vcombine.high %v11704_v48, %v11704_v48 }
 0x396   : > { %5662 = vmatpush1.bf16.msra.mxu0 %v16437_v42  ;;  %12179 = vmatprep.mubr.msk.bf16.mxu0 %vm1170_vm0, %v15537_v38  ;;  %v15548_v38 = vld [vmem:[%s20130_s2 + $0x6bc] ss:$16 sps:$4 sm:$0xff]  }
 0x397   : > { %2186 = vmatmul.mubr.bf16.gmra.mrb[120].mxu1 %v15534_v34  ;;  %5663 = vmatprep.subr.bf16.mxu0 %v20176_v9  ;;  %v2628_v34 = vpop.f32.mrb[160].mxu0 }
 0x398   : > { %11733 = vmatprep.mubr.msk.bf16.mxu1 %vm1170_vm0, %v15538_v58  ;;  %v11727_v58 = vcombine.low %v11704_v48, %v11704_v48  ;;  %v17427_v6 = vadd.f32 %v17298_v46, %v2628_v34  ;;  %v2630_v15 = vpop.f32.mrb[161].mxu0  ;;  %v12152_v48 = vld [vmem:[%s20130_s2 + $0x6d8] sm:$0x11]  ;;  %v12216_v46 = vld [vmem:[%s20130_s2 + $0x788] sm:$0x11] }
 0x399   : > { %v2631_v60 = vpop.f32.mrb[162].mxu0 }
 0x39a   : > { %5664 = vmatpush1.bf16.msra.mxu0 %v16457_v57  ;;  %v17430_v50 = vadd.f32 %v17302_v32, %v2631_v60  ;;  %v15546_v32 = vld [vmem:[%s20130_s2 + $0x6b8] ss:$16 sps:$4 sm:$0xff]   ;;  %v12175_v60 = vcombine.low %v12152_v48, %v12152_v48 }
 0x39b   : > { %5665 = vmatprep.subr.bf16.mxu0 %v20176_v9 }
 0x39d   : > { %5265 = vmatmul.mubr.bf16.gmra.mrb[92].mxu0 %v15535_v14  ;;  %v2633_v14 = vpop.f32.mrb[163].mxu0 }
 0x39e   : > { %5666 = vmatpush1.bf16.msra.mxu0 %v16476_v10  ;;  %12180 = vmatprep.mubr.msk.bf16.mxu0 %vm1170_vm0, %v15543_v22  ;;  %v12176_v22 = vcombine.high %v12152_v48, %v12152_v48  ;;  %v15556_v48 = vld [vmem:[%s20130_s2 + $0x70c] ss:$16 sps:$4 sm:$0xff]  }
 0x39f   : > { %2194 = vmatmul.mubr.bf16.gmra.mrb[124].mxu1 %v15540_v17  ;;  %5667 = vmatprep.subr.bf16.mxu0 %v20176_v9  ;;  %v2636_v17 = vpop.f32.mrb[164].mxu0 }
 0x3a0   : > { %11734 = vmatprep.mubr.msk.bf16.mxu1 %vm1170_vm0, %v11728_v39  ;;  %v17446_v39 = vadd.f32 %v17322_v49, %v2636_v17  ;;  %v15553_v49 = vld [vmem:[%s20130_s2 + $0x6ec] ss:$16 sps:$4 sm:$0xff]  }
 0x3a2   : > { %5668 = vmatpush1.bf16.msra.mxu0 %v16487_v28 }
 0x3a3   : > { %5669 = vmatprep.subr.bf16.mxu0 %v20176_v9 }
 0x3a5   : > { %5273 = vmatmul.mubr.bf16.gmra.mrb[96].mxu0 %v15541_v7  ;;  %v2638_v7 = vpop.f32.mrb[165].mxu0 }
 0x3a6   : > { %5670 = vmatpush1.bf16.msra.mxu0 %v16498_v41  ;;  %12181 = vmatprep.mubr.msk.bf16.mxu0 %vm1170_vm0, %v15548_v38  ;;  %v2639_v38 = vpop.f32.mrb[166].mxu0 }
 0x3a7   : > { %2202 = vmatmul.mubr.bf16.gmra.mrb[128].mxu1 %v11727_v58  ;;  %5671 = vmatprep.subr.bf16.mxu0 %v20176_v9  ;;  %v17449_v34 = vadd.f32 %v17325_v2, %v2639_v38  ;;  %v2641_v58 = vpop.f32.mrb[167].mxu0 }
 0x3a8   : > { %v2644_v14 = vpop.f32.mrb[168].mxu0 }
 0x3a9   : > { %v2646_v2 = vpop.f32.mrb[169].mxu0 }
 0x3aa   : > { %5672 = vmatpush1.bf16.msra.mxu0 %v16512_v55  ;;  %v2647_v17 = vpop.f32.mrb[170].mxu0  ;;  %v15554_v2 = vld [vmem:[%s20130_s2 + $0x708] ss:$16 sps:$4 sm:$0xff]  }
 0x3ab   : > { %5673 = vmatprep.subr.bf16.mxu0 %v20176_v9  ;;  %v2648_v7 = vpop.f32.mrb[171].mxu0 }
 0x3ac   : > { %v17469_v38 = vpop.f32.mrb[172].mxu0  ;;  %v15559_v7 = vld [vmem:[%s20130_s2 + $0x72c] ss:$16 sps:$4 sm:$0xff]  }
 0x3ad   : > { %5281 = vmatmul.mubr.bf16.gmra.mrb[100].mxu0 %v15546_v32  ;;  %v17460_v32 = vadd.f32 %v17338_v16, %v2644_v14  ;;  %v3047_v58 = vpop.f32.mrb[173].mxu0 }
 0x3ae   : > { %5674 = vmatpush1.bf16.msra.mxu0 %v16526_v4  ;;  %12182 = vmatprep.mubr.msk.bf16.mxu0 %vm1170_vm0, %v12176_v22  ;;  %v15551_v22 = vld [vmem:[%s20130_s2 + $0x6e8] ss:$16 sps:$4 sm:$0xff]   ;;  %v17471_v15 = vpop.f32.mrb[174].mxu0 }
 0x3af   : > { %13608 = vmatprep.subr.bf16.mxu0 %v16334_v5  ;;  %20179 = vst [vmem:[#allocation21_spill] sm:$0xff] %v17471_v15  ;;  %v3050_v16 = vpop.f32.mrb[175].mxu0 }
 0x3b5   : > { %5289 = vmatmul.mubr.bf16.gmra.mrb[104].mxu0 %v12175_v60  ;;  %v17475_v60 = vpop.f32.mrb[176].mxu0 }
 0x3b6   : > { %12241 = vmatprep.mubr.msk.bf16.mxu0 %vm1170_vm0, %v15553_v49  ;;  %20180 = vst [vmem:[#allocation22_spill] sm:$0xff] %v17475_v60  ;;  %v3055_v49 = vpop.f32.mrb[177].mxu0  ;;  %v15591_v60 = vld [vmem:[%s20130_s2 + $0x880] ss:$16 sps:$4 sm:$0xff]  }
 0x3b7   : > { %v17478_v14 = vpop.f32.mrb[178].mxu0 }
 0x3b8   : > { %20181 = vst [vmem:[#allocation23_spill] sm:$0xff] %v17478_v14  ;;  %v3058_v17 = vpop.f32.mrb[179].mxu0 }
 0x3b9   : > { %v15562_v17 = vld [vmem:[%s20130_s2 + $0x74c] ss:$16 sps:$4 sm:$0xff]  }
 0x3bd   : > { %5690 = vmatmul.mubr.bf16.vlgmr.msra.gmra.mrb[108].mxu0 %v15551_v22  ;;  %v15602_v22 = vld [vmem:[%s20131_s3 + $0x20] sm:$0xff]  }
 0x3be   : > { %13609 = vmatpush3.bf16.msra.mxu0 %v16318_v12  ;;  %12242 = vmatprep.mubr.msk.bf16.mxu0 %vm1170_vm0, %v15556_v48  ;;  %v17491_v48 = vpop.f32.mrb[180].mxu0 }
 0x3bf   : > { %13610 = vmatprep.subr.bf16.mxu0 %v16340_v13  ;;  %20182 = vst [vmem:[#allocation24_spill] sm:$0xff] %v17491_v48  ;;  %v3063_v58 = vpop.f32.mrb[181].mxu0  ;;  %14240 = vmatprep.subr.bf16.mxu1 %v15602_v22 }
 0x3c0   : > { %v17496_v16 = vpop.f32.mrb[182].mxu0  ;;  %14241 = vmatpush3.bf16.msra.mxu1 %v15602_v22  ;;  %v15565_v22 = vld [vmem:[%s20130_s2 + $0x76c] ss:$16 sps:$4 sm:$0xff]  }
 0x3c1   : > { %20183 = vst [vmem:[#allocation25_spill] sm:$0xff] %v17496_v16  ;;  %v3066_v49 = vpop.f32.mrb[183].mxu0 }
 0x3c2   : > { %13611 = vmatpush3.bf16.msra.mxu0 %v16320_v19  ;;  %v17517_v58 = vpop.f32.mrb[184].mxu0 }
 0x3c3   : > { %13612 = vmatprep.subr.bf16.mxu0 %v16346_v21  ;;  %20184 = vst [vmem:[#allocation26_spill] sm:$0xff] %v17517_v58  ;;  %v3071_v49 = vpop.f32.mrb[185].mxu0  ;;  %v12239_v58 = vcombine.low %v12216_v46, %v12216_v46 }
 0x3c5   : > { %5698 = vmatmul.mubr.bf16.gmra.mrb[112].mxu0 %v15554_v2  ;;  %v15557_v2 = vld [vmem:[%s20130_s2 + $0x728] ss:$16 sps:$4 sm:$0xff]  }
 0x3c6   : > { %13613 = vmatpush3.bf16.msra.mxu0 %v16322_v26  ;;  %12243 = vmatprep.mubr.msk.bf16.mxu0 %vm1170_vm0, %v15559_v7  ;;  %v15560_v7 = vld [vmem:[%s20130_s2 + $0x748] ss:$16 sps:$4 sm:$0xff]  }
 0x3c7   : > { %13614 = vmatprep.subr.bf16.mxu0 %v16352_v29 }
 0x3ca   : > { %13615 = vmatpush3.bf16.msra.mxu0 %v16324_v33 }
 0x3cb   : > { %13616 = vmatprep.subr.bf16.mxu0 %v16358_v37 }
 0x3cd   : > { %5706 = vmatmul.mubr.bf16.gmra.mrb[116].mxu0 %v15557_v2  ;;  %v17519_v2 = vpop.f32.mrb[186].mxu0 }
 0x3ce   : > { %13617 = vmatpush3.bf16.msra.mxu0 %v16326_v40  ;;  %12244 = vmatprep.mubr.msk.bf16.mxu0 %vm1170_vm0, %v15562_v17  ;;  %20185 = vst [vmem:[#allocation27_spill] sm:$0xff] %v17519_v2  ;;  %v3074_v17 = vpop.f32.mrb[187].mxu0  ;;  %v17543_v2 = vld [vmem:[%s20131_s3 + $0x30] sm:$0xff]  }
 0x3cf   : > { %13618 = vmatprep.subr.bf16.mxu0 %v16364_v45  ;;  %v17532_v49 = vpop.f32.mrb[188].mxu0 }
 0x3d0   : > { %20186 = vst [vmem:[#allocation28_spill] sm:$0xff] %v17532_v49  ;;  %v3079_v17 = vpop.f32.mrb[189].mxu0 }
 0x3d1   : > { %v17537_v44 = vpop.f32.mrb[190].mxu0  ;;  %v15570_v17 = vld [vmem:[%s20130_s2 + $0x794] ss:$16 sps:$4 sm:$0xff]  }
 0x3d2   : > { %13619 = vmatpush3.bf16.msra.mxu0 %v16328_v47  ;;  %20187 = vst [vmem:[#allocation29_spill] sm:$0xff] %v17537_v44  ;;  %v3082_v31 = vpop.f32.mrb[191].mxu0 }
 0x3d3   : > { %13620 = vmatprep.subr.bf16.mxu0 %v16370_v53  ;;  %v15568_v31 = vld [vmem:[%s20130_s2 + $0x790] ss:$16 sps:$4 sm:$0xff]  }
 0x3d5   : > { %5714 = vmatmul.mubr.bf16.gmra.mrb[120].mxu0 %v15560_v7  ;;  %v12240_v7 = vcombine.high %v12216_v46, %v12216_v46  ;;  %v15573_v46 = vld [vmem:[%s20130_s2 + $0x7b4] ss:$16 sps:$4 sm:$0xff]  }
 0x3d6   : > { %13621 = vmatpush3.bf16.msra.mxu0 %v16330_v54  ;;  %12245 = vmatprep.mubr.msk.bf16.mxu0 %vm1170_vm0, %v15565_v22  ;;  %v15609_v22 = vld [vmem:[%s20131_s3 + $0x28] sm:$0xff]  }
 0x3d7   : > { %13622 = vmatprep.subr.bf16.mxu0 %v16376_v62  ;;  %14242 = vmatprep.subr.bf16.mxu1 %v15609_v22 }
 0x3d8   : > { %14243 = vmatpush3.bf16.msra.mxu1 %v15609_v22 }
 0x3d9   : > { %14256 = vmatprep.subr.bf16.mxu1 %v17543_v2 }
 0x3da   : > { %13623 = vmatpush3.bf16.msra.mxu0 %v16332_v61 }
 0x3db   : > { %13668 = vmatprep.subr.bf16.mxu0 %v16334_v5 }
 0x3dd   : > { %5722 = vmatmul.mubr.bf16.gmra.mrb[124].mxu0 %v15563_v3  ;;  %v17549_v3 = vpop.f32.mrb[192].mxu0 }
 0x3de   : > { %12246 = vmatprep.mubr.msk.bf16.mxu0 %vm1170_vm0, %v12240_v7  ;;  %20188 = vst [vmem:[#allocation30_spill] sm:$0xff] %v17549_v3  ;;  %v3087_v49 = vpop.f32.mrb[193].mxu0 }
 0x3df   : > { %v3088_v44 = vpop.f32.mrb[194].mxu0  ;;  %v15571_v49 = vld [vmem:[%s20130_s2 + $0x7b0] ss:$16 sps:$4 sm:$0xff]  }
 0x3e0   : > { %v3089_v7 = vpop.f32.mrb[195].mxu0 }
 0x3e1   : > { %v13264_v22 = vpop.f32.mrb[196].mxu0 }
 0x3e2   : > { %v13265_v16 = vpop.f32.mrb[197].mxu0 }
 0x3e3   : > { %v17557_v48 = vadd.f32 %v13265_v16, %v13264_v22  ;;  %v13267_v14 = vpop.f32.mrb[198].mxu0  ;;  %v15576_v16 = vld [vmem:[%s20130_s2 + $0x7d4] ss:$16 sps:$4 sm:$0xff]  }
 0x3e4   : > { %v13268_v44 = vpop.f32.mrb[199].mxu0 }
 0x3e5   : > { %5730 = vmatmul.mubr.bf16.gmra.mrb[128].mxu0 %v12239_v58  ;;  %20189 = vst [vmem:[#allocation31_spill] sm:$0xff] %v17557_v48  ;;  %v17561_v58 = vadd.f32 %v13268_v44, %v13267_v14  ;;  %v15574_v44 = vld [vmem:[%s20130_s2 + $0x7d0] ss:$16 sps:$4 sm:$0xff]  }
 0x3e6   : > { %6050 = vmatprep.mubr.bf16.mxu0 %v15570_v17  ;;  %v13270_v17 = vpop.f32.mrb[200].mxu0 }
 0x3e7   : > { %20190 = vst [vmem:[#allocation32_spill] sm:$0xff] %v17561_v58  ;;  %v13271_v7 = vpop.f32.mrb[201].mxu0 }
 0x3ed   : > { %6051 = vmatmul.mubr.bf16.vlgmr.msra.gmra.mrb[132].mxu0 %v15568_v31  ;;  %v17571_v31 = vadd.f32 %v13271_v7, %v13270_v17 }
 0x3ee   : > { %13669 = vmatpush3.bf16.msra.mxu0 %v16318_v12  ;;  %6058 = vmatprep.mubr.bf16.mxu0 %v15573_v46  ;;  %v13273_v46 = vpop.f32.mrb[202].mxu0 }
 0x3ef   : > { %13670 = vmatprep.subr.bf16.mxu0 %v16340_v13  ;;  %20191 = vst [vmem:[#allocation33_spill] sm:$0xff] %v17571_v31  ;;  %v13274_v14 = vpop.f32.mrb[203].mxu0 }
 0x3f0   : > { %v17575_v22 = vadd.f32 %v13274_v14, %v13273_v46  ;;  %v13276_v17 = vpop.f32.mrb[204].mxu0 }
 0x3f1   : > { %v13277_v7 = vpop.f32.mrb[205].mxu0 }
 0x3f2   : > { %13671 = vmatpush3.bf16.msra.mxu0 %v16320_v19  ;;  %20192 = vst [vmem:[#allocation34_spill] sm:$0xff] %v17575_v22  ;;  %v13279_v31 = vpop.f32.mrb[206].mxu0  ;;  %v15577_v22 = vld [vmem:[%s20130_s2 + $0x7f0] ss:$16 sps:$4 sm:$0xff]  }
 0x3f3   : > { %13672 = vmatprep.subr.bf16.mxu0 %v16346_v21  ;;  %v13280_v46 = vpop.f32.mrb[207].mxu0 }
 0x3f4   : > { %v17589_v14 = vadd.f32 %v13280_v46, %v13279_v31  ;;  %v12279_v46 = vld [vmem:[%s20130_s2 + $0x830] sm:$0x11] }
 0x3f5   : > { %6059 = vmatmul.mubr.bf16.gmra.mrb[136].mxu0 %v15571_v49  ;;  %v15579_v49 = vld [vmem:[%s20130_s2 + $0x7f4] ss:$16 sps:$4 sm:$0xff]  }
 0x3f6   : > { %13673 = vmatpush3.bf16.msra.mxu0 %v16322_v26  ;;  %6066 = vmatprep.mubr.bf16.mxu0 %v15576_v16  ;;  %v17585_v16 = vadd.f32 %v13277_v7, %v13276_v17  ;;  %20194 = vst [vmem:[#allocation36_spill] sm:$0xff] %v17589_v14  ;;  %v17598_v17 = vpop.f32.mrb[208].mxu0  ;;  %v15580_v14 = vld [vmem:[%s20130_s2 + $0x810] ss:$16 sps:$4 sm:$0xff]  }
 0x3f7   : > { %13674 = vmatprep.subr.bf16.mxu0 %v16352_v29  ;;  %20195 = vst [vmem:[#allocation37_spill] sm:$0xff] %v17598_v17 }
 0x3f8   : > { %20193 = vst [vmem:[#allocation35_spill] sm:$0xff] %v17585_v16  ;;  %v12302_v16 = vcombine.high %v12279_v46, %v12279_v46 }
 0x3fa   : > { %13675 = vmatpush3.bf16.msra.mxu0 %v16324_v33 }
 0x3fb   : > { %13676 = vmatprep.subr.bf16.mxu0 %v16358_v37 }
 0x3fd   : > { %6067 = vmatmul.mubr.bf16.gmra.mrb[140].mxu0 %v15574_v44  ;;  %v15582_v44 = vld [vmem:[%s20130_s2 + $0x814] ss:$16 sps:$4 sm:$0xff]  }
 0x3fe   : > { %13677 = vmatpush3.bf16.msra.mxu0 %v16326_v40  ;;  %6074 = vmatprep.mubr.bf16.mxu0 %v15579_v49  ;;  %v17601_v49 = vpop.f32.mrb[209].mxu0 }
 0x3ff   : > { %13678 = vmatprep.subr.bf16.mxu0 %v16364_v45  ;;  %20196 = vst [vmem:[#allocation38_spill] sm:$0xff] %v17601_v49  ;;  %v17603_v7 = vpop.f32.mrb[210].mxu0 }
 0x400   : > { %20197 = vst [vmem:[#allocation39_spill] sm:$0xff] %v17603_v7  ;;  %v17605_v31 = vpop.f32.mrb[211].mxu0  ;;  %v15587_v7 = vld [vmem:[%s20130_s2 + $0x844] ss:$16 sps:$4 sm:$0xff]  }
 0x401   : > { %20198 = vst [vmem:[#allocation40_spill] sm:$0xff] %v17605_v31  ;;  %v17616_v58 = vpop.f32.mrb[212].mxu0  ;;  %v12301_v31 = vcombine.low %v12279_v46, %v12279_v46 }
 0x402   : > { %13679 = vmatpush3.bf16.msra.mxu0 %v16328_v47  ;;  %20199 = vst [vmem:[#allocation41_spill] sm:$0xff] %v17616_v58 }
 0x403   : > { %13680 = vmatprep.subr.bf16.mxu0 %v16370_v53 }
 0x405   : > { %6075 = vmatmul.mubr.bf16.gmra.mrb[144].mxu0 %v15577_v22  ;;  %v17619_v22 = vpop.f32.mrb[213].mxu0 }
 0x406   : > { %13681 = vmatpush3.bf16.msra.mxu0 %v16330_v54  ;;  %6082 = vmatprep.mubr.bf16.mxu0 %v15582_v44  ;;  %20200 = vst [vmem:[#allocation42_spill] sm:$0xff] %v17619_v22  ;;  %v17621_v44 = vpop.f32.mrb[214].mxu0 }
 0x407   : > { %13682 = vmatprep.subr.bf16.mxu0 %v16376_v62  ;;  %20201 = vst [vmem:[#allocation43_spill] sm:$0xff] %v17621_v44  ;;  %v17623_v48 = vpop.f32.mrb[215].mxu0 }
 0x408   : > { %20202 = vst [vmem:[#allocation44_spill] sm:$0xff] %v17623_v48  ;;  %v17628_v49 = vpop.f32.mrb[216].mxu0 }
 0x409   : > { %20203 = vst [vmem:[#allocation45_spill] sm:$0xff] %v17628_v49  ;;  %v17630_v17 = vpop.f32.mrb[217].mxu0 }
 0x40a   : > { %13683 = vmatpush3.bf16.msra.mxu0 %v16332_v61  ;;  %20204 = vst [vmem:[#allocation46_spill] sm:$0xff] %v17630_v17  ;;  %v13297_v58 = vpop.f32.mrb[218].mxu0 }
 0x40b   : > { %13728 = vmatprep.subr.bf16.mxu0 %v16334_v5  ;;  %v13298_v3 = vpop.f32.mrb[219].mxu0 }
 0x40c   : > { %v13324_v46 = vpop.f32.mrb[220].mxu0 }
 0x40d   : > { %6083 = vmatmul.mubr.bf16.gmra.mrb[148].mxu0 %v15580_v14  ;;  %v15585_v14 = vld [vmem:[%s20130_s2 + $0x840] ss:$16 sps:$4 sm:$0xff]   ;;  %v13325_v48 = vpop.f32.mrb[221].mxu0 }
 0x40e   : > { %6090 = vmatprep.mubr.bf16.mxu0 %v12302_v16  ;;  %v15590_v16 = vld [vmem:[%s20130_s2 + $0x864] ss:$16 sps:$4 sm:$0xff]   ;;  %v17638_v44 = vadd.f32 %v13325_v48, %v13324_v46  ;;  %v13327_v49 = vpop.f32.mrb[222].mxu0 }
 0x40f   : > { %v13328_v58 = vpop.f32.mrb[223].mxu0  ;;  %v15593_v48 = vld [vmem:[%s20130_s2 + $0x884] ss:$16 sps:$4 sm:$0xff]  }
 0x410   : > { %v17642_v3 = vadd.f32 %v13328_v58, %v13327_v49 }
 0x415   : > { %6091 = vmatmul.mubr.bf16.gmra.mrb[152].mxu0 %v12301_v31  ;;  %v13330_v31 = vpop.f32.mrb[224].mxu0 }
 0x416   : > { %6491 = vmatprep.mubr.bf16.mxu0 %v15587_v7  ;;  %v15588_v7 = vld [vmem:[%s20130_s2 + $0x860] ss:$16 sps:$4 sm:$0xff]  }
 0x41d   : > { %6492 = vmatmul.mubr.bf16.vlgmr.msra.gmra.mrb[156].mxu0 %v15585_v14  ;;  %v13331_v14 = vpop.f32.mrb[225].mxu0 }
 0x41e   : > { %13729 = vmatpush3.bf16.msra.mxu0 %v16318_v12  ;;  %6499 = vmatprep.mubr.bf16.mxu0 %v15590_v16  ;;  %v17652_v16 = vadd.f32 %v13331_v14, %v13330_v31  ;;  %v13333_v46 = vpop.f32.mrb[226].mxu0  ;;  %v15596_v31 = vld [vmem:[%s20130_s2 + $0x8a4] ss:$16 sps:$4 sm:$0xff]  }
 0x41f   : > { %13730 = vmatprep.subr.bf16.mxu0 %v16340_v13  ;;  %v13334_v49 = vpop.f32.mrb[227].mxu0 }
 0x420   : > { %v17656_v58 = vadd.f32 %v13334_v49, %v13333_v46  ;;  %v13336_v17 = vpop.f32.mrb[228].mxu0  ;;  %v15597_v46 = vld [vmem:[%s20130_s2 + $0x8c0] ss:$16 sps:$4 sm:$0xff]  }
 0x421   : > { %v13337_v22 = vpop.f32.mrb[229].mxu0 }
 0x422   : > { %13731 = vmatpush3.bf16.msra.mxu0 %v16320_v19  ;;  %v17661_v15 = vadd.f32 %v13337_v22, %v13336_v17  ;;  %v15594_v17 = vld [vmem:[%s20130_s2 + $0x8a0] ss:$16 sps:$4 sm:$0xff]   ;;  %v15599_v22 = vld [vmem:[%s20130_s2 + $0x8c4] ss:$16 sps:$4 sm:$0xff]  }
 0x423   : > { %13732 = vmatprep.subr.bf16.mxu0 %v16346_v21 }
 0x425   : > { %6500 = vmatmul.mubr.bf16.gmra.mrb[160].mxu0 %v15588_v7  ;;  %v13339_v7 = vpop.f32.mrb[230].mxu0 }
 0x426   : > { %13733 = vmatpush3.bf16.msra.mxu0 %v16322_v26  ;;  %6507 = vmatprep.mubr.bf16.mxu0 %v15593_v48  ;;  %v13340_v48 = vpop.f32.mrb[231].mxu0 }
 0x427   : > { %13734 = vmatprep.subr.bf16.mxu0 %v16352_v29  ;;  %v17668_v14 = vadd.f32 %v13340_v48, %v13339_v7  ;;  %v15603_v48 = vld [vmem:[%s20130_s2 + $0x8f0] ss:$16 sps:$4 sm:$0xff]  }
 0x429   : > { %20205 = vst [vmem:[#allocation47_spill] sm:$0xff] %v17668_v14 }
 0x42a   : > { %13735 = vmatpush3.bf16.msra.mxu0 %v16324_v33 }
 0x42b   : > { %13736 = vmatprep.subr.bf16.mxu0 %v16358_v37 }
 0x42d   : > { %6508 = vmatmul.mubr.bf16.gmra.mrb[164].mxu0 %v15591_v60  ;;  %v12343_v60 = vld [vmem:[%s20130_s2 + $0x8e0] sm:$0x11] }
 0x42e   : > { %13737 = vmatpush3.bf16.msra.mxu0 %v16326_v40  ;;  %6515 = vmatprep.mubr.bf16.mxu0 %v15596_v31  ;;  %v12366_v49 = vcombine.high %v12343_v60, %v12343_v60  ;;  %v12365_v7 = vcombine.low %v12343_v60, %v12343_v60  ;;  %v15605_v31 = vld [vmem:[%s20130_s2 + $0x8f4] ss:$16 sps:$4 sm:$0xff]  }
 0x42f   : > { %13738 = vmatprep.subr.bf16.mxu0 %v16364_v45 }
 0x432   : > { %13739 = vmatpush3.bf16.msra.mxu0 %v16328_v47 }
 0x433   : > { %13740 = vmatprep.subr.bf16.mxu0 %v16370_v53 }
 0x435   : > { %6516 = vmatmul.mubr.bf16.gmra.mrb[168].mxu0 %v15594_v17  ;;  %v15608_v17 = vld [vmem:[%s20130_s2 + $0x914] ss:$16 sps:$4 sm:$0xff]  }
 0x436   : > { %13741 = vmatpush3.bf16.msra.mxu0 %v16330_v54  ;;  %6523 = vmatprep.mubr.bf16.mxu0 %v15599_v22  ;;  %v15606_v22 = vld [vmem:[%s20130_s2 + $0x910] ss:$16 sps:$4 sm:$0xff]  }
 0x437   : > { %13742 = vmatprep.subr.bf16.mxu0 %v16376_v62 }
 0x43a   : > { %13743 = vmatpush3.bf16.msra.mxu0 %v16332_v61 }
 0x43b   : > { %6980 = vmatprep.subr.bf16.mxu0 %v20176_v9 }
 0x43d   : > { %6524 = vmatmul.mubr.bf16.gmra.mrb[172].mxu0 %v15597_v46  ;;  %v15612_v46 = vld [vmem:[%s20130_s2 + $0x934] ss:$16 sps:$4 sm:$0xff]  }
 0x43e   : > { %6531 = vmatprep.mubr.bf16.mxu0 %v12366_v49 }
 0x445   : > { %6532 = vmatmul.mubr.bf16.gmra.mrb[176].mxu0 %v12365_v7 }
 0x446   : > { %6932 = vmatprep.mubr.bf16.mxu0 %v15605_v31 }
 0x44d   : > { %6933 = vmatmul.mubr.bf16.vlgmr.msra.gmra.mrb[180].mxu0 %v15603_v48 }
 0x44e   : > { %6981 = vmatpush1.bf16.msra.mxu0 %v16397_v11  ;;  %6940 = vmatprep.mubr.bf16.mxu0 %v15608_v17 }
 0x44f   : > { %6982 = vmatprep.subr.bf16.mxu0 %v20176_v9 }
 0x452   : > { %6983 = vmatpush1.bf16.msra.mxu0 %v16417_v27  ;;  %v2163_v60 = vpop.f32.mrb[108].mxu1 }
 0x453   : > { %v2164_v49 = vadd.f32 %v17125_v24, %v2163_v60  ;;  %v2165_v7 = vpop.f32.mrb[109].mxu1  ;;  %6984 = vmatprep.subr.bf16.mxu0 %v20176_v9  ;;  %v15610_v24 = vld [vmem:[%s20130_s2 + $0x930] ss:$16 sps:$4 sm:$0xff]  }
 0x454   : > { %v2166_v31 = vpop.f32.mrb[110].mxu1 }
 0x455   : > { %v2167_v48 = vadd.f32 %v17130_v35, %v2166_v31  ;;  %v2168_v17 = vpop.f32.mrb[111].mxu1  ;;  %6941 = vmatmul.mubr.bf16.gmra.mrb[184].mxu0 %v15606_v22  ;;  %v15617_v35 = vld [vmem:[%s20130_s2 + $0x954] ss:$16 sps:$4 sm:$0xff]  }
 0x456   : > { %6985 = vmatpush1.bf16.msra.mxu0 %v16437_v42  ;;  %6948 = vmatprep.mubr.bf16.mxu0 %v15612_v46 }
 0x457   : > { %v2209_v14 = vpack.c.bf16 %v2167_v48, %v2164_v49  ;;  %6986 = vmatprep.subr.bf16.mxu0 %v20176_v9  ;;  %v15614_v48 = vld [vmem:[%s20131_s3 + $0x38] sm:$0xff]  }
 0x459   : > { %14244 = vmatprep.mubr.msk.bf16.mxu1 %vm1691_vm1, %v2209_v14 }
 0x45a   : > { %6987 = vmatpush1.bf16.msra.mxu0 %v16457_v57  ;;  %v2171_v60 = vpop.f32.mrb[112].mxu1 }
 0x45b   : > { %v2172_v22 = vadd.f32 %v17138_v43, %v2171_v60  ;;  %v2173_v7 = vpop.f32.mrb[113].mxu1  ;;  %6988 = vmatprep.subr.bf16.mxu0 %v20176_v9  ;;  %v15615_v43 = vld [vmem:[%s20130_s2 + $0x950] ss:$16 sps:$4 sm:$0xff]  }
 0x45c   : > { %v2174_v46 = vpop.f32.mrb[114].mxu1 }
 0x45d   : > { %v2175_v49 = vadd.f32 %v17144_v52, %v2174_v46  ;;  %v2176_v14 = vpop.f32.mrb[115].mxu1  ;;  %6949 = vmatmul.mubr.bf16.gmra.mrb[188].mxu0 %v15610_v24 }
 0x45e   : > { %6989 = vmatpush1.bf16.msra.mxu0 %v16476_v10  ;;  %6956 = vmatprep.mubr.bf16.mxu0 %v15617_v35  ;;  %v15620_v35 = vld [vmem:[%s20130_s2 + $0x974] ss:$16 sps:$4 sm:$0xff]  }
 0x45f   : > { %v2210_v31 = vpack.c.bf16 %v2175_v49, %v2172_v22  ;;  %6990 = vmatprep.subr.bf16.mxu0 %v20176_v9 }
 0x461   : > { %14245 = vmatmul.mubr.msk.bf16.vlgmr.msra.gmra.mrb[96].mxu1 %vm1691_vm1, %v2210_v31 }
 0x462   : > { %14257 = vmatpush3.bf16.msra.mxu1 %v17543_v2  ;;  %6991 = vmatpush1.bf16.msra.mxu0 %v16487_v28  ;;  %v2179_v52 = vpop.f32.mrb[116].mxu1 }
 0x463   : > { %v2180_v17 = vadd.f32 %v17154_v23, %v2179_v52  ;;  %v2181_v24 = vpop.f32.mrb[117].mxu1  ;;  %14258 = vmatprep.subr.bf16.mxu1 %v15614_v48  ;;  %6992 = vmatprep.subr.bf16.mxu0 %v20176_v9  ;;  %v12407_v23 = vld [vmem:[%s20130_s2 + $0x990] sm:$0x11] }
 0x464   : > { %v2182_v60 = vpop.f32.mrb[118].mxu1  ;;  %v12430_v49 = vcombine.high %v12407_v23, %v12407_v23  ;;  %v12429_v24 = vcombine.low %v12407_v23, %v12407_v23  ;;  %v15623_v23 = vld [vmem:[%s20130_s2 + $0x8f8] ss:$16 sps:$4 sm:$0xff]  }
 0x465   : > { %v2183_v22 = vadd.f32 %v17161_v30, %v2182_v60  ;;  %v2184_v7 = vpop.f32.mrb[119].mxu1  ;;  %6957 = vmatmul.mubr.bf16.gmra.mrb[192].mxu0 %v15615_v43  ;;  %v15618_v30 = vld [vmem:[%s20130_s2 + $0x970] ss:$16 sps:$4 sm:$0xff]  }
 0x466   : > { %14259 = vmatpush3.bf16.msra.mxu1 %v15614_v48  ;;  %6993 = vmatpush1.bf16.msra.mxu0 %v16498_v41 }
 0x467   : > { %v2211_v2 = vpack.c.bf16 %v2183_v22, %v2180_v17  ;;  %13188 = vmatprep.subr.bf16.mxu1 %v16334_v5  ;;  %6994 = vmatprep.subr.bf16.mxu0 %v20176_v9 }
 0x468   : > { %6964 = vmatprep.mubr.bf16.mxu0 %v15620_v35 }
 0x469   : > { %14248 = vmatprep.mubr.msk.bf16.mxu1 %vm1691_vm1, %v2211_v2 }
 0x46a   : > { %6995 = vmatpush1.bf16.msra.mxu0 %v16512_v55  ;;  %v2187_v46 = vpop.f32.mrb[120].mxu1 }
 0x46b   : > { %v2188_v14 = vadd.f32 %v17181_v56, %v2187_v46  ;;  %v2189_v31 = vpop.f32.mrb[121].mxu1  ;;  %6996 = vmatprep.subr.bf16.mxu0 %v20176_v9  ;;  %v15625_v56 = vld [vmem:[%s20130_s2 + $0x8fc] ss:$16 sps:$4 sm:$0xff]  }
 0x46c   : > { %v2190_v48 = vpop.f32.mrb[122].mxu1 }
 0x46d   : > { %v2191_v43 = vadd.f32 %v17189_v25, %v2190_v48  ;;  %v2192_v52 = vpop.f32.mrb[123].mxu1  ;;  %6965 = vmatmul.mubr.bf16.gmra.mrb[196].mxu0 %v15618_v30 }
 0x46e   : > { %6997 = vmatpush1.bf16.msra.mxu0 %v16526_v4  ;;  %6972 = vmatprep.mubr.bf16.mxu0 %v12430_v49  ;;  %v15631_v52 = vld [vmem:[%s20130_s2 + $0x93c] ss:$16 sps:$4 sm:$0xff]  }
 0x46f   : > { %v2212_v17 = vpack.c.bf16 %v2191_v43, %v2188_v14  ;;  %13788 = vmatprep.subr.bf16.mxu0 %v16334_v5  ;;  %v20206_v43 = vpack.c.bf16 %v17358_v1, %v17352_v20  ;;  %v20207_v20 = vpack.c.bf16 %v17373_v63, %v17366_v59  ;;  %v20208_v1 = vpack.c.bf16 %v17396_v8, %v17391_v36  ;;  %v15634_v59 = vld [vmem:[%s20130_s2 + $0x95c] ss:$16 sps:$4 sm:$0xff]   ;;  %v15632_v8 = vld [vmem:[%s20130_s2 + $0x958] ss:$16 sps:$4 sm:$0xff]  }
 0x470   : > { %v20209_v63 = vpack.c.bf16 %v17430_v50, %v17427_v6  ;;  %v20210_v36 = vpack.c.bf16 %v17449_v34, %v17446_v39  ;;  %v15637_v6 = vld [vmem:[%s20130_s2 + $0x97c] ss:$16 sps:$4 sm:$0xff]   ;;  %v15642_v50 = vld [vmem:[%s20130_s2 + $0x2c4] ss:$16 sps:$4 sm:$0xff]   ;;  %v2655_v39 = vpack.c.bf16 %v17460_v32, %v17460_v32  ;;  %v15635_v32 = vld [vmem:[%s20130_s2 + $0x978] ss:$16 sps:$4 sm:$0xff]  }
 0x471   : > { %14249 = vmatmul.mubr.msk.bf16.gmra.mrb[100].mxu1 %vm1691_vm1, %v2212_v17  ;;  %v15629_v17 = vld [vmem:[%s20130_s2 + $0x938] ss:$16 sps:$4 sm:$0xff]  }
 0x472   : > { %v2195_v60 = vpop.f32.mrb[124].mxu1  ;;  %v12408_v34 = vld [vmem:[%s20130_s2 + $0x998] sm:$0x11] }
 0x473   : > { %v2196_v35 = vadd.f32 %v17198_v51, %v2195_v60  ;;  %v2197_v22 = vpop.f32.mrb[125].mxu1  ;;  %v15628_v51 = vld [vmem:[%s20130_s2 + $0x91c] ss:$16 sps:$4 sm:$0xff]   ;;  %v12431_v60 = vcombine.low %v12408_v34, %v12408_v34 }
 0x474   : > { %v2198_v25 = vpop.f32.mrb[126].mxu1  ;;  %v15640_v22 = vld [vmem:[%s20130_s2 + $0x2c0] ss:$16 sps:$4 sm:$0xff]  }
 0x475   : > { %v2199_v7 = vadd.f32 %v17201_v0, %v2198_v25  ;;  %v2200_v2 = vpop.f32.mrb[127].mxu1  ;;  %6973 = vmatmul.mubr.bf16.gmra.mrb[200].mxu0 %v12429_v24  ;;  %v12432_v24 = vcombine.high %v12408_v34, %v12408_v34  ;;  %v15646_v25 = vld [vmem:[%s20130_s2 + $0x2e4] ss:$16 sps:$4 sm:$0xff]  }
 0x476   : > { %12433 = vmatprep.mubr.msk.bf16.mxu0 %vm1170_vm0, %v15625_v56  ;;  %v15660_v56 = vld [vmem:[%s20131_s3 + $0x40] sm:$0xff]  }
 0x477   : > { %v2213_v30 = vpack.c.bf16 %v2199_v7, %v2196_v35  ;;  %v15645_v35 = vld [vmem:[%s20130_s2 + $0x9a4] ss:$16 sps:$4 sm:$0xff]   ;;  %v15643_v7 = vld [vmem:[%s20130_s2 + $0x9a0] ss:$16 sps:$4 sm:$0xff]  }
 0x478   : > { %v15648_v2 = vld [vmem:[%s20130_s2 + $0x2e0] ss:$16 sps:$4 sm:$0xff]  }
 0x479   : > { %14252 = vmatprep.mubr.msk.bf16.mxu1 %vm1691_vm1, %v2213_v30  ;;  %v15649_v30 = vld [vmem:[%s20130_s2 + $0x304] ss:$16 sps:$4 sm:$0xff]  }
 0x47a   : > { %v2203_v46 = vpop.f32.mrb[128].mxu1 }
 0x47b   : > { %v2204_v49 = vadd.f32 %v17212_v18, %v2203_v46  ;;  %v2205_v14 = vpop.f32.mrb[129].mxu1  ;;  %v15626_v18 = vld [vmem:[%s20130_s2 + $0x918] ss:$16 sps:$4 sm:$0xff]   ;;  %v15652_v46 = vld [vmem:[%s20130_s2 + $0x324] ss:$16 sps:$4 sm:$0xff]  }
 0x47c   : > { %v2206_v0 = vpop.f32.mrb[130].mxu1  ;;  %v11831_v14 = vld [vmem:[%s20130_s2 + $0x360] sm:$0x11] }
 0x47d   : > { %v2214_v31 = vpack.c.bf16 %v2204_v49, %v2204_v49  ;;  %v2207_v48 = vpop.f32.mrb[131].mxu1  ;;  %7013 = vmatmul.mubr.bf16.vlgmr.msra.gmra.mrb[204].mxu0 %v15623_v23  ;;  %v15651_v23 = vld [vmem:[%s20130_s2 + $0x300] ss:$16 sps:$4 sm:$0xff]   ;;  %v15655_v49 = vld [vmem:[%s20130_s2 + $0x344] ss:$16 sps:$4 sm:$0xff]  }
 0x47e   : > { %13789 = vmatpush3.bf16.msra.mxu0 %v16318_v12  ;;  %12434 = vmatprep.mubr.msk.bf16.mxu0 %vm1170_vm0, %v15628_v51  ;;  %v15654_v51 = vld [vmem:[%s20130_s2 + $0x320] ss:$16 sps:$4 sm:$0xff]   ;;  %v11853_v48 = vcombine.low %v11831_v14, %v11831_v14 }
 0x47f   : > { %13790 = vmatprep.subr.bf16.mxu0 %v16340_v13  ;;  %14253 = vmatmul.mubr.msk.bf16.gmra.mrb[104].mxu1 %vm1691_vm1, %v2214_v31  ;;  %v15657_v0 = vld [vmem:[%s20130_s2 + $0x340] ss:$16 sps:$4 sm:$0xff]   ;;  %v11854_v31 = vcombine.high %v11831_v14, %v11831_v14 }
 0x480   : > { %14260 = vmatprep.mubr.msk.bf16.mxu1 %vm1691_vm1, %v20206_v43  ;;  %v15661_v43 = vld [vmem:[%s20131_s3 + $0x48] sm:$0xff]  }
 0x482   : > { %13791 = vmatpush3.bf16.msra.mxu0 %v16320_v19 }
 0x483   : > { %13792 = vmatprep.subr.bf16.mxu0 %v16346_v21 }
 0x485   : > { %7021 = vmatmul.mubr.bf16.gmra.mrb[208].mxu0 %v15626_v18  ;;  %v13342_v18 = vpop.f32.mrb[232].mxu0 }
 0x486   : > { %13793 = vmatpush3.bf16.msra.mxu0 %v16322_v26  ;;  %12435 = vmatprep.mubr.msk.bf16.mxu0 %vm1170_vm0, %v15631_v52  ;;  %v13343_v52 = vpop.f32.mrb[233].mxu0 }
 0x487   : > { %13794 = vmatprep.subr.bf16.mxu0 %v16352_v29  ;;  %14261 = vmatmul.mubr.msk.bf16.vlgmr.msra.gmra.mrb[96].mxu1 %vm1691_vm1, %v20207_v20  ;;  %v17917_v20 = vadd.f32 %v13343_v52, %v13342_v18 }
 0x488   : > { %13189 = vmatpush3.bf16.msra.mxu1 %v16318_v12  ;;  %14264 = vmatprep.mubr.msk.bf16.mxu1 %vm1691_vm1, %v20208_v1  ;;  %v13345_v1 = vpop.f32.mrb[234].mxu0 }
 0x489   : > { %13190 = vmatprep.subr.bf16.mxu1 %v16340_v13 }
 0x48a   : > { %13795 = vmatpush3.bf16.msra.mxu0 %v16324_v33 }
 0x48b   : > { %13796 = vmatprep.subr.bf16.mxu0 %v16358_v37 }
 0x48c   : > { %13191 = vmatpush3.bf16.msra.mxu1 %v16320_v19 }
 0x48d   : > { %13192 = vmatprep.subr.bf16.mxu1 %v16346_v21  ;;  %7029 = vmatmul.mubr.bf16.gmra.mrb[212].mxu0 %v15629_v17  ;;  %v13346_v17 = vpop.f32.mrb[235].mxu0 }
 0x48e   : > { %13797 = vmatpush3.bf16.msra.mxu0 %v16326_v40  ;;  %12436 = vmatprep.mubr.msk.bf16.mxu0 %vm1170_vm0, %v15634_v59  ;;  %v17919_v59 = vadd.f32 %v13346_v17, %v13345_v1 }
 0x48f   : > { %13798 = vmatprep.subr.bf16.mxu0 %v16364_v45  ;;  %14265 = vmatmul.mubr.msk.bf16.gmra.mrb[100].mxu1 %vm1691_vm1, %v20209_v63  ;;  %v13348_v63 = vpop.f32.mrb[236].mxu0 }
 0x490   : > { %13193 = vmatpush3.bf16.msra.mxu1 %v16322_v26  ;;  %14268 = vmatprep.mubr.msk.bf16.mxu1 %vm1691_vm1, %v20210_v36  ;;  %v13349_v36 = vpop.f32.mrb[237].mxu0 }
 0x491   : > { %13194 = vmatprep.subr.bf16.mxu1 %v16352_v29 }
 0x492   : > { %13799 = vmatpush3.bf16.msra.mxu0 %v16328_v47 }
 0x493   : > { %13800 = vmatprep.subr.bf16.mxu0 %v16370_v53 }
 0x494   : > { %13195 = vmatpush3.bf16.msra.mxu1 %v16324_v33 }
 0x495   : > { %13196 = vmatprep.subr.bf16.mxu1 %v16358_v37  ;;  %7037 = vmatmul.mubr.bf16.gmra.mrb[216].mxu0 %v15632_v8  ;;  %v17921_v8 = vadd.f32 %v13349_v36, %v13348_v63 }
 0x496   : > { %13801 = vmatpush3.bf16.msra.mxu0 %v16330_v54  ;;  %12437 = vmatprep.mubr.msk.bf16.mxu0 %vm1170_vm0, %v15637_v6  ;;  %v13351_v6 = vpop.f32.mrb[238].mxu0 }
 0x497   : > { %13802 = vmatprep.subr.bf16.mxu0 %v16376_v62  ;;  %14269 = vmatmul.mubr.msk.bf16.gmra.mrb[104].mxu1 %vm1691_vm1, %v2655_v39 }
 0x498   : > { %13197 = vmatpush3.bf16.msra.mxu1 %v16326_v40  ;;  %2963 = vmatprep.mubr.bf16.mxu1 %v15642_v50  ;;  %v13352_v50 = vpop.f32.mrb[239].mxu0 }
 0x499   : > { %13198 = vmatprep.subr.bf16.mxu1 %v16364_v45  ;;  %v17923_v39 = vadd.f32 %v13352_v50, %v13351_v6  ;;  %v13354_v34 = vpop.f32.mrb[240].mxu0  ;;  %v20211_v6 = vld [vmem:[#allocation21_spill] sm:$0xff] }
 0x49a   : > { %13803 = vmatpush3.bf16.msra.mxu0 %v16332_v61 }
 0x49b   : > { %13848 = vmatprep.subr.bf16.mxu0 %v16334_v5 }
 0x49c   : > { %13199 = vmatpush3.bf16.msra.mxu1 %v16328_v47 }
 0x49d   : > { %13200 = vmatprep.subr.bf16.mxu1 %v16370_v53  ;;  %7045 = vmatmul.mubr.bf16.gmra.mrb[220].mxu0 %v15635_v32  ;;  %v13355_v32 = vpop.f32.mrb[241].mxu0 }
 0x49e   : > { %12438 = vmatprep.mubr.msk.bf16.mxu0 %vm1170_vm0, %v12432_v24  ;;  %v17925_v24 = vadd.f32 %v13355_v32, %v13354_v34 }
 0x4a0   : > { %13201 = vmatpush3.bf16.msra.mxu1 %v16330_v54 }
 0x4a1   : > { %13202 = vmatprep.subr.bf16.mxu1 %v16376_v62 }
 0x4a4   : > { %13203 = vmatpush3.bf16.msra.mxu1 %v16332_v61 }
 0x4a5   : > { %7053 = vmatmul.mubr.bf16.gmra.mrb[224].mxu0 %v12431_v60  ;;  %14272 = vmatprep.subr.bf16.mxu1 %v15660_v56  ;;  %v13357_v60 = vpop.f32.mrb[242].mxu0 }
 0x4a6   : > { %7373 = vmatprep.mubr.bf16.mxu0 %v15645_v35 }
 0x4a7   : > { %2964 = vmatmul.mubr.bf16.vlgmr.msra.gmra.mrb[132].mxu1 %v15640_v22 }
 0x4a8   : > { %2971 = vmatprep.mubr.bf16.mxu1 %v15646_v25  ;;  %14273 = vmatpush3.bf16.msra.mxu1 %v15660_v56  ;;  %v13358_v56 = vpop.f32.mrb[243].mxu0 }
 0x4a9   : > { %14274 = vmatprep.subr.bf16.mxu1 %v15661_v43  ;;  %v3927_v35 = vpop.f32.mrb[244].mxu0 }
 0x4aa   : > { %v17928_v22 = vadd.f32 %v17638_v44, %v3927_v35  ;;  %v3929_v25 = vpop.f32.mrb[245].mxu0  ;;  %v20212_v35 = vld [vmem:[#allocation22_spill] sm:$0xff] }
 0x4ac   : > { %14275 = vmatpush3.bf16.msra.mxu1 %v15661_v43 }
 0x4ad   : > { %7374 = vmatmul.mubr.bf16.vlgmr.msra.gmra.mrb[228].mxu0 %v15643_v7  ;;  %3452 = vmatprep.subr.bf16.mxu1 %v20176_v9  ;;  %v3930_v7 = vpop.f32.mrb[246].mxu0 }
 0x4ae   : > { %13849 = vmatpush3.bf16.msra.mxu0 %v16318_v12 }
 0x4af   : > { %2972 = vmatmul.mubr.bf16.gmra.mrb[136].mxu1 %v15648_v2  ;;  %13850 = vmatprep.subr.bf16.mxu0 %v16340_v13  ;;  %v17931_v2 = vadd.f32 %v17642_v3, %v3930_v7 }
 0x4b0   : > { %2979 = vmatprep.mubr.bf16.mxu1 %v15649_v30  ;;  %v3932_v30 = vpop.f32.mrb[247].mxu0 }
 0x4b1   : > { %v20213_v30 = vld [vmem:[#allocation23_spill] sm:$0xff] }
 0x4b2   : > { %13851 = vmatpush3.bf16.msra.mxu0 %v16320_v19 }
 0x4b3   : > { %13852 = vmatprep.subr.bf16.mxu0 %v16346_v21 }
 0x4b6   : > { %13853 = vmatpush3.bf16.msra.mxu0 %v16322_v26 }
 0x4b7   : > { %2980 = vmatmul.mubr.bf16.gmra.mrb[140].mxu1 %v15651_v23  ;;  %13854 = vmatprep.subr.bf16.mxu0 %v16352_v29  ;;  %v3935_v23 = vpop.f32.mrb[248].mxu0 }
 0x4b8   : > { %2987 = vmatprep.mubr.bf16.mxu1 %v15652_v46  ;;  %v3973_v46 = vpack.c.bf16 %v17931_v2, %v17928_v22 }
 0x4ba   : > { %13855 = vmatpush3.bf16.msra.mxu0 %v16324_v33 }
 0x4bb   : > { %13856 = vmatprep.subr.bf16.mxu0 %v16358_v37 }
 0x4be   : > { %13857 = vmatpush3.bf16.msra.mxu0 %v16326_v40 }
 0x4bf   : > { %2988 = vmatmul.mubr.bf16.gmra.mrb[144].mxu1 %v15654_v51  ;;  %13858 = vmatprep.subr.bf16.mxu0 %v16364_v45  ;;  %v17936_v51 = vadd.f32 %v17652_v16, %v3935_v23 }
 0x4c0   : > { %2995 = vmatprep.mubr.bf16.mxu1 %v15655_v49  ;;  %v3937_v49 = vpop.f32.mrb[249].mxu0 }
 0x4c1   : > { %v3938_v14 = vpop.f32.mrb[250].mxu0 }
 0x4c2   : > { %13859 = vmatpush3.bf16.msra.mxu0 %v16328_v47  ;;  %v3940_v44 = vpop.f32.mrb[251].mxu0 }
 0x4c3   : > { %13860 = vmatprep.subr.bf16.mxu0 %v16370_v53 }
 0x4c6   : > { %13861 = vmatpush3.bf16.msra.mxu0 %v16330_v54 }
 0x4c7   : > { %2996 = vmatmul.mubr.bf16.gmra.mrb[148].mxu1 %v15657_v0  ;;  %13862 = vmatprep.subr.bf16.mxu0 %v16376_v62  ;;  %v17939_v0 = vadd.f32 %v17656_v58, %v3938_v14 }
 0x4c8   : > { %3003 = vmatprep.mubr.bf16.mxu1 %v11854_v31  ;;  %v3943_v31 = vpop.f32.mrb[252].mxu0 }
 0x4c9   : > { %v17944_v3 = vadd.f32 %v17661_v15, %v3943_v31  ;;  %v3945_v43 = vpop.f32.mrb[253].mxu0 }
 0x4ca   : > { %13863 = vmatpush3.bf16.msra.mxu0 %v16332_v61 }
 0x4cf   : > { %3004 = vmatmul.mubr.bf16.gmra.mrb[152].mxu1 %v11853_v48  ;;  %v3974_v48 = vpack.c.bf16 %v17939_v0, %v17936_v51  ;;  %v15700_v0 = vld [vmem:[%s20131_s3 + $0x70] sm:$0xff]  }
 0x57a   : > { %v13204_v18 = vpop.f32.mrb[132].mxu1 }
 0x57b   : > { %v13205_v52 = vpop.f32.mrb[133].mxu1 }
 0x57c   : > { %v13206_v1 = vadd.f32 %v13205_v52, %v13204_v18  ;;  %v13207_v17 = vpop.f32.mrb[134].mxu1  ;;  %v20214_v18 = vld [vmem:[#allocation24_spill] sm:$0xff] }
 0x57d   : > { %v13208_v16 = vpop.f32.mrb[135].mxu1 }
 0x57e   : > { %v3046_v63 = vadd.f32 %v13206_v1, %v17469_v38  ;;  %v13209_v36 = vadd.f32 %v13208_v16, %v13207_v17  ;;  %v20215_v17 = vld [vmem:[#allocation25_spill] sm:$0xff] }
 0x580   : > { %v3049_v58 = vadd.f32 %v13209_v36, %v20211_v6 }
 0x582   : > { %v13210_v50 = vpop.f32.mrb[136].mxu1  ;;  %v3091_v34 = vpack.c.bf16 %v3049_v58, %v3046_v63 }
 0x583   : > { %v13211_v32 = vpop.f32.mrb[137].mxu1 }
 0x584   : > { %v13212_v60 = vadd.f32 %v13211_v32, %v13210_v50  ;;  %v13213_v56 = vpop.f32.mrb[138].mxu1  ;;  %14276 = vmatprep.mubr.msk.bf16.mxu1 %vm1691_vm1, %v3091_v34  ;;  %v20216_v32 = vld [vmem:[#allocation26_spill] sm:$0xff] }
 0x585   : > { %v13214_v15 = vpop.f32.mrb[139].mxu1 }
 0x586   : > { %v3054_v25 = vadd.f32 %v13212_v60, %v20212_v35  ;;  %v13215_v7 = vadd.f32 %v13214_v15, %v13213_v56  ;;  %v20217_v15 = vld [vmem:[#allocation27_spill] sm:$0xff] }
 0x588   : > { %v3057_v23 = vadd.f32 %v13215_v7, %v20213_v30 }
 0x58a   : > { %v3092_v49 = vpack.c.bf16 %v3057_v23, %v3054_v25  ;;  %v13216_v14 = vpop.f32.mrb[140].mxu1 }
 0x58b   : > { %v13217_v44 = vpop.f32.mrb[141].mxu1 }
 0x58c   : > { %v13218_v38 = vadd.f32 %v13217_v44, %v13216_v14  ;;  %v13219_v31 = vpop.f32.mrb[142].mxu1  ;;  %14277 = vmatmul.mubr.msk.bf16.vlgmr.msra.gmra.mrb[96].mxu1 %vm1691_vm1, %v3092_v49  ;;  %v20218_v44 = vld [vmem:[#allocation28_spill] sm:$0xff] }
 0x58d   : > { %3453 = vmatpush1.bf16.msra.mxu1 %v16397_v11  ;;  %v13220_v43 = vpop.f32.mrb[143].mxu1 }
 0x58e   : > { %v3062_v52 = vadd.f32 %v13218_v38, %v20214_v18  ;;  %v13221_v1 = vadd.f32 %v13220_v43, %v13219_v31  ;;  %3454 = vmatprep.subr.bf16.mxu1 %v20176_v9  ;;  %v20219_v43 = vld [vmem:[#allocation29_spill] sm:$0xff] }
 0x590   : > { %v3065_v16 = vadd.f32 %v13221_v1, %v20215_v17 }
 0x591   : > { %3455 = vmatpush1.bf16.msra.mxu1 %v16417_v27 }
 0x592   : > { %v13222_v63 = vpop.f32.mrb[144].mxu1  ;;  %3456 = vmatprep.subr.bf16.mxu1 %v20176_v9  ;;  %v3093_v36 = vpack.c.bf16 %v3065_v16, %v3062_v52 }
 0x593   : > { %v13223_v6 = vpop.f32.mrb[145].mxu1 }
 0x594   : > { %v13224_v58 = vadd.f32 %v13223_v6, %v13222_v63  ;;  %v13225_v50 = vpop.f32.mrb[146].mxu1  ;;  %14280 = vmatprep.mubr.msk.bf16.mxu1 %vm1691_vm1, %v3093_v36  ;;  %v20220_v6 = vld [vmem:[#allocation30_spill] sm:$0xff] }
 0x595   : > { %3457 = vmatpush1.bf16.msra.mxu1 %v16437_v42  ;;  %v13226_v34 = vpop.f32.mrb[147].mxu1 }
 0x596   : > { %v3070_v60 = vadd.f32 %v13224_v58, %v20216_v32  ;;  %v13227_v56 = vadd.f32 %v13226_v34, %v13225_v50  ;;  %3458 = vmatprep.subr.bf16.mxu1 %v20176_v9  ;;  %v15664_v50 = vld [vmem:[%s20130_s2 + $0x37c] ss:$16 sps:$4 sm:$0xff]   ;;  %v15679_v32 = vld [vmem:[%s20131_s3 + $0x50] sm:$0xff]  }
 0x598   : > { %v3073_v35 = vadd.f32 %v13227_v56, %v20217_v15  ;;  %v15665_v56 = vld [vmem:[%s20130_s2 + $0x39c] ss:$16 sps:$4 sm:$0xff]   ;;  %v15667_v15 = vld [vmem:[%s20130_s2 + $0x398] ss:$16 sps:$4 sm:$0xff]  }
 0x599   : > { %3459 = vmatpush1.bf16.msra.mxu1 %v16457_v57 }
 0x59a   : > { %v13228_v25 = vpop.f32.mrb[148].mxu1  ;;  %3460 = vmatprep.subr.bf16.mxu1 %v20176_v9  ;;  %v3094_v7 = vpack.c.bf16 %v3073_v35, %v3070_v60  ;;  %v15662_v60 = vld [vmem:[%s20130_s2 + $0x378] ss:$16 sps:$4 sm:$0xff]   ;;  %v15668_v35 = vld [vmem:[%s20130_s2 + $0x3bc] ss:$16 sps:$4 sm:$0xff]  }
 0x59b   : > { %v13229_v30 = vpop.f32.mrb[149].mxu1 }
 0x59c   : > { %v13230_v23 = vadd.f32 %v13229_v30, %v13228_v25  ;;  %v13231_v49 = vpop.f32.mrb[150].mxu1  ;;  %14281 = vmatmul.mubr.msk.bf16.gmra.mrb[100].mxu1 %vm1691_vm1, %v3094_v7  ;;  %v15670_v25 = vld [vmem:[%s20130_s2 + $0x3b8] ss:$16 sps:$4 sm:$0xff]   ;;  %v15671_v7 = vld [vmem:[%s20130_s2 + $0x3dc] ss:$16 sps:$4 sm:$0xff]  }
 0x59d   : > { %3461 = vmatpush1.bf16.msra.mxu1 %v16476_v10  ;;  %v13232_v14 = vpop.f32.mrb[151].mxu1  ;;  %v15673_v30 = vld [vmem:[%s20130_s2 + $0x3d8] ss:$16 sps:$4 sm:$0xff]  }
 0x59e   : > { %v3078_v38 = vadd.f32 %v13230_v23, %v20218_v44  ;;  %v13233_v31 = vadd.f32 %v13232_v14, %v13231_v49  ;;  %3462 = vmatprep.subr.bf16.mxu1 %v20176_v9  ;;  %v15674_v23 = vld [vmem:[%s20130_s2 + $0x3fc] ss:$16 sps:$4 sm:$0xff]   ;;  %v15676_v14 = vld [vmem:[%s20130_s2 + $0x3f8] ss:$16 sps:$4 sm:$0xff]  }
 0x59f   : > { %v11896_v49 = vld [vmem:[%s20130_s2 + $0x418] sm:$0x11] }
 0x5a0   : > { %v3081_v18 = vadd.f32 %v13233_v31, %v20219_v43  ;;  %v11920_v44 = vcombine.high %v11896_v49, %v11896_v49  ;;  %v20221_v31 = vld [vmem:[#allocation37_spill] sm:$0xff]  ;;  %v20222_v43 = vld [vmem:[#allocation38_spill] sm:$0xff] }
 0x5a1   : > { %3463 = vmatpush1.bf16.msra.mxu1 %v16487_v28 }
 0x5a2   : > { %v13234_v52 = vpop.f32.mrb[152].mxu1  ;;  %3464 = vmatprep.subr.bf16.mxu1 %v20176_v9  ;;  %v3095_v1 = vpack.c.bf16 %v3081_v18, %v3078_v38  ;;  %v11919_v38 = vcombine.low %v11896_v49, %v11896_v49  ;;  %v18024_v18 = vadd.f32 %v20222_v43, %v20221_v31 }
 0x5a3   : > { %v13235_v17 = vpop.f32.mrb[153].mxu1 }
 0x5a4   : > { %v13236_v16 = vadd.f32 %v13235_v17, %v13234_v52  ;;  %v13237_v63 = vpop.f32.mrb[154].mxu1  ;;  %14284 = vmatprep.mubr.msk.bf16.mxu1 %vm1691_vm1, %v3095_v1  ;;  %v20223_v52 = vld [vmem:[#allocation39_spill] sm:$0xff]  ;;  %v20224_v1 = vld [vmem:[#allocation40_spill] sm:$0xff] }
 0x5a5   : > { %3465 = vmatpush1.bf16.msra.mxu1 %v16498_v41  ;;  %v13238_v36 = vpop.f32.mrb[155].mxu1  ;;  %v18028_v17 = vadd.f32 %v20224_v1, %v20223_v52  ;;  %v20226_v63 = vld [vmem:[#allocation42_spill] sm:$0xff] }
 0x5a6   : > { %v3086_v58 = vadd.f32 %v13236_v16, %v20220_v6  ;;  %3466 = vmatprep.subr.bf16.mxu1 %v20176_v9  ;;  %v20225_v16 = vld [vmem:[#allocation41_spill] sm:$0xff]  ;;  %v20227_v6 = vld [vmem:[#allocation43_spill] sm:$0xff] }
 0x5a7   : > { %v18032_v36 = vadd.f32 %v20226_v63, %v20225_v16 }
 0x5a8   : > { %v3096_v34 = vpack.c.bf16 %v3086_v58, %v3086_v58  ;;  %v20228_v58 = vld [vmem:[#allocation44_spill] sm:$0xff] }
 0x5a9   : > { %3467 = vmatpush1.bf16.msra.mxu1 %v16512_v55 }
 0x5aa   : > { %14285 = vmatmul.mubr.msk.bf16.gmra.mrb[104].mxu1 %vm1691_vm1, %v3096_v34  ;;  %3468 = vmatprep.subr.bf16.mxu1 %v20176_v9  ;;  %v20229_v34 = vld [vmem:[#allocation45_spill] sm:$0xff] }
 0x5ab   : > { %11921 = vmatprep.mubr.msk.bf16.mxu1 %vm1170_vm0, %v15664_v50  ;;  %v18036_v50 = vadd.f32 %v20228_v58, %v20227_v6 }
 0x5ad   : > { %3469 = vmatpush1.bf16.msra.mxu1 %v16526_v4 }
 0x5ae   : > { %14288 = vmatprep.subr.bf16.mxu1 %v15679_v32 }
 0x5b2   : > { %3485 = vmatmul.mubr.bf16.vlgmr.msra.gmra.mrb[156].mxu1 %v15662_v60 }
 0x5b3   : > { %11922 = vmatprep.mubr.msk.bf16.mxu1 %vm1170_vm0, %v15665_v56  ;;  %14289 = vmatpush3.bf16.msra.mxu1 %v15679_v32  ;;  %v20230_v32 = vld [vmem:[#allocation46_spill] sm:$0xff]  ;;  %v3946_v56 = vpop.f32.mrb[254].mxu0 }
 0x5b4   : > { %v18040_v60 = vadd.f32 %v20230_v32, %v20229_v34 }
 0x5ba   : > { %3493 = vmatmul.mubr.bf16.gmra.mrb[160].mxu1 %v15667_v15  ;;  %v20231_v15 = vld [vmem:[#allocation47_spill] sm:$0xff] }
 0x5bb   : > { %11923 = vmatprep.mubr.msk.bf16.mxu1 %vm1170_vm0, %v15668_v35  ;;  %v18043_v35 = vadd.f32 %v20231_v15, %v3946_v56 }
 0x5c2   : > { %3501 = vmatmul.mubr.bf16.gmra.mrb[164].mxu1 %v15670_v25  ;;  %v3948_v25 = vpop.f32.mrb[255].mxu0 }
 0x5c3   : > { %11924 = vmatprep.mubr.msk.bf16.mxu1 %vm1170_vm0, %v15671_v7  ;;  %v3975_v7 = vpack.c.bf16 %v18043_v35, %v17944_v3  ;;  %v15686_v3 = vld [vmem:[%s20130_s2 + $0x4f4] ss:$16 sps:$4 sm:$0xff]  }
 0x5c4   : > { %v15692_v35 = vld [vmem:[%s20130_s2 + $0x534] ss:$16 sps:$4 sm:$0xff]  }
 0x5ca   : > { %3509 = vmatmul.mubr.bf16.gmra.mrb[168].mxu1 %v15673_v30  ;;  %v3951_v30 = vpop.f32.mrb[0].mxu0 }
 0x5cb   : > { %11925 = vmatprep.mubr.msk.bf16.mxu1 %vm1170_vm0, %v15674_v23  ;;  %v18048_v23 = vadd.f32 %v17917_v20, %v3951_v30  ;;  %v3953_v49 = vpop.f32.mrb[1].mxu0  ;;  %v15681_v20 = vld [vmem:[%s20131_s3 + $0x60] sm:$0xff]  }
 0x5cc   : > { %v20232_v49 = vld [vmem:[#allocation31_spill] sm:$0xff] }
 0x5d2   : > { %3517 = vmatmul.mubr.bf16.gmra.mrb[172].mxu1 %v15676_v14  ;;  %v3954_v14 = vpop.f32.mrb[2].mxu0 }
 0x5d3   : > { %11926 = vmatprep.mubr.msk.bf16.mxu1 %vm1170_vm0, %v11920_v44  ;;  %v15680_v44 = vld [vmem:[%s20131_s3 + $0x58] sm:$0xff]   ;;  %v3956_v31 = vpop.f32.mrb[3].mxu0 }
 0x5d4   : > { %14290 = vmatprep.subr.bf16.mxu1 %v15680_v44  ;;  %v3959_v52 = vpop.f32.mrb[4].mxu0  ;;  %v20233_v31 = vld [vmem:[#allocation32_spill] sm:$0xff] }
 0x5d5   : > { %14291 = vmatpush3.bf16.msra.mxu1 %v15680_v44  ;;  %v18062_v1 = vadd.f32 %v17921_v8, %v3959_v52  ;;  %v3961_v16 = vpop.f32.mrb[5].mxu0 }
 0x5d6   : > { %14304 = vmatprep.subr.bf16.mxu1 %v15681_v20  ;;  %v3962_v63 = vpop.f32.mrb[6].mxu0 }
 0x5d7   : > { %v3964_v6 = vpop.f32.mrb[7].mxu0 }
 0x5d8   : > { %v3967_v34 = vpop.f32.mrb[8].mxu0  ;;  %v20234_v6 = vld [vmem:[#allocation33_spill] sm:$0xff] }
 0x5d9   : > { %v18070_v32 = vadd.f32 %v17925_v24, %v3967_v34  ;;  %v3969_v56 = vpop.f32.mrb[9].mxu0  ;;  %v20235_v34 = vld [vmem:[#allocation34_spill] sm:$0xff] }
 0x5da   : > { %3525 = vmatmul.mubr.bf16.gmra.mrb[176].mxu1 %v11919_v38  ;;  %v18054_v38 = vadd.f32 %v17919_v59, %v3954_v14  ;;  %v18065_v59 = vadd.f32 %v17923_v39, %v3962_v63  ;;  %v3970_v15 = vpop.f32.mrb[10].mxu0 }
 0x5db   : > { %v3971_v25 = vpop.f32.mrb[11].mxu0  ;;  %v3978_v51 = vpack.c.bf16 %v18070_v32, %v18070_v32 }
 0x5dc   : > { %v20238_v22 = vpack.c.bf16 %v18054_v38, %v18048_v23  ;;  %v20239_v2 = vpack.c.bf16 %v18065_v59, %v18062_v1  ;;  %v15695_v23 = vld [vmem:[%s20130_s2 + $0x554] ss:$16 sps:$4 sm:$0xff]   ;;  %v15697_v1 = vld [vmem:[%s20130_s2 + $0x550] ss:$16 sps:$4 sm:$0xff]  }
 0x5dd   : > { %v12023_v38 = vld [vmem:[%s20130_s2 + $0x570] sm:$0x11] }
 0x5de   : > { %v12046_v59 = vcombine.high %v12023_v38, %v12023_v38  ;;  %v12045_v32 = vcombine.low %v12023_v38, %v12023_v38 }
 0x685   : > { %v3486_v30 = vpop.f32.mrb[156].mxu1 }
 0x686   : > { %v3487_v8 = vadd.f32 %v20232_v49, %v3486_v30  ;;  %v3488_v14 = vpop.f32.mrb[157].mxu1  ;;  %v15682_v30 = vld [vmem:[%s20131_s3 + $0x68] sm:$0xff]  }
 0x687   : > { %v3489_v44 = vpop.f32.mrb[158].mxu1 }
 0x688   : > { %v3490_v52 = vadd.f32 %v20233_v31, %v3489_v44  ;;  %v3491_v39 = vpop.f32.mrb[159].mxu1 }
 0x68a   : > { %v3532_v16 = vpack.c.bf16 %v3490_v52, %v3487_v8  ;;  %v20236_v8 = vld [vmem:[#allocation35_spill] sm:$0xff]  ;;  %v20237_v52 = vld [vmem:[#allocation36_spill] sm:$0xff] }
 0x68c   : > { %14292 = vmatprep.mubr.msk.bf16.mxu1 %vm1691_vm1, %v3532_v16 }
 0x68d   : > { %v3494_v63 = vpop.f32.mrb[160].mxu1 }
 0x68e   : > { %v3495_v58 = vadd.f32 %v20234_v6, %v3494_v63  ;;  %v3496_v43 = vpop.f32.mrb[161].mxu1 }
 0x68f   : > { %v3497_v24 = vpop.f32.mrb[162].mxu1 }
 0x690   : > { %v3498_v56 = vadd.f32 %v20235_v34, %v3497_v24  ;;  %v3499_v15 = vpop.f32.mrb[163].mxu1 }
 0x692   : > { %v3533_v25 = vpack.c.bf16 %v3498_v56, %v3495_v58 }
 0x694   : > { %14293 = vmatmul.mubr.msk.bf16.vlgmr.msra.gmra.mrb[96].mxu1 %vm1691_vm1, %v3533_v25 }
 0x695   : > { %14305 = vmatpush3.bf16.msra.mxu1 %v15681_v20  ;;  %v3502_v49 = vpop.f32.mrb[164].mxu1 }
 0x696   : > { %v3503_v14 = vadd.f32 %v20236_v8, %v3502_v49  ;;  %v3504_v44 = vpop.f32.mrb[165].mxu1  ;;  %14306 = vmatprep.subr.bf16.mxu1 %v15682_v30 }
 0x697   : > { %v3505_v31 = vpop.f32.mrb[166].mxu1 }
 0x698   : > { %v3506_v43 = vadd.f32 %v20237_v52, %v3505_v31  ;;  %v3507_v39 = vpop.f32.mrb[167].mxu1 }
 0x699   : > { %14307 = vmatpush3.bf16.msra.mxu1 %v15682_v30 }
 0x69a   : > { %v3534_v16 = vpack.c.bf16 %v3506_v43, %v3503_v14  ;;  %13368 = vmatprep.subr.bf16.mxu1 %v16334_v5 }
 0x69c   : > { %14296 = vmatprep.mubr.msk.bf16.mxu1 %vm1691_vm1, %v3534_v16  ;;  %v18167_v16 = vpop.f32.mrb[12].mxu0 }
 0x69d   : > { %v3510_v58 = vpop.f32.mrb[168].mxu1 }
 0x69e   : > { %v3511_v63 = vadd.f32 %v18024_v18, %v3510_v58  ;;  %v3512_v6 = vpop.f32.mrb[169].mxu1  ;;  %v4370_v58 = vpop.f32.mrb[13].mxu0 }
 0x69f   : > { %v3513_v20 = vpop.f32.mrb[170].mxu1 }
 0x6a0   : > { %v3514_v24 = vadd.f32 %v18028_v17, %v3513_v20  ;;  %v3515_v34 = vpop.f32.mrb[171].mxu1  ;;  %v15701_v20 = vld [vmem:[%s20131_s3 + $0x78] sm:$0xff]  }
 0x6a2   : > { %v3535_v56 = vpack.c.bf16 %v3514_v24, %v3511_v63  ;;  %v18169_v63 = vpop.f32.mrb[14].mxu0 }
 0x6a3   : > { %v4373_v6 = vpop.f32.mrb[15].mxu0 }
 0x6a4   : > { %14297 = vmatmul.mubr.msk.bf16.gmra.mrb[100].mxu1 %vm1691_vm1, %v3535_v56  ;;  %v18174_v24 = vpop.f32.mrb[16].mxu0 }
 0x6a5   : > { %v3518_v15 = vpop.f32.mrb[172].mxu1  ;;  %v4378_v34 = vpop.f32.mrb[17].mxu0 }
 0x6a6   : > { %v3519_v25 = vadd.f32 %v18032_v36, %v3518_v15  ;;  %v3520_v30 = vpop.f32.mrb[173].mxu1  ;;  %v15688_v36 = vld [vmem:[%s20130_s2 + $0x4f0] ss:$16 sps:$4 sm:$0xff]   ;;  %v18176_v56 = vpop.f32.mrb[18].mxu0 }
 0x6a7   : > { %v3521_v49 = vpop.f32.mrb[174].mxu1  ;;  %v4381_v15 = vpop.f32.mrb[19].mxu0 }
 0x6a8   : > { %v3522_v8 = vadd.f32 %v18036_v50, %v3521_v49  ;;  %v3523_v14 = vpop.f32.mrb[175].mxu1  ;;  %v15689_v50 = vld [vmem:[%s20130_s2 + $0x514] ss:$16 sps:$4 sm:$0xff]  }
 0x6aa   : > { %v3536_v44 = vpack.c.bf16 %v3522_v8, %v3519_v25  ;;  %v18179_v25 = vpop.f32.mrb[20].mxu0 }
 0x6ab   : > { %v4386_v30 = vpop.f32.mrb[21].mxu0 }
 0x6ac   : > { %14300 = vmatprep.mubr.msk.bf16.mxu1 %vm1691_vm1, %v3536_v44  ;;  %v18181_v49 = vpop.f32.mrb[22].mxu0 }
 0x6ad   : > { %v3526_v18 = vpop.f32.mrb[176].mxu1  ;;  %v4389_v8 = vpop.f32.mrb[23].mxu0 }
 0x6ae   : > { %v3527_v31 = vadd.f32 %v18040_v60, %v3526_v18  ;;  %v3528_v52 = vpop.f32.mrb[177].mxu1  ;;  %v15691_v60 = vld [vmem:[%s20130_s2 + $0x510] ss:$16 sps:$4 sm:$0xff]   ;;  %v18183_v14 = vpop.f32.mrb[24].mxu0 }
 0x6af   : > { %v3529_v17 = vpop.f32.mrb[178].mxu1  ;;  %v4394_v44 = vpop.f32.mrb[25].mxu0 }
 0x6b0   : > { %v3537_v43 = vpack.c.bf16 %v3527_v31, %v3527_v31  ;;  %v3530_v39 = vpop.f32.mrb[179].mxu1  ;;  %v18185_v18 = vpop.f32.mrb[26].mxu0 }
 0x6b1   : > { %v4397_v31 = vpop.f32.mrb[27].mxu0 }
 0x6b2   : > { %14301 = vmatmul.mubr.msk.bf16.gmra.mrb[104].mxu1 %vm1691_vm1, %v3537_v43  ;;  %v18187_v52 = vpop.f32.mrb[28].mxu0 }
 0x6b3   : > { %14308 = vmatprep.mubr.msk.bf16.mxu1 %vm1691_vm1, %v3973_v46  ;;  %v15685_v46 = vld [vmem:[%s20130_s2 + $0x4d4] ss:$16 sps:$4 sm:$0xff]   ;;  %v4402_v17 = vpop.f32.mrb[29].mxu0 }
 0x6b4   : > { %v18189_v43 = vpop.f32.mrb[30].mxu0 }
 0x6b5   : > { %v4405_v39 = vpop.f32.mrb[31].mxu0 }
 0x6ba   : > { %14309 = vmatmul.mubr.msk.bf16.vlgmr.msra.gmra.mrb[96].mxu1 %vm1691_vm1, %v3974_v48  ;;  %v15683_v48 = vld [vmem:[%s20130_s2 + $0x4d0] ss:$16 sps:$4 sm:$0xff]  }
 0x6bb   : > { %13369 = vmatpush3.bf16.msra.mxu1 %v16318_v12  ;;  %14312 = vmatprep.mubr.msk.bf16.mxu1 %vm1691_vm1, %v3975_v7  ;;  %v15694_v7 = vld [vmem:[%s20130_s2 + $0x530] ss:$16 sps:$4 sm:$0xff]  }
 0x6bc   : > { %13370 = vmatprep.subr.bf16.mxu1 %v16340_v13 }
 0x6bf   : > { %13371 = vmatpush3.bf16.msra.mxu1 %v16320_v19 }
 0x6c0   : > { %13372 = vmatprep.subr.bf16.mxu1 %v16346_v21 }
 0x6c2   : > { %14313 = vmatmul.mubr.msk.bf16.gmra.mrb[100].mxu1 %vm1691_vm1, %v20238_v22  ;;  %v18191_v22 = vpop.f32.mrb[32].mxu0 }
 0x6c3   : > { %13373 = vmatpush3.bf16.msra.mxu1 %v16322_v26  ;;  %14316 = vmatprep.mubr.msk.bf16.mxu1 %vm1691_vm1, %v20239_v2  ;;  %v4410_v2 = vpop.f32.mrb[33].mxu0 }
 0x6c4   : > { %13374 = vmatprep.subr.bf16.mxu1 %v16352_v29 }
 0x6c7   : > { %13375 = vmatpush3.bf16.msra.mxu1 %v16324_v33 }
 0x6c8   : > { %13376 = vmatprep.subr.bf16.mxu1 %v16358_v37 }
 0x6ca   : > { %14317 = vmatmul.mubr.msk.bf16.gmra.mrb[104].mxu1 %vm1691_vm1, %v3978_v51 }
 0x6cb   : > { %13377 = vmatpush3.bf16.msra.mxu1 %v16326_v40  ;;  %4286 = vmatprep.mubr.bf16.mxu1 %v15685_v46  ;;  %v4411_v46 = vpop.f32.mrb[34].mxu0 }
 0x6cc   : > { %13378 = vmatprep.subr.bf16.mxu1 %v16364_v45  ;;  %v4412_v51 = vpop.f32.mrb[35].mxu0 }
 0x6cf   : > { %13379 = vmatpush3.bf16.msra.mxu1 %v16328_v47 }
 0x6d0   : > { %13380 = vmatprep.subr.bf16.mxu1 %v16370_v53 }
 0x6d3   : > { %13381 = vmatpush3.bf16.msra.mxu1 %v16330_v54 }
 0x6d4   : > { %13382 = vmatprep.subr.bf16.mxu1 %v16376_v62 }
 0x6d7   : > { %13383 = vmatpush3.bf16.msra.mxu1 %v16332_v61 }
 0x6d8   : > { %14320 = vmatprep.subr.bf16.mxu1 %v15700_v0 }
 0x6da   : > { %4287 = vmatmul.mubr.bf16.vlgmr.msra.gmra.mrb[180].mxu1 %v15683_v48 }
 0x6db   : > { %4294 = vmatprep.mubr.bf16.mxu1 %v15686_v3  ;;  %14321 = vmatpush3.bf16.msra.mxu1 %v15700_v0  ;;  %v13444_v0 = vpop.f32.mrb[36].mxu0 }
 0x6dc   : > { %14322 = vmatprep.subr.bf16.mxu1 %v15701_v20  ;;  %v13445_v48 = vpop.f32.mrb[37].mxu0 }
 0x6dd   : > { %v18193_v3 = vpop.f32.mrb[38].mxu0 }
 0x6df   : > { %14323 = vmatpush3.bf16.msra.mxu1 %v15701_v20 }
 0x6e0   : > { %4775 = vmatprep.subr.bf16.mxu1 %v20176_v9 }
 0x6e2   : > { %4295 = vmatmul.mubr.bf16.gmra.mrb[184].mxu1 %v15688_v36  ;;  %v18195_v36 = vadd.f32 %v13445_v48, %v13444_v0 }
 0x6e3   : > { %4302 = vmatprep.mubr.bf16.mxu1 %v15689_v50  ;;  %v18197_v50 = vpop.f32.mrb[39].mxu0 }
 0x6e4   : > { %20240 = vst [vmem:[#allocation21_spill] sm:$0xff] %v18195_v36 }
 0x6ea   : > { %4303 = vmatmul.mubr.bf16.gmra.mrb[188].mxu1 %v15691_v60  ;;  %v18199_v60 = vpop.f32.mrb[40].mxu0 }
 0x6eb   : > { %4310 = vmatprep.mubr.bf16.mxu1 %v15692_v35  ;;  %v18201_v35 = vpop.f32.mrb[41].mxu0 }
 0x6f2   : > { %4311 = vmatmul.mubr.bf16.gmra.mrb[192].mxu1 %v15694_v7  ;;  %v18203_v7 = vpop.f32.mrb[42].mxu0 }
 0x6f3   : > { %4318 = vmatprep.mubr.bf16.mxu1 %v15695_v23  ;;  %v18205_v23 = vpop.f32.mrb[43].mxu0 }
 0x6f4   : > { %v18207_v38 = vpop.f32.mrb[44].mxu0 }
 0x6fa   : > { %4319 = vmatmul.mubr.bf16.gmra.mrb[196].mxu1 %v15697_v1  ;;  %v18209_v1 = vpop.f32.mrb[45].mxu0 }
 0x6fb   : > { %4326 = vmatprep.mubr.bf16.mxu1 %v12046_v59  ;;  %v18211_v59 = vpop.f32.mrb[46].mxu0 }
 0x702   : > { %4327 = vmatmul.mubr.bf16.gmra.mrb[200].mxu1 %v12045_v32  ;;  %v18213_v32 = vpop.f32.mrb[47].mxu0 }
 0x703   : > { %v18215_v58 = vpop.f32.mrb[48].mxu0 }
 0x704   : > { %v18217_v6 = vpop.f32.mrb[49].mxu0 }
 0x705   : > { %v18219_v20 = vpop.f32.mrb[50].mxu0 }
 0x706   : > { %v18221_v34 = vpop.f32.mrb[51].mxu0 }
 0x707   : > { %v18223_v15 = vpop.f32.mrb[52].mxu0 }
 0x708   : > { %v18225_v30 = vpop.f32.mrb[53].mxu0 }
 0x709   : > { %v18227_v8 = vpop.f32.mrb[54].mxu0 }
 0x70a   : > { %v18229_v44 = vpop.f32.mrb[55].mxu0 }
 0x70b   : > { %20241 = vst [vmem:[#allocation22_spill] sm:$0xff] %v18229_v44  ;;  %v18231_v31 = vpop.f32.mrb[56].mxu0 }
 0x70c   : > { %20242 = vst [vmem:[#allocation23_spill] sm:$0xff] %v18231_v31  ;;  %v18233_v17 = vpop.f32.mrb[57].mxu0 }
 0x70d   : > { %20243 = vst [vmem:[#allocation24_spill] sm:$0xff] %v18233_v17  ;;  %v13477_v39 = vpop.f32.mrb[58].mxu0 }
 0x70e   : > { %v13478_v2 = vpop.f32.mrb[59].mxu0 }
 0x70f   : > { %v13504_v46 = vpop.f32.mrb[60].mxu0 }
 0x710   : > { %v13505_v51 = vpop.f32.mrb[61].mxu0 }
 0x711   : > { %v13507_v0 = vpop.f32.mrb[62].mxu0  ;;  %v13506_v48 = vadd.f32 %v13505_v51, %v13504_v46 }
 0x712   : > { %v13508_v61 = vpop.f32.mrb[63].mxu0 }
 0x713   : > { %v13510_v62 = vpop.f32.mrb[64].mxu0  ;;  %v13509_v54 = vadd.f32 %v13508_v61, %v13507_v0 }
 0x714   : > { %v13511_v53 = vpop.f32.mrb[65].mxu0 }
 0x715   : > { %v13513_v47 = vpop.f32.mrb[66].mxu0  ;;  %v18235_v45 = vadd.f32 %v13511_v53, %v13510_v62 }
 0x716   : > { %v13514_v40 = vpop.f32.mrb[67].mxu0 }
 0x717   : > { %v13516_v33 = vpop.f32.mrb[68].mxu0  ;;  %v18237_v29 = vadd.f32 %v13514_v40, %v13513_v47 }
 0x718   : > { %v13517_v21 = vpop.f32.mrb[69].mxu0 }
 0x719   : > { %v18239_v19 = vadd.f32 %v13517_v21, %v13516_v33  ;;  %v13519_v13 = vpop.f32.mrb[70].mxu0 }
 0x71a   : > { %v13520_v51 = vpop.f32.mrb[71].mxu0 }
 0x71b   : > { %v18242_v12 = vadd.f32 %v13520_v51, %v13519_v13  ;;  %v13522_v53 = vpop.f32.mrb[72].mxu0 }
 0x71c   : > { %v13523_v62 = vpop.f32.mrb[73].mxu0 }
 0x71d   : > { %v18245_v40 = vadd.f32 %v13523_v62, %v13522_v53  ;;  %v13525_v47 = vpop.f32.mrb[74].mxu0 }
 0x71e   : > { %v13526_v36 = vpop.f32.mrb[75].mxu0 }
 0x71f   : > { %v18247_v33 = vadd.f32 %v13526_v36, %v13525_v47  ;;  %v13528_v21 = vpop.f32.mrb[76].mxu0 }
 0x720   : > { %v13529_v31 = vpop.f32.mrb[77].mxu0 }
 0x721   : > { %20244 = vst [vmem:[#allocation25_spill] sm:$0xff] %v18247_v33  ;;  %v18250_v13 = vadd.f32 %v13529_v31, %v13528_v21 }
 0x723   : > { %20245 = vst [vmem:[#allocation26_spill] sm:$0xff] %v18250_v13 }
 0x7ad   : > { %v13384_v37 = vpop.f32.mrb[180].mxu1 }
 0x7ae   : > { %v13385_v26 = vpop.f32.mrb[181].mxu1 }
 0x7af   : > { %v13386_v39 = vadd.f32 %v13385_v26, %v13384_v37  ;;  %v13387_v2 = vpop.f32.mrb[182].mxu1 }
 0x7b0   : > { %v13388_v46 = vpop.f32.mrb[183].mxu1 }
 0x7b1   : > { %v4369_v61 = vadd.f32 %v13386_v39, %v18167_v16  ;;  %v13389_v0 = vadd.f32 %v13388_v46, %v13387_v2  ;;  %v13531_v39 = vpop.f32.mrb[78].mxu0 }
 0x7b3   : > { %v4372_v5 = vadd.f32 %v13389_v0, %v18169_v63  ;;  %v13532_v63 = vpop.f32.mrb[79].mxu0 }
 0x7b4   : > { %v18253_v0 = vadd.f32 %v13532_v63, %v13531_v39 }
 0x7b5   : > { %v4414_v26 = vpack.c.bf16 %v4372_v5, %v4369_v61  ;;  %v13390_v37 = vpop.f32.mrb[184].mxu1  ;;  %v13534_v5 = vpop.f32.mrb[80].mxu0 }
 0x7b6   : > { %v13391_v17 = vpop.f32.mrb[185].mxu1  ;;  %v13535_v36 = vpop.f32.mrb[81].mxu0 }
 0x7b7   : > { %v13392_v44 = vadd.f32 %v13391_v17, %v13390_v37  ;;  %v13393_v16 = vpop.f32.mrb[186].mxu1  ;;  %14324 = vmatprep.mubr.msk.bf16.mxu1 %vm1691_vm1, %v4414_v26  ;;  %v18256_v53 = vadd.f32 %v13535_v36, %v13534_v5  ;;  %v13537_v17 = vpop.f32.mrb[82].mxu0 }
 0x7b8   : > { %v13394_v2 = vpop.f32.mrb[187].mxu1  ;;  %v13538_v62 = vpop.f32.mrb[83].mxu0 }
 0x7b9   : > { %v4377_v46 = vadd.f32 %v13392_v44, %v18174_v24  ;;  %v13395_v51 = vadd.f32 %v13394_v2, %v13393_v16  ;;  %v5250_v31 = vpop.f32.mrb[84].mxu0 }
 0x7ba   : > { %v18258_v21 = vadd.f32 %v13506_v48, %v5250_v31  ;;  %v5252_v13 = vpop.f32.mrb[85].mxu0 }
 0x7bb   : > { %v4380_v61 = vadd.f32 %v13395_v51, %v18176_v56  ;;  %v5253_v44 = vpop.f32.mrb[86].mxu0 }
 0x7bc   : > { %v18262_v56 = vadd.f32 %v13509_v54, %v5253_v44  ;;  %v5255_v39 = vpop.f32.mrb[87].mxu0 }
 0x7bd   : > { %v4415_v47 = vpack.c.bf16 %v4380_v61, %v4377_v46  ;;  %v13396_v26 = vpop.f32.mrb[188].mxu1  ;;  %v5258_v46 = vpop.f32.mrb[88].mxu0 }
 0x7be   : > { %v13397_v37 = vpop.f32.mrb[189].mxu1  ;;  %v5296_v48 = vpack.c.bf16 %v18262_v56, %v18258_v21  ;;  %v18269_v13 = vadd.f32 %v18235_v45, %v5258_v46  ;;  %v5260_v51 = vpop.f32.mrb[89].mxu0  ;;  %v20257_v21 = vld [vmem:[#allocation7_spill] sm:$0xff]  ;;  %v20258_v56 = vld [vmem:[#allocation16_spill] sm:$0xff] }
 0x7bf   : > { %v13398_v33 = vadd.f32 %v13397_v37, %v13396_v26  ;;  %v13399_v24 = vpop.f32.mrb[190].mxu1  ;;  %14325 = vmatmul.mubr.msk.bf16.vlgmr.msra.gmra.mrb[96].mxu1 %vm1691_vm1, %v4415_v47  ;;  %v5261_v36 = vpop.f32.mrb[90].mxu0 }
 0x7c0   : > { %4776 = vmatpush1.bf16.msra.mxu1 %v16397_v11  ;;  %v13400_v16 = vpop.f32.mrb[191].mxu1  ;;  %v18274_v54 = vadd.f32 %v18237_v29, %v5261_v36 }
 0x7c1   : > { %v4385_v2 = vadd.f32 %v13398_v33, %v18179_v25  ;;  %v13401_v63 = vadd.f32 %v13400_v16, %v13399_v24  ;;  %4777 = vmatprep.subr.bf16.mxu1 %v20176_v9  ;;  %v5263_v25 = vpop.f32.mrb[91].mxu0 }
 0x7c2   : > { %v5266_v17 = vpop.f32.mrb[92].mxu0  ;;  %v5297_v45 = vpack.c.bf16 %v18274_v54, %v18269_v13  ;;  %v15725_v13 = vld [vmem:[%s20130_s2 + $0x6e4] ss:$16 sps:$4 sm:$0xff]  }
 0x7c3   : > { %v4388_v5 = vadd.f32 %v13401_v63, %v18181_v49  ;;  %v18280_v47 = vadd.f32 %v18239_v19, %v5266_v17  ;;  %v5268_v49 = vpop.f32.mrb[93].mxu0 }
 0x7c4   : > { %4778 = vmatpush1.bf16.msra.mxu1 %v16417_v27  ;;  %v15719_v49 = vld [vmem:[%s20131_s3 + $0x80] sm:$0xff]  }
 0x7c5   : > { %v4416_v33 = vpack.c.bf16 %v4388_v5, %v4385_v2  ;;  %v13402_v61 = vpop.f32.mrb[192].mxu1  ;;  %4779 = vmatprep.subr.bf16.mxu1 %v20176_v9 }
 0x7c6   : > { %v13403_v62 = vpop.f32.mrb[193].mxu1 }
 0x7c7   : > { %v13404_v26 = vadd.f32 %v13403_v62, %v13402_v61  ;;  %v13405_v31 = vpop.f32.mrb[194].mxu1  ;;  %14328 = vmatprep.mubr.msk.bf16.mxu1 %vm1691_vm1, %v4416_v33 }
 0x7c8   : > { %4780 = vmatpush1.bf16.msra.mxu1 %v16437_v42  ;;  %v13406_v29 = vpop.f32.mrb[195].mxu1 }
 0x7c9   : > { %v4393_v37 = vadd.f32 %v13404_v26, %v18183_v14  ;;  %v13407_v24 = vadd.f32 %v13406_v29, %v13405_v31  ;;  %4781 = vmatprep.subr.bf16.mxu1 %v20176_v9  ;;  %v15705_v26 = vld [vmem:[%s20130_s2 + $0x5ac] ss:$16 sps:$4 sm:$0xff]   ;;  %v15707_v31 = vld [vmem:[%s20130_s2 + $0x5a8] ss:$16 sps:$4 sm:$0xff]  }
 0x7ca   : > { %v15708_v29 = vld [vmem:[%s20130_s2 + $0x5cc] ss:$16 sps:$4 sm:$0xff]  }
 0x7cb   : > { %v4396_v44 = vadd.f32 %v13407_v24, %v18185_v18  ;;  %v15711_v24 = vld [vmem:[%s20130_s2 + $0x5ec] ss:$16 sps:$4 sm:$0xff]  }
 0x7cc   : > { %4782 = vmatpush1.bf16.msra.mxu1 %v16457_v57 }
 0x7cd   : > { %v4417_v16 = vpack.c.bf16 %v4396_v44, %v4393_v37  ;;  %v13408_v19 = vpop.f32.mrb[196].mxu1  ;;  %4783 = vmatprep.subr.bf16.mxu1 %v20176_v9  ;;  %v15710_v37 = vld [vmem:[%s20130_s2 + $0x5c8] ss:$16 sps:$4 sm:$0xff]  }
 0x7ce   : > { %v13409_v39 = vpop.f32.mrb[197].mxu1  ;;  %v15713_v44 = vld [vmem:[%s20130_s2 + $0x5e8] ss:$16 sps:$4 sm:$0xff]  }
 0x7cf   : > { %v13410_v2 = vadd.f32 %v13409_v39, %v13408_v19  ;;  %v13411_v63 = vpop.f32.mrb[198].mxu1  ;;  %14329 = vmatmul.mubr.msk.bf16.gmra.mrb[100].mxu1 %vm1691_vm1, %v4417_v16  ;;  %v13449_v16 = vadd.f32 %v18197_v50, %v18193_v3  ;;  %v15714_v19 = vld [vmem:[%s20130_s2 + $0x60c] ss:$16 sps:$4 sm:$0xff]   ;;  %v13455_v3 = vadd.f32 %v18205_v23, %v18203_v7 }
 0x7d0   : > { %4784 = vmatpush1.bf16.msra.mxu1 %v16476_v10  ;;  %v13412_v46 = vpop.f32.mrb[199].mxu1  ;;  %v12088_v39 = vld [vmem:[%s20130_s2 + $0x628] sm:$0x11] }
 0x7d1   : > { %v4401_v14 = vadd.f32 %v13410_v2, %v18187_v52  ;;  %v13413_v51 = vadd.f32 %v13412_v46, %v13411_v63  ;;  %4785 = vmatprep.subr.bf16.mxu1 %v20176_v9  ;;  %v15716_v2 = vld [vmem:[%s20130_s2 + $0x608] ss:$16 sps:$4 sm:$0xff]   ;;  %v13452_v63 = vadd.f32 %v18201_v35, %v18199_v60  ;;  %v12112_v50 = vcombine.high %v12088_v39, %v12088_v39 }
 0x7d2   : > { %v12111_v46 = vcombine.low %v12088_v39, %v12088_v39  ;;  %v18362_v60 = vadd.f32 %v18221_v34, %v18219_v20  ;;  %v18366_v35 = vadd.f32 %v18225_v30, %v18223_v15  ;;  %v20246_v7 = vld [vmem:[#allocation22_spill] sm:$0xff]  ;;  %v20251_v39 = vld [vmem:[#allocation21_spill] sm:$0xff] }
 0x7d3   : > { %v4404_v18 = vadd.f32 %v13413_v51, %v18189_v43  ;;  %v15704_v43 = vld [vmem:[%s20130_s2 + $0x58c] ss:$16 sps:$4 sm:$0xff]   ;;  %v13461_v51 = vadd.f32 %v18213_v32, %v18211_v59  ;;  %v18370_v23 = vadd.f32 %v20246_v7, %v18227_v8  ;;  %v5269_v32 = vpop.f32.mrb[94].mxu0 }
 0x7d4   : > { %4786 = vmatpush1.bf16.msra.mxu1 %v16487_v28  ;;  %v15720_v8 = vld [vmem:[%s20131_s3 + $0x88] sm:$0xff]  }
 0x7d5   : > { %v4418_v5 = vpack.c.bf16 %v4404_v18, %v4401_v14  ;;  %v13414_v36 = vpop.f32.mrb[200].mxu1  ;;  %4787 = vmatprep.subr.bf16.mxu1 %v20176_v9  ;;  %v13458_v14 = vadd.f32 %v18209_v1, %v18207_v38  ;;  %v18358_v18 = vadd.f32 %v18217_v6, %v18215_v58  ;;  %v20247_v38 = vld [vmem:[#allocation23_spill] sm:$0xff]  ;;  %v20248_v1 = vld [vmem:[#allocation24_spill] sm:$0xff]  ;;  %v18377_v58 = vadd.f32 %v18242_v12, %v5269_v32  ;;  %v5271_v6 = vpop.f32.mrb[95].mxu0 }
 0x7d6   : > { %v13415_v25 = vpop.f32.mrb[201].mxu1  ;;  %v18374_v59 = vadd.f32 %v20248_v1, %v20247_v38  ;;  %v5274_v34 = vpop.f32.mrb[96].mxu0 }
 0x7d7   : > { %v13416_v33 = vadd.f32 %v13415_v25, %v13414_v36  ;;  %v13417_v61 = vpop.f32.mrb[202].mxu1  ;;  %14332 = vmatprep.mubr.msk.bf16.mxu1 %vm1691_vm1, %v4418_v5  ;;  %v5298_v20 = vpack.c.bf16 %v18377_v58, %v18280_v47  ;;  %v18382_v15 = vadd.f32 %v18245_v40, %v5274_v34  ;;  %v5276_v30 = vpop.f32.mrb[97].mxu0  ;;  %v20249_v36 = vld [vmem:[#allocation25_spill] sm:$0xff]  ;;  %v15721_v40 = vld [vmem:[%s20131_s3 + $0x90] sm:$0xff]  }
 0x7d8   : > { %4788 = vmatpush1.bf16.msra.mxu1 %v16498_v41  ;;  %v13418_v17 = vpop.f32.mrb[203].mxu1  ;;  %v5277_v5 = vpop.f32.mrb[98].mxu0  ;;  %v20261_v47 = vld [vmem:[#allocation9_spill] sm:$0xff]  ;;  %v20262_v58 = vld [vmem:[#allocation18_spill] sm:$0xff] }
 0x7d9   : > { %v4409_v52 = vadd.f32 %v13416_v33, %v18191_v22  ;;  %4789 = vmatprep.subr.bf16.mxu1 %v20176_v9  ;;  %v15702_v22 = vld [vmem:[%s20130_s2 + $0x588] ss:$16 sps:$4 sm:$0xff]   ;;  %v18388_v25 = vadd.f32 %v20249_v36, %v5277_v5  ;;  %v5279_v33 = vpop.f32.mrb[99].mxu0 }
 0x7da   : > { %v5282_v61 = vpop.f32.mrb[100].mxu0  ;;  %v20250_v17 = vld [vmem:[#allocation26_spill] sm:$0xff] }
 0x7db   : > { %v4419_v62 = vpack.c.bf16 %v4409_v52, %v4409_v52  ;;  %v5299_v12 = vpack.c.bf16 %v18388_v25, %v18382_v15  ;;  %v18396_v52 = vadd.f32 %v20250_v17, %v5282_v61  ;;  %v20264_v15 = vld [vmem:[#allocation19_spill] sm:$0xff] }
 0x7dc   : > { %4790 = vmatpush1.bf16.msra.mxu1 %v16512_v55  ;;  %v20265_v25 = vld [vmem:[#allocation11_spill] sm:$0xff] }
 0x7dd   : > { %14333 = vmatmul.mubr.msk.bf16.gmra.mrb[104].mxu1 %vm1691_vm1, %v4419_v62  ;;  %4791 = vmatprep.subr.bf16.mxu1 %v20176_v9 }
 0x7de   : > { %12113 = vmatprep.mubr.msk.bf16.mxu1 %vm1170_vm0, %v15704_v43  ;;  %v5284_v43 = vpop.f32.mrb[101].mxu0 }
 0x7df   : > { %v5285_v62 = vpop.f32.mrb[102].mxu0 }
 0x7e0   : > { %4792 = vmatpush1.bf16.msra.mxu1 %v16526_v4 }
 0x7e1   : > { %14336 = vmatprep.subr.bf16.mxu1 %v15719_v49 }
 0x7e5   : > { %4808 = vmatmul.mubr.bf16.vlgmr.msra.gmra.mrb[204].mxu1 %v15702_v22  ;;  %v5287_v22 = vpop.f32.mrb[103].mxu0 }
 0x7e6   : > { %12114 = vmatprep.mubr.msk.bf16.mxu1 %vm1170_vm0, %v15705_v26  ;;  %14337 = vmatpush3.bf16.msra.mxu1 %v15719_v49  ;;  %v18399_v49 = vadd.f32 %v18253_v0, %v5285_v62  ;;  %v20252_v62 = vld [vmem:[#allocation13_spill] sm:$0xff] }
 0x7e7   : > { %14338 = vmatprep.subr.bf16.mxu1 %v15720_v8 }
 0x7e8   : > { %v5300_v26 = vpack.c.bf16 %v18399_v49, %v18396_v52  ;;  %v15740_v52 = vld [vmem:[%s20131_s3 + $0xa0] sm:$0xff]  }
 0x7e9   : > { %v15723_v49 = vld [vmem:[%s20130_s2 + $0x6e0] ss:$16 sps:$4 sm:$0xff]  }
 0x7ea   : > { %14339 = vmatpush3.bf16.msra.mxu1 %v15720_v8  ;;  %v15722_v8 = vld [vmem:[%s20131_s3 + $0x98] sm:$0xff]  }
 0x7eb   : > { %14352 = vmatprep.subr.bf16.mxu1 %v15721_v40 }
 0x7ed   : > { %4816 = vmatmul.mubr.bf16.gmra.mrb[208].mxu1 %v15707_v31  ;;  %v5290_v31 = vpop.f32.mrb[104].mxu0 }
 0x7ee   : > { %12115 = vmatprep.mubr.msk.bf16.mxu1 %vm1170_vm0, %v15708_v29  ;;  %v18404_v29 = vadd.f32 %v18256_v53, %v5290_v31 }
 0x7f0   : > { %v5301_v54 = vpack.c.bf16 %v18404_v29, %v18404_v29  ;;  %v15726_v29 = vld [vmem:[%s20130_s2 + $0x704] ss:$16 sps:$4 sm:$0xff]  }
 0x7f5   : > { %4824 = vmatmul.mubr.bf16.gmra.mrb[212].mxu1 %v15710_v37  ;;  %v5292_v37 = vpop.f32.mrb[105].mxu0 }
 0x7f6   : > { %12116 = vmatprep.mubr.msk.bf16.mxu1 %vm1170_vm0, %v15711_v24  ;;  %v5293_v24 = vpop.f32.mrb[106].mxu0 }
 0x7fd   : > { %4832 = vmatmul.mubr.bf16.gmra.mrb[216].mxu1 %v15713_v44  ;;  %v5294_v44 = vpop.f32.mrb[107].mxu0 }
 0x7fe   : > { %12117 = vmatprep.mubr.msk.bf16.mxu1 %vm1170_vm0, %v15714_v19 }
 0x805   : > { %4840 = vmatmul.mubr.bf16.gmra.mrb[220].mxu1 %v15716_v2 }
 0x806   : > { %12118 = vmatprep.mubr.msk.bf16.mxu1 %vm1170_vm0, %v12112_v50 }
 0x80d   : > { %4848 = vmatmul.mubr.bf16.gmra.mrb[224].mxu1 %v12111_v46 }
 0x8b8   : > { %v4809_v19 = vpop.f32.mrb[204].mxu1 }
 0x8b9   : > { %v4810_v2 = vadd.f32 %v20251_v39, %v4809_v19  ;;  %v4811_v50 = vpop.f32.mrb[205].mxu1 }
 0x8ba   : > { %v4812_v46 = vpop.f32.mrb[206].mxu1 }
 0x8bb   : > { %v4813_v7 = vadd.f32 %v13449_v16, %v4812_v46  ;;  %v4814_v38 = vpop.f32.mrb[207].mxu1 }
 0x8bd   : > { %v4855_v0 = vpack.c.bf16 %v4813_v7, %v4810_v2 }
 0x8bf   : > { %14340 = vmatprep.mubr.msk.bf16.mxu1 %vm1691_vm1, %v4855_v0 }
 0x8c0   : > { %v4817_v1 = vpop.f32.mrb[208].mxu1 }
 0x8c1   : > { %v4818_v32 = vadd.f32 %v13452_v63, %v4817_v1  ;;  %v4819_v6 = vpop.f32.mrb[209].mxu1 }
 0x8c2   : > { %v4820_v34 = vpop.f32.mrb[210].mxu1  ;;  %v15728_v6 = vld [vmem:[%s20130_s2 + $0x700] ss:$16 sps:$4 sm:$0xff]  }
 0x8c3   : > { %v4821_v30 = vadd.f32 %v13455_v3, %v4820_v34  ;;  %v4822_v53 = vpop.f32.mrb[211].mxu1  ;;  %v15729_v34 = vld [vmem:[%s20130_s2 + $0x724] ss:$16 sps:$4 sm:$0xff]  }
 0x8c4   : > { %v15732_v53 = vld [vmem:[%s20130_s2 + $0x744] ss:$16 sps:$4 sm:$0xff]  }
 0x8c5   : > { %v4856_v5 = vpack.c.bf16 %v4821_v30, %v4818_v32  ;;  %v20256_v32 = vld [vmem:[#allocation15_spill] sm:$0xff] }
 0x8c6   : > { %v15731_v30 = vld [vmem:[%s20130_s2 + $0x720] ss:$16 sps:$4 sm:$0xff]  }
 0x8c7   : > { %14341 = vmatmul.mubr.msk.bf16.vlgmr.msra.gmra.mrb[96].mxu1 %vm1691_vm1, %v4856_v5  ;;  %v15734_v5 = vld [vmem:[%s20130_s2 + $0x740] ss:$16 sps:$4 sm:$0xff]  }
 0x8c8   : > { %14353 = vmatpush3.bf16.msra.mxu1 %v15721_v40  ;;  %v4825_v36 = vpop.f32.mrb[212].mxu1 }
 0x8c9   : > { %v4826_v16 = vadd.f32 %v13458_v14, %v4825_v36  ;;  %v4827_v33 = vpop.f32.mrb[213].mxu1  ;;  %14354 = vmatprep.subr.bf16.mxu1 %v15722_v8  ;;  %v12215_v36 = vld [vmem:[%s20130_s2 + $0x780] sm:$0x11] }
 0x8ca   : > { %v4828_v61 = vpop.f32.mrb[214].mxu1  ;;  %v12238_v33 = vcombine.high %v12215_v36, %v12215_v36 }
 0x8cb   : > { %v4829_v17 = vadd.f32 %v13461_v51, %v4828_v61  ;;  %v4830_v43 = vpop.f32.mrb[215].mxu1  ;;  %v12237_v61 = vcombine.low %v12215_v36, %v12215_v36 }
 0x8cc   : > { %14355 = vmatpush3.bf16.msra.mxu1 %v15722_v8  ;;  %v15735_v8 = vld [vmem:[%s20130_s2 + $0x764] ss:$16 sps:$4 sm:$0xff]  }
 0x8cd   : > { %v4857_v63 = vpack.c.bf16 %v4829_v17, %v4826_v16  ;;  %13548 = vmatprep.subr.bf16.mxu1 %v20252_v62  ;;  %v15737_v16 = vld [vmem:[%s20130_s2 + $0x760] ss:$16 sps:$4 sm:$0xff]   ;;  %v5691_v17 = vpop.f32.mrb[108].mxu0 }
 0x8ce   : > { %v5693_v43 = vpop.f32.mrb[109].mxu0 }
 0x8cf   : > { %14344 = vmatprep.mubr.msk.bf16.mxu1 %vm1691_vm1, %v4857_v63  ;;  %v5694_v63 = vpop.f32.mrb[110].mxu0 }
 0x8d0   : > { %v4833_v3 = vpop.f32.mrb[216].mxu1  ;;  %v5696_v62 = vpop.f32.mrb[111].mxu0 }
 0x8d1   : > { %v4834_v22 = vadd.f32 %v18358_v18, %v4833_v3  ;;  %v4835_v31 = vpop.f32.mrb[217].mxu1  ;;  %v15741_v3 = vld [vmem:[%s20131_s3 + $0xa8] sm:$0xff]  }
 0x8d2   : > { %v4836_v37 = vpop.f32.mrb[218].mxu1 }
 0x8d3   : > { %v4837_v40 = vadd.f32 %v18362_v60, %v4836_v37  ;;  %v4838_v24 = vpop.f32.mrb[219].mxu1 }
 0x8d5   : > { %v4858_v14 = vpack.c.bf16 %v4837_v40, %v4834_v22  ;;  %v5699_v22 = vpop.f32.mrb[112].mxu0 }
 0x8d6   : > { %v5701_v31 = vpop.f32.mrb[113].mxu0 }
 0x8d7   : > { %14345 = vmatmul.mubr.msk.bf16.gmra.mrb[100].mxu1 %vm1691_vm1, %v4858_v14  ;;  %v5702_v37 = vpop.f32.mrb[114].mxu0 }
 0x8d8   : > { %v4841_v44 = vpop.f32.mrb[220].mxu1  ;;  %v5704_v40 = vpop.f32.mrb[115].mxu0 }
 0x8d9   : > { %v4842_v51 = vadd.f32 %v18366_v35, %v4841_v44  ;;  %v4843_v19 = vpop.f32.mrb[221].mxu1  ;;  %v20253_v35 = vld [vmem:[#allocation5_spill] sm:$0xff]  ;;  %v5707_v24 = vpop.f32.mrb[116].mxu0 }
 0x8da   : > { %v4844_v39 = vpop.f32.mrb[222].mxu1  ;;  %v5709_v14 = vpop.f32.mrb[117].mxu0 }
 0x8db   : > { %v4845_v2 = vadd.f32 %v18370_v23, %v4844_v39  ;;  %v4846_v50 = vpop.f32.mrb[223].mxu1  ;;  %v20254_v23 = vld [vmem:[#allocation14_spill] sm:$0xff]  ;;  %v5710_v44 = vpop.f32.mrb[118].mxu0 }
 0x8dd   : > { %v4859_v46 = vpack.c.bf16 %v4845_v2, %v4842_v51  ;;  %v5712_v51 = vpop.f32.mrb[119].mxu0 }
 0x8de   : > { %v5715_v19 = vpop.f32.mrb[120].mxu0 }
 0x8df   : > { %14348 = vmatprep.mubr.msk.bf16.mxu1 %vm1691_vm1, %v4859_v46  ;;  %v5717_v39 = vpop.f32.mrb[121].mxu0 }
 0x8e0   : > { %v4849_v18 = vpop.f32.mrb[224].mxu1  ;;  %v5718_v2 = vpop.f32.mrb[122].mxu0 }
 0x8e1   : > { %v4850_v7 = vadd.f32 %v18374_v59, %v4849_v18  ;;  %v4851_v38 = vpop.f32.mrb[225].mxu1  ;;  %v20255_v59 = vld [vmem:[#allocation6_spill] sm:$0xff]  ;;  %v5720_v50 = vpop.f32.mrb[123].mxu0 }
 0x8e2   : > { %v4852_v60 = vpop.f32.mrb[226].mxu1  ;;  %v18500_v46 = vpop.f32.mrb[124].mxu0 }
 0x8e3   : > { %v4860_v0 = vpack.c.bf16 %v4850_v7, %v4850_v7  ;;  %v4853_v1 = vpop.f32.mrb[227].mxu1  ;;  %v5725_v18 = vpop.f32.mrb[125].mxu0 }
 0x8e4   : > { %v18502_v7 = vpop.f32.mrb[126].mxu0 }
 0x8e5   : > { %14349 = vmatmul.mubr.msk.bf16.gmra.mrb[104].mxu1 %vm1691_vm1, %v4860_v0  ;;  %v5728_v38 = vpop.f32.mrb[127].mxu0 }
 0x8e6   : > { %14356 = vmatprep.mubr.msk.bf16.mxu1 %vm1691_vm1, %v5296_v48  ;;  %v20259_v48 = vld [vmem:[#allocation8_spill] sm:$0xff]  ;;  %v18504_v60 = vpop.f32.mrb[128].mxu0 }
 0x8e7   : > { %v5733_v0 = vpop.f32.mrb[129].mxu0 }
 0x8e8   : > { %v5734_v1 = vpop.f32.mrb[130].mxu0 }
 0x8ed   : > { %14357 = vmatmul.mubr.msk.bf16.vlgmr.msra.gmra.mrb[96].mxu1 %vm1691_vm1, %v5297_v45  ;;  %v20260_v45 = vld [vmem:[#allocation17_spill] sm:$0xff] }
 0x8ee   : > { %13549 = vmatpush3.bf16.msra.mxu1 %v20253_v35  ;;  %14360 = vmatprep.mubr.msk.bf16.mxu1 %vm1691_vm1, %v5298_v20  ;;  %v20263_v20 = vld [vmem:[#allocation10_spill] sm:$0xff]  ;;  %v5735_v35 = vpop.f32.mrb[131].mxu0 }
 0x8ef   : > { %13550 = vmatprep.subr.bf16.mxu1 %v20254_v23  ;;  %v13624_v23 = vpop.f32.mrb[132].mxu0 }
 0x8f2   : > { %13551 = vmatpush3.bf16.msra.mxu1 %v20255_v59  ;;  %v13625_v59 = vpop.f32.mrb[133].mxu0 }
 0x8f3   : > { %13552 = vmatprep.subr.bf16.mxu1 %v20256_v32  ;;  %v18506_v32 = vadd.f32 %v13625_v59, %v13624_v23 }
 0x8f5   : > { %14361 = vmatmul.mubr.msk.bf16.gmra.mrb[100].mxu1 %vm1691_vm1, %v5299_v12  ;;  %v20266_v12 = vld [vmem:[#allocation20_spill] sm:$0xff] }
 0x8f6   : > { %13553 = vmatpush3.bf16.msra.mxu1 %v20257_v21  ;;  %14364 = vmatprep.mubr.msk.bf16.mxu1 %vm1691_vm1, %v5300_v26  ;;  %v20267_v26 = vld [vmem:[#allocation12_spill] sm:$0xff]  ;;  %v13627_v21 = vpop.f32.mrb[134].mxu0 }
 0x8f7   : > { %13554 = vmatprep.subr.bf16.mxu1 %v20258_v56  ;;  %v13628_v56 = vpop.f32.mrb[135].mxu0 }
 0x8fa   : > { %13555 = vmatpush3.bf16.msra.mxu1 %v20259_v48  ;;  %v18508_v48 = vadd.f32 %v13628_v56, %v13627_v21 }
 0x8fb   : > { %13556 = vmatprep.subr.bf16.mxu1 %v20260_v45 }
 0x8fd   : > { %14365 = vmatmul.mubr.msk.bf16.gmra.mrb[104].mxu1 %vm1691_vm1, %v5301_v54 }
 0x8fe   : > { %13557 = vmatpush3.bf16.msra.mxu1 %v20261_v47  ;;  %5609 = vmatprep.mubr.bf16.mxu1 %v15725_v13 }
 0x8ff   : > { %13558 = vmatprep.subr.bf16.mxu1 %v20262_v58 }
 0x902   : > { %13559 = vmatpush3.bf16.msra.mxu1 %v20263_v20 }
 0x903   : > { %13560 = vmatprep.subr.bf16.mxu1 %v20264_v15 }
 0x906   : > { %13561 = vmatpush3.bf16.msra.mxu1 %v20265_v25 }
 0x907   : > { %13562 = vmatprep.subr.bf16.mxu1 %v20266_v12 }
 0x90a   : > { %13563 = vmatpush3.bf16.msra.mxu1 %v20267_v26 }
 0x90b   : > { %14368 = vmatprep.subr.bf16.mxu1 %v15740_v52 }
 0x90d   : > { %5610 = vmatmul.mubr.bf16.vlgmr.msra.gmra.mrb[228].mxu1 %v15723_v49 }
 0x90e   : > { %5617 = vmatprep.mubr.bf16.mxu1 %v15726_v29  ;;  %14369 = vmatpush3.bf16.msra.mxu1 %v15740_v52 }
 0x90f   : > { %14370 = vmatprep.subr.bf16.mxu1 %v15741_v3 }
 0x912   : > { %14371 = vmatpush3.bf16.msra.mxu1 %v15741_v3 }
 0x913   : > { %6098 = vmatprep.subr.bf16.mxu1 %v20176_v9 }
 0x915   : > { %5618 = vmatmul.mubr.bf16.gmra.mrb[232].mxu1 %v15728_v6 }
 0x916   : > { %5625 = vmatprep.mubr.bf16.mxu1 %v15729_v34 }
 0x91d   : > { %5626 = vmatmul.mubr.bf16.gmra.mrb[236].mxu1 %v15731_v30 }
 0x91e   : > { %5633 = vmatprep.mubr.bf16.mxu1 %v15732_v53 }
 0x925   : > { %5634 = vmatmul.mubr.bf16.gmra.mrb[240].mxu1 %v15734_v5 }
 0x926   : > { %5641 = vmatprep.mubr.bf16.mxu1 %v15735_v8 }
 0x92d   : > { %5642 = vmatmul.mubr.bf16.gmra.mrb[244].mxu1 %v15737_v16 }
 0x92e   : > { %5649 = vmatprep.mubr.bf16.mxu1 %v12238_v33 }
 0x935   : > { %5650 = vmatmul.mubr.bf16.gmra.mrb[248].mxu1 %v12237_v61 }
 0x9e0   : > { %v13564_v13 = vpop.f32.mrb[228].mxu1 }
 0x9e1   : > { %v13565_v54 = vpop.f32.mrb[229].mxu1 }
 0x9e2   : > { %v13566_v45 = vadd.f32 %v13565_v54, %v13564_v13  ;;  %v13567_v47 = vpop.f32.mrb[230].mxu1 }
 0x9e3   : > { %v13568_v58 = vpop.f32.mrb[231].mxu1 }
 0x9e4   : > { %v5692_v20 = vadd.f32 %v13566_v45, %v5691_v17  ;;  %v13569_v15 = vadd.f32 %v13568_v58, %v13567_v47  ;;  %v15759_v45 = vld [vmem:[%s20131_s3 + $0xb0] sm:$0xff]   ;;  %v15747_v47 = vld [vmem:[%s20130_s2 + $0x7bc] ss:$16 sps:$4 sm:$0xff]   ;;  %v15745_v58 = vld [vmem:[%s20130_s2 + $0x7b8] ss:$16 sps:$4 sm:$0xff]  }
 0x9e6   : > { %v5695_v25 = vadd.f32 %v13569_v15, %v5694_v63  ;;  %v15748_v15 = vld [vmem:[%s20130_s2 + $0x7d8] ss:$16 sps:$4 sm:$0xff]  }
 0x9e8   : > { %v5737_v12 = vpack.c.bf16 %v5695_v25, %v5692_v20  ;;  %v13570_v52 = vpop.f32.mrb[232].mxu1  ;;  %v15750_v20 = vld [vmem:[%s20130_s2 + $0x7dc] ss:$16 sps:$4 sm:$0xff]  }
 0x9e9   : > { %v13571_v49 = vpop.f32.mrb[233].mxu1  ;;  %v15753_v25 = vld [vmem:[%s20130_s2 + $0x7fc] ss:$16 sps:$4 sm:$0xff]  }
 0x9ea   : > { %v13572_v26 = vadd.f32 %v13571_v49, %v13570_v52  ;;  %v13573_v29 = vpop.f32.mrb[234].mxu1  ;;  %14372 = vmatprep.mubr.msk.bf16.mxu1 %vm1691_vm1, %v5737_v12  ;;  %v15751_v12 = vld [vmem:[%s20130_s2 + $0x7f8] ss:$16 sps:$4 sm:$0xff]   ;;  %v15756_v52 = vld [vmem:[%s20130_s2 + $0x81c] ss:$16 sps:$4 sm:$0xff]  }
 0x9eb   : > { %v13574_v6 = vpop.f32.mrb[235].mxu1  ;;  %v12280_v49 = vld [vmem:[%s20130_s2 + $0x838] sm:$0x11] }
 0x9ec   : > { %v5700_v34 = vadd.f32 %v13572_v26, %v5699_v22  ;;  %v13575_v30 = vadd.f32 %v13574_v6, %v13573_v29  ;;  %v15754_v26 = vld [vmem:[%s20130_s2 + $0x818] ss:$16 sps:$4 sm:$0xff]   ;;  %v12304_v29 = vcombine.high %v12280_v49, %v12280_v49  ;;  %v12303_v6 = vcombine.low %v12280_v49, %v12280_v49 }
 0x9ee   : > { %v5703_v53 = vadd.f32 %v13575_v30, %v5702_v37 }
 0x9f0   : > { %v5738_v5 = vpack.c.bf16 %v5703_v53, %v5700_v34  ;;  %v13576_v8 = vpop.f32.mrb[236].mxu1  ;;  %v13630_v34 = vpop.f32.mrb[136].mxu0 }
 0x9f1   : > { %v13577_v36 = vpop.f32.mrb[237].mxu1  ;;  %v13631_v30 = vpop.f32.mrb[137].mxu0 }
 0x9f2   : > { %v13578_v16 = vadd.f32 %v13577_v36, %v13576_v8  ;;  %v13579_v33 = vpop.f32.mrb[238].mxu1  ;;  %14373 = vmatmul.mubr.msk.bf16.vlgmr.msra.gmra.mrb[96].mxu1 %vm1691_vm1, %v5738_v5  ;;  %v18578_v53 = vadd.f32 %v13631_v30, %v13630_v34  ;;  %v15760_v5 = vld [vmem:[%s20131_s3 + $0xb8] sm:$0xff]   ;;  %v13633_v8 = vpop.f32.mrb[138].mxu0 }
 0x9f3   : > { %6099 = vmatpush1.bf16.msra.mxu1 %v16397_v11  ;;  %v13580_v61 = vpop.f32.mrb[239].mxu1  ;;  %v13634_v36 = vpop.f32.mrb[139].mxu0 }
 0x9f4   : > { %v5708_v17 = vadd.f32 %v13578_v16, %v5707_v24  ;;  %v13581_v43 = vadd.f32 %v13580_v61, %v13579_v33  ;;  %6100 = vmatprep.subr.bf16.mxu1 %v20176_v9  ;;  %v18583_v16 = vadd.f32 %v13634_v36, %v13633_v8  ;;  %v13636_v33 = vpop.f32.mrb[140].mxu0 }
 0x9f5   : > { %v13637_v61 = vpop.f32.mrb[141].mxu0 }
 0x9f6   : > { %v5711_v63 = vadd.f32 %v13581_v43, %v5710_v44  ;;  %v13639_v43 = vpop.f32.mrb[142].mxu0 }
 0x9f7   : > { %6101 = vmatpush1.bf16.msra.mxu1 %v16417_v27 }
 0x9f8   : > { %v5739_v62 = vpack.c.bf16 %v5711_v63, %v5708_v17  ;;  %v13582_v3 = vpop.f32.mrb[240].mxu1  ;;  %6102 = vmatprep.subr.bf16.mxu1 %v20176_v9  ;;  %v18586_v17 = vadd.f32 %v13637_v61, %v13636_v33  ;;  %v13640_v63 = vpop.f32.mrb[143].mxu0 }
 0x9f9   : > { %v13583_v22 = vpop.f32.mrb[241].mxu1 }
 0x9fa   : > { %v13584_v31 = vadd.f32 %v13583_v22, %v13582_v3  ;;  %v13585_v37 = vpop.f32.mrb[242].mxu1  ;;  %14376 = vmatprep.mubr.msk.bf16.mxu1 %vm1691_vm1, %v5739_v62  ;;  %v18588_v62 = vadd.f32 %v13640_v63, %v13639_v43  ;;  %v13642_v3 = vpop.f32.mrb[144].mxu0 }
 0x9fb   : > { %6103 = vmatpush1.bf16.msra.mxu1 %v16437_v42  ;;  %v13586_v40 = vpop.f32.mrb[243].mxu1  ;;  %v13643_v22 = vpop.f32.mrb[145].mxu0 }
 0x9fc   : > { %v5716_v14 = vadd.f32 %v13584_v31, %v5715_v19  ;;  %v13587_v24 = vadd.f32 %v13586_v40, %v13585_v37  ;;  %6104 = vmatprep.subr.bf16.mxu1 %v20176_v9  ;;  %v18590_v31 = vadd.f32 %v13643_v22, %v13642_v3  ;;  %v13645_v37 = vpop.f32.mrb[146].mxu0 }
 0x9fd   : > { %v13646_v40 = vpop.f32.mrb[147].mxu0 }
 0x9fe   : > { %v5719_v51 = vadd.f32 %v13587_v24, %v5718_v2  ;;  %v13648_v24 = vpop.f32.mrb[148].mxu0 }
 0x9ff   : > { %6105 = vmatpush1.bf16.msra.mxu1 %v16457_v57 }
 0xa00   : > { %v5740_v44 = vpack.c.bf16 %v5719_v51, %v5716_v14  ;;  %v13588_v39 = vpop.f32.mrb[244].mxu1  ;;  %6106 = vmatprep.subr.bf16.mxu1 %v20176_v9  ;;  %v18592_v14 = vadd.f32 %v13646_v40, %v13645_v37  ;;  %v13649_v51 = vpop.f32.mrb[149].mxu0 }
 0xa01   : > { %v13589_v50 = vpop.f32.mrb[245].mxu1 }
 0xa02   : > { %v13590_v18 = vadd.f32 %v13589_v50, %v13588_v39  ;;  %v13591_v38 = vpop.f32.mrb[246].mxu1  ;;  %14377 = vmatmul.mubr.msk.bf16.gmra.mrb[100].mxu1 %vm1691_vm1, %v5740_v44  ;;  %v18594_v44 = vadd.f32 %v13649_v51, %v13648_v24  ;;  %v13651_v39 = vpop.f32.mrb[150].mxu0 }
 0xa03   : > { %6107 = vmatpush1.bf16.msra.mxu1 %v16476_v10  ;;  %v13592_v0 = vpop.f32.mrb[247].mxu1  ;;  %v13652_v50 = vpop.f32.mrb[151].mxu0 }
 0xa04   : > { %v5724_v19 = vadd.f32 %v13590_v18, %v18500_v46  ;;  %v13593_v1 = vadd.f32 %v13592_v0, %v13591_v38  ;;  %6108 = vmatprep.subr.bf16.mxu1 %v20176_v9  ;;  %v18596_v18 = vadd.f32 %v13652_v50, %v13651_v39  ;;  %v13654_v38 = vpop.f32.mrb[152].mxu0 }
 0xa05   : > { %v13655_v0 = vpop.f32.mrb[153].mxu0 }
 0xa06   : > { %v5727_v2 = vadd.f32 %v13593_v1, %v18502_v7  ;;  %v15744_v7 = vld [vmem:[%s20130_s2 + $0x79c] ss:$16 sps:$4 sm:$0xff]   ;;  %v13657_v1 = vpop.f32.mrb[154].mxu0 }
 0xa07   : > { %6109 = vmatpush1.bf16.msra.mxu1 %v16487_v28 }
 0xa08   : > { %v5741_v35 = vpack.c.bf16 %v5727_v2, %v5724_v19  ;;  %v13594_v23 = vpop.f32.mrb[248].mxu1  ;;  %6110 = vmatprep.subr.bf16.mxu1 %v20176_v9  ;;  %v18598_v19 = vadd.f32 %v13655_v0, %v13654_v38  ;;  %v13658_v2 = vpop.f32.mrb[155].mxu0 }
 0xa09   : > { %v13595_v59 = vpop.f32.mrb[249].mxu1 }
 0xa0a   : > { %v13596_v21 = vadd.f32 %v13595_v59, %v13594_v23  ;;  %v13597_v56 = vpop.f32.mrb[250].mxu1  ;;  %14380 = vmatprep.mubr.msk.bf16.mxu1 %vm1691_vm1, %v5741_v35  ;;  %v13684_v35 = vpop.f32.mrb[156].mxu0 }
 0xa0b   : > { %6111 = vmatpush1.bf16.msra.mxu1 %v16498_v41  ;;  %v13598_v13 = vpop.f32.mrb[251].mxu1  ;;  %v13685_v23 = vpop.f32.mrb[157].mxu0 }
 0xa0c   : > { %v5732_v46 = vadd.f32 %v13596_v21, %v18504_v60  ;;  %6112 = vmatprep.subr.bf16.mxu1 %v20176_v9  ;;  %v15742_v60 = vld [vmem:[%s20130_s2 + $0x798] ss:$16 sps:$4 sm:$0xff]   ;;  %v18600_v59 = vadd.f32 %v13685_v23, %v13684_v35  ;;  %v13687_v21 = vpop.f32.mrb[158].mxu0 }
 0xa0d   : > { %v13688_v56 = vpop.f32.mrb[159].mxu0 }
 0xa0e   : > { %v5742_v54 = vpack.c.bf16 %v5732_v46, %v5732_v46  ;;  %v18602_v13 = vadd.f32 %v13688_v56, %v13687_v21  ;;  %v13690_v46 = vpop.f32.mrb[160].mxu0 }
 0xa0f   : > { %6113 = vmatpush1.bf16.msra.mxu1 %v16512_v55 }
 0xa10   : > { %14381 = vmatmul.mubr.msk.bf16.gmra.mrb[104].mxu1 %vm1691_vm1, %v5742_v54  ;;  %6114 = vmatprep.subr.bf16.mxu1 %v20176_v9 }
 0xa11   : > { %12305 = vmatprep.mubr.msk.bf16.mxu1 %vm1170_vm0, %v15744_v7  ;;  %v13691_v7 = vpop.f32.mrb[161].mxu0 }
 0xa12   : > { %v18604_v54 = vadd.f32 %v13691_v7, %v13690_v46 }
 0xa13   : > { %6115 = vmatpush1.bf16.msra.mxu1 %v16526_v4 }
 0xa14   : > { %14384 = vmatprep.subr.bf16.mxu1 %v15759_v45 }
 0xa18   : > { %6131 = vmatmul.mubr.bf16.vlgmr.msra.gmra.mrb[252].mxu1 %v15742_v60 }
 0xa19   : > { %12306 = vmatprep.mubr.msk.bf16.mxu1 %vm1170_vm0, %v15747_v47  ;;  %14385 = vmatpush3.bf16.msra.mxu1 %v15759_v45  ;;  %v13693_v45 = vpop.f32.mrb[162].mxu0 }
 0xa1a   : > { %14386 = vmatprep.subr.bf16.mxu1 %v15760_v5  ;;  %v13694_v60 = vpop.f32.mrb[163].mxu0 }
 0xa1b   : > { %v18606_v47 = vadd.f32 %v13694_v60, %v13693_v45 }
 0xa1d   : > { %14387 = vmatpush3.bf16.msra.mxu1 %v15760_v5 }
 0xa1e   : > { %6539 = vmatprep.subr.bf16.mxu1 %v20176_v9 }
 0xa20   : > { %6139 = vmatmul.mubr.bf16.gmra.mrb[0].mxu1 %v15745_v58  ;;  %v13696_v58 = vpop.f32.mrb[164].mxu0 }
 0xa21   : > { %12307 = vmatprep.mubr.msk.bf16.mxu1 %vm1170_vm0, %v15750_v20  ;;  %v13697_v20 = vpop.f32.mrb[165].mxu0 }
 0xa28   : > { %6147 = vmatmul.mubr.bf16.gmra.mrb[4].mxu1 %v15748_v15  ;;  %v18608_v15 = vadd.f32 %v13697_v20, %v13696_v58 }
 0xa29   : > { %12308 = vmatprep.mubr.msk.bf16.mxu1 %vm1170_vm0, %v15753_v25  ;;  %v13699_v25 = vpop.f32.mrb[166].mxu0 }
 0xa30   : > { %6155 = vmatmul.mubr.bf16.gmra.mrb[8].mxu1 %v15751_v12  ;;  %v13700_v12 = vpop.f32.mrb[167].mxu0 }
 0xa31   : > { %12309 = vmatprep.mubr.msk.bf16.mxu1 %vm1170_vm0, %v15756_v52  ;;  %v18610_v52 = vadd.f32 %v13700_v12, %v13699_v25  ;;  %v13702_v49 = vpop.f32.mrb[168].mxu0 }
 0xa38   : > { %6163 = vmatmul.mubr.bf16.gmra.mrb[12].mxu1 %v15754_v26  ;;  %v13703_v26 = vpop.f32.mrb[169].mxu0 }
 0xa39   : > { %12310 = vmatprep.mubr.msk.bf16.mxu1 %vm1170_vm0, %v12304_v29  ;;  %v18612_v29 = vadd.f32 %v13703_v26, %v13702_v49 }
 0xa40   : > { %6171 = vmatmul.mubr.bf16.gmra.mrb[16].mxu1 %v12303_v6  ;;  %v13705_v6 = vpop.f32.mrb[170].mxu0 }
 0xa41   : > { %v13706_v34 = vpop.f32.mrb[171].mxu0 }
 0xa42   : > { %v18614_v30 = vadd.f32 %v13706_v34, %v13705_v6  ;;  %v13708_v5 = vpop.f32.mrb[172].mxu0 }
 0xa43   : > { %v13709_v8 = vpop.f32.mrb[173].mxu0 }
 0xa44   : > { %v18616_v36 = vadd.f32 %v13709_v8, %v13708_v5  ;;  %v13711_v33 = vpop.f32.mrb[174].mxu0 }
 0xa45   : > { %v13712_v61 = vpop.f32.mrb[175].mxu0 }
 0xa46   : > { %v18618_v43 = vadd.f32 %v13712_v61, %v13711_v33  ;;  %v13714_v63 = vpop.f32.mrb[176].mxu0 }
 0xa47   : > { %v13715_v3 = vpop.f32.mrb[177].mxu0 }
 0xa48   : > { %v18620_v22 = vadd.f32 %v13715_v3, %v13714_v63  ;;  %v13717_v37 = vpop.f32.mrb[178].mxu0 }
 0xa49   : > { %v13718_v40 = vpop.f32.mrb[179].mxu0 }
 0xa4a   : > { %v13744_v24 = vpop.f32.mrb[180].mxu0 }
 0xa4b   : > { %v13745_v51 = vpop.f32.mrb[181].mxu0 }
 0xa4c   : > { %v13746_v39 = vadd.f32 %v13745_v51, %v13744_v24  ;;  %v13747_v50 = vpop.f32.mrb[182].mxu0 }
 0xa4d   : > { %v13748_v38 = vpop.f32.mrb[183].mxu0 }
 0xa4e   : > { %v13749_v0 = vadd.f32 %v13748_v38, %v13747_v50  ;;  %v13750_v1 = vpop.f32.mrb[184].mxu0 }
 0xa4f   : > { %v13751_v2 = vpop.f32.mrb[185].mxu0 }
 0xa50   : > { %v13752_v35 = vadd.f32 %v13751_v2, %v13750_v1  ;;  %v13753_v23 = vpop.f32.mrb[186].mxu0 }
 0xa51   : > { %v13754_v21 = vpop.f32.mrb[187].mxu0 }
 0xa52   : > { %v13755_v56 = vadd.f32 %v13754_v21, %v13753_v23  ;;  %v13756_v46 = vpop.f32.mrb[188].mxu0 }
 0xa53   : > { %v13757_v7 = vpop.f32.mrb[189].mxu0 }
 0xa54   : > { %v18622_v45 = vadd.f32 %v13757_v7, %v13756_v46  ;;  %v13759_v60 = vpop.f32.mrb[190].mxu0 }
 0xa55   : > { %v13760_v20 = vpop.f32.mrb[191].mxu0 }
 0xa56   : > { %v18625_v49 = vadd.f32 %v13760_v20, %v13759_v60  ;;  %v13762_v26 = vpop.f32.mrb[192].mxu0 }
 0xa57   : > { %v13763_v34 = vpop.f32.mrb[193].mxu0 }
 0xa58   : > { %v18628_v33 = vadd.f32 %v13763_v34, %v13762_v26  ;;  %v13765_v61 = vpop.f32.mrb[194].mxu0 }
 0xa59   : > { %v13766_v63 = vpop.f32.mrb[195].mxu0 }
 0xa5a   : > { %v18630_v37 = vadd.f32 %v13766_v63, %v13765_v61  ;;  %v13768_v40 = vpop.f32.mrb[196].mxu0 }
 0xa5b   : > { %v13769_v24 = vpop.f32.mrb[197].mxu0 }
 0xa5c   : > { %v13771_v51 = vpop.f32.mrb[198].mxu0 }
 0xa5d   : > { %v13772_v38 = vpop.f32.mrb[199].mxu0 }
 0xa5e   : > { %v18636_v2 = vadd.f32 %v13772_v38, %v13771_v51  ;;  %v13774_v23 = vpop.f32.mrb[200].mxu0 }
 0xa5f   : > { %v13775_v46 = vpop.f32.mrb[201].mxu0 }
 0xa60   : > { %v13777_v20 = vpop.f32.mrb[202].mxu0 }
 0xaeb   : > { %v6132_v58 = vpop.f32.mrb[252].mxu1 }
 0xaec   : > { %v6133_v25 = vadd.f32 %v18506_v32, %v6132_v58  ;;  %v6134_v12 = vpop.f32.mrb[253].mxu1  ;;  %v18633_v32 = vadd.f32 %v13769_v24, %v13768_v40  ;;  %v18639_v58 = vadd.f32 %v13775_v46, %v13774_v23 }
 0xaed   : > { %v6135_v6 = vpop.f32.mrb[254].mxu1 }
 0xaee   : > { %v6136_v5 = vadd.f32 %v18508_v48, %v6135_v6  ;;  %v6137_v8 = vpop.f32.mrb[255].mxu1 }
 0xaf0   : > { %v6178_v3 = vpack.c.bf16 %v6136_v5, %v6133_v25  ;;  %v13778_v25 = vpop.f32.mrb[203].mxu0 }
 0xaf1   : > { %v7014_v26 = vpop.f32.mrb[204].mxu0 }
 0xaf2   : > { %14388 = vmatprep.mubr.msk.bf16.mxu1 %vm1691_vm1, %v6178_v3  ;;  %v18641_v6 = vadd.f32 %v13746_v39, %v7014_v26  ;;  %v7016_v34 = vpop.f32.mrb[205].mxu0 }
 0xaf3   : > { %v6140_v50 = vpop.f32.mrb[0].mxu1 }
 0xaf4   : > { %v6141_v1 = vadd.f32 %v18578_v53, %v6140_v50  ;;  %v6142_v48 = vpop.f32.mrb[1].mxu1  ;;  %v7017_v53 = vpop.f32.mrb[206].mxu0 }
 0xaf5   : > { %v6143_v21 = vpop.f32.mrb[2].mxu1  ;;  %v18645_v8 = vadd.f32 %v13749_v0, %v7017_v53  ;;  %v7019_v61 = vpop.f32.mrb[207].mxu0 }
 0xaf6   : > { %v6144_v7 = vadd.f32 %v18583_v16, %v6143_v21  ;;  %v6145_v60 = vpop.f32.mrb[3].mxu1  ;;  %v7022_v3 = vpop.f32.mrb[208].mxu0 }
 0xaf7   : > { %v7060_v39 = vpack.c.bf16 %v18645_v8, %v18641_v6  ;;  %v18651_v24 = vadd.f32 %v13752_v35, %v7022_v3  ;;  %v7024_v51 = vpop.f32.mrb[209].mxu0  ;;  %v15761_v3 = vld [vmem:[%s20130_s2 + $0x848] ss:$16 sps:$4 sm:$0xff]   ;;  %v15790_v8 = vld [vmem:[%s20130_s2 + $0x9cc] ss:$16 sps:$4 sm:$0xff]  }
 0xaf8   : > { %v6179_v12 = vpack.c.bf16 %v6144_v7, %v6141_v1  ;;  %v7025_v1 = vpop.f32.mrb[210].mxu0  ;;  %v15764_v51 = vld [vmem:[%s20130_s2 + $0x868] ss:$16 sps:$4 sm:$0xff]  }
 0xaf9   : > { %v18655_v0 = vadd.f32 %v13755_v56, %v7025_v1  ;;  %v15772_v1 = vld [vmem:[%s20130_s2 + $0x8ac] ss:$16 sps:$4 sm:$0xff]   ;;  %v15782_v6 = vld [vmem:[%s20130_s2 + $0x9a8] ss:$16 sps:$4 sm:$0xff]  }
 0xafa   : > { %14389 = vmatmul.mubr.msk.bf16.vlgmr.msra.gmra.mrb[96].mxu1 %vm1691_vm1, %v6179_v12 }
 0xafb   : > { %6540 = vmatpush1.bf16.msra.mxu1 %v16397_v11  ;;  %v6148_v5 = vpop.f32.mrb[4].mxu1  ;;  %v7061_v23 = vpack.c.bf16 %v18655_v0, %v18651_v24  ;;  %v15796_v24 = vld [vmem:[%s20130_s2 + $0x9ec] ss:$16 sps:$4 sm:$0xff]   ;;  %v15794_v0 = vld [vmem:[%s20130_s2 + $0x9e8] ss:$16 sps:$4 sm:$0xff]  }
 0xafc   : > { %v6149_v16 = vadd.f32 %v18586_v17, %v6148_v5  ;;  %v6150_v63 = vpop.f32.mrb[5].mxu1  ;;  %6541 = vmatprep.subr.bf16.mxu1 %v20176_v9  ;;  %v7027_v17 = vpop.f32.mrb[211].mxu0 }
 0xafd   : > { %v6151_v40 = vpop.f32.mrb[6].mxu1  ;;  %v15770_v17 = vld [vmem:[%s20130_s2 + $0x8a8] ss:$16 sps:$4 sm:$0xff]  }
 0xafe   : > { %v6152_v50 = vadd.f32 %v18588_v62, %v6151_v40  ;;  %v6153_v38 = vpop.f32.mrb[7].mxu1  ;;  %v15766_v40 = vld [vmem:[%s20130_s2 + $0x86c] ss:$16 sps:$4 sm:$0xff]  }
 0xaff   : > { %6542 = vmatpush1.bf16.msra.mxu1 %v16417_v27  ;;  %v15767_v38 = vld [vmem:[%s20130_s2 + $0x888] ss:$16 sps:$4 sm:$0xff]  }
 0xb00   : > { %v6180_v48 = vpack.c.bf16 %v6152_v50, %v6149_v16  ;;  %6543 = vmatprep.subr.bf16.mxu1 %v20176_v9  ;;  %v15769_v50 = vld [vmem:[%s20130_s2 + $0x88c] ss:$16 sps:$4 sm:$0xff]  }
 0xb02   : > { %14392 = vmatprep.mubr.msk.bf16.mxu1 %vm1691_vm1, %v6180_v48  ;;  %v15775_v48 = vld [vmem:[%s20130_s2 + $0x8cc] ss:$16 sps:$4 sm:$0xff]  }
 0xb03   : > { %6544 = vmatpush1.bf16.msra.mxu1 %v16437_v42  ;;  %v6156_v35 = vpop.f32.mrb[8].mxu1 }
 0xb04   : > { %v6157_v62 = vadd.f32 %v18590_v31, %v6156_v35  ;;  %v6158_v21 = vpop.f32.mrb[9].mxu1  ;;  %6545 = vmatprep.subr.bf16.mxu1 %v20176_v9  ;;  %v12344_v35 = vld [vmem:[%s20130_s2 + $0x8e8] sm:$0x11] }
 0xb05   : > { %v6159_v46 = vpop.f32.mrb[10].mxu1  ;;  %v12368_v21 = vcombine.high %v12344_v35, %v12344_v35 }
 0xb06   : > { %v6160_v56 = vadd.f32 %v18592_v14, %v6159_v46  ;;  %v6161_v7 = vpop.f32.mrb[11].mxu1  ;;  %v12367_v46 = vcombine.low %v12344_v35, %v12344_v35  ;;  %v15797_v35 = vld [vmem:[%s20130_s2 + $0xa00] ss:$16 sps:$4 sm:$0xff]  }
 0xb07   : > { %6546 = vmatpush1.bf16.msra.mxu1 %v16457_v57 }
 0xb08   : > { %v6181_v60 = vpack.c.bf16 %v6160_v56, %v6157_v62  ;;  %6547 = vmatprep.subr.bf16.mxu1 %v20176_v9  ;;  %v15773_v62 = vld [vmem:[%s20130_s2 + $0x8c8] ss:$16 sps:$4 sm:$0xff]   ;;  %v7030_v56 = vpop.f32.mrb[212].mxu0 }
 0xb09   : > { %v18725_v7 = vadd.f32 %v18622_v45, %v7030_v56 }
 0xb0a   : > { %14393 = vmatmul.mubr.msk.bf16.gmra.mrb[100].mxu1 %vm1691_vm1, %v6181_v60  ;;  %v7032_v60 = vpop.f32.mrb[213].mxu0 }
 0xb0b   : > { %6548 = vmatpush1.bf16.msra.mxu1 %v16476_v10  ;;  %v6164_v20 = vpop.f32.mrb[12].mxu1 }
 0xb0c   : > { %v6165_v25 = vadd.f32 %v18594_v44, %v6164_v20  ;;  %v6166_v31 = vpop.f32.mrb[13].mxu1  ;;  %6549 = vmatprep.subr.bf16.mxu1 %v20176_v9  ;;  %v7033_v20 = vpop.f32.mrb[214].mxu0 }
 0xb0d   : > { %v6167_v12 = vpop.f32.mrb[14].mxu1  ;;  %v7035_v31 = vpop.f32.mrb[215].mxu0 }
 0xb0e   : > { %v6168_v26 = vadd.f32 %v18596_v18, %v6167_v12  ;;  %v6169_v14 = vpop.f32.mrb[15].mxu1  ;;  %v15763_v18 = vld [vmem:[%s20130_s2 + $0x84c] ss:$16 sps:$4 sm:$0xff]  }
 0xb0f   : > { %6550 = vmatpush1.bf16.msra.mxu1 %v16487_v28  ;;  %v7038_v14 = vpop.f32.mrb[216].mxu0 }
 0xb10   : > { %v6182_v34 = vpack.c.bf16 %v6168_v26, %v6165_v25  ;;  %6551 = vmatprep.subr.bf16.mxu1 %v20176_v9  ;;  %v18728_v25 = vadd.f32 %v18625_v49, %v7033_v20  ;;  %v15779_v26 = vld [vmem:[%s20131_s3 + $0xc8] sm:$0xff]   ;;  %v7040_v45 = vpop.f32.mrb[217].mxu0 }
 0xb12   : > { %14396 = vmatprep.mubr.msk.bf16.mxu1 %vm1691_vm1, %v6182_v34  ;;  %v7062_v12 = vpack.c.bf16 %v18728_v25, %v18725_v7  ;;  %v18736_v34 = vadd.f32 %v18628_v33, %v7038_v14  ;;  %v15800_v7 = vld [vmem:[%s20130_s2 + $0xa08] ss:$16 sps:$4 sm:$0xff]   ;;  %v15808_v25 = vld [vmem:[%s20130_s2 + $0xa2c] ss:$16 sps:$4 sm:$0xff]  }
 0xb13   : > { %6552 = vmatpush1.bf16.msra.mxu1 %v16498_v41  ;;  %v6172_v53 = vpop.f32.mrb[16].mxu1 }
 0xb14   : > { %v6173_v5 = vadd.f32 %v18598_v19, %v6172_v53  ;;  %v6174_v44 = vpop.f32.mrb[17].mxu1  ;;  %6553 = vmatprep.subr.bf16.mxu1 %v20176_v9  ;;  %v15778_v19 = vld [vmem:[%s20131_s3 + $0xc0] sm:$0xff]   ;;  %v7041_v53 = vpop.f32.mrb[218].mxu0 }
 0xb15   : > { %v6175_v61 = vpop.f32.mrb[18].mxu1  ;;  %v7043_v49 = vpop.f32.mrb[219].mxu0 }
 0xb16   : > { %v6183_v16 = vpack.c.bf16 %v6173_v5, %v6173_v5  ;;  %v6176_v63 = vpop.f32.mrb[19].mxu1  ;;  %v18739_v5 = vadd.f32 %v18630_v37, %v7041_v53  ;;  %v7046_v61 = vpop.f32.mrb[220].mxu0 }
 0xb17   : > { %6554 = vmatpush1.bf16.msra.mxu1 %v16512_v55 }
 0xb18   : > { %14397 = vmatmul.mubr.msk.bf16.gmra.mrb[104].mxu1 %vm1691_vm1, %v6183_v16  ;;  %6555 = vmatprep.subr.bf16.mxu1 %v20176_v9  ;;  %v7063_v44 = vpack.c.bf16 %v18739_v5, %v18736_v34  ;;  %v7048_v16 = vpop.f32.mrb[221].mxu0  ;;  %v15806_v34 = vld [vmem:[%s20130_s2 + $0xa28] ss:$16 sps:$4 sm:$0xff]  }
 0xb19   : > { %12369 = vmatprep.mubr.msk.bf16.mxu1 %vm1170_vm0, %v15763_v18  ;;  %v18744_v18 = vadd.f32 %v18633_v32, %v7046_v61  ;;  %v7049_v63 = vpop.f32.mrb[222].mxu0  ;;  %v15780_v32 = vld [vmem:[%s20131_s3 + $0xd0] sm:$0xff]  }
 0xb1a   : > { %v7051_v33 = vpop.f32.mrb[223].mxu0 }
 0xb1b   : > { %6556 = vmatpush1.bf16.msra.mxu1 %v16526_v4 }
 0xb1c   : > { %14400 = vmatprep.subr.bf16.mxu1 %v15778_v19 }
 0xb20   : > { %6572 = vmatmul.mubr.bf16.vlgmr.msra.gmra.mrb[20].mxu1 %v15761_v3 }
 0xb21   : > { %12370 = vmatprep.mubr.msk.bf16.mxu1 %vm1170_vm0, %v15766_v40  ;;  %14401 = vmatpush3.bf16.msra.mxu1 %v15778_v19  ;;  %v18747_v19 = vadd.f32 %v18636_v2, %v7049_v63  ;;  %v7054_v40 = vpop.f32.mrb[224].mxu0  ;;  %v15787_v2 = vld [vmem:[%s20130_s2 + $0x9c4] ss:$16 sps:$4 sm:$0xff]  }
 0xb22   : > { %14402 = vmatprep.subr.bf16.mxu1 %v15779_v26  ;;  %v18752_v37 = vadd.f32 %v18639_v58, %v7054_v40  ;;  %7381 = vmatprep.mubr.bf16.mxu0 %v15787_v2  ;;  %v15793_v58 = vld [vmem:[%s20130_s2 + $0x9e4] ss:$16 sps:$4 sm:$0xff]  }
 0xb23   : > { %v7064_v3 = vpack.c.bf16 %v18747_v19, %v18744_v18 }
 0xb25   : > { %14403 = vmatpush3.bf16.msra.mxu1 %v15779_v26 }
 0xb26   : > { %14416 = vmatprep.subr.bf16.mxu1 %v15780_v32 }
 0xb28   : > { %6580 = vmatmul.mubr.bf16.gmra.mrb[24].mxu1 %v15764_v51  ;;  %v7056_v51 = vpop.f32.mrb[225].mxu0 }
 0xb29   : > { %12371 = vmatprep.mubr.msk.bf16.mxu1 %vm1170_vm0, %v15769_v50  ;;  %v7057_v50 = vpop.f32.mrb[226].mxu0 }
 0xb30   : > { %6588 = vmatmul.mubr.bf16.gmra.mrb[28].mxu1 %v15767_v38  ;;  %v7058_v38 = vpop.f32.mrb[227].mxu0 }
 0xb31   : > { %12372 = vmatprep.mubr.msk.bf16.mxu1 %vm1170_vm0, %v15772_v1  ;;  %v15785_v1 = vld [vmem:[%s20130_s2 + $0x9c0] ss:$16 sps:$4 sm:$0xff]   ;;  %v13804_v14 = vpop.f32.mrb[228].mxu0 }
 0xb32   : > { %7382 = vmatmul.mubr.bf16.gmra.mrb[232].mxu0 %v15785_v1  ;;  %v13805_v53 = vpop.f32.mrb[229].mxu0 }
 0xb33   : > { %7389 = vmatprep.mubr.bf16.mxu0 %v15793_v58  ;;  %v18786_v16 = vadd.f32 %v13805_v53, %v13804_v14  ;;  %v13807_v63 = vpop.f32.mrb[230].mxu0 }
 0xb34   : > { %v13808_v33 = vpop.f32.mrb[231].mxu0 }
 0xb35   : > { %v18788_v51 = vadd.f32 %v13808_v33, %v13807_v63 }
 0xb38   : > { %6596 = vmatmul.mubr.bf16.gmra.mrb[32].mxu1 %v15770_v17  ;;  %v15791_v17 = vld [vmem:[%s20130_s2 + $0x9e0] ss:$16 sps:$4 sm:$0xff]  }
 0xb39   : > { %12373 = vmatprep.mubr.msk.bf16.mxu1 %vm1170_vm0, %v15775_v48  ;;  %v15799_v48 = vld [vmem:[%s20130_s2 + $0xa04] ss:$16 sps:$4 sm:$0xff]  }
 0xb3a   : > { %7390 = vmatmul.mubr.bf16.gmra.mrb[236].mxu0 %v15791_v17 }
 0xb3b   : > { %7397 = vmatprep.mubr.bf16.mxu0 %v15799_v48 }
 0xb40   : > { %6604 = vmatmul.mubr.bf16.gmra.mrb[36].mxu1 %v15773_v62  ;;  %v15805_v62 = vld [vmem:[%s20130_s2 + $0xa24] ss:$16 sps:$4 sm:$0xff]  }
 0xb41   : > { %12374 = vmatprep.mubr.msk.bf16.mxu1 %vm1170_vm0, %v12368_v21  ;;  %v15803_v21 = vld [vmem:[%s20130_s2 + $0xa20] ss:$16 sps:$4 sm:$0xff]  }
 0xb42   : > { %7398 = vmatmul.mubr.bf16.gmra.mrb[240].mxu0 %v15797_v35 }
 0xb43   : > { %7405 = vmatprep.mubr.bf16.mxu0 %v15805_v62 }
 0xb48   : > { %6612 = vmatmul.mubr.bf16.gmra.mrb[40].mxu1 %v12367_v46  ;;  %v12471_v46 = vld [vmem:[%s20130_s2 + $0xa40] sm:$0x11] }
 0xb49   : > { %v12494_v56 = vcombine.high %v12471_v46, %v12471_v46  ;;  %v12493_v60 = vcombine.low %v12471_v46, %v12471_v46 }
 0xb4a   : > { %7406 = vmatmul.mubr.bf16.gmra.mrb[244].mxu0 %v15803_v21 }
 0xb4b   : > { %7413 = vmatprep.mubr.bf16.mxu0 %v12494_v56 }
 0xb52   : > { %7414 = vmatmul.mubr.bf16.gmra.mrb[248].mxu0 %v12493_v60 }
 0xbf3   : > { %v6573_v20 = vpop.f32.mrb[20].mxu1 }
 0xbf4   : > { %v6574_v31 = vadd.f32 %v18600_v59, %v6573_v20  ;;  %v6575_v26 = vpop.f32.mrb[21].mxu1 }
 0xbf5   : > { %v6576_v45 = vpop.f32.mrb[22].mxu1 }
 0xbf6   : > { %v6577_v49 = vadd.f32 %v18602_v13, %v6576_v45  ;;  %v6578_v61 = vpop.f32.mrb[23].mxu1  ;;  %v15781_v13 = vld [vmem:[%s20131_s3 + $0xd8] sm:$0xff]  }
 0xbf8   : > { %v6619_v40 = vpack.c.bf16 %v6577_v49, %v6574_v31 }
 0xbfa   : > { %14404 = vmatprep.mubr.msk.bf16.mxu1 %vm1691_vm1, %v6619_v40 }
 0xbfb   : > { %v6581_v50 = vpop.f32.mrb[24].mxu1 }
 0xbfc   : > { %v6582_v38 = vadd.f32 %v18604_v54, %v6581_v50  ;;  %v6583_v59 = vpop.f32.mrb[25].mxu1 }
 0xbfd   : > { %v6584_v2 = vpop.f32.mrb[26].mxu1  ;;  %v15814_v59 = vld [vmem:[%s20131_s3 + $0xe8] sm:$0xff]  }
 0xbfe   : > { %v6585_v1 = vadd.f32 %v18606_v47, %v6584_v2  ;;  %v6586_v58 = vpop.f32.mrb[27].mxu1 }
 0xc00   : > { %v6620_v17 = vpack.c.bf16 %v6585_v1, %v6582_v38 }
 0xc02   : > { %14405 = vmatmul.mubr.msk.bf16.vlgmr.msra.gmra.mrb[96].mxu1 %vm1691_vm1, %v6620_v17 }
 0xc03   : > { %v6589_v48 = vpop.f32.mrb[28].mxu1  ;;  %14417 = vmatpush3.bf16.msra.mxu1 %v15780_v32 }
 0xc04   : > { %v6590_v35 = vadd.f32 %v18608_v15, %v6589_v48  ;;  %v6591_v62 = vpop.f32.mrb[29].mxu1  ;;  %14418 = vmatprep.subr.bf16.mxu1 %v15781_v13 }
 0xc05   : > { %v6592_v21 = vpop.f32.mrb[30].mxu1  ;;  %v13810_v18 = vpop.f32.mrb[232].mxu0 }
 0xc06   : > { %v6593_v54 = vadd.f32 %v18610_v52, %v6592_v21  ;;  %v6594_v46 = vpop.f32.mrb[31].mxu1  ;;  %v13811_v19 = vpop.f32.mrb[233].mxu0 }
 0xc07   : > { %14419 = vmatpush3.bf16.msra.mxu1 %v15781_v13 }
 0xc08   : > { %v6621_v47 = vpack.c.bf16 %v6593_v54, %v6590_v35  ;;  %7421 = vmatprep.subr.bf16.mxu1 %v20176_v9 }
 0xc0a   : > { %14408 = vmatprep.mubr.msk.bf16.mxu1 %vm1691_vm1, %v6621_v47 }
 0xc0b   : > { %v6597_v56 = vpop.f32.mrb[32].mxu1 }
 0xc0c   : > { %v6598_v60 = vadd.f32 %v18612_v29, %v6597_v56  ;;  %v6599_v20 = vpop.f32.mrb[33].mxu1 }
 0xc0d   : > { %v6600_v31 = vpop.f32.mrb[34].mxu1 }
 0xc0e   : > { %v6601_v32 = vadd.f32 %v18614_v30, %v6600_v31  ;;  %v6602_v15 = vpop.f32.mrb[35].mxu1 }
 0xc10   : > { %v6622_v26 = vpack.c.bf16 %v6601_v32, %v6598_v60 }
 0xc12   : > { %14409 = vmatmul.mubr.msk.bf16.gmra.mrb[100].mxu1 %vm1691_vm1, %v6622_v26 }
 0xc13   : > { %v6605_v14 = vpop.f32.mrb[36].mxu1 }
 0xc14   : > { %v6606_v52 = vadd.f32 %v18616_v36, %v6605_v14  ;;  %v6607_v45 = vpop.f32.mrb[37].mxu1  ;;  %v15784_v36 = vld [vmem:[%s20130_s2 + $0x9ac] ss:$16 sps:$4 sm:$0xff]  }
 0xc15   : > { %v6608_v53 = vpop.f32.mrb[38].mxu1 }
 0xc16   : > { %v6609_v49 = vadd.f32 %v18618_v43, %v6608_v53  ;;  %v6610_v61 = vpop.f32.mrb[39].mxu1  ;;  %v7065_v43 = vpack.c.bf16 %v18752_v37, %v18752_v37  ;;  %v18891_v37 = vadd.f32 %v13811_v19, %v13810_v18 }
 0xc18   : > { %v6623_v63 = vpack.c.bf16 %v6609_v49, %v6606_v52 }
 0xc1a   : > { %14412 = vmatprep.mubr.msk.bf16.mxu1 %vm1691_vm1, %v6623_v63  ;;  %v15815_v63 = vld [vmem:[%s20130_s2 + $0xa50] ss:$16 sps:$4 sm:$0xff]  }
 0xc1b   : > { %v6613_v29 = vpop.f32.mrb[40].mxu1 }
 0xc1c   : > { %v6614_v33 = vadd.f32 %v18620_v22, %v6613_v29  ;;  %v6615_v40 = vpop.f32.mrb[41].mxu1  ;;  %v15813_v22 = vld [vmem:[%s20131_s3 + $0xe0] sm:$0xff]  }
 0xc1d   : > { %v6616_v30 = vpop.f32.mrb[42].mxu1  ;;  %v15817_v29 = vld [vmem:[%s20130_s2 + $0xa54] ss:$16 sps:$4 sm:$0xff]  }
 0xc1e   : > { %v6624_v50 = vpack.c.bf16 %v6614_v33, %v6614_v33  ;;  %v6617_v38 = vpop.f32.mrb[43].mxu1  ;;  %7814 = vmatprep.mubr.bf16.mxu0 %v15817_v29  ;;  %v15821_v33 = vld [vmem:[%s20130_s2 + $0xa70] ss:$16 sps:$4 sm:$0xff]   ;;  %v15823_v40 = vld [vmem:[%s20130_s2 + $0xa74] ss:$16 sps:$4 sm:$0xff]  }
 0xc1f   : > { %7815 = vmatmul.mubr.bf16.vlgmr.msra.gmra.mrb[252].mxu0 %v15815_v63  ;;  %v15827_v30 = vld [vmem:[%s20130_s2 + $0xa90] ss:$16 sps:$4 sm:$0xff]   ;;  %v15844_v63 = vld [vmem:[%s20130_s2 + $0xadc] ss:$16 sps:$4 sm:$0xff]  }
 0xc20   : > { %14413 = vmatmul.mubr.msk.bf16.gmra.mrb[104].mxu1 %vm1691_vm1, %v6624_v50  ;;  %7822 = vmatprep.mubr.bf16.mxu0 %v15823_v40  ;;  %v15829_v50 = vld [vmem:[%s20130_s2 + $0xa94] ss:$16 sps:$4 sm:$0xff]   ;;  %v15833_v38 = vld [vmem:[%s20130_s2 + $0xab0] ss:$16 sps:$4 sm:$0xff]   ;;  %v12536_v29 = vld [vmem:[%s20130_s2 + $0xaf8] sm:$0x11] }
 0xc21   : > { %14420 = vmatprep.mubr.msk.bf16.mxu1 %vm1691_vm1, %v7060_v39  ;;  %v15788_v39 = vld [vmem:[%s20130_s2 + $0x9c8] ss:$16 sps:$4 sm:$0xff]   ;;  %v12560_v40 = vcombine.high %v12536_v29, %v12536_v29 }
 0xc27   : > { %7823 = vmatmul.mubr.bf16.gmra.mrb[0].mxu0 %v15821_v33  ;;  %v15842_v33 = vld [vmem:[%s20130_s2 + $0xad8] ss:$16 sps:$4 sm:$0xff]  }
 0xc28   : > { %14421 = vmatmul.mubr.msk.bf16.vlgmr.msra.gmra.mrb[96].mxu1 %vm1691_vm1, %v7061_v23  ;;  %v15802_v23 = vld [vmem:[%s20130_s2 + $0xa0c] ss:$16 sps:$4 sm:$0xff]   ;;  %7830 = vmatprep.mubr.bf16.mxu0 %v15829_v50 }
 0xc29   : > { %7422 = vmatpush1.bf16.msra.mxu1 %v16397_v11  ;;  %14424 = vmatprep.mubr.msk.bf16.mxu1 %vm1691_vm1, %v7062_v12  ;;  %v12472_v12 = vld [vmem:[%s20130_s2 + $0xa48] sm:$0x11] }
 0xc2a   : > { %7423 = vmatprep.subr.bf16.mxu1 %v20176_v9  ;;  %v12496_v5 = vcombine.high %v12472_v12, %v12472_v12 }
 0xc2d   : > { %7424 = vmatpush1.bf16.msra.mxu1 %v16417_v27 }
 0xc2e   : > { %7425 = vmatprep.subr.bf16.mxu1 %v20176_v9 }
 0xc2f   : > { %7831 = vmatmul.mubr.bf16.gmra.mrb[4].mxu0 %v15827_v30  ;;  %v12559_v30 = vcombine.low %v12536_v29, %v12536_v29 }
 0xc30   : > { %14425 = vmatmul.mubr.msk.bf16.gmra.mrb[100].mxu1 %vm1691_vm1, %v7063_v44  ;;  %v12495_v44 = vcombine.low %v12472_v12, %v12472_v12 }
 0xc31   : > { %7426 = vmatpush1.bf16.msra.mxu1 %v16437_v42  ;;  %14428 = vmatprep.mubr.msk.bf16.mxu1 %vm1691_vm1, %v7064_v3  ;;  %v13813_v3 = vpop.f32.mrb[234].mxu0 }
 0xc32   : > { %7427 = vmatprep.subr.bf16.mxu1 %v20176_v9  ;;  %v13814_v2 = vpop.f32.mrb[235].mxu0 }
 0xc33   : > { %v18896_v1 = vadd.f32 %v13814_v2, %v13813_v3  ;;  %v13816_v58 = vpop.f32.mrb[236].mxu0 }
 0xc34   : > { %v13817_v17 = vpop.f32.mrb[237].mxu0 }
 0xc35   : > { %7428 = vmatpush1.bf16.msra.mxu1 %v16457_v57  ;;  %v13819_v13 = vpop.f32.mrb[238].mxu0  ;;  %v18899_v48 = vadd.f32 %v13817_v17, %v13816_v58 }
 0xc36   : > { %7429 = vmatprep.subr.bf16.mxu1 %v20176_v9  ;;  %v13820_v35 = vpop.f32.mrb[239].mxu0 }
 0xc37   : > { %v18901_v62 = vadd.f32 %v13820_v35, %v13819_v13  ;;  %v13822_v21 = vpop.f32.mrb[240].mxu0 }
 0xc38   : > { %14429 = vmatmul.mubr.msk.bf16.gmra.mrb[104].mxu1 %vm1691_vm1, %v7065_v43  ;;  %v13823_v54 = vpop.f32.mrb[241].mxu0  ;;  %v15839_v43 = vld [vmem:[%s20130_s2 + $0xad0] ss:$16 sps:$4 sm:$0xff]  }
 0xc39   : > { %7430 = vmatpush1.bf16.msra.mxu1 %v16476_v10  ;;  %12497 = vmatprep.mubr.msk.bf16.mxu1 %vm1170_vm0, %v15784_v36  ;;  %v18903_v46 = vadd.f32 %v13823_v54, %v13822_v21  ;;  %v13825_v47 = vpop.f32.mrb[242].mxu0  ;;  %v15835_v36 = vld [vmem:[%s20130_s2 + $0xab4] ss:$16 sps:$4 sm:$0xff]  }
 0xc3a   : > { %7431 = vmatprep.subr.bf16.mxu1 %v20176_v9  ;;  %v13826_v56 = vpop.f32.mrb[243].mxu0  ;;  %7838 = vmatprep.mubr.bf16.mxu0 %v15835_v36 }
 0xc3b   : > { %v18905_v60 = vadd.f32 %v13826_v56, %v13825_v47  ;;  %v13828_v20 = vpop.f32.mrb[244].mxu0  ;;  %7839 = vmatmul.mubr.bf16.gmra.mrb[8].mxu0 %v15833_v38 }
 0xc3c   : > { %v13829_v31 = vpop.f32.mrb[245].mxu0 }
 0xc3d   : > { %7432 = vmatpush1.bf16.msra.mxu1 %v16487_v28  ;;  %v18907_v32 = vadd.f32 %v13829_v31, %v13828_v20  ;;  %v13831_v15 = vpop.f32.mrb[246].mxu0 }
 0xc3e   : > { %7433 = vmatprep.subr.bf16.mxu1 %v20176_v9  ;;  %v13832_v26 = vpop.f32.mrb[247].mxu0 }
 0xc3f   : > { %v18909_v14 = vadd.f32 %v13832_v26, %v13831_v15  ;;  %v13834_v52 = vpop.f32.mrb[248].mxu0  ;;  %v15820_v26 = vld [vmem:[%s20130_s2 + $0xa5c] ss:$16 sps:$4 sm:$0xff]  }
 0xc40   : > { %v13835_v45 = vpop.f32.mrb[249].mxu0 }
 0xc41   : > { %7434 = vmatpush1.bf16.msra.mxu1 %v16498_v41  ;;  %v18911_v53 = vadd.f32 %v13835_v45, %v13834_v52  ;;  %v13837_v49 = vpop.f32.mrb[250].mxu0  ;;  %v15818_v52 = vld [vmem:[%s20130_s2 + $0xa58] ss:$16 sps:$4 sm:$0xff]  }
 0xc42   : > { %7435 = vmatprep.subr.bf16.mxu1 %v20176_v9  ;;  %v13838_v61 = vpop.f32.mrb[251].mxu0  ;;  %v15824_v45 = vld [vmem:[%s20130_s2 + $0xa78] ss:$16 sps:$4 sm:$0xff]   ;;  %v15838_v49 = vld [vmem:[%s20130_s2 + $0xabc] ss:$16 sps:$4 sm:$0xff]  }
 0xc43   : > { %v15836_v61 = vld [vmem:[%s20130_s2 + $0xab8] ss:$16 sps:$4 sm:$0xff]  }
 0xc45   : > { %7436 = vmatpush1.bf16.msra.mxu1 %v16512_v55 }
 0xc46   : > { %7437 = vmatprep.subr.bf16.mxu1 %v20176_v9 }
 0xc49   : > { %7438 = vmatpush1.bf16.msra.mxu1 %v16526_v4 }
 0xc4a   : > { %14432 = vmatprep.subr.bf16.mxu1 %v15813_v22 }
 0xc4c   : > { %7454 = vmatmul.mubr.bf16.vlgmr.msra.gmra.mrb[44].mxu1 %v15782_v6  ;;  %v12535_v6 = vld [vmem:[%s20130_s2 + $0xaf0] sm:$0x11] }
 0xc4d   : > { %12498 = vmatprep.mubr.msk.bf16.mxu1 %vm1170_vm0, %v15790_v8  ;;  %14433 = vmatpush3.bf16.msra.mxu1 %v15813_v22  ;;  %v15841_v22 = vld [vmem:[%s20130_s2 + $0xad4] ss:$16 sps:$4 sm:$0xff]   ;;  %v12557_v8 = vcombine.low %v12535_v6, %v12535_v6 }
 0xc4e   : > { %14434 = vmatprep.subr.bf16.mxu1 %v15814_v59  ;;  %7846 = vmatprep.mubr.bf16.mxu0 %v15841_v22 }
 0xc4f   : > { %7847 = vmatmul.mubr.bf16.gmra.mrb[12].mxu0 %v15839_v43 }
 0xc51   : > { %14435 = vmatpush3.bf16.msra.mxu1 %v15814_v59 }
 0xc52   : > { %7862 = vmatprep.subr.bf16.mxu1 %v20176_v9 }
 0xc54   : > { %7462 = vmatmul.mubr.bf16.gmra.mrb[48].mxu1 %v15788_v39  ;;  %v12558_v39 = vcombine.high %v12535_v6, %v12535_v6 }
 0xc55   : > { %12499 = vmatprep.mubr.msk.bf16.mxu1 %vm1170_vm0, %v15796_v24 }
 0xc56   : > { %7854 = vmatprep.mubr.bf16.mxu0 %v12558_v39 }
 0xc57   : > { %7855 = vmatmul.mubr.bf16.gmra.mrb[16].mxu0 %v12557_v8 }
 0xc5c   : > { %7470 = vmatmul.mubr.bf16.gmra.mrb[52].mxu1 %v15794_v0 }
 0xc5d   : > { %12500 = vmatprep.mubr.msk.bf16.mxu1 %vm1170_vm0, %v15802_v23 }
 0xc64   : > { %7478 = vmatmul.mubr.bf16.gmra.mrb[56].mxu1 %v15800_v7 }
 0xc65   : > { %12501 = vmatprep.mubr.msk.bf16.mxu1 %vm1170_vm0, %v15808_v25 }
 0xc6c   : > { %7486 = vmatmul.mubr.bf16.gmra.mrb[60].mxu1 %v15806_v34 }
 0xc6d   : > { %12502 = vmatprep.mubr.msk.bf16.mxu1 %vm1170_vm0, %v12496_v5 }
 0xc74   : > { %7494 = vmatmul.mubr.bf16.gmra.mrb[64].mxu1 %v12495_v44 }
 0xcf2   : > { %v13864_v50 = vpop.f32.mrb[252].mxu0 }
 0xcf3   : > { %v13865_v38 = vpop.f32.mrb[253].mxu0 }
 0xcf4   : > { %v13866_v36 = vadd.f32 %v13865_v38, %v13864_v50  ;;  %v13867_v43 = vpop.f32.mrb[254].mxu0 }
 0xcf5   : > { %v13868_v22 = vpop.f32.mrb[255].mxu0 }
 0xcf6   : > { %v13869_v6 = vadd.f32 %v13868_v22, %v13867_v43 }
 0xcfa   : > { %v13870_v8 = vpop.f32.mrb[0].mxu0 }
 0xcfb   : > { %v13871_v39 = vpop.f32.mrb[1].mxu0 }
 0xd1f   : > { %v7455_v24 = vpop.f32.mrb[44].mxu1 }
 0xd20   : > { %v7456_v0 = vadd.f32 %v18786_v16, %v7455_v24  ;;  %v7457_v23 = vpop.f32.mrb[45].mxu1  ;;  %v13872_v24 = vadd.f32 %v13871_v39, %v13870_v8 }
 0xd21   : > { %v7458_v7 = vpop.f32.mrb[46].mxu1 }
 0xd22   : > { %v7459_v25 = vadd.f32 %v18788_v51, %v7458_v7  ;;  %v7460_v12 = vpop.f32.mrb[47].mxu1 }
 0xd24   : > { %v7501_v34 = vpack.c.bf16 %v7459_v25, %v7456_v0  ;;  %v13873_v0 = vpop.f32.mrb[2].mxu0  ;;  %v15850_v25 = vld [vmem:[%s20131_s3 + $0xf8] sm:$0xff]  }
 0xd25   : > { %v13874_v23 = vpop.f32.mrb[3].mxu0 }
 0xd26   : > { %14436 = vmatprep.mubr.msk.bf16.mxu1 %vm1691_vm1, %v7501_v34  ;;  %v13875_v7 = vadd.f32 %v13874_v23, %v13873_v0  ;;  %v13876_v12 = vpop.f32.mrb[4].mxu0 }
 0xd27   : > { %v7463_v5 = vpop.f32.mrb[48].mxu1  ;;  %v13877_v34 = vpop.f32.mrb[5].mxu0 }
 0xd28   : > { %v7464_v44 = vadd.f32 %v18891_v37, %v7463_v5  ;;  %v7465_v18 = vpop.f32.mrb[49].mxu1  ;;  %v13878_v5 = vadd.f32 %v13877_v34, %v13876_v12  ;;  %v15851_v34 = vld [vmem:[%s20132_s4] sm:$0xff]  }
 0xd29   : > { %v7466_v19 = vpop.f32.mrb[50].mxu1  ;;  %14476 = vmatprep.mubr.msk.bf16.mxu0 %vm8116_vm2, %v15851_v34  ;;  %v15899_v34 = vld [vmem:[%s20132_s4 + $0xe0] sm:$0xff]  }
 0xd2a   : > { %v7467_v3 = vadd.f32 %v18896_v1, %v7466_v19  ;;  %v7468_v59 = vpop.f32.mrb[51].mxu1 }
 0xd2c   : > { %v7502_v2 = vpack.c.bf16 %v7467_v3, %v7464_v44  ;;  %v13879_v44 = vpop.f32.mrb[6].mxu0 }
 0xd2d   : > { %v13880_v18 = vpop.f32.mrb[7].mxu0 }
 0xd2e   : > { %14437 = vmatmul.mubr.msk.bf16.vlgmr.msra.gmra.mrb[96].mxu1 %vm1691_vm1, %v7502_v2  ;;  %v13881_v19 = vadd.f32 %v13880_v18, %v13879_v44  ;;  %v13882_v3 = vpop.f32.mrb[8].mxu0 }
 0xd2f   : > { %7863 = vmatpush1.bf16.msra.mxu1 %v16397_v11  ;;  %v7471_v16 = vpop.f32.mrb[52].mxu1  ;;  %v13883_v59 = vpop.f32.mrb[9].mxu0 }
 0xd30   : > { %v7472_v51 = vadd.f32 %v18899_v48, %v7471_v16  ;;  %v7473_v58 = vpop.f32.mrb[53].mxu1  ;;  %7864 = vmatprep.subr.bf16.mxu1 %v20176_v9  ;;  %v13884_v2 = vadd.f32 %v13883_v59, %v13882_v3  ;;  %v13885_v16 = vpop.f32.mrb[10].mxu0 }
 0xd31   : > { %v7474_v17 = vpop.f32.mrb[54].mxu1 }
 0xd32   : > { %v7475_v13 = vadd.f32 %v18901_v62, %v7474_v17  ;;  %v7476_v37 = vpop.f32.mrb[55].mxu1 }
 0xd33   : > { %7865 = vmatpush1.bf16.msra.mxu1 %v16417_v27 }
 0xd34   : > { %v7503_v35 = vpack.c.bf16 %v7475_v13, %v7472_v51  ;;  %7866 = vmatprep.subr.bf16.mxu1 %v20176_v9  ;;  %v13886_v51 = vpop.f32.mrb[11].mxu0 }
 0xd35   : > { %v13887_v58 = vadd.f32 %v13886_v51, %v13885_v16  ;;  %v13888_v17 = vpop.f32.mrb[12].mxu0 }
 0xd36   : > { %14440 = vmatprep.mubr.msk.bf16.mxu1 %vm1691_vm1, %v7503_v35  ;;  %v13889_v13 = vpop.f32.mrb[13].mxu0 }
 0xd37   : > { %7867 = vmatpush1.bf16.msra.mxu1 %v16437_v42  ;;  %v7479_v11 = vpop.f32.mrb[56].mxu1  ;;  %v13890_v37 = vadd.f32 %v13889_v13, %v13888_v17  ;;  %v13891_v35 = vpop.f32.mrb[14].mxu0 }
 0xd38   : > { %v7480_v1 = vadd.f32 %v18903_v46, %v7479_v11  ;;  %v7481_v48 = vpop.f32.mrb[57].mxu1  ;;  %7868 = vmatprep.subr.bf16.mxu1 %v20176_v9  ;;  %v13892_v11 = vpop.f32.mrb[15].mxu0 }
 0xd39   : > { %v7482_v21 = vpop.f32.mrb[58].mxu1  ;;  %v13894_v48 = vpop.f32.mrb[16].mxu0 }
 0xd3a   : > { %v7483_v54 = vadd.f32 %v18905_v60, %v7482_v21  ;;  %v7484_v62 = vpop.f32.mrb[59].mxu1  ;;  %v13895_v21 = vpop.f32.mrb[17].mxu0 }
 0xd3b   : > { %7869 = vmatpush1.bf16.msra.mxu1 %v16457_v57  ;;  %v13897_v62 = vpop.f32.mrb[18].mxu0 }
 0xd3c   : > { %v7504_v27 = vpack.c.bf16 %v7483_v54, %v7480_v1  ;;  %7870 = vmatprep.subr.bf16.mxu1 %v20176_v9  ;;  %v13893_v1 = vadd.f32 %v13892_v11, %v13891_v35  ;;  %v13896_v54 = vadd.f32 %v13895_v21, %v13894_v48 }
 0xd3e   : > { %14441 = vmatmul.mubr.msk.bf16.gmra.mrb[100].mxu1 %vm1691_vm1, %v7504_v27  ;;  %v13898_v27 = vpop.f32.mrb[19].mxu0 }
 0xd3f   : > { %7871 = vmatpush1.bf16.msra.mxu1 %v16476_v10  ;;  %v7487_v42 = vpop.f32.mrb[60].mxu1 }
 0xd40   : > { %v7488_v47 = vadd.f32 %v18907_v32, %v7487_v42  ;;  %v7489_v46 = vpop.f32.mrb[61].mxu1  ;;  %7872 = vmatprep.subr.bf16.mxu1 %v20176_v9 }
 0xd41   : > { %v7490_v56 = vpop.f32.mrb[62].mxu1 }
 0xd42   : > { %v7491_v20 = vadd.f32 %v18909_v14, %v7490_v56  ;;  %v7492_v60 = vpop.f32.mrb[63].mxu1 }
 0xd43   : > { %7873 = vmatpush1.bf16.msra.mxu1 %v16487_v28 }
 0xd44   : > { %v7505_v57 = vpack.c.bf16 %v7491_v20, %v7488_v47  ;;  %7874 = vmatprep.subr.bf16.mxu1 %v20176_v9 }
 0xd46   : > { %14444 = vmatprep.mubr.msk.bf16.mxu1 %vm1691_vm1, %v7505_v57 }
 0xd47   : > { %7875 = vmatpush1.bf16.msra.mxu1 %v16498_v41  ;;  %v7495_v10 = vpop.f32.mrb[64].mxu1  ;;  %v15849_v41 = vld [vmem:[%s20131_s3 + $0xf0] sm:$0xff]  }
 0xd48   : > { %v7496_v31 = vadd.f32 %v18911_v53, %v7495_v10  ;;  %v7497_v32 = vpop.f32.mrb[65].mxu1  ;;  %7876 = vmatprep.subr.bf16.mxu1 %v20176_v9  ;;  %v15830_v53 = vld [vmem:[%s20130_s2 + $0xa98] ss:$16 sps:$4 sm:$0xff]  }
 0xd49   : > { %v7498_v15 = vpop.f32.mrb[66].mxu1 }
 0xd4a   : > { %v7506_v14 = vpack.c.bf16 %v7496_v31, %v7496_v31  ;;  %v7499_v28 = vpop.f32.mrb[67].mxu1 }
 0xd4b   : > { %7877 = vmatpush1.bf16.msra.mxu1 %v16512_v55  ;;  %v15826_v55 = vld [vmem:[%s20130_s2 + $0xa7c] ss:$16 sps:$4 sm:$0xff]  }
 0xd4c   : > { %14445 = vmatmul.mubr.msk.bf16.gmra.mrb[104].mxu1 %vm1691_vm1, %v7506_v14  ;;  %7878 = vmatprep.subr.bf16.mxu1 %v20176_v9 }
 0xd4d   : > { %12561 = vmatprep.mubr.msk.bf16.mxu1 %vm1170_vm0, %v15820_v26 }
 0xd4f   : > { %7879 = vmatpush1.bf16.msra.mxu1 %v16526_v4  ;;  %v15832_v4 = vld [vmem:[%s20130_s2 + $0xa9c] ss:$16 sps:$4 sm:$0xff]  }
 0xd50   : > { %14448 = vmatprep.subr.bf16.mxu1 %v15849_v41 }
 0xd54   : > { %7895 = vmatmul.mubr.bf16.vlgmr.msra.gmra.mrb[68].mxu1 %v15818_v52 }
 0xd55   : > { %12562 = vmatprep.mubr.msk.bf16.mxu1 %vm1170_vm0, %v15826_v55  ;;  %14449 = vmatpush3.bf16.msra.mxu1 %v15849_v41 }
 0xd56   : > { %14450 = vmatprep.subr.bf16.mxu1 %v15850_v25 }
 0xd59   : > { %14451 = vmatpush3.bf16.msra.mxu1 %v15850_v25 }
 0xd5c   : > { %7903 = vmatmul.mubr.bf16.gmra.mrb[72].mxu1 %v15824_v45 }
 0xd5d   : > { %12563 = vmatprep.mubr.msk.bf16.mxu1 %vm1170_vm0, %v15832_v4 }
 0xd64   : > { %7911 = vmatmul.mubr.bf16.gmra.mrb[76].mxu1 %v15830_v53 }
 0xd65   : > { %12564 = vmatprep.mubr.msk.bf16.mxu1 %vm1170_vm0, %v15838_v49 }
 0xd6c   : > { %7919 = vmatmul.mubr.bf16.gmra.mrb[80].mxu1 %v15836_v61 }
 0xd6d   : > { %12565 = vmatprep.mubr.msk.bf16.mxu1 %vm1170_vm0, %v15844_v63 }
 0xd74   : > { %7927 = vmatmul.mubr.bf16.gmra.mrb[84].mxu1 %v15842_v33 }
 0xd75   : > { %12566 = vmatprep.mubr.msk.bf16.mxu1 %vm1170_vm0, %v12560_v40 }
 0xd7c   : > { %7935 = vmatmul.mubr.bf16.gmra.mrb[88].mxu1 %v12559_v30 }
 0xe27   : > { %v7896_v42 = vpop.f32.mrb[68].mxu1 }
 0xe28   : > { %v7897_v47 = vadd.f32 %v13866_v36, %v7896_v42  ;;  %v7898_v46 = vpop.f32.mrb[69].mxu1 }
 0xe29   : > { %v7899_v56 = vpop.f32.mrb[70].mxu1 }
 0xe2a   : > { %v7900_v20 = vadd.f32 %v13869_v6, %v7899_v56  ;;  %v7901_v60 = vpop.f32.mrb[71].mxu1 }
 0xe2c   : > { %v7942_v57 = vpack.c.bf16 %v7900_v20, %v7897_v47 }
 0xe2e   : > { %14452 = vmatprep.mubr.msk.bf16.mxu1 %vm1691_vm1, %v7942_v57 }
 0xe2f   : > { %v7904_v10 = vpop.f32.mrb[72].mxu1 }
 0xe30   : > { %v7905_v31 = vadd.f32 %v13872_v24, %v7904_v10  ;;  %v7906_v32 = vpop.f32.mrb[73].mxu1 }
 0xe31   : > { %v7907_v15 = vpop.f32.mrb[74].mxu1 }
 0xe32   : > { %v7908_v26 = vadd.f32 %v13875_v7, %v7907_v15  ;;  %v7909_v14 = vpop.f32.mrb[75].mxu1 }
 0xe33   : > { %v15855_v14 = vld [vmem:[%s20132_s4 + $0x10] sm:$0xff]  }
 0xe34   : > { %v7943_v28 = vpack.c.bf16 %v7908_v26, %v7905_v31  ;;  %v8131_v31 = vsel %vm8129_vm3, 65535, %v20176_v9  ;;  %v15853_v9 = vld [vmem:[%s20132_s4 + $0x8] sm:$0xff]   ;;  %v15854_v26 = vld [vmem:[%s20132_s4 + $0x40] sm:$0xff]  }
 0xe36   : > { %14453 = vmatmul.mubr.msk.bf16.vlgmr.msra.gmra.mrb[96].mxu1 %vm1691_vm1, %v7943_v28  ;;  %v15857_v28 = vld [vmem:[%s20132_s4 + $0x48] sm:$0xff]  }
 0xe37   : > { %v7912_v41 = vpop.f32.mrb[76].mxu1 }
 0xe38   : > { %v7913_v52 = vadd.f32 %v13878_v5, %v7912_v41  ;;  %v7914_v55 = vpop.f32.mrb[77].mxu1  ;;  %v15852_v5 = vld [vmem:[%s20132_s4 + $0x38] sm:$0xff]  }
 0xe39   : > { %v7915_v45 = vpop.f32.mrb[78].mxu1  ;;  %v15856_v41 = vld [vmem:[%s20132_s4 + $0x18] ss:$0 sps:$4 sm:$0x11]   ;;  %v15859_v55 = vld [vmem:[%s20132_s4 + $0x1c] sm:$0xff]  }
 0xe3a   : > { %v7916_v4 = vadd.f32 %v13881_v19, %v7915_v45  ;;  %v7917_v53 = vpop.f32.mrb[79].mxu1  ;;  %v15861_v45 = vld [vmem:[%s20132_s4 + $0x54] sm:$0xff]  }
 0xe3b   : > { %v15862_v53 = vld [vmem:[%s20132_s4 + $0x5c] sm:$0xff]  }
 0xe3c   : > { %v7944_v49 = vpack.c.bf16 %v7916_v4, %v7913_v52  ;;  %v15858_v52 = vld [vmem:[%s20132_s4 + $0x50] ss:$0 sps:$4 sm:$0x11]   ;;  %v15860_v4 = vld [vmem:[%s20132_s4 + $0x24] sm:$0xff]  }
 0xe3e   : > { %14456 = vmatprep.mubr.msk.bf16.mxu1 %vm1691_vm1, %v7944_v49  ;;  %v15863_v49 = vld [vmem:[%s20132_s4 + $0x2c] sm:$0xff]  }
 0xe3f   : > { %v7920_v61 = vpop.f32.mrb[80].mxu1 }
 0xe40   : > { %v7921_v63 = vadd.f32 %v13884_v2, %v7920_v61  ;;  %v7922_v29 = vpop.f32.mrb[81].mxu1  ;;  %v15865_v61 = vld [vmem:[%s20132_s4 + $0x64] sm:$0xff]  }
 0xe41   : > { %v7923_v33 = vpop.f32.mrb[82].mxu1  ;;  %v15866_v29 = vld [vmem:[%s20132_s4 + $0x6c] ss:$0 sps:$4 sm:$0x11]  }
 0xe42   : > { %v7924_v40 = vadd.f32 %v13887_v58, %v7923_v33  ;;  %v7925_v30 = vpop.f32.mrb[83].mxu1  ;;  %v15867_v33 = vld [vmem:[%s20132_s4 + $0x8c] sm:$0xff]  }
 0xe43   : > { %v15869_v30 = vld [vmem:[%s20132_s4 + $0x9c] sm:$0xff]  }
 0xe44   : > { %v7945_v50 = vpack.c.bf16 %v7924_v40, %v7921_v63  ;;  %v15864_v63 = vld [vmem:[%s20132_s4 + $0x34] ss:$0 sps:$4 sm:$0x11]  }
 0xe45   : > { %v15868_v40 = vld [vmem:[%s20132_s4 + $0x94] sm:$0xff]  }
 0xe46   : > { %14457 = vmatmul.mubr.msk.bf16.gmra.mrb[100].mxu1 %vm1691_vm1, %v7945_v50  ;;  %v15870_v50 = vld [vmem:[%s20132_s4 + $0xa4] ss:$0 sps:$4 sm:$0x11]  }
 0xe47   : > { %v7928_v38 = vpop.f32.mrb[84].mxu1 }
 0xe48   : > { %v7929_v36 = vadd.f32 %v13890_v37, %v7928_v38  ;;  %v7930_v43 = vpop.f32.mrb[85].mxu1  ;;  %v15871_v38 = vld [vmem:[%s20132_s4 + $0xa8] sm:$0xff]  }
 0xe49   : > { %v7931_v22 = vpop.f32.mrb[86].mxu1  ;;  %v15873_v43 = vld [vmem:[%s20132_s4 + $0xb8] sm:$0xff]  }
 0xe4a   : > { %v7932_v6 = vadd.f32 %v13893_v1, %v7931_v22  ;;  %v7933_v8 = vpop.f32.mrb[87].mxu1  ;;  %v15874_v22 = vld [vmem:[%s20132_s4 + $0xc0] ss:$0 sps:$4 sm:$0x11]  }
 0xe4b   : > { %v15877_v8 = vld [vmem:[%s20133_s5 + $0x20] sm:$0xff]  }
 0xe4c   : > { %v7946_v39 = vpack.c.bf16 %v7932_v6, %v7929_v36  ;;  %v15872_v36 = vld [vmem:[%s20132_s4 + $0xb0] sm:$0xff]   ;;  %v15875_v6 = vld [vmem:[%s20132_s4 + $0xc4] sm:$0xff]  }
 0xe4e   : > { %14460 = vmatprep.mubr.msk.bf16.mxu1 %vm1691_vm1, %v7946_v39  ;;  %v15878_v39 = vld [vmem:[%s20133_s5 + $0x28] sm:$0xff]  }
 0xe4f   : > { %v7936_v24 = vpop.f32.mrb[88].mxu1 }
 0xe50   : > { %v7937_v0 = vadd.f32 %v13896_v54, %v7936_v24  ;;  %v7938_v23 = vpop.f32.mrb[89].mxu1  ;;  %v15876_v24 = vld [vmem:[%s20132_s4 + $0xcc] sm:$0xff]  }
 0xe51   : > { %v7939_v7 = vpop.f32.mrb[90].mxu1  ;;  %v15880_v23 = vld [vmem:[%s20133_s5 + $0x38] sm:$0xff]  }
 0xe52   : > { %v7947_v25 = vpack.c.bf16 %v7937_v0, %v7937_v0  ;;  %v7940_v12 = vpop.f32.mrb[91].mxu1  ;;  %v15879_v0 = vld [vmem:[%s20133_s5 + $0x30] sm:$0xff]   ;;  %v15881_v7 = vld [vmem:[%s20133_s5] sm:$0xff]  }
 0xe53   : > { %v15898_v12 = vld [vmem:[%s20132_s4 + $0xdc] ss:$0 sps:$4 sm:$0x11]  }
 0xe54   : > { %14461 = vmatmul.mubr.msk.bf16.gmra.mrb[104].mxu1 %vm1691_vm1, %v7947_v25  ;;  %v15897_v25 = vld [vmem:[%s20132_s4 + $0xd4] sm:$0xff]  }
 0xe55   : > { %14548 = vmatprep.mubr.msk.bf16.mxu1 %vm8116_vm2, %v15852_v5  ;;  %v15900_v5 = vld [vmem:[%s20132_s4 + $0xe8] sm:$0xff]  }
 0xf09   : > { %v14454_v44 = vpop.f32.mrb[96].mxu1 }
 0xf0a   : > { %v8017_v18 = vpop.f32.mrb[97].mxu1  ;;  %v8076_v3 = vmax.f32 %v14454_v44, 0.0  ;;  %v15901_v44 = vld [vmem:[%s20132_s4 + $0xf0] sm:$0xff]  }
 0xf0b   : > { %v14455_v19 = vpop.f32.mrb[98].mxu1  ;;  %v8074_v16 = vmax.f32 %v8017_v18, 0.0  ;;  %v15902_v18 = vld [vmem:[%s20132_s4 + $0xf8] ss:$0 sps:$4 sm:$0x11]  }
 0xf0c   : > { %v8077_v59 = vmax.f32 %v14455_v19, 0.0  ;;  %v8020_v2 = vpop.f32.mrb[99].mxu1 }
 0xf0d   : > { %v8075_v51 = vmax.f32 %v8020_v2, 0.0 }
 0xf0e   : > { %v19039_v58 = vpack.c.bf16 %v8077_v59, %v8076_v3 }
 0xf0f   : > { %v19041_v17 = vpack.c.bf16 %v8075_v51, %v8074_v16 }
 0xf11   : > { %14464 = vmatprep.subr.bf16.mxu0 %v19041_v17  ;;  %14536 = vmatprep.subr.bf16.mxu1 %v19041_v17 }
 0xf12   : > { %14465 = vmatpush3.bf16.msra.mxu0 %v19041_v17  ;;  %14537 = vmatpush3.bf16.msra.mxu1 %v19041_v17 }
 0xf13   : > { %14466 = vmatprep.subr.bf16.mxu0 %v19039_v58  ;;  %14538 = vmatprep.subr.bf16.mxu1 %v19039_v58 }
 0xf16   : > { %14467 = vmatpush3.bf16.msra.mxu0 %v19039_v58  ;;  %14539 = vmatpush3.bf16.msra.mxu1 %v19039_v58 }
 0xf19   : > { %v14458_v13 = vpop.f32.mrb[100].mxu1 }
 0xf1a   : > { %v8033_v37 = vpop.f32.mrb[101].mxu1  ;;  %v8080_v11 = vmax.f32 %v14458_v13, 0.0 }
 0xf1b   : > { %v14459_v35 = vpop.f32.mrb[102].mxu1  ;;  %v8078_v21 = vmax.f32 %v8033_v37, 0.0 }
 0xf1c   : > { %v8081_v1 = vmax.f32 %v14459_v35, 0.0  ;;  %v8036_v48 = vpop.f32.mrb[103].mxu1 }
 0xf1d   : > { %v8079_v54 = vmax.f32 %v8036_v48, 0.0 }
 0xf1e   : > { %v19051_v62 = vpack.c.bf16 %v8081_v1, %v8080_v11 }
 0xf1f   : > { %v19053_v27 = vpack.c.bf16 %v8079_v54, %v8078_v21 }
 0xf21   : > { %14468 = vmatprep.subr.bf16.mxu0 %v19053_v27  ;;  %14540 = vmatprep.subr.bf16.mxu1 %v19053_v27 }
 0xf22   : > { %14469 = vmatpush3.bf16.msra.mxu0 %v19053_v27  ;;  %14541 = vmatpush3.bf16.msra.mxu1 %v19053_v27 }
 0xf23   : > { %14470 = vmatprep.subr.bf16.mxu0 %v19051_v62  ;;  %14542 = vmatprep.subr.bf16.mxu1 %v19051_v62 }
 0xf26   : > { %14471 = vmatpush3.bf16.msra.mxu0 %v19051_v62  ;;  %14543 = vmatpush3.bf16.msra.mxu1 %v19051_v62 }
 0xf27   : > { %v14462_v42 = vpop.f32.mrb[104].mxu1 }
 0xf28   : > { %v8084_v47 = vmax.f32 %v14462_v42, 0.0  ;;  %v8049_v46 = vpop.f32.mrb[105].mxu1 }
 0xf29   : > { %v14463_v56 = vpop.f32.mrb[106].mxu1  ;;  %v8082_v57 = vmax.f32 %v8049_v46, 0.0 }
 0xf2a   : > { %v8052_v20 = vpop.f32.mrb[107].mxu1  ;;  %v8090_v60 = vpack.c.bf16 %v8084_v47, %v8084_v47 }
 0xf2b   : > { %v8083_v10 = vmax.f32 %v8052_v20, 0.0 }
 0xf2c   : > { %v19066_v15 = vand.u32 %v8131_v31, %v8090_v60 }
 0xf2d   : > { %v19064_v32 = vpack.c.bf16 %v8083_v10, %v8082_v57 }
 0xf2f   : > { %14472 = vmatprep.subr.bf16.mxu0 %v19064_v32  ;;  %14544 = vmatprep.subr.bf16.mxu1 %v19064_v32 }
 0xf30   : > { %14473 = vmatpush3.bf16.msra.mxu0 %v19064_v32  ;;  %14545 = vmatpush3.bf16.msra.mxu1 %v19064_v32 }
 0xf31   : > { %14474 = vmatprep.subr.bf16.mxu0 %v19066_v15  ;;  %14546 = vmatprep.subr.bf16.mxu1 %v19066_v15 }
 0xf34   : > { %14475 = vmatpush3.bf16.msra.mxu0 %v19066_v15  ;;  %14547 = vmatpush3.bf16.msra.mxu1 %v19066_v15 }
 0xf35   : > { %14484 = vmatprep.subr.bf16.mxu0 %v19041_v17  ;;  %14572 = vmatprep.subr.bf16.mxu1 %v19041_v17 }
 0xf37   : > { %14477 = vmatmul.mubr.msk.bf16.vlgmr.msra.gmra.mrb[20].mxu0 %vm8116_vm2, %v15853_v9  ;;  %14549 = vmatmul.mubr.msk.bf16.vlgmr.msra.gmra.mrb[92].mxu1 %vm8116_vm2, %v15854_v26 }
 0xf38   : > { %14485 = vmatpush3.bf16.msra.mxu0 %v19041_v17  ;;  %14573 = vmatpush3.bf16.msra.mxu1 %v19041_v17 }
 0xf39   : > { %14486 = vmatprep.subr.bf16.mxu0 %v19039_v58  ;;  %14574 = vmatprep.subr.bf16.mxu1 %v19039_v58 }
 0xf3a   : > { %14480 = vmatprep.mubr.msk.bf16.mxu0 %vm8116_vm2, %v15855_v14  ;;  %14552 = vmatprep.mubr.msk.bf16.mxu1 %vm8116_vm2, %v15857_v28 }
 0xf3c   : > { %14487 = vmatpush3.bf16.msra.mxu0 %v19039_v58  ;;  %14575 = vmatpush3.bf16.msra.mxu1 %v19039_v58 }
 0xf3d   : > { %14488 = vmatprep.subr.bf16.mxu0 %v19053_v27  ;;  %14576 = vmatprep.subr.bf16.mxu1 %v19053_v27 }
 0xf3f   : > { %14481 = vmatmul.mubr.msk.bf16.gmra.mrb[24].mxu0 %vm8116_vm2, %v15856_v41  ;;  %14553 = vmatmul.mubr.msk.bf16.gmra.mrb[108].mxu1 %vm8116_vm2, %v15858_v52 }
 0xf40   : > { %14489 = vmatpush3.bf16.msra.mxu0 %v19053_v27  ;;  %14577 = vmatpush3.bf16.msra.mxu1 %v19053_v27 }
 0xf41   : > { %14490 = vmatprep.subr.bf16.mxu0 %v19051_v62  ;;  %14578 = vmatprep.subr.bf16.mxu1 %v19051_v62 }
 0xf42   : > { %14496 = vmatprep.mubr.msk.bf16.mxu0 %vm8116_vm2, %v15859_v55  ;;  %14584 = vmatprep.mubr.msk.bf16.mxu1 %vm8116_vm2, %v15861_v45 }
 0xf44   : > { %14491 = vmatpush3.bf16.msra.mxu0 %v19051_v62  ;;  %14579 = vmatpush3.bf16.msra.mxu1 %v19051_v62 }
 0xf45   : > { %14492 = vmatprep.subr.bf16.mxu0 %v19064_v32  ;;  %14580 = vmatprep.subr.bf16.mxu1 %v19064_v32 }
 0xf48   : > { %14493 = vmatpush3.bf16.msra.mxu0 %v19064_v32  ;;  %14581 = vmatpush3.bf16.msra.mxu1 %v19064_v32 }
 0xf49   : > { %14494 = vmatprep.subr.bf16.mxu0 %v19066_v15  ;;  %14582 = vmatprep.subr.bf16.mxu1 %v19066_v15 }
 0xf4c   : > { %14495 = vmatpush3.bf16.msra.mxu0 %v19066_v15  ;;  %14583 = vmatpush3.bf16.msra.mxu1 %v19066_v15 }
 0xf4d   : > { %14644 = vmatprep.subr.bf16.mxu1 %v19041_v17  ;;  %14504 = vmatprep.subr.bf16.mxu0 %v15877_v8 }
 0xf4f   : > { %14497 = vmatmul.mubr.msk.bf16.vlgmr.msra.gmra.mrb[28].mxu0 %vm8116_vm2, %v15860_v4  ;;  %14585 = vmatmul.mubr.msk.bf16.vlgmr.msra.gmra.mrb[112].mxu1 %vm8116_vm2, %v15862_v53 }
 0xf50   : > { %14645 = vmatpush3.bf16.msra.mxu1 %v19041_v17  ;;  %14500 = vmatprep.mubr.msk.bf16.mxu0 %vm8116_vm2, %v15863_v49 }
 0xf51   : > { %14646 = vmatprep.subr.bf16.mxu1 %v19039_v58  ;;  %14588 = vmatprep.mubr.msk.bf16.mxu1 %vm8116_vm2, %v15865_v61  ;;  %v15882_v61 = vld [vmem:[%s20133_s5 + $0x8] sm:$0xff]  }
 0xf52   : > { %14505 = vmatpush3.bf16.msra.mxu0 %v15877_v8 }
 0xf53   : > { %14506 = vmatprep.subr.bf16.mxu0 %v15878_v39 }
 0xf54   : > { %14647 = vmatpush3.bf16.msra.mxu1 %v19039_v58 }
 0xf55   : > { %14648 = vmatprep.subr.bf16.mxu1 %v19053_v27 }
 0xf56   : > { %14507 = vmatpush3.bf16.msra.mxu0 %v15878_v39  ;;  %v15884_v39 = vld [vmem:[%s20133_s5 + $0x18] sm:$0xff]  }
 0xf57   : > { %14501 = vmatmul.mubr.msk.bf16.gmra.mrb[32].mxu0 %vm8116_vm2, %v15864_v63  ;;  %14589 = vmatmul.mubr.msk.bf16.gmra.mrb[116].mxu1 %vm8116_vm2, %v15866_v29 }
 0xf58   : > { %14649 = vmatpush3.bf16.msra.mxu1 %v19053_v27  ;;  %14656 = vmatprep.mubr.msk.bf16.mxu1 %vm8116_vm2, %v15867_v33 }
 0xf59   : > { %14650 = vmatprep.subr.bf16.mxu1 %v19051_v62  ;;  %14508 = vmatprep.subr.bf16.mxu0 %v15879_v0 }
 0xf5a   : > { %14509 = vmatpush3.bf16.msra.mxu0 %v15879_v0  ;;  %v15886_v0 = vld [vmem:[%s20133_s5 + $0x48] sm:$0xff]  }
 0xf5b   : > { %14510 = vmatprep.subr.bf16.mxu0 %v15880_v23 }
 0xf5c   : > { %14651 = vmatpush3.bf16.msra.mxu1 %v19051_v62 }
 0xf5d   : > { %14652 = vmatprep.subr.bf16.mxu1 %v19064_v32 }
 0xf5e   : > { %14511 = vmatpush3.bf16.msra.mxu0 %v15880_v23  ;;  %v15887_v23 = vld [vmem:[%s20133_s5 + $0x50] sm:$0xff]  }
 0xf5f   : > { %14520 = vmatprep.subr.bf16.mxu0 %v15881_v7 }
 0xf60   : > { %14653 = vmatpush3.bf16.msra.mxu1 %v19064_v32 }
 0xf61   : > { %14654 = vmatprep.subr.bf16.mxu1 %v19066_v15 }
 0xf64   : > { %14655 = vmatpush3.bf16.msra.mxu1 %v19066_v15 }
 0xf65   : > { %14680 = vmatprep.subr.bf16.mxu1 %v19041_v17 }
 0xf67   : > { %14657 = vmatmul.mubr.msk.bf16.vlgmr.msra.gmra.mrb[120].mxu1 %vm8116_vm2, %v15868_v40  ;;  %v15883_v40 = vld [vmem:[%s20133_s5 + $0x10] sm:$0xff]  }
 0xf68   : > { %14681 = vmatpush3.bf16.msra.mxu1 %v19041_v17  ;;  %14660 = vmatprep.mubr.msk.bf16.mxu1 %vm8116_vm2, %v15869_v30 }
 0xf69   : > { %14682 = vmatprep.subr.bf16.mxu1 %v19039_v58 }
 0xf6c   : > { %14683 = vmatpush3.bf16.msra.mxu1 %v19039_v58 }
 0xf6d   : > { %14684 = vmatprep.subr.bf16.mxu1 %v19053_v27 }
 0xf6f   : > { %14661 = vmatmul.mubr.msk.bf16.gmra.mrb[124].mxu1 %vm8116_vm2, %v15870_v50 }
 0xf70   : > { %14685 = vmatpush3.bf16.msra.mxu1 %v19053_v27  ;;  %14692 = vmatprep.mubr.msk.bf16.mxu1 %vm8116_vm2, %v15871_v38 }
 0xf71   : > { %14686 = vmatprep.subr.bf16.mxu1 %v19051_v62 }
 0xf74   : > { %14687 = vmatpush3.bf16.msra.mxu1 %v19051_v62 }
 0xf75   : > { %14688 = vmatprep.subr.bf16.mxu1 %v19064_v32 }
 0xf78   : > { %14689 = vmatpush3.bf16.msra.mxu1 %v19064_v32 }
 0xf79   : > { %14690 = vmatprep.subr.bf16.mxu1 %v19066_v15 }
 0xf7c   : > { %14691 = vmatpush3.bf16.msra.mxu1 %v19066_v15 }
 0xf7d   : > { %14716 = vmatprep.subr.bf16.mxu1 %v19041_v17 }
 0xf7f   : > { %14693 = vmatmul.mubr.msk.bf16.vlgmr.msra.gmra.mrb[128].mxu1 %vm8116_vm2, %v15872_v36 }
 0xf80   : > { %14717 = vmatpush3.bf16.msra.mxu1 %v19041_v17  ;;  %14696 = vmatprep.mubr.msk.bf16.mxu1 %vm8116_vm2, %v15873_v43 }
 0xf81   : > { %14718 = vmatprep.subr.bf16.mxu1 %v19039_v58 }
 0xf84   : > { %14719 = vmatpush3.bf16.msra.mxu1 %v19039_v58 }
 0xf85   : > { %14720 = vmatprep.subr.bf16.mxu1 %v19053_v27 }
 0xf87   : > { %14697 = vmatmul.mubr.msk.bf16.gmra.mrb[132].mxu1 %vm8116_vm2, %v15874_v22 }
 0xf88   : > { %14721 = vmatpush3.bf16.msra.mxu1 %v19053_v27  ;;  %14728 = vmatprep.mubr.msk.bf16.mxu1 %vm8116_vm2, %v15875_v6 }
 0xf89   : > { %14722 = vmatprep.subr.bf16.mxu1 %v19051_v62 }
 0xf8c   : > { %14723 = vmatpush3.bf16.msra.mxu1 %v19051_v62 }
 0xf8d   : > { %14724 = vmatprep.subr.bf16.mxu1 %v19064_v32 }
 0xf90   : > { %14725 = vmatpush3.bf16.msra.mxu1 %v19064_v32 }
 0xf91   : > { %14726 = vmatprep.subr.bf16.mxu1 %v19066_v15 }
 0xf94   : > { %14727 = vmatpush3.bf16.msra.mxu1 %v19066_v15 }
 0xf95   : > { %14752 = vmatprep.subr.bf16.mxu1 %v19041_v17 }
 0xf97   : > { %14729 = vmatmul.mubr.msk.bf16.vlgmr.msra.gmra.mrb[136].mxu1 %vm8116_vm2, %v15876_v24  ;;  %v15885_v24 = vld [vmem:[%s20133_s5 + $0x40] sm:$0xff]  }
 0xf98   : > { %14753 = vmatpush3.bf16.msra.mxu1 %v19041_v17  ;;  %14732 = vmatprep.mubr.msk.bf16.mxu1 %vm8116_vm2, %v15897_v25  ;;  %v15888_v25 = vld [vmem:[%s20133_s5 + $0x58] sm:$0xff]  }
 0xf99   : > { %14754 = vmatprep.subr.bf16.mxu1 %v19039_v58 }
 0xf9c   : > { %14755 = vmatpush3.bf16.msra.mxu1 %v19039_v58 }
 0xf9d   : > { %14756 = vmatprep.subr.bf16.mxu1 %v19053_v27 }
 0xf9f   : > { %14733 = vmatmul.mubr.msk.bf16.gmra.mrb[140].mxu1 %vm8116_vm2, %v15898_v12  ;;  %v15889_v12 = vld [vmem:[%s20133_s5 + $0x60] sm:$0xff]  }
 0xfa0   : > { %14757 = vmatpush3.bf16.msra.mxu1 %v19053_v27  ;;  %14764 = vmatprep.mubr.msk.bf16.mxu1 %vm8116_vm2, %v15899_v34  ;;  %v15890_v34 = vld [vmem:[%s20133_s5 + $0x68] sm:$0xff]  }
 0xfa1   : > { %14758 = vmatprep.subr.bf16.mxu1 %v19051_v62 }
 0xfa4   : > { %14759 = vmatpush3.bf16.msra.mxu1 %v19051_v62 }
 0xfa5   : > { %14760 = vmatprep.subr.bf16.mxu1 %v19064_v32 }
 0xfa8   : > { %14761 = vmatpush3.bf16.msra.mxu1 %v19064_v32 }
 0xfa9   : > { %14762 = vmatprep.subr.bf16.mxu1 %v19066_v15 }
 0xfac   : > { %14763 = vmatpush3.bf16.msra.mxu1 %v19066_v15 }
 0xfaf   : > { %14765 = vmatmul.mubr.msk.bf16.vlgmr.msra.gmra.mrb[144].mxu1 %vm8116_vm2, %v15900_v5  ;;  %v15891_v5 = vld [vmem:[%s20133_s5 + $0x70] sm:$0xff]  }
 0xfb0   : > { %14768 = vmatprep.mubr.msk.bf16.mxu1 %vm8116_vm2, %v15901_v44 }
 0xfb7   : > { %14769 = vmatmul.mubr.msk.bf16.gmra.mrb[148].mxu1 %vm8116_vm2, %v15902_v18  ;;  %v15892_v18 = vld [vmem:[%s20133_s5 + $0x78] sm:$0xff]  }
0x100a   : > { %v19282_v19 = vpop.f32.mrb[20].mxu0  ;;  %v19284_v3 = vpop.f32.mrb[92].mxu1 }
0x100b   : > { %v8169_v59 = vpop.f32.mrb[21].mxu0  ;;  %v19286_v2 = vpop.f32.mrb[93].mxu1 }
0x100c   : > { %v14479_v16 = vpop.f32.mrb[22].mxu0  ;;  %v19288_v51 = vpop.f32.mrb[94].mxu1 }
0x100d   : > { %v8200_v13 = vpack.c.bf16 %v14479_v16, %v19282_v19  ;;  %v8172_v37 = vpop.f32.mrb[23].mxu0  ;;  %v8630_v35 = vpack.c.bf16 %v19288_v51, %v19284_v3  ;;  %v19294_v11 = vpop.f32.mrb[95].mxu1  ;;  %v15893_v3 = vld [vmem:[%s20132_s4 + $0x70] sm:$0xff]  }
0x100e   : > { %v8199_v1 = vpack.c.bf16 %v8172_v37, %v8169_v59  ;;  %v8629_v48 = vpack.c.bf16 %v19294_v11, %v19286_v2  ;;  %v15907_v11 = vld [vmem:[%s20133_s5 + $0xa0] sm:$0xff]  }
0x1012   : > { %v14482_v21 = vpop.f32.mrb[24].mxu0  ;;  %v19298_v54 = vpop.f32.mrb[108].mxu1 }
0x1013   : > { %v8185_v42 = vpop.f32.mrb[25].mxu0  ;;  %v19300_v47 = vpop.f32.mrb[109].mxu1  ;;  %v8632_v44 = vpack.c.bf16 %v19298_v54, %v19298_v54 }
0x1014   : > { %v14483_v46 = vpop.f32.mrb[26].mxu0  ;;  %v14555_v56 = vpop.f32.mrb[110].mxu1 }
0x1015   : > { %v8188_v20 = vpop.f32.mrb[27].mxu0  ;;  %v19302_v60 = vpop.f32.mrb[111].mxu1 }
0x1016   : > { %v8201_v57 = vpack.c.bf16 %v8188_v20, %v8185_v42  ;;  %v8631_v10 = vpack.c.bf16 %v19302_v60, %v19300_v47 }
0x1022   : > { %v14498_v31 = vpop.f32.mrb[28].mxu0  ;;  %v19306_v9 = vpop.f32.mrb[112].mxu1 }
0x1023   : > { %v8283_v26 = vpop.f32.mrb[29].mxu0  ;;  %v19308_v14 = vpop.f32.mrb[113].mxu1 }
0x1024   : > { %v14499_v28 = vpop.f32.mrb[30].mxu0  ;;  %v19310_v41 = vpop.f32.mrb[114].mxu1 }
0x1025   : > { %v8314_v52 = vpack.c.bf16 %v14499_v28, %v14498_v31  ;;  %v8286_v55 = vpop.f32.mrb[31].mxu0  ;;  %v8852_v45 = vpack.c.bf16 %v19310_v41, %v19306_v9  ;;  %v8824_v4 = vpop.f32.mrb[115].mxu1 }
0x1026   : > { %v8313_v53 = vpack.c.bf16 %v8286_v55, %v8283_v26  ;;  %v8851_v49 = vpack.c.bf16 %v8824_v4, %v19308_v14 }
0x1028   : > { %14512 = vmatprep.mubr.msk.bf16.mxu0 %vm8350_vm4, %v8313_v53 }
0x1029   : > { %14513 = vmatmul.mubr.msk.bf16.vlgmr.msra.gmra.mrb[36].mxu0 %vm8350_vm4, %v8314_v52 }
0x102a   : > { %14521 = vmatpush3.bf16.msra.mxu0 %v15881_v7  ;;  %v14502_v63 = vpop.f32.mrb[32].mxu0  ;;  %v19320_v29 = vpop.f32.mrb[116].mxu1  ;;  %v8202_v7 = vpack.c.bf16 %v14482_v21, %v14482_v21 }
0x102b   : > { %v8299_v33 = vpop.f32.mrb[33].mxu0  ;;  %14522 = vmatprep.subr.bf16.mxu0 %v15882_v61  ;;  %v8837_v30 = vpop.f32.mrb[117].mxu1  ;;  %v8316_v8 = vpack.c.bf16 %v14502_v63, %v14502_v63  ;;  %v8854_v19 = vpack.c.bf16 %v19320_v29, %v19320_v29 }
0x102c   : > { %v14503_v50 = vpop.f32.mrb[34].mxu0  ;;  %v14591_v38 = vpop.f32.mrb[118].mxu1 }
0x102d   : > { %v8302_v36 = vpop.f32.mrb[35].mxu0  ;;  %v8840_v43 = vpop.f32.mrb[119].mxu1 }
0x102e   : > { %v8315_v22 = vpack.c.bf16 %v8302_v36, %v8299_v33  ;;  %14523 = vmatpush3.bf16.msra.mxu0 %v15882_v61  ;;  %v8853_v6 = vpack.c.bf16 %v8840_v43, %v8837_v30 }
0x102f   : > { %14524 = vmatprep.subr.bf16.mxu0 %v15883_v40 }
0x1030   : > { %14516 = vmatprep.mubr.msk.bf16.mxu0 %vm8350_vm4, %v8315_v22 }
0x1031   : > { %14517 = vmatmul.mubr.msk.bf16.gmra.mrb[40].mxu0 %vm8350_vm4, %v8316_v8 }
0x1032   : > { %14525 = vmatpush3.bf16.msra.mxu0 %v15883_v40  ;;  %14528 = vmatprep.mubr.msk.bf16.mxu0 %vm8350_vm4, %v8199_v1 }
0x1033   : > { %14526 = vmatprep.subr.bf16.mxu0 %v15884_v39 }
0x1036   : > { %14527 = vmatpush3.bf16.msra.mxu0 %v15884_v39 }
0x1037   : > { %14556 = vmatprep.subr.bf16.mxu0 %v15885_v24 }
0x1039   : > { %14529 = vmatmul.mubr.msk.bf16.vlgmr.msra.gmra.mrb[36].mxu0 %vm8350_vm4, %v8200_v13 }
0x103a   : > { %14557 = vmatpush3.bf16.msra.mxu0 %v15885_v24  ;;  %14532 = vmatprep.mubr.msk.bf16.mxu0 %vm8350_vm4, %v8201_v57  ;;  %v19416_v59 = vpop.f32.mrb[120].mxu1 }
0x103b   : > { %14558 = vmatprep.subr.bf16.mxu0 %v15886_v0  ;;  %v19418_v2 = vpop.f32.mrb[121].mxu1 }
0x103c   : > { %v19420_v16 = vpop.f32.mrb[122].mxu1 }
0x103d   : > { %v19422_v51 = vpop.f32.mrb[123].mxu1  ;;  %v9296_v13 = vpack.c.bf16 %v19420_v16, %v19416_v59  ;;  %v15914_v59 = vld [vmem:[%s20133_s5 + $0xd8] sm:$0xff]   ;;  %v15915_v16 = vld [vmem:[%s20133_s5 + $0xe0] sm:$0xff]  }
0x103e   : > { %14559 = vmatpush3.bf16.msra.mxu0 %v15886_v0  ;;  %v9295_v37 = vpack.c.bf16 %v19422_v51, %v19418_v2  ;;  %v15916_v51 = vld [vmem:[%s20133_s5 + $0xe8] sm:$0xff]  }
0x103f   : > { %14560 = vmatprep.subr.bf16.mxu0 %v15887_v23 }
0x1041   : > { %14533 = vmatmul.mubr.msk.bf16.gmra.mrb[40].mxu0 %vm8350_vm4, %v8202_v7 }
0x1042   : > { %14561 = vmatpush3.bf16.msra.mxu0 %v15887_v23  ;;  %14564 = vmatprep.mubr.msk.bf16.mxu0 %vm8350_vm4, %v8629_v48  ;;  %v19434_v1 = vpop.f32.mrb[124].mxu1 }
0x1043   : > { %14562 = vmatprep.subr.bf16.mxu0 %v15888_v25  ;;  %v19436_v48 = vpop.f32.mrb[125].mxu1  ;;  %v9298_v2 = vpack.c.bf16 %v19434_v1, %v19434_v1  ;;  %v15920_v1 = vld [vmem:[%s20133_s5 + $0x108] sm:$0xff]  }
0x1044   : > { %v14663_v21 = vpop.f32.mrb[126].mxu1 }
0x1045   : > { %v19438_v54 = vpop.f32.mrb[127].mxu1 }
0x1046   : > { %14563 = vmatpush3.bf16.msra.mxu0 %v15888_v25  ;;  %v9297_v42 = vpack.c.bf16 %v19438_v54, %v19436_v48  ;;  %v15921_v48 = vld [vmem:[%s20133_s5 + $0x110] sm:$0xff]   ;;  %v15922_v54 = vld [vmem:[%s20133_s5 + $0x118] sm:$0xff]  }
0x1047   : > { %14592 = vmatprep.subr.bf16.mxu0 %v15889_v12 }
0x1049   : > { %14565 = vmatmul.mubr.msk.bf16.vlgmr.msra.gmra.mrb[36].mxu0 %vm8350_vm4, %v8630_v35  ;;  %v15906_v35 = vld [vmem:[%s20133_s5 + $0x98] sm:$0xff]  }
0x104a   : > { %14593 = vmatpush3.bf16.msra.mxu0 %v15889_v12  ;;  %14568 = vmatprep.mubr.msk.bf16.mxu0 %vm8350_vm4, %v8631_v10 }
0x104b   : > { %14594 = vmatprep.subr.bf16.mxu0 %v15890_v34 }
0x104e   : > { %14595 = vmatpush3.bf16.msra.mxu0 %v15890_v34  ;;  %v15908_v34 = vld [vmem:[%s20133_s5 + $0xa8] sm:$0xff]  }
0x104f   : > { %14596 = vmatprep.subr.bf16.mxu0 %v15891_v5 }
0x1051   : > { %14569 = vmatmul.mubr.msk.bf16.gmra.mrb[40].mxu0 %vm8350_vm4, %v8632_v44 }
0x1052   : > { %14597 = vmatpush3.bf16.msra.mxu0 %v15891_v5  ;;  %14600 = vmatprep.mubr.msk.bf16.mxu0 %vm8350_vm4, %v8851_v49  ;;  %v19442_v47 = vpop.f32.mrb[128].mxu1 }
0x1053   : > { %14598 = vmatprep.subr.bf16.mxu0 %v15892_v18  ;;  %v19444_v46 = vpop.f32.mrb[129].mxu1 }
0x1054   : > { %v19446_v56 = vpop.f32.mrb[130].mxu1 }
0x1055   : > { %v19448_v20 = vpop.f32.mrb[131].mxu1  ;;  %v9518_v60 = vpack.c.bf16 %v19446_v56, %v19442_v47  ;;  %v15923_v47 = vld [vmem:[%s20134_s6 + $0x40] sm:$0xff]   ;;  %v15925_v56 = vld [vmem:[%s20134_s6 + $0x48] sm:$0xff]  }
0x1056   : > { %14599 = vmatpush3.bf16.msra.mxu0 %v15892_v18  ;;  %v9517_v57 = vpack.c.bf16 %v19448_v20, %v19444_v46  ;;  %v15909_v18 = vld [vmem:[%s20133_s5 + $0xb0] sm:$0xff]   ;;  %v15924_v46 = vld [vmem:[%s20134_s6] sm:$0xff]   ;;  %14070 = vmatprep.subr.bf16.mxu1 %v15923_v47 }
0x1057   : > { %14608 = vmatprep.subr.bf16.mxu0 %v19041_v17  ;;  %v15926_v20 = vld [vmem:[%s20134_s6 + $0xc0] sm:$0xff]   ;;  %14071 = vmatpush3.bf16.msra.mxu1 %v15924_v46 }
0x1058   : > { %14072 = vmatprep.subr.bf16.mxu1 %v15925_v56 }
0x1059   : > { %14601 = vmatmul.mubr.msk.bf16.vlgmr.msra.gmra.mrb[36].mxu0 %vm8350_vm4, %v8852_v45 }
0x105a   : > { %14609 = vmatpush3.bf16.msra.mxu0 %v19041_v17  ;;  %14604 = vmatprep.mubr.msk.bf16.mxu0 %vm8350_vm4, %v8853_v6  ;;  %v15894_v17 = vld [vmem:[%s20132_s4 + $0x78] sm:$0xff]   ;;  %v19454_v10 = vpop.f32.mrb[132].mxu1 }
0x105b   : > { %14610 = vmatprep.subr.bf16.mxu0 %v19039_v58  ;;  %v19456_v31 = vpop.f32.mrb[133].mxu1 }
0x105c   : > { %v14699_v9 = vpop.f32.mrb[134].mxu1 }
0x105d   : > { %v19458_v26 = vpop.f32.mrb[135].mxu1  ;;  %v15932_v9 = vld [vmem:[%s20134_s6 + $0x88] sm:$0xff]  }
0x105e   : > { %14611 = vmatpush3.bf16.msra.mxu0 %v19039_v58  ;;  %v15903_v58 = vld [vmem:[%s20133_s5 + $0x80] sm:$0xff]   ;;  %v9519_v14 = vpack.c.bf16 %v19458_v26, %v19456_v31  ;;  %v15929_v31 = vld [vmem:[%s20134_s6 + $0x50] sm:$0xff]  }
0x105f   : > { %14612 = vmatprep.subr.bf16.mxu0 %v19053_v27  ;;  %v15934_v26 = vld [vmem:[%s20134_s6 + $0xd0] sm:$0xff]  }
0x1061   : > { %14605 = vmatmul.mubr.msk.bf16.gmra.mrb[40].mxu0 %vm8350_vm4, %v8854_v19 }
0x1062   : > { %14613 = vmatpush3.bf16.msra.mxu0 %v19053_v27  ;;  %14620 = vmatprep.mubr.msk.bf16.mxu0 %vm8116_vm2, %v15893_v3  ;;  %v15904_v27 = vld [vmem:[%s20133_s5 + $0x88] sm:$0xff]  }
0x1063   : > { %14614 = vmatprep.subr.bf16.mxu0 %v19051_v62 }
0x1066   : > { %14615 = vmatpush3.bf16.msra.mxu0 %v19051_v62  ;;  %v15895_v62 = vld [vmem:[%s20132_s4 + $0x80] sm:$0xff]  }
0x1067   : > { %14616 = vmatprep.subr.bf16.mxu0 %v19064_v32 }
0x106a   : > { %14617 = vmatpush3.bf16.msra.mxu0 %v19064_v32  ;;  %v15905_v32 = vld [vmem:[%s20133_s5 + $0x90] sm:$0xff]   ;;  %v19462_v28 = vpop.f32.mrb[136].mxu1 }
0x106b   : > { %14618 = vmatprep.subr.bf16.mxu0 %v19066_v15  ;;  %v19464_v41 = vpop.f32.mrb[137].mxu1 }
0x106c   : > { %v19466_v52 = vpop.f32.mrb[138].mxu1 }
0x106d   : > { %v19468_v55 = vpop.f32.mrb[139].mxu1  ;;  %v9740_v45 = vpack.c.bf16 %v19466_v52, %v19462_v28  ;;  %v15933_v28 = vld [vmem:[%s20134_s6 + $0x58] sm:$0xff]  }
0x106e   : > { %14619 = vmatpush3.bf16.msra.mxu0 %v19066_v15  ;;  %v15896_v15 = vld [vmem:[%s20132_s4 + $0x88] ss:$0 sps:$4 sm:$0x11]   ;;  %v9739_v4 = vpack.c.bf16 %v19468_v55, %v19464_v41  ;;  %v15936_v41 = vld [vmem:[%s20134_s6 + $0x90] sm:$0xff]   ;;  %v15938_v52 = vld [vmem:[%s20134_s6 + $0xd8] sm:$0xff]  }
0x106f   : > { %14628 = vmatprep.subr.bf16.mxu0 %v15903_v58  ;;  %v15935_v55 = vld [vmem:[%s20134_s6 + $0x18] sm:$0xff]  }
0x1071   : > { %14621 = vmatmul.mubr.msk.bf16.vlgmr.msra.gmra.mrb[44].mxu0 %vm8116_vm2, %v15894_v17 }
0x1072   : > { %14624 = vmatprep.mubr.msk.bf16.mxu0 %vm8116_vm2, %v15895_v62  ;;  %14629 = vmatpush3.bf16.msra.mxu0 %v15903_v58  ;;  %v19474_v53 = vpop.f32.mrb[140].mxu1  ;;  %v15910_v62 = vld [vmem:[%s20133_s5 + $0xb8] sm:$0xff]  }
0x1073   : > { %14630 = vmatprep.subr.bf16.mxu0 %v15904_v27  ;;  %v19476_v49 = vpop.f32.mrb[141].mxu1  ;;  %v9742_v21 = vpack.c.bf16 %v19474_v53, %v19474_v53  ;;  %v15942_v53 = vld [vmem:[%s20134_s6 + $0xe0] sm:$0xff]  }
0x1074   : > { %v14735_v61 = vpop.f32.mrb[142].mxu1 }
0x1075   : > { %v19478_v63 = vpop.f32.mrb[143].mxu1  ;;  %v15941_v61 = vld [vmem:[%s20134_s6 + $0x68] sm:$0xff]  }
0x1076   : > { %14631 = vmatpush3.bf16.msra.mxu0 %v15904_v27  ;;  %v9741_v29 = vpack.c.bf16 %v19478_v63, %v19476_v49  ;;  %v15911_v27 = vld [vmem:[%s20133_s5 + $0xc0] sm:$0xff]  }
0x1077   : > { %14632 = vmatprep.subr.bf16.mxu0 %v15905_v32  ;;  %v15939_v49 = vld [vmem:[%s20134_s6 + $0x20] sm:$0xff]  }
0x1078   : > { %v15944_v63 = vld [vmem:[%s20134_s6 + $0xa0] sm:$0xff]  }
0x1079   : > { %14625 = vmatmul.mubr.msk.bf16.gmra.mrb[48].mxu0 %vm8116_vm2, %v15896_v15  ;;  %v15913_v15 = vld [vmem:[%s20133_s5 + $0xd0] sm:$0xff]  }
0x107a   : > { %14633 = vmatpush3.bf16.msra.mxu0 %v15905_v32  ;;  %v15912_v32 = vld [vmem:[%s20133_s5 + $0xc8] sm:$0xff]  }
0x107b   : > { %14634 = vmatprep.subr.bf16.mxu0 %v15906_v35 }
0x107e   : > { %14635 = vmatpush3.bf16.msra.mxu0 %v15906_v35  ;;  %v15918_v35 = vld [vmem:[%s20133_s5 + $0xf8] sm:$0xff]  }
0x107f   : > { %14664 = vmatprep.subr.bf16.mxu0 %v15907_v11 }
0x1082   : > { %v19482_v33 = vpop.f32.mrb[144].mxu1 }
0x1083   : > { %v19484_v40 = vpop.f32.mrb[145].mxu1 }
0x1084   : > { %v19486_v30 = vpop.f32.mrb[146].mxu1 }
0x1085   : > { %v9962_v50 = vpack.c.bf16 %v19486_v30, %v19482_v33  ;;  %v19490_v38 = vpop.f32.mrb[147].mxu1  ;;  %v15945_v33 = vld [vmem:[%s20134_s6 + $0x70] sm:$0xff]  }
0x1086   : > { %v9961_v36 = vpack.c.bf16 %v19490_v38, %v19484_v40  ;;  %v15946_v40 = vld [vmem:[%s20134_s6 + $0xe8] sm:$0xff]   ;;  %v15947_v30 = vld [vmem:[%s20134_s6 + $0x30] sm:$0xff]  }
0x108a   : > { %v19494_v43 = vpop.f32.mrb[148].mxu1 }
0x108b   : > { %v19496_v22 = vpop.f32.mrb[149].mxu1 }
0x108c   : > { %v14771_v6 = vpop.f32.mrb[150].mxu1 }
0x108d   : > { %v19498_v8 = vpop.f32.mrb[151].mxu1 }
0x108e   : > { %v9963_v39 = vpack.c.bf16 %v19498_v8, %v19496_v22 }
0x1144   : > { %v14622_v24 = vpop.f32.mrb[44].mxu0 }
0x1145   : > { %v9043_v0 = vpop.f32.mrb[45].mxu0 }
0x1146   : > { %v14623_v23 = vpop.f32.mrb[46].mxu0 }
0x1147   : > { %v9074_v7 = vpack.c.bf16 %v14623_v23, %v14622_v24  ;;  %v9046_v25 = vpop.f32.mrb[47].mxu0  ;;  %v15949_v23 = vld [vmem:[%s20134_s6 + $0x78] sm:$0xff]  }
0x1148   : > { %v9073_v12 = vpack.c.bf16 %v9046_v25, %v9043_v0 }
0x114a   : > { %14636 = vmatprep.mubr.msk.bf16.mxu0 %vm8350_vm4, %v9073_v12  ;;  %v15951_v12 = vld [vmem:[%s20134_s6 + $0x38] sm:$0xff]  }
0x114b   : > { %14637 = vmatmul.mubr.msk.bf16.vlgmr.msra.gmra.mrb[36].mxu0 %vm8350_vm4, %v9074_v7  ;;  %v15950_v7 = vld [vmem:[%s20134_s6 + $0xf0] sm:$0xff]  }
0x114c   : > { %v14626_v5 = vpop.f32.mrb[48].mxu0  ;;  %14665 = vmatpush3.bf16.msra.mxu0 %v15907_v11  ;;  %v15919_v11 = vld [vmem:[%s20133_s5 + $0x100] sm:$0xff]  }
0x114d   : > { %v9059_v44 = vpop.f32.mrb[49].mxu0  ;;  %14666 = vmatprep.subr.bf16.mxu0 %v15908_v34  ;;  %v9076_v17 = vpack.c.bf16 %v14626_v5, %v14626_v5 }
0x114e   : > { %v14627_v19 = vpop.f32.mrb[50].mxu0 }
0x114f   : > { %v9062_v3 = vpop.f32.mrb[51].mxu0 }
0x1150   : > { %v9075_v58 = vpack.c.bf16 %v9062_v3, %v9059_v44  ;;  %14667 = vmatpush3.bf16.msra.mxu0 %v15908_v34  ;;  %v15952_v34 = vld [vmem:[%s20134_s6 + $0xb0] sm:$0xff]  }
0x1151   : > { %14668 = vmatprep.subr.bf16.mxu0 %v15909_v18 }
0x1152   : > { %14640 = vmatprep.mubr.msk.bf16.mxu0 %vm8350_vm4, %v9075_v58 }
0x1153   : > { %14641 = vmatmul.mubr.msk.bf16.gmra.mrb[40].mxu0 %vm8350_vm4, %v9076_v17 }
0x1154   : > { %14669 = vmatpush3.bf16.msra.mxu0 %v15909_v18  ;;  %14672 = vmatprep.mubr.msk.bf16.mxu0 %vm8350_vm4, %v9295_v37  ;;  %v9520_v37 = vpack.c.bf16 %v19454_v10, %v19454_v10  ;;  %v15927_v10 = vld [vmem:[%s20134_s6 + $0x8] sm:$0xff]  }
0x1155   : > { %14670 = vmatprep.subr.bf16.mxu0 %v15910_v62  ;;  %14073 = vmatpush3.bf16.msra.mxu1 %v15927_v10 }
0x1156   : > { %14074 = vmatprep.subr.bf16.mxu1 %v15929_v31 }
0x1158   : > { %14671 = vmatpush3.bf16.msra.mxu0 %v15910_v62  ;;  %v15953_v62 = vld [vmem:[%s20134_s6 + $0xf8] sm:$0xff]  }
0x1159   : > { %14700 = vmatprep.subr.bf16.mxu0 %v15911_v27 }
0x115b   : > { %14673 = vmatmul.mubr.msk.bf16.vlgmr.msra.gmra.mrb[36].mxu0 %vm8350_vm4, %v9296_v13  ;;  %v15917_v13 = vld [vmem:[%s20133_s5 + $0xf0] sm:$0xff]  }
0x115c   : > { %14676 = vmatprep.mubr.msk.bf16.mxu0 %vm8350_vm4, %v9297_v42  ;;  %14701 = vmatpush3.bf16.msra.mxu0 %v15911_v27  ;;  %v9964_v42 = vpack.c.bf16 %v19494_v43, %v19494_v43  ;;  %v15954_v27 = vld [vmem:[%s20134_s6 + $0x140] sm:$0xff]  }
0x115d   : > { %14702 = vmatprep.subr.bf16.mxu0 %v15912_v32 }
0x1160   : > { %14703 = vmatpush3.bf16.msra.mxu0 %v15912_v32 }
0x1161   : > { %14704 = vmatprep.subr.bf16.mxu0 %v15913_v15 }
0x1163   : > { %14677 = vmatmul.mubr.msk.bf16.gmra.mrb[40].mxu0 %vm8350_vm4, %v9298_v2 }
0x1164   : > { %14705 = vmatpush3.bf16.msra.mxu0 %v15913_v15  ;;  %14708 = vmatprep.mubr.msk.bf16.mxu0 %vm8350_vm4, %v9517_v57  ;;  %v15930_v57 = vld [vmem:[%s20134_s6 + $0xc8] sm:$0xff]   ;;  %v15955_v15 = vld [vmem:[%s20134_s6 + $0xb8] sm:$0xff]  }
0x1165   : > { %14706 = vmatprep.subr.bf16.mxu0 %v15914_v59 }
0x1168   : > { %14707 = vmatpush3.bf16.msra.mxu0 %v15914_v59 }
0x1169   : > { %14736 = vmatprep.subr.bf16.mxu0 %v15915_v16 }
0x116b   : > { %14709 = vmatmul.mubr.msk.bf16.vlgmr.msra.gmra.mrb[36].mxu0 %vm8350_vm4, %v9518_v60  ;;  %v15928_v60 = vld [vmem:[%s20134_s6 + $0x80] sm:$0xff]  }
0x116c   : > { %14737 = vmatpush3.bf16.msra.mxu0 %v15915_v16  ;;  %14712 = vmatprep.mubr.msk.bf16.mxu0 %vm8350_vm4, %v9519_v14  ;;  %v15931_v14 = vld [vmem:[%s20134_s6 + $0x10] sm:$0xff]  }
0x116d   : > { %14738 = vmatprep.subr.bf16.mxu0 %v15916_v51  ;;  %14075 = vmatpush3.bf16.msra.mxu1 %v15931_v14 }
0x116e   : > { %14076 = vmatprep.subr.bf16.mxu1 %v15933_v28 }
0x1170   : > { %14739 = vmatpush3.bf16.msra.mxu0 %v15916_v51 }
0x1171   : > { %14740 = vmatprep.subr.bf16.mxu0 %v15917_v13  ;;  %14077 = vmatpush3.bf16.msra.mxu1 %v15935_v55 }
0x1173   : > { %14713 = vmatmul.mubr.msk.bf16.gmra.mrb[40].mxu0 %vm8350_vm4, %v9520_v37 }
0x1174   : > { %14741 = vmatpush3.bf16.msra.mxu0 %v15917_v13  ;;  %14744 = vmatprep.mubr.msk.bf16.mxu0 %vm8350_vm4, %v9739_v4  ;;  %v15940_v4 = vld [vmem:[%s20134_s6 + $0x98] sm:$0xff]  }
0x1175   : > { %14742 = vmatprep.subr.bf16.mxu0 %v15918_v35 }
0x1178   : > { %14743 = vmatpush3.bf16.msra.mxu0 %v15918_v35 }
0x1179   : > { %14772 = vmatprep.subr.bf16.mxu0 %v15919_v11 }
0x117b   : > { %14745 = vmatmul.mubr.msk.bf16.vlgmr.msra.gmra.mrb[36].mxu0 %vm8350_vm4, %v9740_v45  ;;  %v15937_v45 = vld [vmem:[%s20134_s6 + $0x60] sm:$0xff]  }
0x117c   : > { %14773 = vmatpush3.bf16.msra.mxu0 %v15919_v11  ;;  %14748 = vmatprep.mubr.msk.bf16.mxu0 %vm8350_vm4, %v9741_v29  ;;  %v15943_v29 = vld [vmem:[%s20134_s6 + $0x28] sm:$0xff]  }
0x117d   : > { %14774 = vmatprep.subr.bf16.mxu0 %v15920_v1  ;;  %14078 = vmatprep.subr.bf16.mxu1 %v15937_v45 }
0x117e   : > { %14079 = vmatpush3.bf16.msra.mxu1 %v15939_v49 }
0x117f   : > { %14080 = vmatprep.subr.bf16.mxu1 %v15941_v61 }
0x1180   : > { %14775 = vmatpush3.bf16.msra.mxu0 %v15920_v1 }
0x1181   : > { %14776 = vmatprep.subr.bf16.mxu0 %v15921_v48 }
0x1182   : > { %14081 = vmatpush3.bf16.msra.mxu1 %v15943_v29 }
0x1183   : > { %14749 = vmatmul.mubr.msk.bf16.gmra.mrb[40].mxu0 %vm8350_vm4, %v9742_v21  ;;  %14082 = vmatprep.subr.bf16.mxu1 %v15945_v33 }
0x1184   : > { %14777 = vmatpush3.bf16.msra.mxu0 %v15921_v48  ;;  %14780 = vmatprep.mubr.msk.bf16.mxu0 %vm8350_vm4, %v9961_v36  ;;  %v15958_v48 = vld [vmem:[%s20134_s6 + $0x1c0] sm:$0xff]  }
0x1185   : > { %14778 = vmatprep.subr.bf16.mxu0 %v15922_v54 }
0x1186   : > { %14083 = vmatpush3.bf16.msra.mxu1 %v15947_v30 }
0x1187   : > { %14084 = vmatprep.subr.bf16.mxu1 %v15949_v23 }
0x1188   : > { %14779 = vmatpush3.bf16.msra.mxu0 %v15922_v54 }
0x1189   : > { %14092 = vmatprep.subr.bf16.mxu0 %v15926_v20 }
0x118a   : > { %14085 = vmatpush3.bf16.msra.mxu1 %v15951_v12 }
0x118b   : > { %14781 = vmatmul.mubr.msk.bf16.vlgmr.msra.gmra.mrb[36].mxu0 %vm8350_vm4, %v9962_v50  ;;  %v15948_v50 = vld [vmem:[%s20134_s6 + $0xa8] sm:$0xff]   ;;  %14114 = vmatprep.subr.bf16.mxu1 %v15954_v27 }
0x118c   : > { %14784 = vmatprep.mubr.msk.bf16.mxu0 %vm8350_vm4, %v9963_v39  ;;  %14093 = vmatpush3.bf16.msra.mxu0 %v15928_v60 }
0x118d   : > { %14094 = vmatprep.subr.bf16.mxu0 %v15930_v57 }
0x1190   : > { %14095 = vmatpush3.bf16.msra.mxu0 %v15932_v9 }
0x1191   : > { %14096 = vmatprep.subr.bf16.mxu0 %v15934_v26 }
0x1193   : > { %14785 = vmatmul.mubr.msk.bf16.gmra.mrb[40].mxu0 %vm8350_vm4, %v9964_v42 }
0x1194   : > { %14097 = vmatpush3.bf16.msra.mxu0 %v15936_v41 }
0x1195   : > { %14098 = vmatprep.subr.bf16.mxu0 %v15938_v52 }
0x1198   : > { %14099 = vmatpush3.bf16.msra.mxu0 %v15940_v4 }
0x1199   : > { %14100 = vmatprep.subr.bf16.mxu0 %v15942_v53 }
0x119c   : > { %14101 = vmatpush3.bf16.msra.mxu0 %v15944_v63 }
0x119d   : > { %14102 = vmatprep.subr.bf16.mxu0 %v15946_v40 }
0x11a0   : > { %14103 = vmatpush3.bf16.msra.mxu0 %v15948_v50 }
0x11a1   : > { %14104 = vmatprep.subr.bf16.mxu0 %v15950_v7 }
0x11a4   : > { %14105 = vmatpush3.bf16.msra.mxu0 %v15952_v34 }
0x11a5   : > { %14106 = vmatprep.subr.bf16.mxu0 %v15953_v62 }
0x11a8   : > { %14107 = vmatpush3.bf16.msra.mxu0 %v15955_v15 }
0x11a9   : > { %14136 = vmatprep.subr.bf16.mxu0 %v15958_v48 }
0x125e   : > { %v14782_v38 = vpop.f32.mrb[36].mxu0 }
0x125f   : > { %v10044_v36 = vpop.f32.mrb[37].mxu0  ;;  %v19726_v2 = vmax.f32 %v14782_v38, 0.0 }
0x1260   : > { %v19689_v43 = vmax.f32 %v10044_v36, 0.0  ;;  %v14783_v22 = vpop.f32.mrb[38].mxu0 }
0x1261   : > { %v10047_v6 = vpop.f32.mrb[39].mxu0  ;;  %v19737_v21 = vmax.f32 %v14783_v22, 0.0  ;;  %v10160_v42 = vrot.slane %v19726_v2, 2  ;;  %v10174_v47 = vrot.slane %v19726_v2, 6  ;;  %v10156_v56 = vrot.slane %v19726_v2, 1 }
0x1262   : > { %v19691_v8 = vmax.f32 %v10047_v6, 0.0  ;;  %v10097_v39 = vrot.slane %v19689_v43, 3  ;;  %v10111_v24 = vrot.slane %v19689_v43, 7  ;;  %v10089_v0 = vrot.slane %v19689_v43, 1 }
0x1263   : > { %v10103_v25 = vrot.slane %v19689_v43, 5  ;;  %v10093_v3 = vrot.slane %v19689_v43, 2  ;;  %v10107_v58 = vrot.slane %v19689_v43, 6  ;;  %v10170_v20 = vrot.slane %v19726_v2, 5 }
0x1264   : > { %v15104_v5 = vpack.i.bf16 %v10097_v39, %v10111_v24  ;;  %v10116_v44 = vrot.slane %v19691_v8, 1  ;;  %v10130_v18 = vrot.slane %v19691_v8, 5  ;;  %v10124_v51 = vrot.slane %v19691_v8, 3 }
0x1265   : > { %v15094_v19 = vpack.i.bf16 %v10089_v0, %v10103_v25  ;;  %v10138_v13 = vrot.slane %v19691_v8, 7  ;;  %v15099_v35 = vpack.i.bf16 %v10093_v3, %v10107_v58  ;;  %v10120_v11 = vrot.slane %v19691_v8, 2 }
0x1266   : > { %15105 = vrot.lane.b32.xlu1 %v15104_v5, %s16092_s26  ;;  %v19714_v17 = vpop.f32.mrb[40].mxu0  ;;  %v15109_v16 = vpack.i.bf16 %v10116_v44, %v10130_v18  ;;  %v10134_v1 = vrot.slane %v19691_v8, 6  ;;  %v15129_v60 = vpack.i.bf16 %v10160_v42, %v10174_v47  ;;  %v10183_v57 = vrot.slane %v19737_v21, 1 }
0x1267   : > { %15095 = vrot.lane.b32.xlu0 %v15094_v19, %s16093_s19  ;;  %v10060_v32 = vpop.f32.mrb[41].mxu0  ;;  %v15119_v54 = vpack.i.bf16 %v10124_v51, %v10138_v13  ;;  %v10197_v10 = vrot.slane %v19737_v21, 5  ;;  %v15124_v31 = vpack.i.bf16 %v10156_v56, %v10170_v20  ;;  %v10164_v9 = vrot.slane %v19726_v2, 3 }
0x1268   : > { %v14787_v59 = vpop.f32.mrb[42].mxu0  ;;  %v15114_v46 = vpack.i.bf16 %v10120_v11, %v10134_v1  ;;  %v10178_v26 = vrot.slane %v19726_v2, 7  ;;  %v19751_v14 = vmax.f32 %v10060_v32, 0.0  ;;  %v10191_v41 = vrot.slane %v19737_v21, 3 }
0x1269   : > { %v10063_v37 = vpop.f32.mrb[43].mxu0  ;;  %v15139_v28 = vpack.i.bf16 %v10183_v57, %v10197_v10  ;;  %v10205_v52 = vrot.slane %v19737_v21, 7  ;;  %v10187_v45 = vrot.slane %v19737_v21, 2  ;;  %v10201_v4 = vrot.slane %v19737_v21, 6  ;;  %v15956_v10 = vld [vmem:[%s20134_s6 + $0x100] sm:$0xff]  }
0x126a   : > { %15110 = vrot.lane.b32.xlu1 %v15109_v16, %s16093_s19  ;;  %v15134_v55 = vpack.i.bf16 %v10164_v9, %v10178_v26  ;;  %v19759_v53 = vmax.f32 %v10063_v37, 0.0  ;;  %v10226_v61 = vrot.slane %v19751_v14, 2  ;;  %v10240_v63 = vrot.slane %v19751_v14, 6  ;;  %v15957_v26 = vld [vmem:[%s20134_s6 + $0x148] sm:$0xff]  }
0x126b   : > { %15100 = vrot.lane.b32.xlu0 %v15099_v35, %s16094_s23  ;;  %v15149_v49 = vpack.i.bf16 %v10191_v41, %v10205_v52  ;;  %v15144_v29 = vpack.i.bf16 %v10187_v45, %v10201_v4  ;;  %v10222_v33 = vrot.slane %v19751_v14, 1  ;;  %v10236_v40 = vrot.slane %v19751_v14, 5 }
0x126c   : > { %v15159_v30 = vpack.i.bf16 %v10226_v61, %v10240_v63  ;;  %v10249_v50 = vrot.slane %v19759_v53, 1  ;;  %v10263_v38 = vrot.slane %v19759_v53, 5  ;;  %v10230_v22 = vrot.slane %v19751_v14, 3 }
0x126d   : > { %v15154_v36 = vpack.i.bf16 %v10222_v33, %v10236_v40  ;;  %v10244_v6 = vrot.slane %v19751_v14, 7  ;;  %v10257_v24 = vrot.slane %v19759_v53, 3  ;;  %v10271_v0 = vrot.slane %v19759_v53, 7  ;;  %v15960_v33 = vld [vmem:[%s20134_s6 + $0x180] sm:$0xff]  }
0x126e   : > { %15120 = vrot.lane.b32.xlu1 %v15119_v54, %s16092_s26  ;;  %v15169_v39 = vpack.i.bf16 %v10249_v50, %v10263_v38  ;;  %v10253_v7 = vrot.slane %v19759_v53, 2  ;;  %v10267_v25 = vrot.slane %v19759_v53, 6  ;;  %v10101_v58 = vrot.slane %v19689_v43, 4  ;;  %v15962_v50 = vld [vmem:[%s20134_s6 + $0x1c8] sm:$0xff]  }
0x126f   : > { %15115 = vrot.lane.b32.xlu0 %v15114_v46, %s16094_s23  ;;  %v15164_v23 = vpack.i.bf16 %v10230_v22, %v10244_v6  ;;  %v15179_v12 = vpack.i.bf16 %v10257_v24, %v10271_v0  ;;  %v10128_v1 = vrot.slane %v19691_v8, 4  ;;  %v15964_v24 = vld [vmem:[%s20134_s6 + $0x188] sm:$0xff]  }
0x1270   : > { %v15174_v34 = vpack.i.bf16 %v10253_v7, %v10267_v25  ;;  %v15965_v7 = vld [vmem:[%s20134_s6 + $0x158] sm:$0xff]  }
0x1272   : > { %15130 = vrot.lane.b32.xlu1 %v15129_v60, %s16094_s23 }
0x1273   : > { %15125 = vrot.lane.b32.xlu0 %v15124_v31, %s16093_s19 }
0x1276   : > { %15140 = vrot.lane.b32.xlu1 %v15139_v28, %s16093_s19 }
0x1277   : > { %15135 = vrot.lane.b32.xlu0 %v15134_v55, %s16092_s26 }
0x127a   : > { %15150 = vrot.lane.b32.xlu1 %v15149_v49, %s16092_s26  ;;  %v10168_v49 = vrot.slane %v19726_v2, 4 }
0x127b   : > { %15145 = vrot.lane.b32.xlu0 %v15144_v29, %s16094_s23  ;;  %v15959_v29 = vld [vmem:[%s20134_s6 + $0x108] sm:$0xff]  }
0x127e   : > { %15160 = vrot.lane.b32.xlu1 %v15159_v30, %s16094_s23  ;;  %v15961_v30 = vld [vmem:[%s20134_s6 + $0x150] sm:$0xff]  }
0x127f   : > { %15155 = vrot.lane.b32.xlu0 %v15154_v36, %s16093_s19 }
0x1282   : > { %15170 = vrot.lane.b32.xlu1 %v15169_v39, %s16093_s19  ;;  %v15963_v39 = vld [vmem:[%s20134_s6 + $0x110] sm:$0xff]  }
0x1283   : > { %15165 = vrot.lane.b32.xlu0 %v15164_v23, %s16092_s26 }
0x1286   : > { %15180 = vrot.lane.b32.xlu1 %v15179_v12, %s16092_s26  ;;  %s296_s26 = sand.u32 1, %s16081_s28  }
0x1287   : > { %15175 = vrot.lane.b32.xlu0 %v15174_v34, %s16094_s23  ;;  %v15966_v34 = vld [vmem:[%s20134_s6 + $0x1d0] sm:$0xff]   ;;  %s297_s12 = scalar_lea.vmem [#allocation2], %s296_s26  ;;  %s11443_s18 = scalar_lea.sflag [#allocation3], %s296_s26 }
0x1288   : > { %s11455_s13 = sshll.u32 %s297_s12, 4  ;;  %s16033_s23 = scalar_lea.vmem %s16032_s22, 32  ;;  %s20087_s13 = int_to_ptr.vmem [resolvable:$true] %s11455_s13 }
0x1289   : > { %s16027_s21 = scalar_lea.vmem %s20087_s13, 16  ;;  %p16034_p0 = scmp.lt.s32.totalorder %s20087_s13, %s16032_s22 }
0x128a   : > { %p16028_p11 = scmp.ne.s32.totalorder %s20087_s13, %s16027_s21  ;;  %p16035_p1 = scmp.lt.s32.totalorder %s16033_s23, %s16027_s21 }
0x128c   : > { %p16029_p12 = pnand %p16028_p11, %p16181_p5  ;;  %p16036_p2 = por %p16035_p1, %p16034_p0 }
0x128e   : > { %p16030_p13 = pneg %p16029_p12 }
0x1290   : > { %p16037_p3 = pnand %p16036_p2, %p16030_p13 }
0x12d8   : > { %v15106_v5 = vpop.permute.xlu1 %15105 }
0x12d9   : > { %v15096_v44 = vpop.permute.xlu0 %15095  ;;  %v15108_v27 = vunpack.i.h.bf16 %v15106_v5  ;;  %v15107_v32 = vunpack.i.l.bf16 %v15106_v5  ;;  %v10195_v5 = vrot.slane %v19737_v21, 4 }
0x12da   : > { %v15098_v18 = vunpack.i.h.bf16 %v15096_v44  ;;  %v15097_v19 = vunpack.i.l.bf16 %v15096_v44 }
0x12dc   : > { %v15111_v3 = vpop.permute.xlu1 %15110  ;;  %v10142_v16 = vsel %vm1691_vm1, %v19689_v43, %v15098_v18  ;;  %v10146_v51 = vsel %vm1691_vm1, %v10101_v58, %v15097_v19  ;;  %v15967_v58 = vld [vmem:[%s20134_s6 + $0x118] sm:$0xff]  }
0x12dd   : > { %v15101_v62 = vpop.permute.xlu0 %15100  ;;  %v15113_v13 = vunpack.i.h.bf16 %v15111_v3  ;;  %v15112_v37 = vunpack.i.l.bf16 %v15111_v3 }
0x12de   : > { %v15103_v15 = vunpack.i.h.bf16 %v15101_v62  ;;  %v15102_v59 = vunpack.i.l.bf16 %v15101_v62  ;;  %v15968_v62 = vld [vmem:[%s20134_s6 + $0x190] sm:$0xff]  }
0x12df   : > { %v10149_v31 = vsel %vm1691_vm1, %v19691_v8, %v15113_v13  ;;  %v10152_v9 = vsel %vm1691_vm1, %v10128_v1, %v15112_v37  ;;  %v15971_v37 = vld [vmem:[%s20134_s6 + $0x120] sm:$0xff]   ;;  %v15973_v1 = vld [vmem:[%s20134_s6 + $0x168] sm:$0xff]  }
0x12e0   : > { %v10143_v35 = vsel %vm8350_vm4, %v10142_v16, %v15103_v15  ;;  %v10147_v11 = vsel %vm8350_vm4, %v10146_v51, %v15102_v59  ;;  %v15121_v48 = vpop.permute.xlu1 %15120  ;;  %v15970_v15 = vld [vmem:[%s20134_s6 + $0x1d8] sm:$0xff]  }
0x12e1   : > { %v10145_v54 = vsel %vm10144_vm5, %v10143_v35, %v15108_v27  ;;  %v15116_v42 = vpop.permute.xlu0 %15115  ;;  %v15123_v47 = vunpack.i.h.bf16 %v15121_v48  ;;  %v15122_v46 = vunpack.i.l.bf16 %v15121_v48  ;;  %v10148_v56 = vsel %vm10144_vm5, %v10147_v11, %v15107_v32  ;;  %v15969_v32 = vld [vmem:[%s20134_s6 + $0x160] sm:$0xff]   ;;  %v15972_v35 = vld [vmem:[%s20134_s6 + $0x198] sm:$0xff]  }
0x12e2   : > { %v10287_v20 = vpack.c.bf16 %v10145_v54, %v10145_v54  ;;  %v15118_v43 = vunpack.i.h.bf16 %v15116_v42  ;;  %v15117_v60 = vunpack.i.l.bf16 %v15116_v42  ;;  %v10288_v57 = vpack.c.bf16 %v10148_v56, %v10148_v56  ;;  %v15974_v48 = vld [vmem:[%s20134_s6 + $0x1e0] sm:$0xff]   ;;  %v15975_v42 = vld [vmem:[%s20134_s6 + $0x128] sm:$0xff]  }
0x12e3   : > { %v15978_v56 = vld [vmem:[%s20134_s6 + $0x1e8] sm:$0xff]  }
0x12e4   : > { %v10150_v28 = vsel %vm8350_vm4, %v10149_v31, %v15118_v43  ;;  %v10153_v41 = vsel %vm8350_vm4, %v10152_v9, %v15117_v60  ;;  %11119 = vmatprep.mubr.bf16.mxu1 %v10288_v57  ;;  %v19801_v52 = vpop.permute.xlu1 %15130  ;;  %v15979_v57 = vld [vmem:[%s20134_s6 + $0x130] sm:$0xff]   ;;  %v15981_v9 = vld [vmem:[%s20134_s6 + $0x178] sm:$0xff]  }
0x12e5   : > { %v10151_v55 = vsel %vm10144_vm5, %v10150_v28, %v15123_v47  ;;  %11120 = vmatmul.mubr.bf16.vlgmr.msra.gmra.mrb[152].mxu1 %v10287_v20  ;;  %v19804_v45 = vpop.permute.xlu0 %15125  ;;  %v10154_v8 = vsel %vm10144_vm5, %v10153_v41, %v15122_v46  ;;  %v15132_v40 = vunpack.i.l.bf16 %v19801_v52  ;;  %v15976_v47 = vld [vmem:[%s20134_s6 + $0x1a0] sm:$0xff]   ;;  %v15977_v46 = vld [vmem:[%s20134_s6 + $0x170] sm:$0xff]   ;;  %v15133_v31 = vunpack.i.h.bf16 %v19801_v52 }
0x12e6   : > { %v10289_v4 = vpack.c.bf16 %v10151_v55, %v10151_v55  ;;  %14115 = vmatpush3.bf16.msra.mxu1 %v15956_v10  ;;  %v15127_v61 = vunpack.i.l.bf16 %v19804_v45  ;;  %v10290_v63 = vpack.c.bf16 %v10154_v8, %v10154_v8  ;;  %v15128_v20 = vunpack.i.h.bf16 %v19804_v45  ;;  %v15980_v10 = vld [vmem:[%s20134_s6 + $0x1a8] sm:$0xff]  }
0x12e7   : > { %14116 = vmatprep.subr.bf16.mxu1 %v15957_v26  ;;  %v15982_v26 = vld [vmem:[%s20134_s6 + $0x1f0] sm:$0xff]   ;;  %v10234_v45 = vrot.slane %v19751_v14, 4 }
0x12e8   : > { %v10212_v38 = vsel %vm1691_vm1, %v10168_v49, %v15127_v61  ;;  %11159 = vmatprep.mubr.bf16.mxu0 %v10290_v63  ;;  %v19823_v36 = vpop.permute.xlu1 %15140  ;;  %v10209_v28 = vsel %vm1691_vm1, %v19726_v2, %v15128_v20  ;;  %v15983_v2 = vld [vmem:[%s20134_s6 + $0x138] sm:$0xff]  }
0x12e9   : > { %v19825_v22 = vpop.permute.xlu0 %15135  ;;  %11160 = vmatmul.mubr.bf16.vlgmr.msra.gmra.mrb[52].mxu0 %v10289_v4  ;;  %v10213_v0 = vsel %vm8350_vm4, %v10212_v38, %v15132_v40  ;;  %v15142_v23 = vunpack.i.l.bf16 %v19823_v36  ;;  %v15143_v55 = vunpack.i.h.bf16 %v19823_v36  ;;  %v15986_v38 = vld [vmem:[%s20134_s6 + $0x240] sm:$0xff]   ;;  %v16004_v20 = vld [vmem:[%s20134_s6 + $0x298] sm:$0xff]  }
0x12ea   : > { %14117 = vmatpush3.bf16.msra.mxu1 %v15959_v29  ;;  %v15137_v6 = vunpack.i.l.bf16 %v19825_v22  ;;  %14137 = vmatpush3.bf16.msra.mxu0 %v15960_v33  ;;  %v15138_v41 = vunpack.i.h.bf16 %v19825_v22  ;;  %v15984_v29 = vld [vmem:[%s20134_s6 + $0x1b0] sm:$0xff]   ;;  %v10210_v33 = vsel %vm8350_vm4, %v10209_v28, %v15133_v31  ;;  %v16008_v31 = vld [vmem:[%s20134_s6 + $0x2a0] sm:$0xff]  }
0x12eb   : > { %14118 = vmatprep.subr.bf16.mxu1 %v15961_v30  ;;  %14138 = vmatprep.subr.bf16.mxu0 %v15962_v50  ;;  %v10218_v27 = vsel %vm1691_vm1, %v10195_v5, %v15142_v23  ;;  %v15985_v50 = vld [vmem:[%s20134_s6 + $0x1f8] sm:$0xff]   ;;  %v10215_v22 = vsel %vm1691_vm1, %v19737_v21, %v15143_v55  ;;  %v15988_v21 = vld [vmem:[%s20134_s6 + $0x200] sm:$0xff]   ;;  %v16012_v55 = vld [vmem:[%s20134_s6 + $0x2a8] sm:$0xff]  }
0x12ec   : > { %v19839_v25 = vpop.permute.xlu1 %15150  ;;  %v10214_v12 = vsel %vm10144_vm5, %v10213_v0, %v15137_v6  ;;  %v10211_v36 = vsel %vm10144_vm5, %v10210_v33, %v15138_v41  ;;  %v16011_v41 = vld [vmem:[%s20134_s6 + $0x230] sm:$0xff]  }
0x12ed   : > { %v19846_v44 = vpop.permute.xlu0 %15145  ;;  %v15152_v18 = vunpack.i.l.bf16 %v19839_v25  ;;  %v10292_v19 = vpack.c.bf16 %v10214_v12, %v10214_v12  ;;  %v15153_v6 = vunpack.i.h.bf16 %v19839_v25  ;;  %v15987_v12 = vld [vmem:[%s20134_s6 + $0x1b8] sm:$0xff]  }
0x12ee   : > { %14119 = vmatpush3.bf16.msra.mxu1 %v15963_v39  ;;  %v15147_v3 = vunpack.i.l.bf16 %v19846_v44  ;;  %14139 = vmatpush3.bf16.msra.mxu0 %v15964_v24  ;;  %v15148_v8 = vunpack.i.h.bf16 %v19846_v44  ;;  %v10261_v39 = vrot.slane %v19759_v53, 4  ;;  %v15989_v44 = vld [vmem:[%s20134_s6 + $0x248] sm:$0xff]  }
0x12ef   : > { %11199 = vmatprep.mubr.bf16.mxu1 %v10292_v19  ;;  %14120 = vmatprep.subr.bf16.mxu1 %v15965_v7  ;;  %v15990_v19 = vld [vmem:[%s20134_s6 + $0x2c0] sm:$0xff]  }
0x12f0   : > { %v10219_v59 = vsel %vm8350_vm4, %v10218_v27, %v15147_v3  ;;  %14140 = vmatprep.subr.bf16.mxu0 %v15966_v34  ;;  %v19873_v11 = vpop.permute.xlu1 %15160  ;;  %v10216_v24 = vsel %vm8350_vm4, %v10215_v22, %v15148_v8  ;;  %v10291_v34 = vpack.c.bf16 %v10211_v36, %v10211_v36  ;;  %v16013_v8 = vld [vmem:[%s20134_s6 + $0x278] sm:$0xff]   ;;  %v16095_v36 = vmov 0.0  }
0x12f1   : > { %v19864_v16 = vpop.permute.xlu0 %15155  ;;  %v10220_v51 = vsel %vm10144_vm5, %v10219_v59, %v15152_v18  ;;  %v15162_v4 = vunpack.i.l.bf16 %v19873_v11  ;;  %v10217_v18 = vsel %vm10144_vm5, %v10216_v24, %v15153_v6  ;;  %v15994_v59 = vld [vmem:[%s20134_s6 + $0x2c8] sm:$0xff]   ;;  %v10087_v22 = vmax.f32 %v19714_v17, 0.0  ;;  %v16021_v24 = vld [vmem:[%s20135_s7] sm:$0xff]  }
0x12f2   : > { %14121 = vmatpush3.bf16.msra.mxu1 %v15967_v58  ;;  %14141 = vmatpush3.bf16.msra.mxu0 %v15968_v62  ;;  %v10294_v13 = vpack.c.bf16 %v10220_v51, %v10220_v51  ;;  %v15157_v60 = vunpack.i.l.bf16 %v19864_v16  ;;  %v15991_v58 = vld [vmem:[%s20134_s6 + $0x208] sm:$0xff]   ;;  %v15992_v62 = vld [vmem:[%s20134_s6 + $0x280] sm:$0xff]   ;;  %v15158_v28 = vunpack.i.h.bf16 %v19864_v16  ;;  %v16014_v16 = vld [vmem:[%s20134_s6 + $0x2f0] sm:$0xff]  }
0x12f3   : > { %14122 = vmatprep.subr.bf16.mxu1 %v15969_v32  ;;  %14142 = vmatprep.subr.bf16.mxu0 %v15970_v15  ;;  %v10293_v32 = vpack.c.bf16 %v10217_v18, %v10217_v18  ;;  %v15993_v15 = vld [vmem:[%s20134_s6 + $0x250] sm:$0xff]   ;;  %v16022_v17 = vld [vmem:[%s20135_s7 + $0x8] sm:$0xff]  }
0x12f4   : > { %11239 = vmatprep.mubr.bf16.mxu0 %v10294_v13  ;;  %v19896_v43 = vpop.permute.xlu1 %15170  ;;  %v10278_v49 = vsel %vm1691_vm1, %v10234_v45, %v15157_v60  ;;  %v15995_v13 = vld [vmem:[%s20134_s6 + $0x210] sm:$0xff]   ;;  %v16005_v60 = vld [vmem:[%s20134_s6 + $0x268] sm:$0xff]   ;;  %v15163_v45 = vunpack.i.h.bf16 %v19873_v11  ;;  %v16015_v11 = vld [vmem:[%s20134_s6 + $0x238] sm:$0xff]  }
0x12f5   : > { %v19881_v54 = vpop.permute.xlu0 %15165  ;;  %v15172_v63 = vunpack.i.l.bf16 %v19896_v43  ;;  %v10279_v0 = vsel %vm8350_vm4, %v10278_v49, %v15162_v4  ;;  %v10275_v4 = vsel %vm1691_vm1, %v19751_v14, %v15158_v28  ;;  %v16017_v14 = vld [vmem:[%s20134_s6 + $0x2f8] sm:$0xff]  }
0x12f6   : > { %14123 = vmatpush3.bf16.msra.mxu1 %v15971_v37  ;;  %14143 = vmatpush3.bf16.msra.mxu0 %v15972_v35  ;;  %v15167_v61 = vunpack.i.l.bf16 %v19881_v54  ;;  %v15996_v37 = vld [vmem:[%s20134_s6 + $0x288] sm:$0xff]   ;;  %v15997_v35 = vld [vmem:[%s20134_s6 + $0x258] sm:$0xff]   ;;  %v15168_v49 = vunpack.i.h.bf16 %v19881_v54 }
0x12f7   : > { %14124 = vmatprep.subr.bf16.mxu1 %v15973_v1  ;;  %14144 = vmatprep.subr.bf16.mxu0 %v15974_v48  ;;  %v10284_v23 = vsel %vm1691_vm1, %v10261_v39, %v15172_v63  ;;  %v15998_v1 = vld [vmem:[%s20134_s6 + $0x2d0] sm:$0xff]   ;;  %v15999_v48 = vld [vmem:[%s20134_s6 + $0x218] sm:$0xff]   ;;  %v10299_v39 = vpack.c.bf16 %v10087_v22, %v10087_v22 }
0x12f8   : > { %v19932_v30 = vpop.permute.xlu1 %15180  ;;  %v10280_v25 = vsel %vm10144_vm5, %v10279_v0, %v15167_v61  ;;  %v15173_v61 = vunpack.i.h.bf16 %v19896_v43 }
0x12f9   : > { %v19917_v52 = vpop.permute.xlu0 %15175  ;;  %v15182_v7 = vunpack.i.l.bf16 %v19932_v30  ;;  %v10296_v3 = vpack.c.bf16 %v10280_v25, %v10280_v25 }
0x12fa   : > { %14125 = vmatpush3.bf16.msra.mxu1 %v15975_v42  ;;  %14145 = vmatpush3.bf16.msra.mxu0 %v15976_v47  ;;  %v15177_v40 = vunpack.i.l.bf16 %v19917_v52  ;;  %v16000_v42 = vld [vmem:[%s20134_s6 + $0x290] sm:$0xff]   ;;  %v16001_v47 = vld [vmem:[%s20134_s6 + $0x260] sm:$0xff]   ;;  %v15178_v63 = vunpack.i.h.bf16 %v19917_v52  ;;  %v10281_v43 = vsel %vm1691_vm1, %v19759_v53, %v15173_v61  ;;  %v15183_v52 = vunpack.i.h.bf16 %v19932_v30  ;;  %v16020_v30 = vld [vmem:[%s20134_s6 + $0x308] sm:$0xff]  }
0x12fb   : > { %14126 = vmatprep.subr.bf16.mxu1 %v15977_v46  ;;  %14146 = vmatprep.subr.bf16.mxu0 %v15978_v56  ;;  %v16002_v46 = vld [vmem:[%s20134_s6 + $0x2d8] sm:$0xff]   ;;  %v16003_v56 = vld [vmem:[%s20134_s6 + $0x220] sm:$0xff]  }
0x12fc   : > { %v10285_v5 = vsel %vm8350_vm4, %v10284_v23, %v15177_v40  ;;  %v10282_v33 = vsel %vm8350_vm4, %v10281_v43, %v15178_v63  ;;  %v16018_v40 = vld [vmem:[%s20134_s6 + $0x2b8] sm:$0xff]  }
0x12fd   : > { %v10286_v27 = vsel %vm10144_vm5, %v10285_v5, %v15182_v7  ;;  %v10283_v53 = vsel %vm10144_vm5, %v10282_v33, %v15183_v52 }
0x12fe   : > { %14127 = vmatpush3.bf16.msra.mxu1 %v15979_v57  ;;  %14147 = vmatpush3.bf16.msra.mxu0 %v15980_v10  ;;  %v10298_v51 = vpack.c.bf16 %v10286_v27, %v10286_v27  ;;  %v16006_v57 = vld [vmem:[%s20134_s6 + $0x2e0] sm:$0xff]   ;;  %v16007_v10 = vld [vmem:[%s20134_s6 + $0x228] sm:$0xff]   ;;  %v10297_v6 = vpack.c.bf16 %v10283_v53, %v10283_v53 }
0x12ff   : > { %14128 = vmatprep.subr.bf16.mxu1 %v15981_v9  ;;  %14148 = vmatprep.subr.bf16.mxu0 %v15982_v26  ;;  %v16009_v9 = vld [vmem:[%s20134_s6 + $0x270] sm:$0xff]   ;;  %v16010_v26 = vld [vmem:[%s20134_s6 + $0x2e8] sm:$0xff]  }
0x1302   : > { %14129 = vmatpush3.bf16.msra.mxu1 %v15983_v2  ;;  %14149 = vmatpush3.bf16.msra.mxu0 %v15984_v29  ;;  %v16016_v2 = vld [vmem:[%s20134_s6 + $0x2b0] sm:$0xff]   ;;  %v10276_v29 = vsel %vm8350_vm4, %v10275_v4, %v15163_v45 }
0x1303   : > { %14150 = vmatprep.subr.bf16.mxu0 %v15985_v50  ;;  %14158 = vmatprep.subr.bf16.mxu1 %v15986_v38  ;;  %v10277_v54 = vsel %vm10144_vm5, %v10276_v29, %v15168_v49  ;;  %v16019_v50 = vld [vmem:[%s20134_s6 + $0x300] sm:$0xff]  }
0x1304   : > { %v10295_v38 = vpack.c.bf16 %v10277_v54, %v10277_v54 }
0x1305   : > { %11200 = vmatmul.mubr.bf16.vlgmr.msra.gmra.mrb[156].mxu1 %v10291_v34 }
0x1306   : > { %14151 = vmatpush3.bf16.msra.mxu0 %v15987_v12  ;;  %14159 = vmatpush3.bf16.msra.mxu1 %v15988_v21 }
0x1307   : > { %11279 = vmatprep.mubr.bf16.mxu1 %v10296_v3  ;;  %14160 = vmatprep.subr.bf16.mxu1 %v15989_v44 }
0x1308   : > { %14180 = vmatprep.subr.bf16.mxu0 %v15990_v19 }
0x1309   : > { %11240 = vmatmul.mubr.bf16.vlgmr.msra.gmra.mrb[56].mxu0 %v10293_v32 }
0x130a   : > { %14161 = vmatpush3.bf16.msra.mxu1 %v15991_v58  ;;  %14181 = vmatpush3.bf16.msra.mxu0 %v15992_v62 }
0x130b   : > { %11319 = vmatprep.mubr.bf16.mxu0 %v10298_v51  ;;  %14162 = vmatprep.subr.bf16.mxu1 %v15993_v15 }
0x130c   : > { %14182 = vmatprep.subr.bf16.mxu0 %v15994_v59 }
0x130e   : > { %14163 = vmatpush3.bf16.msra.mxu1 %v15995_v13  ;;  %14183 = vmatpush3.bf16.msra.mxu0 %v15996_v37 }
0x130f   : > { %14164 = vmatprep.subr.bf16.mxu1 %v15997_v35  ;;  %14184 = vmatprep.subr.bf16.mxu0 %v15998_v1 }
0x1312   : > { %14165 = vmatpush3.bf16.msra.mxu1 %v15999_v48  ;;  %14185 = vmatpush3.bf16.msra.mxu0 %v16000_v42 }
0x1313   : > { %14166 = vmatprep.subr.bf16.mxu1 %v16001_v47  ;;  %14186 = vmatprep.subr.bf16.mxu0 %v16002_v46 }
0x1316   : > { %14167 = vmatpush3.bf16.msra.mxu1 %v16003_v56  ;;  %14187 = vmatpush3.bf16.msra.mxu0 %v16004_v20 }
0x1317   : > { %14168 = vmatprep.subr.bf16.mxu1 %v16005_v60  ;;  %14188 = vmatprep.subr.bf16.mxu0 %v16006_v57 }
0x131a   : > { %14169 = vmatpush3.bf16.msra.mxu1 %v16007_v10  ;;  %14189 = vmatpush3.bf16.msra.mxu0 %v16008_v31 }
0x131b   : > { %14170 = vmatprep.subr.bf16.mxu1 %v16009_v9  ;;  %14190 = vmatprep.subr.bf16.mxu0 %v16010_v26 }
0x131e   : > { %14171 = vmatpush3.bf16.msra.mxu1 %v16011_v41  ;;  %14191 = vmatpush3.bf16.msra.mxu0 %v16012_v55 }
0x131f   : > { %14172 = vmatprep.subr.bf16.mxu1 %v16013_v8  ;;  %14192 = vmatprep.subr.bf16.mxu0 %v16014_v16 }
0x1322   : > { %14173 = vmatpush3.bf16.msra.mxu1 %v16015_v11  ;;  %14193 = vmatpush3.bf16.msra.mxu0 %v16016_v2 }
0x1323   : > { %14194 = vmatprep.subr.bf16.mxu0 %v16017_v14  ;;  %14788 = vmatprep.subr.bf16.mxu1 %v16095_v36 }
0x1325   : > { %11280 = vmatmul.mubr.bf16.vlgmr.msra.gmra.mrb[160].mxu1 %v10295_v38 }
0x1326   : > { %14195 = vmatpush3.bf16.msra.mxu0 %v16018_v40  ;;  %14789 = vmatpush3.bf16.msra.mxu1 %v16019_v50 }
0x1327   : > { %14790 = vmatprep.subr.bf16.mxu1 %v16095_v36  ;;  %14792 = vmatprep.mubr.msk.bf16.mxu1 %vm16096_vm6, %v16095_v36 }
0x1328   : > { %14796 = vmatprep.subr.bf16.mxu0 %v16095_v36 }
0x1329   : > { %11320 = vmatmul.mubr.bf16.vlgmr.msra.gmra.mrb[60].mxu0 %v10297_v6 }
0x132a   : > { %14791 = vmatpush3.bf16.msra.mxu1 %v16020_v30  ;;  %14800 = vmatprep.mubr.msk.bf16.mxu0 %vm16096_vm6, %v16095_v36 }
0x132b   : > { %14797 = vmatpush3.bf16.msra.mxu0 %v16021_v24 }
0x132c   : > { %14798 = vmatprep.subr.bf16.mxu0 %v16095_v36 }
0x132d   : > { %14793 = vmatmul.mubr.msk.bf16.vlgmr.msra.gmra.mrb[164].mxu1 %vm1691_vm1, %v10299_v39 }
0x132f   : > { %14799 = vmatpush3.bf16.msra.mxu0 %v16022_v17 }
0x13b8   : > { %v14086_v0 = vpop.f32.mrb[152].mxu1 }
0x13b9   : > { %v14087_v23 = vpop.f32.mrb[153].mxu1 }
0x13ba   : > { %v14088_v7 = vadd.f32 %v14087_v23, %v14086_v0  ;;  %v14089_v12 = vpop.f32.mrb[154].mxu1 }
0x13bb   : > { %v14090_v21 = vpop.f32.mrb[155].mxu1 }
0x13bc   : > { %v14108_v25 = vpop.f32.mrb[52].mxu0 }
0x13bd   : > { %v14109_v34 = vpop.f32.mrb[53].mxu0 }
0x13be   : > { %v14110_v5 = vadd.f32 %v14109_v34, %v14108_v25  ;;  %v14111_v44 = vpop.f32.mrb[54].mxu0 }
0x13bf   : > { %v14112_v18 = vpop.f32.mrb[55].mxu0 }
0x13c0   : > { %v11162_v19 = vadd.f32 %v14110_v5, %v14088_v7 }
0x13d8   : > { %v14130_v3 = vpop.f32.mrb[156].mxu1 }
0x13d9   : > { %v14131_v58 = vpop.f32.mrb[157].mxu1 }
0x13da   : > { %v14132_v62 = vadd.f32 %v14131_v58, %v14130_v3  ;;  %v14133_v27 = vpop.f32.mrb[158].mxu1 }
0x13db   : > { %v14134_v32 = vpop.f32.mrb[159].mxu1 }
0x13dc   : > { %v11202_v15 = vadd.f32 %v14132_v62, %v11162_v19  ;;  %v14152_v59 = vpop.f32.mrb[56].mxu0 }
0x13dd   : > { %v14153_v51 = vpop.f32.mrb[57].mxu0 }
0x13de   : > { %v14154_v13 = vadd.f32 %v14153_v51, %v14152_v59  ;;  %v14155_v37 = vpop.f32.mrb[58].mxu0 }
0x13df   : > { %v14156_v35 = vpop.f32.mrb[59].mxu0 }
0x13e0   : > { %v11242_v1 = vadd.f32 %v14154_v13, %v11202_v15 }
0x13f8   : > { %v14174_v48 = vpop.f32.mrb[160].mxu1 }
0x13f9   : > { %v14175_v42 = vpop.f32.mrb[161].mxu1 }
0x13fa   : > { %v14176_v47 = vadd.f32 %v14175_v42, %v14174_v48  ;;  %v14177_v46 = vpop.f32.mrb[162].mxu1 }
0x13fb   : > { %v14178_v56 = vpop.f32.mrb[163].mxu1 }
0x13fc   : > { %v11282_v20 = vadd.f32 %v14176_v47, %v11242_v1  ;;  %v14196_v60 = vpop.f32.mrb[60].mxu0 }
0x13fd   : > { %v14197_v57 = vpop.f32.mrb[61].mxu0 }
0x13fe   : > { %v14198_v10 = vadd.f32 %v14197_v57, %v14196_v60  ;;  %v14199_v31 = vpop.f32.mrb[62].mxu0 }
0x13ff   : > { %v14200_v9 = vpop.f32.mrb[63].mxu0 }
0x1400   : > { %v11322_v26 = vadd.f32 %v14198_v10, %v11282_v20  ;;  %v11361_v28 = vpop.f32.mrb[164].mxu1 }
0x1401   : > { %v14794_v41 = vpop.f32.mrb[165].mxu1 }
0x1402   : > { %v11362_v55 = vadd.f32 %v11361_v28, %v11322_v26  ;;  %v11364_v45 = vpop.f32.mrb[166].mxu1 }
0x1403   : > { %v14795_v8 = vpop.f32.mrb[167].mxu1 }
0x1404   : > { %v11367_v16 = vmax.f32 %v11362_v55, 0.0 }
0x1406   : > { %v11368_v4 = vpack.c.bf16 %v11367_v16, %v11367_v16 }
0x1408   : > { %14801 = vmatmul.mubr.msk.bf16.vlgmr.msra.gmra.mrb[64].mxu0 %vm1691_vm1, %v11368_v4 }
0x14db   : > { %v11422_v49 = vpop.f32.mrb[64].mxu0 }
0x14dc   : > { %v14802_v61 = vpop.f32.mrb[65].mxu0  ;;  %v11429_v63 = vsel %vm11428_vm7, %v11422_v49, -inf }
0x14dd   : > { %11430 = vmax.xlane.f32.xlu0 %v11429_v63  ;;  %v11425_v11 = vpop.f32.mrb[66].mxu0 }
0x14de   : > { %v14803_v2 = vpop.f32.mrb[67].mxu0 }
0x156a   : > { %v11431_v29 = vpop.xlane.xlu0 %11430 }
0x156b   : > { %v11432_v14 = vsub.f32 %v11422_v49, %v11431_v29 }
0x156d   : > { %v11433_v54 = vmul.f32 1.442695, %v11432_v14 }
0x156f   : > { %16023 = vpow2.f32 %v11433_v54 }
0x1579   : > { %v16024_v43 = vpop.eup %16023 }
0x157a   : > { %v11435_v52 = vsel %vm11428_vm7, %v16024_v43, 0.0 }
0x157b   : > { %11436 = vadd.xlane.f32.xlu1 %v11435_v52 }
0x1608   : > { %v11437_v33 = vpop.xlane.xlu1 %11436 }
0x1609   : > { %16025 = vlog2.f32 %v11437_v33 }
0x1613   : > { %v16026_v40 = vpop.eup %16025 }
0x1614   : > { %v11439_v50 = vmul.f32 0.6931472, %v16026_v40 }
0x1616   : > { %v11440_v38 = vsub.f32 %v11432_v14, %v11439_v50 }
0x1618   : > { %11441 = vst.msk [vmem:[%s297_s12] sm:$0x1] %vm11428_vm7, %v11440_v38 }
0x1619   : > { %16040 = shalt.err (!%p16037_p3)
}
0x161a   : > { %s16041_s24 = scalar_lea.hbm %s20085_s20, 16  ;;  %s16045_s10 = scalar_lea.hbm %s20136_s8, 32 }
0x161b   : > { %p16042_p4 = scmp.ne.s32.totalorder %s20085_s20, %s16041_s24  ;;  %p16046_p9 = scmp.lt.u32.totalorder %s20085_s20, %s20136_s8 }
0x161c   : > { %p16047_p10 = scmp.lt.u32.totalorder %s16045_s10, %s16041_s24  ;;  %p16049_p12 = scmp.lt.u32.totalorder %s16041_s24, %s20085_s20 }
0x161d   : > { %p16043_p7 = pnand %p16042_p4, %p16181_p5 }
0x161e   : > { %p16048_p11 = por %p16047_p10, %p16046_p9 }
0x161f   : > { %p16044_p8 = pneg %p16043_p7 }
0x1620   : > { %p16050_p13 = por %p16049_p12, %p16048_p11 }
0x1622   : > { %p16051_p0 = pnand %p16050_p13, %p16044_p8 }
0x1624   : > { %16054 = shalt.err (!%p16051_p0)
}
0x1625   : > { %15049 = dma.vmem_to_hbm [thread:$0]  (%p16181_p5), %s20087_s13, 16, %s20085_s20, %s11443_s18  }
0x1626 PF: > { %p15055_p1 = scmp.ge.s32.totalorder %s16089_s30, 2  ;;  %s11467_s19 = sand.u32 1, %s16077_s27  }
0x1627   : > { %s11468_s21 = scalar_lea.sflag [#allocation3], %s11467_s19 }
0x1628   : > { %p15052_p2 = pnand %p15055_p1, %p16185_p6 }
0x162a   : > { %16072 = dma.done.wait (!%p15052_p2), %s11468_s21, 16  }
0x162b   : > { %16074 = vsyncadd (!%p15052_p2), %s11468_s21, 4294967280  ;;  %p18_p3 = scmp.ge.s32.totalorder %s16168_s11, 4   ;;  %s20268_s27 = smov %s16081_s28 }
0x162c   : > { %s20269_s28 = smov %s16085_s29  ;;  %s20270_s29 = smov %s16179_s14 }
0x162d   : > { %s20271_s30 = smov %s16168_s11  ;;  %20 = sbr.rel (!%p18_p3) target bundleno = 3 (0x3), region = 133 }
0x1634   :  { %11472 = vsyncpa [#allocation3], 1 }
0x1635   :  { %11474 = vsyncpa [#allocation3 + $0x1], 1 }

</bundles_post_ra>
